<compile_context>
chip_gen: v6e
topology: v6e:2x2x1
jax: 0.10.0
libtpu: 0.0.40
codegen_flags: <defaults>
</compile_context>

<pallas_src>
import functools

import jax
import jax.numpy as jnp
from jax.experimental import pallas as pl
from jax.experimental.pallas import tpu as pltpu

IN_FEATURES = 224 * 224 * 3   # 150528
HIDDEN = 512
OUT = 1
NSPLIT = 2                    # K-split: both TCs on v7x; harmless serial on 1-TC chips


def _select_config():
    """Per-generation tile / VMEM sizing for the bandwidth-bound W1 stream."""
    kind = ""
    try:
        kind = jax.devices()[0].device_kind.lower()
    except Exception:
        pass
    if "v7" in kind or "7x" in kind:
        # 64 MiB VMEM/TC: 2 x 25.7 MB W1 buffers + tiles ~ 52 MB, 56 MiB scoped.
        return {"tk": 12544, "vmem_limit": 56 << 20, "core_parallel": True}
    if any(tag in kind for tag in ("v4", "v5", "v6")):
        # 128 MiB VMEM/TC: keep a generous scoped limit (v5e default is 16 MiB).
        return {"tk": 12544, "vmem_limit": 96 << 20, "core_parallel": False}
    # Unknown chip: conservative sizing so double-buffered W1 tiles always fit.
    return {"tk": 6272, "vmem_limit": 44 << 20, "core_parallel": False}


def layer1_partial_kernel(x_ref, w1_ref, part_ref):
    """Accumulate one K-tile of x @ W1 into this split's resident (B,512) partial."""
    k = pl.program_id(1)

    @pl.when(k == 0)
    def _():
        part_ref[...] = jnp.zeros_like(part_ref)

    part_ref[...] += jnp.dot(x_ref[...], w1_ref[...],
                             preferred_element_type=jnp.float32)


def tail_kernel(part_ref, b1_ref, w2_ref, b2_ref, w3t_ref, b3_ref, out_ref):
    """Sum K-split partials, then bias+ReLU -> 512x512+ReLU -> 512->1 (+ReLU)."""
    h1 = jnp.maximum(jnp.sum(part_ref[...], axis=0) + b1_ref[...], 0.0)   # (B, 512)
    h2 = jnp.dot(h1, w2_ref[...], preferred_element_type=jnp.float32)
    h2 = jnp.maximum(h2 + b2_ref[...], 0.0)                               # (B, 512)
    # (512 -> 1) as a VPU reduction against w3^T (1,512); avoids a lane-padded
    # (512,1) weight block and a masked N=1 MXU matmul.
    h3 = jnp.sum(h2 * w3t_ref[...], axis=-1, keepdims=True)               # (B, 1)
    out_ref[...] = jnp.maximum(h3 + b3_ref[...], 0.0).astype(out_ref.dtype)


def doppler_forward(x, w1, b1, w2, b2, w3, b3, *, tk, vmem_limit, core_parallel):
    b = x.shape[0]
    x2d = x.reshape(b, -1)                                     # nn.Flatten

    assert IN_FEATURES % NSPLIT == 0
    k_half = IN_FEATURES // NSPLIT
    assert k_half % tk == 0, (k_half, tk)                      # no silent ragged tiles
    ks = k_half // tk                                          # K steps per split

    # Advisory scheduling hint: ~308 MB HBM traffic, ~1.5e8 flops.
    flops = 2 * b * IN_FEATURES * HIDDEN
    bytes_accessed = 4 * (IN_FEATURES * HIDDEN + b * IN_FEATURES
                          + NSPLIT * b * HIDDEN)

    # Leading (NSPLIT) axis: force cross-TensorCore sharding on v7x, otherwise
    # plain "parallel" (measured no-op vs "arbitrary" on single-TC chips).
    lead_sem = pltpu.CORE_PARALLEL if core_parallel else "parallel"

    # --- Main bandwidth-bound call: per-split partial x @ W1 accumulation. ---
    partials = pl.pallas_call(
        layer1_partial_kernel,
        out_shape=jax.ShapeDtypeStruct((NSPLIT, b, HIDDEN), jnp.float32),
        grid_spec=pltpu.PrefetchScalarGridSpec(
            num_scalar_prefetch=0,
            grid=(NSPLIT, ks),
            in_specs=[
                pl.BlockSpec((b, tk),
                             lambda p, k, ks=ks: (0, p * ks + k)),        # x tile
                pl.BlockSpec((tk, HIDDEN),
                             lambda p, k, ks=ks: (p * ks + k, 0)),        # W1 tile
            ],
            out_specs=pl.BlockSpec((None, b, HIDDEN), lambda p, k: (p, 0, 0)),
        ),
        compiler_params=pltpu.CompilerParams(
            dimension_semantics=(lead_sem, "arbitrary"),
            vmem_limit_bytes=vmem_limit,
        ),
        cost_estimate=pl.CostEstimate(flops=flops, transcendentals=0,
                                      bytes_accessed=bytes_accessed),
    )(x2d, w1)

    # --- Tiny tail: combine partials + the two small layers (one-shot call). ---
    w3t = w3.reshape(1, HIDDEN) if w3.shape == (HIDDEN, OUT) else w3.T    # (1, 512)
    b3s = b3.reshape(1, 1)

    out = pl.pallas_call(
        tail_kernel,
        out_shape=jax.ShapeDtypeStruct((b, OUT), jnp.float32),
        grid=(1,),
        in_specs=[
            pl.BlockSpec((NSPLIT, b, HIDDEN), lambda i: (0, 0, 0)),
            pl.BlockSpec((1, HIDDEN), lambda i: (0, 0)),
            pl.BlockSpec((HIDDEN, HIDDEN), lambda i: (0, 0)),
            pl.BlockSpec((1, HIDDEN), lambda i: (0, 0)),
            pl.BlockSpec((1, HIDDEN), lambda i: (0, 0)),
            pl.BlockSpec((1, 1), lambda i: (0, 0)),
        ],
        out_specs=pl.BlockSpec((b, OUT), lambda i: (0, 0)),
        compiler_params=pltpu.CompilerParams(
            dimension_semantics=("arbitrary",)),
    )(partials, b1, w2, b2, w3t, b3s)

    return out.reshape(b)                                      # flatten(start_dim=0)


def _uniform(key, shape, bound):
    return jax.random.uniform(key, shape, jnp.float32, -bound, bound)


if __name__ == "__main__":
    key = jax.random.PRNGKey(0)
    kx, k1, k2, k3, k4, k5, k6 = jax.random.split(key, 7)

    batch = 2
    # Input spatial size is fixed by the first Linear(224*224*3, 512).
    x = jax.random.normal(kx, (batch, 3, 224, 224), jnp.float32)

    # Deterministic PyTorch-style init: U(-1/sqrt(fan_in), 1/sqrt(fan_in)).
    bnd1 = 1.0 / (IN_FEATURES ** 0.5)
    bnd2 = 1.0 / (HIDDEN ** 0.5)
    w1 = _uniform(k1, (IN_FEATURES, HIDDEN), bnd1)
    b1 = _uniform(k2, (1, HIDDEN), bnd1)
    w2 = _uniform(k3, (HIDDEN, HIDDEN), bnd2)
    b2 = _uniform(k4, (1, HIDDEN), bnd2)
    w3 = _uniform(k5, (HIDDEN, OUT), bnd2)
    b3 = _uniform(k6, (1, OUT), bnd2)

    cfg = _select_config()
    fwd = jax.jit(functools.partial(doppler_forward, **cfg))

    try:
        out = jax.block_until_ready(fwd(x, w1, b1, w2, b2, w3, b3))
    except Exception:
        # If CORE_PARALLEL sharding of the K-split is rejected on this
        # toolchain/chip, fall back to plain "parallel" semantics.
        if cfg.get("core_parallel"):
            cfg["core_parallel"] = False
            fwd = jax.jit(functools.partial(doppler_forward, **cfg))
            out = jax.block_until_ready(fwd(x, w1, b1, w2, b2, w3, b3))
        else:
            raise

    # Pure-JAX reference for correctness.
    xf = x.reshape(batch, -1)
    h = jnp.maximum(xf @ w1 + b1, 0.0)
    h = jnp.maximum(h @ w2 + b2, 0.0)
    ref = jnp.maximum(h @ w3 + b3, 0.0).reshape(batch)
    assert out.shape == (batch,)
    assert jnp.allclose(out, ref, rtol=1e-4, atol=1e-4), (out, ref)

    print("KERNEL_OK")
</pallas_src>

<mosaic_0001>
module attributes {stable_mosaic.version = 11 : i64} {
  func.func @tail_kernel(%arg0: i32, %arg1: memref<2x2x512xf32, #tpu.memory_space<vmem>>, %arg2: memref<1x512xf32, #tpu.memory_space<vmem>>, %arg3: memref<512x512xf32, #tpu.memory_space<vmem>>, %arg4: memref<1x512xf32, #tpu.memory_space<vmem>>, %arg5: memref<1x512xf32, #tpu.memory_space<vmem>>, %arg6: memref<1x1xf32, #tpu.memory_space<vmem>>, %arg7: memref<2x1xf32, #tpu.memory_space<vmem>>) attributes {dimension_semantics = [#tpu.dimension_semantics<arbitrary>], iteration_bounds = array<i64: 1>, scalar_prefetch = 0 : i64, scratch_operands = 0 : i64, tpu.core_type = #tpu.core_type<tc>, window_params = [{pipeline_mode = #tpu.pipeline_mode<synchronous>, transform_indices = @transform_0, window_bounds = array<i64: 2, 2, 512>}, {pipeline_mode = #tpu.pipeline_mode<synchronous>, transform_indices = @transform_1, window_bounds = array<i64: 1, 512>}, {pipeline_mode = #tpu.pipeline_mode<synchronous>, transform_indices = @transform_2, window_bounds = array<i64: 512, 512>}, {pipeline_mode = #tpu.pipeline_mode<synchronous>, transform_indices = @transform_3, window_bounds = array<i64: 1, 512>}, {pipeline_mode = #tpu.pipeline_mode<synchronous>, transform_indices = @transform_4, window_bounds = array<i64: 1, 512>}, {pipeline_mode = #tpu.pipeline_mode<synchronous>, transform_indices = @transform_5, window_bounds = array<i64: 1, 1>}, {pipeline_mode = #tpu.pipeline_mode<synchronous>, transform_indices = @transform_6, window_bounds = array<i64: 2, 1>}]} {
    %c0 = arith.constant 0 : index
    %c0_0 = arith.constant 0 : index
    %c0_1 = arith.constant 0 : index
    %0 = vector.load %arg1[%c0, %c0_0, %c0_1] : memref<2x2x512xf32, #tpu.memory_space<vmem>>, vector<2x2x512xf32>
    %cst = arith.constant dense<0.000000e+00> : vector<2x512xf32>
    %1 = vector.multi_reduction <add>, %0, %cst [0] : vector<2x2x512xf32> to vector<2x512xf32>
    %c0_2 = arith.constant 0 : index
    %c0_3 = arith.constant 0 : index
    %2 = vector.load %arg2[%c0_2, %c0_3] : memref<1x512xf32, #tpu.memory_space<vmem>>, vector<1x512xf32>
    %3 = vector.broadcast %2 : vector<1x512xf32> to vector<2x512xf32>
    %4 = arith.addf %1, %3 : vector<2x512xf32>
    %cst_4 = arith.constant 0.000000e+00 : f32
    %5 = vector.broadcast %cst_4 : f32 to vector<2x512xf32>
    %6 = arith.maximumf %4, %5 : vector<2x512xf32>
    %c0_5 = arith.constant 0 : index
    %c0_6 = arith.constant 0 : index
    %7 = vector.load %arg3[%c0_5, %c0_6] : memref<512x512xf32, #tpu.memory_space<vmem>>, vector<512x512xf32>
    %cst_7 = arith.constant dense<0.000000e+00> : vector<2x512xf32>
    %8 = tpu.matmul %6, %7, %cst_7 {dimension_numbers = #tpu.dot_dimension_numbers<[1], [0], [0], [1], [0, 0, 1, 1], [], []>} : vector<2x512xf32>, vector<512x512xf32>, vector<2x512xf32> -> vector<2x512xf32>
    %c0_8 = arith.constant 0 : index
    %c0_9 = arith.constant 0 : index
    %9 = vector.load %arg4[%c0_8, %c0_9] : memref<1x512xf32, #tpu.memory_space<vmem>>, vector<1x512xf32>
    %10 = vector.broadcast %9 : vector<1x512xf32> to vector<2x512xf32>
    %11 = arith.addf %8, %10 : vector<2x512xf32>
    %cst_10 = arith.constant 0.000000e+00 : f32
    %12 = vector.broadcast %cst_10 : f32 to vector<2x512xf32>
    %13 = arith.maximumf %11, %12 : vector<2x512xf32>
    %c0_11 = arith.constant 0 : index
    %c0_12 = arith.constant 0 : index
    %14 = vector.load %arg5[%c0_11, %c0_12] : memref<1x512xf32, #tpu.memory_space<vmem>>, vector<1x512xf32>
    %15 = vector.broadcast %14 : vector<1x512xf32> to vector<2x512xf32>
    %16 = arith.mulf %13, %15 : vector<2x512xf32>
    %cst_13 = arith.constant dense<0.000000e+00> : vector<2xf32>
    %17 = vector.multi_reduction <add>, %16, %cst_13 [1] : vector<2x512xf32> to vector<2xf32>
    %18 = vector.shape_cast %17 : vector<2xf32> to vector<2x1xf32>
    %c0_14 = arith.constant 0 : index
    %c0_15 = arith.constant 0 : index
    %19 = vector.load %arg6[%c0_14, %c0_15] : memref<1x1xf32, #tpu.memory_space<vmem>>, vector<1x1xf32>
    %20 = vector.broadcast %19 : vector<1x1xf32> to vector<2x1xf32>
    %21 = arith.addf %18, %20 : vector<2x1xf32>
    %cst_16 = arith.constant 0.000000e+00 : f32
    %22 = vector.broadcast %cst_16 : f32 to vector<2x1xf32>
    %23 = arith.maximumf %21, %22 : vector<2x1xf32>
    %c0_17 = arith.constant 0 : index
    %c0_18 = arith.constant 0 : index
    %24 = vector.load %arg7[%c0_17, %c0_18] : memref<2x1xf32, #tpu.memory_space<vmem>>, vector<2x1xf32>
    tpu.vector_store %arg7[%c0_17, %c0_18], %23 {strides = array<i32>} : memref<2x1xf32, #tpu.memory_space<vmem>>, vector<2x1xf32>,
    return
  }
  func.func @transform_0(%arg0: i32) -> (i32, i32, i32) {
    %c0_i32 = arith.constant 0 : i32
    %c0_i32_0 = arith.constant 0 : i32
    %c0_i32_1 = arith.constant 0 : i32
    %c0_i32_2 = arith.constant 0 : i32
    return %c0_i32, %c0_i32_0, %c0_i32_1 : i32, i32, i32
  }
  func.func @transform_1(%arg0: i32) -> (i32, i32) {
    %c0_i32 = arith.constant 0 : i32
    %c0_i32_0 = arith.constant 0 : i32
    %c0_i32_1 = arith.constant 0 : i32
    return %c0_i32, %c0_i32_0 : i32, i32
  }
  func.func @transform_2(%arg0: i32) -> (i32, i32) {
    %c0_i32 = arith.constant 0 : i32
    %c0_i32_0 = arith.constant 0 : i32
    %c0_i32_1 = arith.constant 0 : i32
    return %c0_i32, %c0_i32_0 : i32, i32
  }
  func.func @transform_3(%arg0: i32) -> (i32, i32) {
    %c0_i32 = arith.constant 0 : i32
    %c0_i32_0 = arith.constant 0 : i32
    %c0_i32_1 = arith.constant 0 : i32
    return %c0_i32, %c0_i32_0 : i32, i32
  }
  func.func @transform_4(%arg0: i32) -> (i32, i32) {
    %c0_i32 = arith.constant 0 : i32
    %c0_i32_0 = arith.constant 0 : i32
    %c0_i32_1 = arith.constant 0 : i32
    return %c0_i32, %c0_i32_0 : i32, i32
  }
  func.func @transform_5(%arg0: i32) -> (i32, i32) {
    %c0_i32 = arith.constant 0 : i32
    %c0_i32_0 = arith.constant 0 : i32
    %c0_i32_1 = arith.constant 0 : i32
    return %c0_i32, %c0_i32_0 : i32, i32
  }
  func.func @transform_6(%arg0: i32) -> (i32, i32) {
    %c0_i32 = arith.constant 0 : i32
    %c0_i32_0 = arith.constant 0 : i32
    %c0_i32_1 = arith.constant 0 : i32
    return %c0_i32, %c0_i32_0 : i32, i32
  }
}

module attributes {stable_mosaic.version = 11 : i64} {
  func.func @layer1_partial_kernel(%arg0: i32, %arg1: i32, %arg2: memref<2x6272xf32, #tpu.memory_space<vmem>>, %arg3: memref<6272x512xf32, #tpu.memory_space<vmem>>, %arg4: memref<1x2x512xf32, #tpu.memory_space<vmem>>) attributes {dimension_semantics = [#tpu.dimension_semantics<parallel>, #tpu.dimension_semantics<arbitrary>], iteration_bounds = array<i64: 2, 12>, scalar_prefetch = 0 : i64, scratch_operands = 0 : i64, tpu.core_type = #tpu.core_type<tc>, window_params = [{transform_indices = @transform_0, window_bounds = array<i64: 2, 6272>}, {transform_indices = @transform_1, window_bounds = array<i64: 6272, 512>}, {transform_indices = @transform_2, window_bounds = array<i64: 1, 2, 512>}]} {
    %c0_i32 = arith.constant 0 : i32
    %0 = arith.cmpi eq, %arg1, %c0_i32 : i32
    %1 = arith.extui %0 : i1 to i32
    %c0_i32_0 = arith.constant 0 : i32
    %2 = arith.cmpi ne, %1, %c0_i32_0 : i32
    scf.if %2 {
      %cst_10 = arith.constant 0.000000e+00 : f32
      %12 = vector.broadcast %cst_10 : f32 to vector<2x512xf32>
      %c0_11 = arith.constant 0 : index
      %c0_12 = arith.constant 0 : index
      %c0_13 = arith.constant 0 : index
      %13 = vector.load %arg4[%c0_11, %c0_12, %c0_13] : memref<1x2x512xf32, #tpu.memory_space<vmem>>, vector<1x2x512xf32>
      %14 = vector.shape_cast %13 : vector<1x2x512xf32> to vector<2x512xf32>
      %15 = vector.shape_cast %12 : vector<2x512xf32> to vector<1x2x512xf32>
      tpu.vector_store %arg4[%c0_11, %c0_12, %c0_13], %15 {strides = array<i32>} : memref<1x2x512xf32, #tpu.memory_space<vmem>>, vector<1x2x512xf32>,
    } else {
    }
    %c0 = arith.constant 0 : index
    %c0_1 = arith.constant 0 : index
    %c0_2 = arith.constant 0 : index
    %3 = vector.load %arg4[%c0, %c0_1, %c0_2] : memref<1x2x512xf32, #tpu.memory_space<vmem>>, vector<1x2x512xf32>
    %4 = vector.shape_cast %3 : vector<1x2x512xf32> to vector<2x512xf32>
    %c0_3 = arith.constant 0 : index
    %c0_4 = arith.constant 0 : index
    %5 = vector.load %arg2[%c0_3, %c0_4] : memref<2x6272xf32, #tpu.memory_space<vmem>>, vector<2x6272xf32>
    %c0_5 = arith.constant 0 : index
    %c0_6 = arith.constant 0 : index
    %6 = vector.load %arg3[%c0_5, %c0_6] : memref<6272x512xf32, #tpu.memory_space<vmem>>, vector<6272x512xf32>
    %cst = arith.constant dense<0.000000e+00> : vector<2x512xf32>
    %7 = tpu.matmul %5, %6, %cst {dimension_numbers = #tpu.dot_dimension_numbers<[1], [0], [0], [1], [0, 0, 1, 1], [], []>} : vector<2x6272xf32>, vector<6272x512xf32>, vector<2x512xf32> -> vector<2x512xf32>
    %8 = arith.addf %4, %7 : vector<2x512xf32>
    %c0_7 = arith.constant 0 : index
    %c0_8 = arith.constant 0 : index
    %c0_9 = arith.constant 0 : index
    %9 = vector.load %arg4[%c0_7, %c0_8, %c0_9] : memref<1x2x512xf32, #tpu.memory_space<vmem>>, vector<1x2x512xf32>
    %10 = vector.shape_cast %9 : vector<1x2x512xf32> to vector<2x512xf32>
    %11 = vector.shape_cast %8 : vector<2x512xf32> to vector<1x2x512xf32>
    tpu.vector_store %arg4[%c0_7, %c0_8, %c0_9], %11 {strides = array<i32>} : memref<1x2x512xf32, #tpu.memory_space<vmem>>, vector<1x2x512xf32>,
    return
  }
  func.func @transform_0(%arg0: i32, %arg1: i32) -> (i32, i32) {
    %c12_i32 = arith.constant 12 : i32
    %0 = arith.muli %arg0, %c12_i32 : i32
    %1 = arith.addi %0, %arg1 : i32
    %c0_i32 = arith.constant 0 : i32
    %c0_i32_0 = arith.constant 0 : i32
    return %c0_i32, %1 : i32, i32
  }
  func.func @transform_1(%arg0: i32, %arg1: i32) -> (i32, i32) {
    %c12_i32 = arith.constant 12 : i32
    %0 = arith.muli %arg0, %c12_i32 : i32
    %1 = arith.addi %0, %arg1 : i32
    %c0_i32 = arith.constant 0 : i32
    %c0_i32_0 = arith.constant 0 : i32
    return %1, %c0_i32 : i32, i32
  }
  func.func @transform_2(%arg0: i32, %arg1: i32) -> (i32, i32, i32) {
    %c0_i32 = arith.constant 0 : i32
    %c0_i32_0 = arith.constant 0 : i32
    %c0_i32_1 = arith.constant 0 : i32
    return %arg0, %c0_i32, %c0_i32_0 : i32, i32, i32
  }
}

</mosaic_0001>

<bundles_post_ra>
// kernel: doppler_forward.3
= control target key start
LH: loop header
LB: loop body
LE: loop exit
PB: predicated region body
PF: predicated region fallthrough
CT: control target
= control target key end

     0   :  { %vm71_vm0 = vcmask 1041408   ;;  %vm724_vm1 = vcmask 1024   ;;  %s1626_s2 = inlined_call_operand.vmem [shape: f32[512,512], index: 2, kind: input, shape index: {}]   ;;  %s1627_s0 = inlined_call_operand.vmem [shape: f32[2,2,512], index: 0, kind: input, shape index: {}]   ;;  %s1628_s1 = inlined_call_operand.vmem [shape: f32[1,512], index: 1, kind: input, shape index: {}]   ;;  %s1629_s5 = inlined_call_operand.<no memory space> [shape: f32[1,1], index: 5, kind: input, shape index: {}]   ;;  %s1630_s3 = inlined_call_operand.vmem [shape: f32[1,512], index: 3, kind: input, shape index: {}]   ;;  %s1631_s4 = inlined_call_operand.vmem [shape: f32[1,512], index: 4, kind: input, shape index: {}]   ;;  %s1632_s6 = inlined_call_operand.vmem [shape: f32[2,1], index: 6, kind: output, shape index: {}]  }
   0x1   :  { %v175_v0 = vld [vmem:[%s1626_s2 + $0x1e8] sm:$0xff]  ;;  %v174_v2 = vld [vmem:[%s1626_s2 + $0x1e0] sm:$0xff] }
   0x2   :  { %v303_v1 = vld [vmem:[%s1626_s2 + $0x5e8] sm:$0xff]  ;;  %392 = vmatprep.subr.mxu0 %v175_v0  ;;  %v302_v3 = vld [vmem:[%s1626_s2 + $0x5e0] sm:$0xff] }
   0x3   :  { %463 = vmatprep.subr.mxu1 %v303_v1  ;;  %v171_v4 = vld [vmem:[%s1626_s2 + $0x1c8] sm:$0xff]  ;;  %393 = vmatpush1.msra.mxu0 %v174_v2  ;;  %v170_v6 = vld [vmem:[%s1626_s2 + $0x1c0] sm:$0xff] }
   0x4   :  { %v299_v5 = vld [vmem:[%s1626_s2 + $0x5c8] sm:$0xff]  ;;  %464 = vmatpush1.msra.mxu1 %v302_v3  ;;  %v298_v7 = vld [vmem:[%s1626_s2 + $0x5c0] sm:$0xff]  ;;  %394 = vmatprep.subr.mxu0 %v171_v4  ;;  %v734_v4 = vmov 1983009808  }
   0x5   :  { %v167_v8 = vld [vmem:[%s1626_s2 + $0x1a8] sm:$0xff]  ;;  %465 = vmatprep.subr.mxu1 %v299_v5  ;;  %v166_v10 = vld [vmem:[%s1626_s2 + $0x1a0] sm:$0xff]  ;;  %395 = vmatpush1.msra.mxu0 %v170_v6  ;;  %v31_v5 = vunpack.c.l.s4 %v734_v4  ;;  %v33_v6 = vlaneseq }
   0x6   :  { %v295_v9 = vld [vmem:[%s1626_s2 + $0x5a8] sm:$0xff]  ;;  %v294_v11 = vld [vmem:[%s1626_s2 + $0x5a0] sm:$0xff]  ;;  %466 = vmatpush1.msra.mxu1 %v298_v7  ;;  %396 = vmatprep.subr.mxu0 %v167_v8 }
   0x7   :  { %v163_v12 = vld [vmem:[%s1626_s2 + $0x188] sm:$0xff]  ;;  %467 = vmatprep.subr.mxu1 %v295_v9  ;;  %v162_v14 = vld [vmem:[%s1626_s2 + $0x180] sm:$0xff]  ;;  %397 = vmatpush1.msra.mxu0 %v166_v10 }
   0x8   :  { %v291_v13 = vld [vmem:[%s1626_s2 + $0x588] sm:$0xff]  ;;  %v290_v15 = vld [vmem:[%s1626_s2 + $0x580] sm:$0xff]  ;;  %468 = vmatpush1.msra.mxu1 %v294_v11  ;;  %398 = vmatprep.subr.mxu0 %v163_v12 }
   0x9   :  { %v159_v16 = vld [vmem:[%s1626_s2 + $0x168] sm:$0xff]  ;;  %469 = vmatprep.subr.mxu1 %v291_v13  ;;  %v158_v18 = vld [vmem:[%s1626_s2 + $0x160] sm:$0xff]  ;;  %399 = vmatpush1.msra.mxu0 %v162_v14 }
   0xa   :  { %v287_v17 = vld [vmem:[%s1626_s2 + $0x568] sm:$0xff]  ;;  %v286_v19 = vld [vmem:[%s1626_s2 + $0x560] sm:$0xff]  ;;  %470 = vmatpush1.msra.mxu1 %v290_v15  ;;  %400 = vmatprep.subr.mxu0 %v159_v16  ;;  %v32_v15 = vunpack.c.0.s8 %v31_v5  ;;  %v998_v16 = vshrl.u32 %v33_v6, 7 }
   0xb   :  { %v155_v20 = vld [vmem:[%s1626_s2 + $0x148] sm:$0xff]  ;;  %471 = vmatprep.subr.mxu1 %v287_v17  ;;  %v154_v22 = vld [vmem:[%s1626_s2 + $0x140] sm:$0xff]  ;;  %401 = vmatpush1.msra.mxu0 %v158_v18 }
   0xc   :  { %v283_v21 = vld [vmem:[%s1626_s2 + $0x548] sm:$0xff]  ;;  %v282_v23 = vld [vmem:[%s1626_s2 + $0x540] sm:$0xff]  ;;  %472 = vmatpush1.msra.mxu1 %v286_v19  ;;  %402 = vmatprep.subr.mxu0 %v155_v20 }
   0xd   :  { %v151_v24 = vld [vmem:[%s1626_s2 + $0x128] sm:$0xff]  ;;  %473 = vmatprep.subr.mxu1 %v283_v21  ;;  %v150_v26 = vld [vmem:[%s1626_s2 + $0x120] sm:$0xff]  ;;  %403 = vmatpush1.msra.mxu0 %v154_v22 }
   0xe   :  { %v279_v25 = vld [vmem:[%s1626_s2 + $0x528] sm:$0xff]  ;;  %v278_v27 = vld [vmem:[%s1626_s2 + $0x520] sm:$0xff]  ;;  %474 = vmatpush1.msra.mxu1 %v282_v23  ;;  %404 = vmatprep.subr.mxu0 %v151_v24 }
   0xf   :  { %v147_v28 = vld [vmem:[%s1626_s2 + $0x108] sm:$0xff]  ;;  %475 = vmatprep.subr.mxu1 %v279_v25  ;;  %v146_v30 = vld [vmem:[%s1626_s2 + $0x100] sm:$0xff]  ;;  %405 = vmatpush1.msra.mxu0 %v150_v26  ;;  %v35_v25 = vsub.s32 %v32_v15, %v998_v16 }
  0x10   :  { %v275_v29 = vld [vmem:[%s1626_s2 + $0x508] sm:$0xff]  ;;  %v274_v31 = vld [vmem:[%s1626_s2 + $0x500] sm:$0xff]  ;;  %476 = vmatpush1.msra.mxu1 %v278_v27  ;;  %406 = vmatprep.subr.mxu0 %v147_v28 }
  0x11   :  { %v143_v32 = vld [vmem:[%s1626_s2 + $0xe8] sm:$0xff]  ;;  %477 = vmatprep.subr.mxu1 %v275_v29  ;;  %v142_v34 = vld [vmem:[%s1626_s2 + $0xe0] sm:$0xff]  ;;  %407 = vmatpush1.msra.mxu0 %v146_v30 }
  0x12   :  { %v271_v33 = vld [vmem:[%s1626_s2 + $0x4e8] sm:$0xff]  ;;  %v270_v35 = vld [vmem:[%s1626_s2 + $0x4e0] sm:$0xff]  ;;  %478 = vmatpush1.msra.mxu1 %v274_v31  ;;  %408 = vmatprep.subr.mxu0 %v143_v32 }
  0x13   :  { %v139_v36 = vld [vmem:[%s1626_s2 + $0xc8] sm:$0xff]  ;;  %479 = vmatprep.subr.mxu1 %v271_v33  ;;  %v138_v38 = vld [vmem:[%s1626_s2 + $0xc0] sm:$0xff]  ;;  %409 = vmatpush1.msra.mxu0 %v142_v34 }
  0x14   :  { %v267_v37 = vld [vmem:[%s1626_s2 + $0x4c8] sm:$0xff]  ;;  %v266_v39 = vld [vmem:[%s1626_s2 + $0x4c0] sm:$0xff]  ;;  %480 = vmatpush1.msra.mxu1 %v270_v35  ;;  %410 = vmatprep.subr.mxu0 %v139_v36 }
  0x15   :  { %v135_v40 = vld [vmem:[%s1626_s2 + $0xa8] sm:$0xff]  ;;  %481 = vmatprep.subr.mxu1 %v267_v37  ;;  %v134_v42 = vld [vmem:[%s1626_s2 + $0xa0] sm:$0xff]  ;;  %411 = vmatpush1.msra.mxu0 %v138_v38 }
  0x16   :  { %v263_v41 = vld [vmem:[%s1626_s2 + $0x4a8] sm:$0xff]  ;;  %v262_v43 = vld [vmem:[%s1626_s2 + $0x4a0] sm:$0xff]  ;;  %482 = vmatpush1.msra.mxu1 %v266_v39  ;;  %412 = vmatprep.subr.mxu0 %v135_v40 }
  0x17   :  { %v131_v44 = vld [vmem:[%s1626_s2 + $0x88] sm:$0xff]  ;;  %483 = vmatprep.subr.mxu1 %v263_v41  ;;  %v130_v46 = vld [vmem:[%s1626_s2 + $0x80] sm:$0xff]  ;;  %413 = vmatpush1.msra.mxu0 %v134_v42 }
  0x18   :  { %v259_v45 = vld [vmem:[%s1626_s2 + $0x488] sm:$0xff]  ;;  %v258_v47 = vld [vmem:[%s1626_s2 + $0x480] sm:$0xff]  ;;  %484 = vmatpush1.msra.mxu1 %v262_v43  ;;  %414 = vmatprep.subr.mxu0 %v131_v44 }
  0x19   :  { %v127_v48 = vld [vmem:[%s1626_s2 + $0x68] sm:$0xff]  ;;  %485 = vmatprep.subr.mxu1 %v259_v45  ;;  %v126_v50 = vld [vmem:[%s1626_s2 + $0x60] sm:$0xff]  ;;  %415 = vmatpush1.msra.mxu0 %v130_v46 }
  0x1a   :  { %v255_v49 = vld [vmem:[%s1626_s2 + $0x468] sm:$0xff]  ;;  %v254_v51 = vld [vmem:[%s1626_s2 + $0x460] sm:$0xff]  ;;  %486 = vmatpush1.msra.mxu1 %v258_v47  ;;  %416 = vmatprep.subr.mxu0 %v127_v48 }
  0x1b   :  { %v123_v52 = vld [vmem:[%s1626_s2 + $0x48] sm:$0xff]  ;;  %487 = vmatprep.subr.mxu1 %v255_v49  ;;  %v122_v54 = vld [vmem:[%s1626_s2 + $0x40] sm:$0xff]  ;;  %417 = vmatpush1.msra.mxu0 %v126_v50 }
  0x1c   :  { %v251_v53 = vld [vmem:[%s1626_s2 + $0x448] sm:$0xff]  ;;  %v250_v55 = vld [vmem:[%s1626_s2 + $0x440] sm:$0xff]  ;;  %488 = vmatpush1.msra.mxu1 %v254_v51  ;;  %418 = vmatprep.subr.mxu0 %v123_v52 }
  0x1d   :  { %v119_v56 = vld [vmem:[%s1626_s2 + $0x28] sm:$0xff]  ;;  %489 = vmatprep.subr.mxu1 %v251_v53  ;;  %v118_v58 = vld [vmem:[%s1626_s2 + $0x20] sm:$0xff]  ;;  %419 = vmatpush1.msra.mxu0 %v122_v54  ;;  %v1086_v54 = vsub.s32 1, %v998_v16 }
  0x1e   :  { %v247_v57 = vld [vmem:[%s1626_s2 + $0x428] sm:$0xff]  ;;  %v246_v59 = vld [vmem:[%s1626_s2 + $0x420] sm:$0xff]  ;;  %490 = vmatpush1.msra.mxu1 %v250_v55  ;;  %420 = vmatprep.subr.mxu0 %v119_v56  ;;  %v1089_v55 = vsub.s32 0, %v998_v16 }
  0x1f   :  { %v115_v60 = vld [vmem:[%s1626_s2 + $0x8] sm:$0xff]  ;;  %491 = vmatprep.subr.mxu1 %v247_v57  ;;  %v114_v62 = vld [vmem:[%s1626_s2] sm:$0xff]  ;;  %421 = vmatpush1.msra.mxu0 %v118_v58 }
  0x20   :  { %v243_v61 = vld [vmem:[%s1626_s2 + $0x408] sm:$0xff]  ;;  %v242_v63 = vld [vmem:[%s1626_s2 + $0x400] sm:$0xff]  ;;  %492 = vmatpush1.msra.mxu1 %v246_v59  ;;  %422 = vmatprep.subr.mxu0 %v115_v60 }
  0x21   :  { %v239_v0 = vld [vmem:[%s1626_s2 + $0x3e8] sm:$0xff]  ;;  %493 = vmatprep.subr.mxu1 %v243_v61  ;;  %v238_v2 = vld [vmem:[%s1626_s2 + $0x3e0] sm:$0xff]  ;;  %423 = vmatpush1.msra.mxu0 %v114_v62 }
  0x22   :  { %v367_v1 = vld [vmem:[%s1626_s2 + $0x7e8] sm:$0xff]  ;;  %v366_v3 = vld [vmem:[%s1626_s2 + $0x7e0] sm:$0xff]  ;;  %494 = vmatpush1.msra.mxu1 %v242_v63  ;;  %424 = vmatprep.subr.mxu0 %v239_v0 }
  0x23   :  { %v235_v7 = vld [vmem:[%s1626_s2 + $0x3c8] sm:$0xff]  ;;  %495 = vmatprep.subr.mxu1 %v367_v1  ;;  %v234_v9 = vld [vmem:[%s1626_s2 + $0x3c0] sm:$0xff]  ;;  %425 = vmatpush2.msra.mxu0 %v238_v2 }
  0x24   :  { %v363_v8 = vld [vmem:[%s1626_s2 + $0x7c8] sm:$0xff]  ;;  %v362_v10 = vld [vmem:[%s1626_s2 + $0x7c0] sm:$0xff]  ;;  %496 = vmatpush2.msra.mxu1 %v366_v3  ;;  %426 = vmatprep.subr.mxu0 %v235_v7  ;;  %v1111_v3 = vsub.s32 3, %v998_v16 }
  0x25   :  { %v231_v11 = vld [vmem:[%s1626_s2 + $0x3a8] sm:$0xff]  ;;  %497 = vmatprep.subr.mxu1 %v363_v8  ;;  %v230_v13 = vld [vmem:[%s1626_s2 + $0x3a0] sm:$0xff]  ;;  %427 = vmatpush2.msra.mxu0 %v234_v9  ;;  %v1122_v8 = vsub.s32 2, %v998_v16 }
  0x26   :  { %v359_v12 = vld [vmem:[%s1626_s2 + $0x7a8] sm:$0xff]  ;;  %v358_v14 = vld [vmem:[%s1626_s2 + $0x7a0] sm:$0xff]  ;;  %498 = vmatpush2.msra.mxu1 %v362_v10  ;;  %428 = vmatprep.subr.mxu0 %v231_v11 }
  0x27   :  { %v227_v17 = vld [vmem:[%s1626_s2 + $0x388] sm:$0xff]  ;;  %499 = vmatprep.subr.mxu1 %v359_v12  ;;  %v226_v19 = vld [vmem:[%s1626_s2 + $0x380] sm:$0xff]  ;;  %429 = vmatpush2.msra.mxu0 %v230_v13 }
  0x28   :  { %v355_v18 = vld [vmem:[%s1626_s2 + $0x788] sm:$0xff]  ;;  %v354_v20 = vld [vmem:[%s1626_s2 + $0x780] sm:$0xff]  ;;  %500 = vmatpush2.msra.mxu1 %v358_v14  ;;  %430 = vmatprep.subr.mxu0 %v227_v17 }
  0x29   :  { %v223_v21 = vld [vmem:[%s1626_s2 + $0x368] sm:$0xff]  ;;  %501 = vmatprep.subr.mxu1 %v355_v18  ;;  %v222_v23 = vld [vmem:[%s1626_s2 + $0x360] sm:$0xff]  ;;  %431 = vmatpush2.msra.mxu0 %v226_v19 }
  0x2a   :  { %v351_v22 = vld [vmem:[%s1626_s2 + $0x768] sm:$0xff]  ;;  %v350_v24 = vld [vmem:[%s1626_s2 + $0x760] sm:$0xff]  ;;  %502 = vmatpush2.msra.mxu1 %v354_v20  ;;  %432 = vmatprep.subr.mxu0 %v223_v21 }
  0x2b   :  { %v219_v26 = vld [vmem:[%s1626_s2 + $0x348] sm:$0xff]  ;;  %503 = vmatprep.subr.mxu1 %v351_v22  ;;  %v218_v28 = vld [vmem:[%s1626_s2 + $0x340] sm:$0xff]  ;;  %433 = vmatpush2.msra.mxu0 %v222_v23 }
  0x2c   :  { %v347_v27 = vld [vmem:[%s1626_s2 + $0x748] sm:$0xff]  ;;  %v346_v29 = vld [vmem:[%s1626_s2 + $0x740] sm:$0xff]  ;;  %504 = vmatpush2.msra.mxu1 %v350_v24  ;;  %434 = vmatprep.subr.mxu0 %v219_v26 }
  0x2d   :  { %v215_v30 = vld [vmem:[%s1626_s2 + $0x328] sm:$0xff]  ;;  %v25_v32 = vld [vmem:[%s1627_s0] sm:$0xff]  ;;  %505 = vmatprep.subr.mxu1 %v347_v27  ;;  %435 = vmatpush2.msra.mxu0 %v218_v28 }
  0x2e   :  { %v343_v31 = vld [vmem:[%s1626_s2 + $0x728] sm:$0xff]  ;;  %v214_v34 = vld [vmem:[%s1626_s2 + $0x320] sm:$0xff]  ;;  %v36_v36 = vrot.slane %v25_v32, %v35_v25  ;;  %v29_v38 = vcombine.high %v25_v32, %v25_v32  ;;  %506 = vmatpush2.msra.mxu1 %v346_v29  ;;  %436 = vmatprep.subr.mxu0 %v215_v30 }
  0x2f   :  { %v26_v33 = vld [vmem:[%s1627_s0 + $0x8] sm:$0xff]  ;;  %v342_v35 = vld [vmem:[%s1626_s2 + $0x720] sm:$0xff]  ;;  %507 = vmatprep.subr.mxu1 %v343_v31  ;;  %437 = vmatpush2.msra.mxu0 %v214_v34 }
  0x30   :  { %v53_v37 = vrot.slane %v26_v33, %v35_v25  ;;  %v211_v39 = vld [vmem:[%s1626_s2 + $0x308] sm:$0xff]  ;;  %v46_v41 = vcombine.high %v26_v33, %v26_v33  ;;  %v210_v42 = vld [vmem:[%s1626_s2 + $0x300] sm:$0xff]  ;;  %v44_v44 = vcombine.high %v36_v36, %v36_v36  ;;  %508 = vmatpush2.msra.mxu1 %v342_v35  ;;  %v43_v48 = vrot.slane %v29_v38, %v35_v25 }
  0x31   :  { %v339_v40 = vld [vmem:[%s1626_s2 + $0x708] sm:$0xff]  ;;  %v338_v43 = vld [vmem:[%s1626_s2 + $0x700] sm:$0xff]  ;;  %438 = vmatprep.subr.mxu0 %v211_v39  ;;  %v72_v1 = vsel %vm71_vm0, %v36_v36, 0.0 }
  0x32   :  { %v61_v45 = vcombine.high %v53_v37, %v53_v37  ;;  %v207_v46 = vld [vmem:[%s1626_s2 + $0x2e8] sm:$0xff]  ;;  %v60_v49 = vrot.slane %v46_v41, %v35_v25  ;;  %509 = vmatprep.subr.mxu1 %v339_v40  ;;  %v206_v50 = vld [vmem:[%s1626_s2 + $0x2e0] sm:$0xff]  ;;  %439 = vmatpush2.msra.mxu0 %v210_v42  ;;  %v45_v56 = vcombine.high %v43_v48, %v43_v48  ;;  %v75_v59 = vsel %vm71_vm0, %v44_v44, 0.0 }
  0x33   :  { %v335_v47 = vld [vmem:[%s1626_s2 + $0x6e8] sm:$0xff]  ;;  %v334_v51 = vld [vmem:[%s1626_s2 + $0x6e0] sm:$0xff]  ;;  %510 = vmatpush2.msra.mxu1 %v338_v43  ;;  %440 = vmatprep.subr.mxu0 %v207_v46  ;;  %v73_v2 = vsel %vm71_vm0, %v53_v37, 0.0  ;;  %v78_v13 = vsel %vm71_vm0, %v43_v48, 0.0  ;;  %v177_v46 = vld [vmem:[%s1626_s2 + $0x1f8] sm:$0xff] }
  0x34   :  { %v203_v52 = vld [vmem:[%s1626_s2 + $0x2c8] sm:$0xff]  ;;  %511 = vmatprep.subr.mxu1 %v335_v47  ;;  %v202_v57 = vld [vmem:[%s1626_s2 + $0x2c0] sm:$0xff]  ;;  %v76_v60 = vsel %vm71_vm0, %v61_v45, 0.0  ;;  %v62_v62 = vcombine.high %v60_v49, %v60_v49  ;;  %441 = vmatpush2.msra.mxu0 %v206_v50  ;;  %v81_v6 = vsel %vm71_vm0, %v45_v56, 0.0  ;;  %v79_v14 = vsel %vm71_vm0, %v60_v49, 0.0  ;;  %v305_v48 = vld [vmem:[%s1626_s2 + $0x5f8] sm:$0xff] }
  0x35   :  { %v331_v53 = vld [vmem:[%s1626_s2 + $0x6c8] sm:$0xff]  ;;  %v330_v58 = vld [vmem:[%s1626_s2 + $0x6c0] sm:$0xff]  ;;  %512 = vmatpush2.msra.mxu1 %v334_v51  ;;  %442 = vmatprep.subr.mxu0 %v203_v52  ;;  %v77_v11 = vadd.f32 %v76_v60, %v75_v59  ;;  %v74_v17 = vadd.f32 %v73_v2, %v72_v1  ;;  %v80_v25 = vadd.f32 %v79_v14, %v78_v13  ;;  %v176_v49 = vld [vmem:[%s1626_s2 + $0x1f0] sm:$0xff] }
  0x36   :  { %v84_v61 = vld [vmem:[%s1628_s1] sm:$0xf]  ;;  %v199_v63 = vld [vmem:[%s1626_s2 + $0x2a8] sm:$0xff]  ;;  %513 = vmatprep.subr.mxu1 %v331_v53  ;;  %v82_v7 = vsel %vm71_vm0, %v62_v62, 0.0  ;;  %443 = vmatpush2.msra.mxu0 %v202_v57  ;;  %v304_v50 = vld [vmem:[%s1626_s2 + $0x5f0] sm:$0xff] }
  0x37   :  { %v327_v0 = vld [vmem:[%s1626_s2 + $0x6a8] sm:$0xff]  ;;  %v198_v4 = vld [vmem:[%s1626_s2 + $0x2a0] sm:$0xff]  ;;  %514 = vmatpush2.msra.mxu1 %v330_v58  ;;  %v93_v12 = vrot.slane %v84_v61, %v1086_v54  ;;  %444 = vmatprep.subr.mxu0 %v199_v63  ;;  %v89_v18 = vrot.slane %v84_v61, %v1089_v55  ;;  %v83_v21 = vadd.f32 %v82_v7, %v81_v6  ;;  %v173_v51 = vld [vmem:[%s1626_s2 + $0x1d8] sm:$0xff] }
  0x38   :  { %v326_v5 = vld [vmem:[%s1626_s2 + $0x6a0] sm:$0xff]  ;;  %v195_v9 = vld [vmem:[%s1626_s2 + $0x288] sm:$0xff]  ;;  %515 = vmatprep.subr.mxu1 %v327_v0  ;;  %445 = vmatpush2.msra.mxu0 %v198_v4  ;;  %v101_v22 = vrot.slane %v84_v61, %v1111_v3  ;;  %v97_v26 = vrot.slane %v84_v61, %v1122_v8  ;;  %v301_v52 = vld [vmem:[%s1626_s2 + $0x5d8] sm:$0xff] }
  0x39   :  { %v323_v10 = vld [vmem:[%s1626_s2 + $0x688] sm:$0xff]  ;;  %v194_v15 = vld [vmem:[%s1626_s2 + $0x280] sm:$0xff]  ;;  %516 = vmatpush2.msra.mxu1 %v326_v5  ;;  %446 = vmatprep.subr.mxu0 %v195_v9  ;;  %v1160_v29 = vadd.f32 %v93_v12, %v77_v11  ;;  %v1168_v32 = vadd.f32 %v89_v18, %v74_v17  ;;  %v172_v53 = vld [vmem:[%s1626_s2 + $0x1d0] sm:$0xff] }
  0x3a   :  { %v322_v16 = vld [vmem:[%s1626_s2 + $0x680] sm:$0xff]  ;;  %v191_v19 = vld [vmem:[%s1626_s2 + $0x268] sm:$0xff]  ;;  %517 = vmatprep.subr.mxu1 %v323_v10  ;;  %447 = vmatpush2.msra.mxu0 %v194_v15  ;;  %v1176_v35 = vadd.f32 %v101_v22, %v83_v21  ;;  %v1184_v38 = vadd.f32 %v97_v26, %v80_v25  ;;  %v300_v56 = vld [vmem:[%s1626_s2 + $0x5d0] sm:$0xff] }
  0x3b   :  { %v319_v20 = vld [vmem:[%s1626_s2 + $0x668] sm:$0xff]  ;;  %v190_v23 = vld [vmem:[%s1626_s2 + $0x260] sm:$0xff]  ;;  %518 = vmatpush2.msra.mxu1 %v322_v16  ;;  %448 = vmatprep.subr.mxu0 %v191_v19  ;;  %v111_v41 = vmax.f32 %v1160_v29, 0.0  ;;  %v110_v43 = vmax.f32 %v1168_v32, 0.0  ;;  %v169_v57 = vld [vmem:[%s1626_s2 + $0x1b8] sm:$0xff] }
  0x3c   :  { %v318_v24 = vld [vmem:[%s1626_s2 + $0x660] sm:$0xff]  ;;  %v187_v27 = vld [vmem:[%s1626_s2 + $0x248] sm:$0xff]  ;;  %519 = vmatprep.subr.mxu1 %v319_v20  ;;  %449 = vmatpush2.msra.mxu0 %v190_v23  ;;  %v113_v45 = vmax.f32 %v1176_v35, 0.0  ;;  %v112_v47 = vmax.f32 %v1184_v38, 0.0  ;;  %v297_v58 = vld [vmem:[%s1626_s2 + $0x5b8] sm:$0xff] }
  0x3d   :  { %v315_v28 = vld [vmem:[%s1626_s2 + $0x648] sm:$0xff]  ;;  %v186_v30 = vld [vmem:[%s1626_s2 + $0x240] sm:$0xff]  ;;  %520 = vmatpush2.msra.mxu1 %v318_v24  ;;  %450 = vmatprep.subr.mxu0 %v187_v27  ;;  %v168_v59 = vld [vmem:[%s1626_s2 + $0x1b0] sm:$0xff] }
  0x3e   :  { %v314_v31 = vld [vmem:[%s1626_s2 + $0x640] sm:$0xff]  ;;  %v183_v33 = vld [vmem:[%s1626_s2 + $0x228] sm:$0xff]  ;;  %521 = vmatprep.subr.mxu1 %v315_v28  ;;  %451 = vmatpush2.msra.mxu0 %v186_v30  ;;  %v296_v60 = vld [vmem:[%s1626_s2 + $0x5b0] sm:$0xff] }
  0x3f   :  { %v311_v34 = vld [vmem:[%s1626_s2 + $0x628] sm:$0xff]  ;;  %v182_v36 = vld [vmem:[%s1626_s2 + $0x220] sm:$0xff]  ;;  %522 = vmatpush2.msra.mxu1 %v314_v31  ;;  %452 = vmatprep.subr.mxu0 %v183_v33  ;;  %v165_v61 = vld [vmem:[%s1626_s2 + $0x198] sm:$0xff] }
  0x40   :  { %v310_v37 = vld [vmem:[%s1626_s2 + $0x620] sm:$0xff]  ;;  %v179_v39 = vld [vmem:[%s1626_s2 + $0x208] sm:$0xff]  ;;  %523 = vmatprep.subr.mxu1 %v311_v34  ;;  %453 = vmatpush2.msra.mxu0 %v182_v36  ;;  %v293_v62 = vld [vmem:[%s1626_s2 + $0x598] sm:$0xff] }
  0x41   :  { %v307_v40 = vld [vmem:[%s1626_s2 + $0x608] sm:$0xff]  ;;  %v178_v42 = vld [vmem:[%s1626_s2 + $0x200] sm:$0xff]  ;;  %524 = vmatpush2.msra.mxu1 %v310_v37  ;;  %454 = vmatprep.subr.mxu0 %v179_v39  ;;  %v164_v63 = vld [vmem:[%s1626_s2 + $0x190] sm:$0xff] }
  0x42   :  { %v306_v44 = vld [vmem:[%s1626_s2 + $0x600] sm:$0xff]  ;;  %525 = vmatprep.subr.mxu1 %v307_v40  ;;  %455 = vmatpush2.msra.mxu0 %v178_v42  ;;  %v292_v0 = vld [vmem:[%s1626_s2 + $0x590] sm:$0xff]  ;;  %v161_v1 = vld [vmem:[%s1626_s2 + $0x178] sm:$0xff] }
  0x43   :  { %456 = vmatprep.mubr.f32.mxu0 %v111_v41  ;;  %526 = vmatpush2.msra.mxu1 %v306_v44  ;;  %v289_v2 = vld [vmem:[%s1626_s2 + $0x578] sm:$0xff]  ;;  %v160_v4 = vld [vmem:[%s1626_s2 + $0x170] sm:$0xff]  ;;  %v370_v29 = vld [vmem:[%s1630_s3] sm:$0xf] }
  0x44   :  { %457 = vmatmul.mubr.f32.vlgmr.msra.gmra.mxu0 %v110_v43  ;;  %527 = vmatprep.mubr.f32.mxu1 %v113_v45  ;;  %v288_v5 = vld [vmem:[%s1626_s2 + $0x570] sm:$0xff]  ;;  %v157_v6 = vld [vmem:[%s1626_s2 + $0x158] sm:$0xff]  ;;  %v379_v35 = vrot.slane %v370_v29, %v1086_v54 }
  0x45   :  { %534 = vmatprep.subr.mxu0 %v177_v46  ;;  %605 = vmatprep.subr.mxu1 %v305_v48  ;;  %v285_v7 = vld [vmem:[%s1626_s2 + $0x558] sm:$0xff]  ;;  %v156_v9 = vld [vmem:[%s1626_s2 + $0x150] sm:$0xff] }
  0x46   :  { %528 = vmatmul.mubr.f32.vlgmr.msra.gmra.mxu1 %v112_v47  ;;  %535 = vmatpush1.msra.mxu0 %v176_v49  ;;  %v284_v10 = vld [vmem:[%s1626_s2 + $0x550] sm:$0xff]  ;;  %v153_v11 = vld [vmem:[%s1626_s2 + $0x138] sm:$0xff] }
  0x47   :  { %606 = vmatpush1.msra.mxu1 %v304_v50  ;;  %536 = vmatprep.subr.mxu0 %v173_v51  ;;  %v281_v12 = vld [vmem:[%s1626_s2 + $0x538] sm:$0xff]  ;;  %v152_v13 = vld [vmem:[%s1626_s2 + $0x130] sm:$0xff] }
  0x48   :  { %607 = vmatprep.subr.mxu1 %v301_v52  ;;  %537 = vmatpush1.msra.mxu0 %v172_v53  ;;  %v280_v14 = vld [vmem:[%s1626_s2 + $0x530] sm:$0xff]  ;;  %v149_v15 = vld [vmem:[%s1626_s2 + $0x118] sm:$0xff] }
  0x49   :  { %608 = vmatpush1.msra.mxu1 %v300_v56  ;;  %538 = vmatprep.subr.mxu0 %v169_v57  ;;  %v277_v16 = vld [vmem:[%s1626_s2 + $0x518] sm:$0xff]  ;;  %v148_v17 = vld [vmem:[%s1626_s2 + $0x110] sm:$0xff] }
  0x4a   :  { %609 = vmatprep.subr.mxu1 %v297_v58  ;;  %539 = vmatpush1.msra.mxu0 %v168_v59  ;;  %v276_v18 = vld [vmem:[%s1626_s2 + $0x510] sm:$0xff]  ;;  %v145_v19 = vld [vmem:[%s1626_s2 + $0xf8] sm:$0xff] }
  0x4b   :  { %610 = vmatpush1.msra.mxu1 %v296_v60  ;;  %540 = vmatprep.subr.mxu0 %v165_v61  ;;  %v273_v20 = vld [vmem:[%s1626_s2 + $0x4f8] sm:$0xff]  ;;  %v144_v21 = vld [vmem:[%s1626_s2 + $0xf0] sm:$0xff] }
  0x4c   :  { %611 = vmatprep.subr.mxu1 %v293_v62  ;;  %541 = vmatpush1.msra.mxu0 %v164_v63  ;;  %v272_v22 = vld [vmem:[%s1626_s2 + $0x4f0] sm:$0xff]  ;;  %v141_v23 = vld [vmem:[%s1626_s2 + $0xd8] sm:$0xff] }
  0x4d   :  { %612 = vmatpush1.msra.mxu1 %v292_v0  ;;  %542 = vmatprep.subr.mxu0 %v161_v1  ;;  %v269_v24 = vld [vmem:[%s1626_s2 + $0x4d8] sm:$0xff]  ;;  %v140_v25 = vld [vmem:[%s1626_s2 + $0xd0] sm:$0xff] }
  0x4e   :  { %613 = vmatprep.subr.mxu1 %v289_v2  ;;  %543 = vmatpush1.msra.mxu0 %v160_v4  ;;  %v268_v26 = vld [vmem:[%s1626_s2 + $0x4d0] sm:$0xff]  ;;  %v137_v27 = vld [vmem:[%s1626_s2 + $0xb8] sm:$0xff] }
  0x4f   :  { %614 = vmatpush1.msra.mxu1 %v288_v5  ;;  %544 = vmatprep.subr.mxu0 %v157_v6  ;;  %v265_v28 = vld [vmem:[%s1626_s2 + $0x4b8] sm:$0xff]  ;;  %v136_v30 = vld [vmem:[%s1626_s2 + $0xb0] sm:$0xff] }
  0x50   :  { %615 = vmatprep.subr.mxu1 %v285_v7  ;;  %545 = vmatpush1.msra.mxu0 %v156_v9  ;;  %v264_v31 = vld [vmem:[%s1626_s2 + $0x4b0] sm:$0xff]  ;;  %v133_v33 = vld [vmem:[%s1626_s2 + $0x98] sm:$0xff] }
  0x51   :  { %616 = vmatpush1.msra.mxu1 %v284_v10  ;;  %546 = vmatprep.subr.mxu0 %v153_v11  ;;  %v261_v34 = vld [vmem:[%s1626_s2 + $0x498] sm:$0xff]  ;;  %v132_v36 = vld [vmem:[%s1626_s2 + $0x90] sm:$0xff] }
  0x52   :  { %617 = vmatprep.subr.mxu1 %v281_v12  ;;  %547 = vmatpush1.msra.mxu0 %v152_v13  ;;  %v260_v37 = vld [vmem:[%s1626_s2 + $0x490] sm:$0xff]  ;;  %v129_v39 = vld [vmem:[%s1626_s2 + $0x78] sm:$0xff] }
  0x53   :  { %618 = vmatpush1.msra.mxu1 %v280_v14  ;;  %548 = vmatprep.subr.mxu0 %v149_v15  ;;  %v257_v40 = vld [vmem:[%s1626_s2 + $0x478] sm:$0xff]  ;;  %v128_v42 = vld [vmem:[%s1626_s2 + $0x70] sm:$0xff] }
  0x54   :  { %619 = vmatprep.subr.mxu1 %v277_v16  ;;  %549 = vmatpush1.msra.mxu0 %v148_v17  ;;  %v256_v44 = vld [vmem:[%s1626_s2 + $0x470] sm:$0xff]  ;;  %v125_v46 = vld [vmem:[%s1626_s2 + $0x58] sm:$0xff] }
  0x55   :  { %620 = vmatpush1.msra.mxu1 %v276_v18  ;;  %550 = vmatprep.subr.mxu0 %v145_v19  ;;  %v253_v48 = vld [vmem:[%s1626_s2 + $0x458] sm:$0xff]  ;;  %v124_v49 = vld [vmem:[%s1626_s2 + $0x50] sm:$0xff] }
  0x56   :  { %621 = vmatprep.subr.mxu1 %v273_v20  ;;  %551 = vmatpush1.msra.mxu0 %v144_v21  ;;  %v252_v50 = vld [vmem:[%s1626_s2 + $0x450] sm:$0xff]  ;;  %v121_v51 = vld [vmem:[%s1626_s2 + $0x38] sm:$0xff] }
  0x57   :  { %622 = vmatpush1.msra.mxu1 %v272_v22  ;;  %552 = vmatprep.subr.mxu0 %v141_v23  ;;  %v249_v52 = vld [vmem:[%s1626_s2 + $0x438] sm:$0xff]  ;;  %v120_v53 = vld [vmem:[%s1626_s2 + $0x30] sm:$0xff] }
  0x58   :  { %623 = vmatprep.subr.mxu1 %v269_v24  ;;  %553 = vmatpush1.msra.mxu0 %v140_v25  ;;  %v248_v56 = vld [vmem:[%s1626_s2 + $0x430] sm:$0xff]  ;;  %v117_v57 = vld [vmem:[%s1626_s2 + $0x18] sm:$0xff] }
  0x59   :  { %624 = vmatpush1.msra.mxu1 %v268_v26  ;;  %554 = vmatprep.subr.mxu0 %v137_v27  ;;  %v245_v58 = vld [vmem:[%s1626_s2 + $0x418] sm:$0xff]  ;;  %v116_v59 = vld [vmem:[%s1626_s2 + $0x10] sm:$0xff] }
  0x5a   :  { %625 = vmatprep.subr.mxu1 %v265_v28  ;;  %555 = vmatpush1.msra.mxu0 %v136_v30  ;;  %v244_v60 = vld [vmem:[%s1626_s2 + $0x410] sm:$0xff]  ;;  %v241_v61 = vld [vmem:[%s1626_s2 + $0x3f8] sm:$0xff] }
  0x5b   :  { %626 = vmatpush1.msra.mxu1 %v264_v31  ;;  %556 = vmatprep.subr.mxu0 %v133_v33  ;;  %v369_v62 = vld [vmem:[%s1626_s2 + $0x7f8] sm:$0xff]  ;;  %v240_v63 = vld [vmem:[%s1626_s2 + $0x3f0] sm:$0xff] }
  0x5c   :  { %627 = vmatprep.subr.mxu1 %v261_v34  ;;  %557 = vmatpush1.msra.mxu0 %v132_v36  ;;  %v368_v0 = vld [vmem:[%s1626_s2 + $0x7f0] sm:$0xff]  ;;  %v237_v1 = vld [vmem:[%s1626_s2 + $0x3d8] sm:$0xff] }
  0x5d   :  { %628 = vmatpush1.msra.mxu1 %v260_v37  ;;  %558 = vmatprep.subr.mxu0 %v129_v39  ;;  %v365_v2 = vld [vmem:[%s1626_s2 + $0x7d8] sm:$0xff]  ;;  %v236_v4 = vld [vmem:[%s1626_s2 + $0x3d0] sm:$0xff] }
  0x5e   :  { %629 = vmatprep.subr.mxu1 %v257_v40  ;;  %559 = vmatpush1.msra.mxu0 %v128_v42  ;;  %v364_v5 = vld [vmem:[%s1626_s2 + $0x7d0] sm:$0xff]  ;;  %v233_v6 = vld [vmem:[%s1626_s2 + $0x3b8] sm:$0xff] }
  0x5f   :  { %630 = vmatpush1.msra.mxu1 %v256_v44  ;;  %560 = vmatprep.subr.mxu0 %v125_v46  ;;  %v361_v7 = vld [vmem:[%s1626_s2 + $0x7b8] sm:$0xff]  ;;  %v232_v9 = vld [vmem:[%s1626_s2 + $0x3b0] sm:$0xff] }
  0x60   :  { %631 = vmatprep.subr.mxu1 %v253_v48  ;;  %561 = vmatpush1.msra.mxu0 %v124_v49  ;;  %v360_v10 = vld [vmem:[%s1626_s2 + $0x7b0] sm:$0xff]  ;;  %v229_v11 = vld [vmem:[%s1626_s2 + $0x398] sm:$0xff] }
  0x61   :  { %632 = vmatpush1.msra.mxu1 %v252_v50  ;;  %562 = vmatprep.subr.mxu0 %v121_v51  ;;  %v357_v12 = vld [vmem:[%s1626_s2 + $0x798] sm:$0xff]  ;;  %v228_v13 = vld [vmem:[%s1626_s2 + $0x390] sm:$0xff] }
  0x62   :  { %633 = vmatprep.subr.mxu1 %v249_v52  ;;  %563 = vmatpush1.msra.mxu0 %v120_v53  ;;  %v356_v14 = vld [vmem:[%s1626_s2 + $0x790] sm:$0xff]  ;;  %v225_v15 = vld [vmem:[%s1626_s2 + $0x378] sm:$0xff] }
  0x63   :  { %634 = vmatpush1.msra.mxu1 %v248_v56  ;;  %564 = vmatprep.subr.mxu0 %v117_v57  ;;  %v353_v16 = vld [vmem:[%s1626_s2 + $0x778] sm:$0xff]  ;;  %v224_v17 = vld [vmem:[%s1626_s2 + $0x370] sm:$0xff] }
  0x64   :  { %635 = vmatprep.subr.mxu1 %v245_v58  ;;  %565 = vmatpush1.msra.mxu0 %v116_v59  ;;  %v352_v18 = vld [vmem:[%s1626_s2 + $0x770] sm:$0xff]  ;;  %v221_v19 = vld [vmem:[%s1626_s2 + $0x358] sm:$0xff] }
  0x65   :  { %636 = vmatpush1.msra.mxu1 %v244_v60  ;;  %566 = vmatprep.subr.mxu0 %v241_v61  ;;  %v349_v20 = vld [vmem:[%s1626_s2 + $0x758] sm:$0xff]  ;;  %v220_v21 = vld [vmem:[%s1626_s2 + $0x350] sm:$0xff] }
  0x66   :  { %637 = vmatprep.subr.mxu1 %v369_v62  ;;  %567 = vmatpush2.msra.mxu0 %v240_v63  ;;  %v348_v22 = vld [vmem:[%s1626_s2 + $0x750] sm:$0xff]  ;;  %v217_v23 = vld [vmem:[%s1626_s2 + $0x338] sm:$0xff] }
  0x67   :  { %638 = vmatpush2.msra.mxu1 %v368_v0  ;;  %568 = vmatprep.subr.mxu0 %v237_v1  ;;  %v345_v24 = vld [vmem:[%s1626_s2 + $0x738] sm:$0xff]  ;;  %v216_v25 = vld [vmem:[%s1626_s2 + $0x330] sm:$0xff] }
  0x68   :  { %639 = vmatprep.subr.mxu1 %v365_v2  ;;  %569 = vmatpush2.msra.mxu0 %v236_v4  ;;  %v344_v26 = vld [vmem:[%s1626_s2 + $0x730] sm:$0xff]  ;;  %v213_v27 = vld [vmem:[%s1626_s2 + $0x318] sm:$0xff] }
  0x69   :  { %640 = vmatpush2.msra.mxu1 %v364_v5  ;;  %570 = vmatprep.subr.mxu0 %v233_v6  ;;  %v341_v28 = vld [vmem:[%s1626_s2 + $0x718] sm:$0xff]  ;;  %v212_v30 = vld [vmem:[%s1626_s2 + $0x310] sm:$0xff] }
  0x6a   :  { %641 = vmatprep.subr.mxu1 %v361_v7  ;;  %571 = vmatpush2.msra.mxu0 %v232_v9  ;;  %v340_v31 = vld [vmem:[%s1626_s2 + $0x710] sm:$0xff]  ;;  %v209_v33 = vld [vmem:[%s1626_s2 + $0x2f8] sm:$0xff] }
  0x6b   :  { %642 = vmatpush2.msra.mxu1 %v360_v10  ;;  %572 = vmatprep.subr.mxu0 %v229_v11  ;;  %v337_v34 = vld [vmem:[%s1626_s2 + $0x6f8] sm:$0xff]  ;;  %v208_v36 = vld [vmem:[%s1626_s2 + $0x2f0] sm:$0xff]  ;;  %v11_v11 = vstv %s1629_s5 }
  0x6c   :  { %643 = vmatprep.subr.mxu1 %v357_v12  ;;  %573 = vmatpush2.msra.mxu0 %v228_v13  ;;  %v336_v37 = vld [vmem:[%s1626_s2 + $0x6f0] sm:$0xff]  ;;  %v205_v39 = vld [vmem:[%s1626_s2 + $0x2d8] sm:$0xff]  ;;  %12 = vst [vmem:[#allocation2] sm:$0x1] %v11_v11  ;;  %v375_v12 = vrot.slane %v370_v29, %v1089_v55 }
  0x6d   :  { %644 = vmatpush2.msra.mxu1 %v356_v14  ;;  %574 = vmatprep.subr.mxu0 %v225_v15  ;;  %v333_v40 = vld [vmem:[%s1626_s2 + $0x6d8] sm:$0xff]  ;;  %v204_v42 = vld [vmem:[%s1626_s2 + $0x2d0] sm:$0xff]  ;;  %v680_v14 = vld [vmem:[%s1631_s4] sm:$0xf] }
  0x6e   :  { %645 = vmatprep.subr.mxu1 %v353_v16  ;;  %575 = vmatpush2.msra.mxu0 %v224_v17  ;;  %v332_v44 = vld [vmem:[%s1626_s2 + $0x6d0] sm:$0xff]  ;;  %v201_v46 = vld [vmem:[%s1626_s2 + $0x2b8] sm:$0xff]  ;;  %v685_v16 = vrot.slane %v680_v14, %v1089_v55  ;;  %v697_v55 = vrot.slane %v680_v14, %v1111_v3 }
  0x6f   :  { %646 = vmatpush2.msra.mxu1 %v352_v18  ;;  %576 = vmatprep.subr.mxu0 %v221_v19  ;;  %v329_v48 = vld [vmem:[%s1626_s2 + $0x6b8] sm:$0xff]  ;;  %v200_v49 = vld [vmem:[%s1626_s2 + $0x2b0] sm:$0xff]  ;;  %v689_v19 = vrot.slane %v680_v14, %v1086_v54 }
  0x70   :  { %647 = vmatprep.subr.mxu1 %v349_v20  ;;  %577 = vmatpush2.msra.mxu0 %v220_v21  ;;  %v328_v50 = vld [vmem:[%s1626_s2 + $0x6b0] sm:$0xff]  ;;  %v197_v51 = vld [vmem:[%s1626_s2 + $0x298] sm:$0xff]  ;;  %v383_v20 = vrot.slane %v370_v29, %v1122_v8  ;;  %v387_v21 = vrot.slane %v370_v29, %v1111_v3 }
  0x71   :  { %648 = vmatpush2.msra.mxu1 %v348_v22  ;;  %578 = vmatprep.subr.mxu0 %v217_v23  ;;  %v325_v52 = vld [vmem:[%s1626_s2 + $0x698] sm:$0xff]  ;;  %v196_v53 = vld [vmem:[%s1626_s2 + $0x290] sm:$0xff] }
  0x72   :  { %649 = vmatprep.subr.mxu1 %v345_v24  ;;  %579 = vmatpush2.msra.mxu0 %v216_v25  ;;  %v324_v56 = vld [vmem:[%s1626_s2 + $0x690] sm:$0xff]  ;;  %v193_v57 = vld [vmem:[%s1626_s2 + $0x278] sm:$0xff] }
  0x73   :  { %650 = vmatpush2.msra.mxu1 %v344_v26  ;;  %580 = vmatprep.subr.mxu0 %v213_v27  ;;  %v321_v58 = vld [vmem:[%s1626_s2 + $0x678] sm:$0xff]  ;;  %v192_v59 = vld [vmem:[%s1626_s2 + $0x270] sm:$0xff] }
  0x74   :  { %651 = vmatprep.subr.mxu1 %v341_v28  ;;  %581 = vmatpush2.msra.mxu0 %v212_v30  ;;  %v320_v60 = vld [vmem:[%s1626_s2 + $0x670] sm:$0xff]  ;;  %v189_v61 = vld [vmem:[%s1626_s2 + $0x258] sm:$0xff]  ;;  %v693_v30 = vrot.slane %v680_v14, %v1122_v8 }
  0x75   :  { %652 = vmatpush2.msra.mxu1 %v340_v31  ;;  %582 = vmatprep.subr.mxu0 %v209_v33  ;;  %v317_v62 = vld [vmem:[%s1626_s2 + $0x658] sm:$0xff]  ;;  %v188_v63 = vld [vmem:[%s1626_s2 + $0x250] sm:$0xff] }
  0x76   :  { %653 = vmatprep.subr.mxu1 %v337_v34  ;;  %583 = vmatpush2.msra.mxu0 %v208_v36  ;;  %v316_v0 = vld [vmem:[%s1626_s2 + $0x650] sm:$0xff]  ;;  %v185_v1 = vld [vmem:[%s1626_s2 + $0x238] sm:$0xff] }
  0x77   :  { %654 = vmatpush2.msra.mxu1 %v336_v37  ;;  %584 = vmatprep.subr.mxu0 %v205_v39  ;;  %v313_v2 = vld [vmem:[%s1626_s2 + $0x638] sm:$0xff]  ;;  %v184_v4 = vld [vmem:[%s1626_s2 + $0x230] sm:$0xff] }
  0x78   :  { %655 = vmatprep.subr.mxu1 %v333_v40  ;;  %585 = vmatpush2.msra.mxu0 %v204_v42  ;;  %v312_v5 = vld [vmem:[%s1626_s2 + $0x630] sm:$0xff]  ;;  %v181_v6 = vld [vmem:[%s1626_s2 + $0x218] sm:$0xff] }
  0x79   :  { %656 = vmatpush2.msra.mxu1 %v332_v44  ;;  %586 = vmatprep.subr.mxu0 %v201_v46  ;;  %v309_v7 = vld [vmem:[%s1626_s2 + $0x618] sm:$0xff]  ;;  %v180_v9 = vld [vmem:[%s1626_s2 + $0x210] sm:$0xff] }
  0x7a   :  { %657 = vmatprep.subr.mxu1 %v329_v48  ;;  %587 = vmatpush2.msra.mxu0 %v200_v49  ;;  %v308_v10 = vld [vmem:[%s1626_s2 + $0x610] sm:$0xff] }
  0x7b   :  { %658 = vmatpush2.msra.mxu1 %v328_v50  ;;  %588 = vmatprep.subr.mxu0 %v197_v51  ;;  %v730_v50 = vld [vmem:[#allocation2] ss:$0 sm:$0xff] }
  0x7c   :  { %659 = vmatprep.subr.mxu1 %v325_v52  ;;  %589 = vmatpush2.msra.mxu0 %v196_v53 }
  0x7d   :  { %660 = vmatpush2.msra.mxu1 %v324_v56  ;;  %590 = vmatprep.subr.mxu0 %v193_v57 }
  0x7e   :  { %661 = vmatprep.subr.mxu1 %v321_v58  ;;  %591 = vmatpush2.msra.mxu0 %v192_v59 }
  0x7f   :  { %662 = vmatpush2.msra.mxu1 %v320_v60  ;;  %592 = vmatprep.subr.mxu0 %v189_v61 }
  0x80   :  { %663 = vmatprep.subr.mxu1 %v317_v62  ;;  %593 = vmatpush2.msra.mxu0 %v188_v63 }
  0x81   :  { %664 = vmatpush2.msra.mxu1 %v316_v0  ;;  %594 = vmatprep.subr.mxu0 %v185_v1 }
  0x82   :  { %665 = vmatprep.subr.mxu1 %v313_v2  ;;  %595 = vmatpush2.msra.mxu0 %v184_v4 }
  0x83   :  { %666 = vmatpush2.msra.mxu1 %v312_v5  ;;  %596 = vmatprep.subr.mxu0 %v181_v6 }
  0x84   :  { %667 = vmatprep.subr.mxu1 %v309_v7  ;;  %597 = vmatpush2.msra.mxu0 %v180_v9 }
  0x85   :  { %598 = vmatprep.mubr.f32.mxu0 %v111_v41  ;;  %668 = vmatpush2.msra.mxu1 %v308_v10 }
  0x86   :  { %669 = vmatprep.mubr.f32.mxu1 %v113_v45  ;;  %599 = vmatmul.mubr.f32.vlgmr.msra.gmra.mxu0 %v110_v43 }
  0x87   :  { %670 = vmatmul.mubr.f32.vlgmr.msra.gmra.mxu1 %v112_v47 }
 0x104   :  { %v458_v41 = vpop.f32.mrf.mxu0 }
 0x105   :  { %v459_v43 = vadd.f32 %v458_v41, %v375_v12 }
 0x106   :  { %v529_v45 = vpop.f32.mrf.mxu1  ;;  %v460_v32 = vpop.f32.mrf.mxu0 }
 0x107   :  { %v461_v13 = vadd.f32 %v460_v32, %v379_v35  ;;  %v530_v47 = vadd.f32 %v529_v45, %v459_v43 }
 0x108   :  { %v531_v38 = vpop.f32.mrf.mxu1 }
 0x109   :  { %v532_v15 = vadd.f32 %v531_v38, %v461_v13  ;;  %v676_v17 = vmax.f32 %v530_v47, 0.0 }
 0x10b   :  { %v677_v18 = vmax.f32 %v532_v15, 0.0  ;;  %v702_v24 = vmul.f32 %v685_v16, %v676_v17 }
 0x10d   :  { %v703_v25 = vmul.f32 %v689_v19, %v677_v18  ;;  %v706_v54 = vsel %vm71_vm0, %v702_v24, 0.0 }
 0x10f   :  { %v707_v37 = vsel %vm71_vm0, %v703_v25, 0.0 }
 0x110   :  { %v708_v42 = vadd.f32 %v707_v37, %v706_v54 }
 0x146   :  { %v600_v22 = vpop.f32.mrf.mxu0 }
 0x147   :  { %v671_v23 = vpop.f32.mrf.mxu1  ;;  %v601_v26 = vadd.f32 %v600_v22, %v383_v20 }
 0x148   :  { %v602_v27 = vpop.f32.mrf.mxu0 }
 0x149   :  { %v672_v28 = vadd.f32 %v671_v23, %v601_v26  ;;  %v603_v31 = vadd.f32 %v602_v27, %v387_v21  ;;  %v673_v33 = vpop.f32.mrf.mxu1 }
 0x14b   :  { %v678_v34 = vmax.f32 %v672_v28, 0.0  ;;  %v674_v36 = vadd.f32 %v673_v33, %v603_v31 }
 0x14d   :  { %v704_v39 = vmul.f32 %v693_v30, %v678_v34  ;;  %v679_v40 = vmax.f32 %v674_v36, 0.0 }
 0x14f   :  { %v705_v44 = vmul.f32 %v697_v55, %v679_v40  ;;  %v709_v46 = vsel %vm71_vm0, %v704_v39, 0.0 }
 0x150   :  { %v710_v48 = vadd.f32 %v709_v46, %v708_v42 }
 0x151   :  { %v711_v49 = vsel %vm71_vm0, %v705_v44, 0.0 }
 0x152   :  { %v712_v8 = vadd.f32 %v711_v49, %v710_v48 }
 0x154   :  { %713 = vadd.xlane.f32.xlu0 %v712_v8 }
 0x1dd   :  { %v714_v51 = vpop.xlane.xlu0 %713 }
 0x1de   :  { %v722_v3 = vadd.f32 %v730_v50, %v714_v51 }
 0x1e0   :  { %v723_v52 = vmax.f32 %v722_v3, 0.0 }
 0x1e2   :  { %725 = vst.msk [vmem:[%s1632_s6] sm:$0x3] %vm724_vm1, %v723_v52 }

// kernel: doppler_forward.2
= control target key start
LH: loop header
LB: loop body
LE: loop exit
PB: predicated region body
PF: predicated region fallthrough
CT: control target
= control target key end

     0   :  { %7 = vsyncpa [#allocation3], 0  ;;  %s11190_s0 = inlined_call_operand.vmem [shape: f32[2,150528], index: 0, kind: input, shape index: {}]   ;;  %s11191_s1 = inlined_call_operand.hbm [shape: f32[150528,512], index: 1, kind: input, shape index: {}]   ;;  %s11192_s2 = inlined_call_operand.vmem [shape: f32[2,2,512], index: 2, kind: output, shape index: {}]  }
   0x1   :  { %9 = vsyncpa [#allocation3 + $0x1], 0  ;;  %s7542_s9 = smov 0   ;;  %s7544_s10 = smov 0  }
   0x2   :  { %s7546_s11 = smov 0   ;;  %s7548_s12 = smov 0  }
   0x3   :  { %s7550_s13 = smov 0   ;;  %s7552_s14 = smov 0  }
   0x4   :  { %s7554_s15 = smov 0   ;;  %s7556_s16 = smov 0  }
   0x5 LB: > { %s7316_s17 = sadd.s32 4294967295, %s7519_s16   ;;  %s24_s18 = sadd.s32 1, %s7511_s14  ;;  %s7519_s16 = sphi %s7556_s16, %s15_s16   ;;  %s7515_s15 = sphi %s7554_s15, %s11223_s15   ;;  %s7511_s14 = sphi %s7552_s14, %s11222_s14   ;;  %s7507_s13 = sphi %s7550_s13, %s11221_s13   ;;  %s7503_s12 = sphi %s7548_s12, %s11220_s12   ;;  %s7499_s11 = sphi %s7546_s11, %s11219_s11   ;;  %s7495_s10 = sphi %s7544_s10, %s11218_s10   ;;  %s7491_s9 = sphi %s7542_s9, %s11217_s9  }
   0x6   : > { %p25_p0 = scmp.ge.s32.totalorder %s24_s18, 12  ;;  %s27_s19 = sadd.s32 1, %s7515_s15 }
   0x7   : > { %s61_s20 = smul.u32 12, %s7515_s15  ;;  %s68_s21 = sadd.s32 1, %s7499_s11 }
   0x8   : > { %s11225_s18 = smov (%p25_p0, %s24_s18), 0  ;;  %s11227_s19 = smov (!%p25_p0, %s27_s19), %s7515_s15 }
   0x9   : > { %s62_s22 = sadd.s32 %s7511_s14, %s61_s20  ;;  %p75_p1 = scmp.ne.s32.totalorder %s7499_s11, %s7495_s10 }
   0xa   : > { %p29_p2 = scmp.ge.s32.totalorder %s11227_s19, 2  ;;  %p76_p3 = scmp.eq.s32.totalorder %s7519_s16, 0 }
   0xb   : > { %p81_p4 = scmp.ne.s32.totalorder %s7495_s10, %s7491_s9  ;;  %p82_p5 = scmp.eq.s32.totalorder %s7316_s17, 0 }
   0xc   : > { %s11229_s19 = smov (%p29_p2, %s11227_s19), 0  ;;  %p77_p6 = por %p76_p3, %p75_p1 }
   0xd   : > { %p7595_p7 = por %p82_p5, %p81_p4  ;;  %s63_s24 = smul.u32 12, %s11229_s19 }
   0xe   : > { %p7342_p8 = scmp.lt.s32.totalorder %s7519_s16, 24  ;;  %s144_s25 = sand.u32 1, %s7499_s11  }
   0xf   : > { %s64_s26 = sadd.s32 %s63_s24, %s11225_s18  ;;  %s7334_s28 = smul.u32 25088, %s144_s25 }
  0x10   : > { %s65_s27 = ssub.s32 %s62_s22, %s64_s26  ;;  %s7333_s29 = smul.u32 401408, %s62_s22 }
  0x11   : > { %p66_p9 = scmp.eq.s32.totalorder %s65_s27, 0  ;;  %p7603_p10 = pnand %p7342_p8, %p77_p6 }
  0x12   : > { %s157_s6 = scalar_lea.hbm %s11191_s1, %s7333_s29  ;;  %s148_s7 = scalar_lea.vmem [#allocation2], %s7334_s28 }
  0x13   : > { %s7608_s3 = scalar_select %p66_p9, %s7499_s11, %s68_s21  }
  0x14   : > { %s158_s8 = sshll.u32 %s148_s7, 4  ;;  %s145_s9 = scalar_lea.sflag [#allocation3], %s144_s25  ;;  %s159_s8 = int_to_ptr.vmem [resolvable:$true] %s158_s8 }
  0x15   : > { %p7427_p11 = pneg %p7603_p10  ;;  %s7438_s17 = scalar_lea.vmem %s159_s8, 401408 }
  0x16   : > { %p7439_p12 = scmp.ne.s32.totalorder %s159_s8, %s7438_s17  ;;  %s7521_s20 = smov [#allocation2]  }
  0x17   : > { %s7443_s22 = sshll.u32 %s7521_s20, 4  ;;  %s7444_s22 = int_to_ptr.vmem [resolvable:$false] %s7443_s22 }
  0x18   : > { %p7441_p13 = pnand %p7439_p12, %p7427_p11  ;;  %s7445_s24 = scalar_lea.vmem %s7444_s22, 802816 }
  0x19   : > { %p7446_p1 = scmp.lt.s32.totalorder %s159_s8, %s7444_s22  ;;  %p7447_p2 = scmp.lt.s32.totalorder %s7445_s24, %s7438_s17 }
  0x1a   : > { %p7442_p0 = pneg %p7441_p13 }
  0x1b   : > { %p7448_p3 = por %p7447_p2, %p7446_p1 }
  0x1d   : > { %p7449_p4 = pnand %p7448_p3, %p7442_p0 }
  0x1f   : > { %7452 = shalt.err (!%p7449_p4)
}
  0x20   : > { %s7522_s21 = smov 512   ;;  %s7523_s25 = smov 32  }
  0x21   : > { %7341 = dma.hbm_to_vmem [thread:$0]  (!%p7603_p10), %s157_s6, 401408, %s159_s8, %s145_s9, %s7522_s21, %s7522_s21, %s7523_s25  }
  0x22   : > { %p7322_p5 = scmp.ge.s32.totalorder %s7519_s16, 1  ;;  %p166_p6 = scmp.lt.s32.totalorder %s7519_s16, 25 }
  0x24   : > { %p167_p8 = pnand %p7322_p5, %p166_p6 }
  0x26   : > { %170 = sbr.rel (%p167_p8) target bundleno = 1886 (0x75e), region = 28 }
  0x2b   : > { %s172_s26 = sand.u32 1, %s7495_s10  }
  0x2c   : > { %s7335_s27 = smul.u32 25088, %s172_s26  ;;  %s173_s28 = scalar_lea.sflag [#allocation3], %s172_s26 }
  0x2e   : > { %s7620_s29 = scalar_lea.vmem [#allocation2], %s7335_s27 }
  0x2f   : > { %7486 = dma.done.wait (%p7595_p7), %s173_s28, 401408  }
  0x30   : > { %7488 = vsyncadd (%p7595_p7), %s173_s28, 4294565888  ;;  %s204_s30 = smul.u32 12, %s7507_s13  ;;  %p217_p9 = scmp.lt.s32.totalorder %s7507_s13, 1 }
  0x31   : > { %p7326_p7 = scmp.ne.s32.totalorder %s7503_s12, 0 }
  0x32   : > { %s205_s4 = sadd.s32 %s7503_s12, %s204_s30  ;;  %s11231_s13 = smov (!%p217_p9, %s7507_s13), 1 }
  0x33   : > { %s206_s5 = smul.u32 49, %s205_s4  ;;  %s7332_s6 = sshll.u32 %s11231_s13, 3 }
  0x34   : > { %s7633_s9 = scalar_lea.vmem %s11192_s2, %s7332_s6 }
  0x35   : > { %p207_p10 = scmp.lt.s32.totalorder %s206_s5, 1175  ;;  %225 = sbr.rel (%p7326_p7) target bundleno = 60 (0x3c), region = 36 }
  0x37   : > { %s11233_s5 = smov (!%p207_p10, %s206_s5), 1175 }
  0x38   : > { %s7323_s17 = sshll.u32 %s11233_s5, 1 }
  0x39   : > { %s7638_s22 = scalar_lea.vmem %s11190_s0, %s7323_s17 }
  0x3a   : > { %v7524_v0 = vmov 0.0  }
  0x3b   : > { %226 = vst [vmem:[%s7633_s9] sm:$0xff] %v7524_v0 }
  0x3c PF: > { %v302_v1 = vld [vmem:[%s7620_s29 + $0x1e8] sm:$0xff]  ;;  %v301_v3 = vld [vmem:[%s7620_s29 + $0x1e0] sm:$0xff] }
  0x3d   : > { %v430_v2 = vld [vmem:[%s7620_s29 + $0x5e8] sm:$0xff]  ;;  %3650 = vmatprep.subr.mxu0 %v302_v1  ;;  %v429_v4 = vld [vmem:[%s7620_s29 + $0x5e0] sm:$0xff] }
  0x3e   : > { %3721 = vmatprep.subr.mxu1 %v430_v2  ;;  %v298_v5 = vld [vmem:[%s7620_s29 + $0x1c8] sm:$0xff]  ;;  %3651 = vmatpush1.msra.mxu0 %v301_v3  ;;  %v297_v7 = vld [vmem:[%s7620_s29 + $0x1c0] sm:$0xff] }
  0x3f   : > { %v426_v6 = vld [vmem:[%s7620_s29 + $0x5c8] sm:$0xff]  ;;  %3722 = vmatpush1.msra.mxu1 %v429_v4  ;;  %v425_v8 = vld [vmem:[%s7620_s29 + $0x5c0] sm:$0xff]  ;;  %3652 = vmatprep.subr.mxu0 %v298_v5 }
  0x40   : > { %v294_v9 = vld [vmem:[%s7620_s29 + $0x1a8] sm:$0xff]  ;;  %3723 = vmatprep.subr.mxu1 %v426_v6  ;;  %v293_v11 = vld [vmem:[%s7620_s29 + $0x1a0] sm:$0xff]  ;;  %3653 = vmatpush1.msra.mxu0 %v297_v7 }
  0x41   : > { %v422_v10 = vld [vmem:[%s7620_s29 + $0x5a8] sm:$0xff]  ;;  %v421_v12 = vld [vmem:[%s7620_s29 + $0x5a0] sm:$0xff]  ;;  %3724 = vmatpush1.msra.mxu1 %v425_v8  ;;  %3654 = vmatprep.subr.mxu0 %v294_v9 }
  0x42   : > { %v290_v13 = vld [vmem:[%s7620_s29 + $0x188] sm:$0xff]  ;;  %3725 = vmatprep.subr.mxu1 %v422_v10  ;;  %v289_v15 = vld [vmem:[%s7620_s29 + $0x180] sm:$0xff]  ;;  %3655 = vmatpush1.msra.mxu0 %v293_v11 }
  0x43   : > { %v418_v14 = vld [vmem:[%s7620_s29 + $0x588] sm:$0xff]  ;;  %v417_v16 = vld [vmem:[%s7620_s29 + $0x580] sm:$0xff]  ;;  %3726 = vmatpush1.msra.mxu1 %v421_v12  ;;  %3656 = vmatprep.subr.mxu0 %v290_v13 }
  0x44   : > { %v286_v17 = vld [vmem:[%s7620_s29 + $0x168] sm:$0xff]  ;;  %3727 = vmatprep.subr.mxu1 %v418_v14  ;;  %v285_v19 = vld [vmem:[%s7620_s29 + $0x160] sm:$0xff]  ;;  %3657 = vmatpush1.msra.mxu0 %v289_v15 }
  0x45   : > { %v414_v18 = vld [vmem:[%s7620_s29 + $0x568] sm:$0xff]  ;;  %v413_v20 = vld [vmem:[%s7620_s29 + $0x560] sm:$0xff]  ;;  %3728 = vmatpush1.msra.mxu1 %v417_v16  ;;  %3658 = vmatprep.subr.mxu0 %v286_v17 }
  0x46   : > { %v282_v21 = vld [vmem:[%s7620_s29 + $0x148] sm:$0xff]  ;;  %3729 = vmatprep.subr.mxu1 %v414_v18  ;;  %v281_v23 = vld [vmem:[%s7620_s29 + $0x140] sm:$0xff]  ;;  %3659 = vmatpush1.msra.mxu0 %v285_v19 }
  0x47   : > { %v410_v22 = vld [vmem:[%s7620_s29 + $0x548] sm:$0xff]  ;;  %v409_v24 = vld [vmem:[%s7620_s29 + $0x540] sm:$0xff]  ;;  %3730 = vmatpush1.msra.mxu1 %v413_v20  ;;  %3660 = vmatprep.subr.mxu0 %v282_v21 }
  0x48   : > { %v278_v25 = vld [vmem:[%s7620_s29 + $0x128] sm:$0xff]  ;;  %3731 = vmatprep.subr.mxu1 %v410_v22  ;;  %v277_v27 = vld [vmem:[%s7620_s29 + $0x120] sm:$0xff]  ;;  %3661 = vmatpush1.msra.mxu0 %v281_v23 }
  0x49   : > { %v406_v26 = vld [vmem:[%s7620_s29 + $0x528] sm:$0xff]  ;;  %v405_v28 = vld [vmem:[%s7620_s29 + $0x520] sm:$0xff]  ;;  %3732 = vmatpush1.msra.mxu1 %v409_v24  ;;  %3662 = vmatprep.subr.mxu0 %v278_v25 }
  0x4a   : > { %v274_v29 = vld [vmem:[%s7620_s29 + $0x108] sm:$0xff]  ;;  %3733 = vmatprep.subr.mxu1 %v406_v26  ;;  %v273_v31 = vld [vmem:[%s7620_s29 + $0x100] sm:$0xff]  ;;  %3663 = vmatpush1.msra.mxu0 %v277_v27 }
  0x4b   : > { %v402_v30 = vld [vmem:[%s7620_s29 + $0x508] sm:$0xff]  ;;  %v401_v32 = vld [vmem:[%s7620_s29 + $0x500] sm:$0xff]  ;;  %3734 = vmatpush1.msra.mxu1 %v405_v28  ;;  %3664 = vmatprep.subr.mxu0 %v274_v29 }
  0x4c   : > { %v270_v33 = vld [vmem:[%s7620_s29 + $0xe8] sm:$0xff]  ;;  %3735 = vmatprep.subr.mxu1 %v402_v30  ;;  %v269_v35 = vld [vmem:[%s7620_s29 + $0xe0] sm:$0xff]  ;;  %3665 = vmatpush1.msra.mxu0 %v273_v31  ;;  %v7525_v31 = vmov 1983009808  }
  0x4d   : > { %v398_v34 = vld [vmem:[%s7620_s29 + $0x4e8] sm:$0xff]  ;;  %v397_v36 = vld [vmem:[%s7620_s29 + $0x4e0] sm:$0xff]  ;;  %3736 = vmatpush1.msra.mxu1 %v401_v32  ;;  %3666 = vmatprep.subr.mxu0 %v270_v33  ;;  %v3392_v32 = vunpack.c.l.s4 %v7525_v31  ;;  %v3394_v33 = vlaneseq }
  0x4e   : > { %v266_v37 = vld [vmem:[%s7620_s29 + $0xc8] sm:$0xff]  ;;  %3737 = vmatprep.subr.mxu1 %v398_v34  ;;  %v265_v39 = vld [vmem:[%s7620_s29 + $0xc0] sm:$0xff]  ;;  %3667 = vmatpush1.msra.mxu0 %v269_v35 }
  0x4f   : > { %v394_v38 = vld [vmem:[%s7620_s29 + $0x4c8] sm:$0xff]  ;;  %v393_v40 = vld [vmem:[%s7620_s29 + $0x4c0] sm:$0xff]  ;;  %3738 = vmatpush1.msra.mxu1 %v397_v36  ;;  %3668 = vmatprep.subr.mxu0 %v266_v37 }
  0x50   : > { %v262_v41 = vld [vmem:[%s7620_s29 + $0xa8] sm:$0xff]  ;;  %3739 = vmatprep.subr.mxu1 %v394_v38  ;;  %v261_v43 = vld [vmem:[%s7620_s29 + $0xa0] sm:$0xff]  ;;  %3669 = vmatpush1.msra.mxu0 %v265_v39 }
  0x51   : > { %v390_v42 = vld [vmem:[%s7620_s29 + $0x4a8] sm:$0xff]  ;;  %v389_v44 = vld [vmem:[%s7620_s29 + $0x4a0] sm:$0xff]  ;;  %3740 = vmatpush1.msra.mxu1 %v393_v40  ;;  %3670 = vmatprep.subr.mxu0 %v262_v41 }
  0x52   : > { %v258_v45 = vld [vmem:[%s7620_s29 + $0x88] sm:$0xff]  ;;  %3741 = vmatprep.subr.mxu1 %v390_v42  ;;  %v257_v47 = vld [vmem:[%s7620_s29 + $0x80] sm:$0xff]  ;;  %3671 = vmatpush1.msra.mxu0 %v261_v43  ;;  %v3393_v42 = vunpack.c.0.s8 %v3392_v32  ;;  %v3395_v43 = vshrl.u32 %v3394_v33, 7 }
  0x53   : > { %v386_v46 = vld [vmem:[%s7620_s29 + $0x488] sm:$0xff]  ;;  %v385_v48 = vld [vmem:[%s7620_s29 + $0x480] sm:$0xff]  ;;  %3742 = vmatpush1.msra.mxu1 %v389_v44  ;;  %3672 = vmatprep.subr.mxu0 %v258_v45 }
  0x54   : > { %v254_v49 = vld [vmem:[%s7620_s29 + $0x68] sm:$0xff]  ;;  %3743 = vmatprep.subr.mxu1 %v386_v46  ;;  %v253_v51 = vld [vmem:[%s7620_s29 + $0x60] sm:$0xff]  ;;  %3673 = vmatpush1.msra.mxu0 %v257_v47 }
  0x55   : > { %v382_v50 = vld [vmem:[%s7620_s29 + $0x468] sm:$0xff]  ;;  %v381_v52 = vld [vmem:[%s7620_s29 + $0x460] sm:$0xff]  ;;  %3744 = vmatpush1.msra.mxu1 %v385_v48  ;;  %3674 = vmatprep.subr.mxu0 %v254_v49 }
  0x56   : > { %v250_v53 = vld [vmem:[%s7620_s29 + $0x48] sm:$0xff]  ;;  %3745 = vmatprep.subr.mxu1 %v382_v50  ;;  %v249_v55 = vld [vmem:[%s7620_s29 + $0x40] sm:$0xff]  ;;  %3675 = vmatpush1.msra.mxu0 %v253_v51 }
  0x57   : > { %v378_v54 = vld [vmem:[%s7620_s29 + $0x448] sm:$0xff]  ;;  %v377_v56 = vld [vmem:[%s7620_s29 + $0x440] sm:$0xff]  ;;  %3746 = vmatpush1.msra.mxu1 %v381_v52  ;;  %3676 = vmatprep.subr.mxu0 %v250_v53  ;;  %v7753_v53 = vsub.s32 %v3393_v42, %v3395_v43 }
  0x58   : > { %v246_v57 = vld [vmem:[%s7620_s29 + $0x28] sm:$0xff]  ;;  %3747 = vmatprep.subr.mxu1 %v378_v54  ;;  %v245_v59 = vld [vmem:[%s7620_s29 + $0x20] sm:$0xff]  ;;  %3677 = vmatpush1.msra.mxu0 %v249_v55 }
  0x59   : > { %v374_v58 = vld [vmem:[%s7620_s29 + $0x428] sm:$0xff]  ;;  %v373_v60 = vld [vmem:[%s7620_s29 + $0x420] sm:$0xff]  ;;  %3748 = vmatpush1.msra.mxu1 %v377_v56  ;;  %3678 = vmatprep.subr.mxu0 %v246_v57  ;;  %11197 = vst [vmem:[#allocation5_spill] sm:$0xff] %v7753_v53 }
  0x5a   : > { %v242_v61 = vld [vmem:[%s7620_s29 + $0x8] sm:$0xff]  ;;  %3749 = vmatprep.subr.mxu1 %v374_v58  ;;  %v241_v63 = vld [vmem:[%s7620_s29] sm:$0xff]  ;;  %3679 = vmatpush1.msra.mxu0 %v245_v59 }
  0x5b   : > { %v370_v62 = vld [vmem:[%s7620_s29 + $0x408] sm:$0xff]  ;;  %v369_v0 = vld [vmem:[%s7620_s29 + $0x400] sm:$0xff]  ;;  %3750 = vmatpush1.msra.mxu1 %v373_v60  ;;  %3680 = vmatprep.subr.mxu0 %v242_v61 }
  0x5c   : > { %v366_v1 = vld [vmem:[%s7620_s29 + $0x3e8] sm:$0xff]  ;;  %3751 = vmatprep.subr.mxu1 %v370_v62  ;;  %v365_v3 = vld [vmem:[%s7620_s29 + $0x3e0] sm:$0xff]  ;;  %3681 = vmatpush1.msra.mxu0 %v241_v63 }
  0x5d   : > { %v494_v2 = vld [vmem:[%s7620_s29 + $0x7e8] sm:$0xff]  ;;  %v493_v4 = vld [vmem:[%s7620_s29 + $0x7e0] sm:$0xff]  ;;  %3752 = vmatpush1.msra.mxu1 %v369_v0  ;;  %3682 = vmatprep.subr.mxu0 %v366_v1 }
  0x5e   : > { %v362_v5 = vld [vmem:[%s7620_s29 + $0x3c8] sm:$0xff]  ;;  %3753 = vmatprep.subr.mxu1 %v494_v2  ;;  %v361_v7 = vld [vmem:[%s7620_s29 + $0x3c0] sm:$0xff]  ;;  %3683 = vmatpush2.msra.mxu0 %v365_v3 }
  0x5f   : > { %v490_v6 = vld [vmem:[%s7620_s29 + $0x7c8] sm:$0xff]  ;;  %v489_v8 = vld [vmem:[%s7620_s29 + $0x7c0] sm:$0xff]  ;;  %3754 = vmatpush2.msra.mxu1 %v493_v4  ;;  %3684 = vmatprep.subr.mxu0 %v362_v5 }
  0x60   : > { %v358_v9 = vld [vmem:[%s7620_s29 + $0x3a8] sm:$0xff]  ;;  %3755 = vmatprep.subr.mxu1 %v490_v6  ;;  %v357_v11 = vld [vmem:[%s7620_s29 + $0x3a0] sm:$0xff]  ;;  %3685 = vmatpush2.msra.mxu0 %v361_v7 }
  0x61   : > { %v486_v10 = vld [vmem:[%s7620_s29 + $0x7a8] sm:$0xff]  ;;  %v485_v12 = vld [vmem:[%s7620_s29 + $0x7a0] sm:$0xff]  ;;  %3756 = vmatpush2.msra.mxu1 %v489_v8  ;;  %3686 = vmatprep.subr.mxu0 %v358_v9 }
  0x62   : > { %v354_v13 = vld [vmem:[%s7620_s29 + $0x388] sm:$0xff]  ;;  %3757 = vmatprep.subr.mxu1 %v486_v10  ;;  %v353_v15 = vld [vmem:[%s7620_s29 + $0x380] sm:$0xff]  ;;  %3687 = vmatpush2.msra.mxu0 %v357_v11 }
  0x63   : > { %v482_v14 = vld [vmem:[%s7620_s29 + $0x788] sm:$0xff]  ;;  %v481_v16 = vld [vmem:[%s7620_s29 + $0x780] sm:$0xff]  ;;  %3758 = vmatpush2.msra.mxu1 %v485_v12  ;;  %3688 = vmatprep.subr.mxu0 %v354_v13 }
  0x64   : > { %v350_v17 = vld [vmem:[%s7620_s29 + $0x368] sm:$0xff]  ;;  %3759 = vmatprep.subr.mxu1 %v482_v14  ;;  %v349_v19 = vld [vmem:[%s7620_s29 + $0x360] sm:$0xff]  ;;  %3689 = vmatpush2.msra.mxu0 %v353_v15 }
  0x65   : > { %v478_v18 = vld [vmem:[%s7620_s29 + $0x768] sm:$0xff]  ;;  %v477_v20 = vld [vmem:[%s7620_s29 + $0x760] sm:$0xff]  ;;  %3760 = vmatpush2.msra.mxu1 %v481_v16  ;;  %3690 = vmatprep.subr.mxu0 %v350_v17 }
  0x66   : > { %v346_v21 = vld [vmem:[%s7620_s29 + $0x348] sm:$0xff]  ;;  %3761 = vmatprep.subr.mxu1 %v478_v18  ;;  %v345_v23 = vld [vmem:[%s7620_s29 + $0x340] sm:$0xff]  ;;  %3691 = vmatpush2.msra.mxu0 %v349_v19 }
  0x67   : > { %v474_v22 = vld [vmem:[%s7620_s29 + $0x748] sm:$0xff]  ;;  %v473_v24 = vld [vmem:[%s7620_s29 + $0x740] sm:$0xff]  ;;  %3762 = vmatpush2.msra.mxu1 %v477_v20  ;;  %3692 = vmatprep.subr.mxu0 %v346_v21 }
  0x68   : > { %v342_v25 = vld [vmem:[%s7620_s29 + $0x328] sm:$0xff]  ;;  %3763 = vmatprep.subr.mxu1 %v474_v22  ;;  %v341_v27 = vld [vmem:[%s7620_s29 + $0x320] sm:$0xff]  ;;  %3693 = vmatpush2.msra.mxu0 %v345_v23 }
  0x69   : > { %v470_v26 = vld [vmem:[%s7620_s29 + $0x728] sm:$0xff]  ;;  %v469_v28 = vld [vmem:[%s7620_s29 + $0x720] sm:$0xff]  ;;  %3764 = vmatpush2.msra.mxu1 %v473_v24  ;;  %3694 = vmatprep.subr.mxu0 %v342_v25 }
  0x6a   : > { %v338_v29 = vld [vmem:[%s7620_s29 + $0x308] sm:$0xff]  ;;  %3765 = vmatprep.subr.mxu1 %v470_v26  ;;  %v337_v34 = vld [vmem:[%s7620_s29 + $0x300] sm:$0xff]  ;;  %3695 = vmatpush2.msra.mxu0 %v341_v27 }
  0x6b   : > { %v466_v30 = vld [vmem:[%s7620_s29 + $0x708] sm:$0xff]  ;;  %v465_v35 = vld [vmem:[%s7620_s29 + $0x700] sm:$0xff]  ;;  %3766 = vmatpush2.msra.mxu1 %v469_v28  ;;  %3696 = vmatprep.subr.mxu0 %v338_v29 }
  0x6c   : > { %v334_v36 = vld [vmem:[%s7620_s29 + $0x2e8] sm:$0xff]  ;;  %3767 = vmatprep.subr.mxu1 %v466_v30  ;;  %v333_v38 = vld [vmem:[%s7620_s29 + $0x2e0] sm:$0xff]  ;;  %3697 = vmatpush2.msra.mxu0 %v337_v34 }
  0x6d   : > { %v462_v37 = vld [vmem:[%s7620_s29 + $0x6e8] sm:$0xff]  ;;  %v461_v39 = vld [vmem:[%s7620_s29 + $0x6e0] sm:$0xff]  ;;  %3768 = vmatpush2.msra.mxu1 %v465_v35  ;;  %3698 = vmatprep.subr.mxu0 %v334_v36 }
  0x6e   : > { %v330_v40 = vld [vmem:[%s7620_s29 + $0x2c8] sm:$0xff]  ;;  %3769 = vmatprep.subr.mxu1 %v462_v37  ;;  %v329_v44 = vld [vmem:[%s7620_s29 + $0x2c0] sm:$0xff]  ;;  %3699 = vmatpush2.msra.mxu0 %v333_v38 }
  0x6f   : > { %v458_v41 = vld [vmem:[%s7620_s29 + $0x6c8] sm:$0xff]  ;;  %v457_v45 = vld [vmem:[%s7620_s29 + $0x6c0] sm:$0xff]  ;;  %3770 = vmatpush2.msra.mxu1 %v461_v39  ;;  %3700 = vmatprep.subr.mxu0 %v330_v40 }
  0x70   : > { %v326_v46 = vld [vmem:[%s7620_s29 + $0x2a8] sm:$0xff]  ;;  %v228_v48 = vld [vmem:[%s7638_s22] sm:$0xff]  ;;  %3771 = vmatprep.subr.mxu1 %v458_v41  ;;  %3701 = vmatpush2.msra.mxu0 %v329_v44 }
  0x71   : > { %v454_v47 = vld [vmem:[%s7620_s29 + $0x6a8] sm:$0xff]  ;;  %v325_v49 = vld [vmem:[%s7620_s29 + $0x2a0] sm:$0xff]  ;;  %3772 = vmatpush2.msra.mxu1 %v457_v45  ;;  %3702 = vmatprep.subr.mxu0 %v326_v46  ;;  %v3390_v56 = vcombine.high %v228_v48, %v228_v48  ;;  %v7764_v63 = vrot.slane %v228_v48, %v7753_v53 }
  0x72   : > { %v453_v50 = vld [vmem:[%s7620_s29 + $0x6a0] sm:$0xff]  ;;  %v322_v51 = vld [vmem:[%s7620_s29 + $0x288] sm:$0xff]  ;;  %3773 = vmatprep.subr.mxu1 %v454_v47  ;;  %3703 = vmatpush2.msra.mxu0 %v325_v49 }
  0x73   : > { %v450_v52 = vld [vmem:[%s7620_s29 + $0x688] sm:$0xff]  ;;  %v321_v54 = vld [vmem:[%s7620_s29 + $0x280] sm:$0xff]  ;;  %3774 = vmatpush2.msra.mxu1 %v453_v50  ;;  %3704 = vmatprep.subr.mxu0 %v322_v51  ;;  %v7769_v2 = vrot.slane %v3390_v56, %v7753_v53  ;;  %v7779_v9 = vcombine.high %v7764_v63, %v7764_v63 }
  0x74   : > { %v449_v55 = vld [vmem:[%s7620_s29 + $0x680] sm:$0xff]  ;;  %v318_v57 = vld [vmem:[%s7620_s29 + $0x268] sm:$0xff]  ;;  %3775 = vmatprep.subr.mxu1 %v450_v52  ;;  %3705 = vmatpush2.msra.mxu0 %v321_v54 }
  0x75   : > { %v446_v58 = vld [vmem:[%s7620_s29 + $0x668] sm:$0xff]  ;;  %v317_v59 = vld [vmem:[%s7620_s29 + $0x260] sm:$0xff]  ;;  %3776 = vmatpush2.msra.mxu1 %v449_v55  ;;  %3706 = vmatprep.subr.mxu0 %v318_v57  ;;  %v7784_v11 = vcombine.high %v7769_v2, %v7769_v2 }
  0x76   : > { %v445_v60 = vld [vmem:[%s7620_s29 + $0x660] sm:$0xff]  ;;  %v314_v61 = vld [vmem:[%s7620_s29 + $0x248] sm:$0xff]  ;;  %3777 = vmatprep.subr.mxu1 %v446_v58  ;;  %3707 = vmatpush2.msra.mxu0 %v317_v59 }
  0x77   : > { %v442_v62 = vld [vmem:[%s7620_s29 + $0x648] sm:$0xff]  ;;  %v313_v0 = vld [vmem:[%s7620_s29 + $0x240] sm:$0xff]  ;;  %3778 = vmatpush2.msra.mxu1 %v445_v60  ;;  %3708 = vmatprep.subr.mxu0 %v314_v61 }
  0x78   : > { %v441_v1 = vld [vmem:[%s7620_s29 + $0x640] sm:$0xff]  ;;  %v310_v3 = vld [vmem:[%s7620_s29 + $0x228] sm:$0xff]  ;;  %3779 = vmatprep.subr.mxu1 %v442_v62  ;;  %3709 = vmatpush2.msra.mxu0 %v313_v0 }
  0x79   : > { %v438_v4 = vld [vmem:[%s7620_s29 + $0x628] sm:$0xff]  ;;  %v309_v5 = vld [vmem:[%s7620_s29 + $0x220] sm:$0xff]  ;;  %3780 = vmatpush2.msra.mxu1 %v441_v1  ;;  %3710 = vmatprep.subr.mxu0 %v310_v3 }
  0x7a   : > { %v437_v6 = vld [vmem:[%s7620_s29 + $0x620] sm:$0xff]  ;;  %v306_v7 = vld [vmem:[%s7620_s29 + $0x208] sm:$0xff]  ;;  %3781 = vmatprep.subr.mxu1 %v438_v4  ;;  %3711 = vmatpush2.msra.mxu0 %v309_v5 }
  0x7b   : > { %v434_v8 = vld [vmem:[%s7620_s29 + $0x608] sm:$0xff]  ;;  %v305_v10 = vld [vmem:[%s7620_s29 + $0x200] sm:$0xff]  ;;  %3782 = vmatpush2.msra.mxu1 %v437_v6  ;;  %3712 = vmatprep.subr.mxu0 %v306_v7 }
  0x7c   : > { %v433_v12 = vld [vmem:[%s7620_s29 + $0x600] sm:$0xff]  ;;  %3783 = vmatprep.subr.mxu1 %v434_v8  ;;  %3713 = vmatpush2.msra.mxu0 %v305_v10  ;;  %v558_v13 = vld [vmem:[%s7620_s29 + $0x9e8] sm:$0xff] }
  0x7d   : > { %3714 = vmatprep.mubr.f32.mxu0 %v7779_v9  ;;  %v686_v14 = vld [vmem:[%s7620_s29 + $0xde8] sm:$0xff]  ;;  %3784 = vmatpush2.msra.mxu1 %v433_v12  ;;  %v557_v15 = vld [vmem:[%s7620_s29 + $0x9e0] sm:$0xff] }
  0x7e   : > { %3785 = vmatprep.mubr.f32.mxu1 %v7784_v11  ;;  %v685_v16 = vld [vmem:[%s7620_s29 + $0xde0] sm:$0xff]  ;;  %3715 = vmatmul.mubr.f32.vlgmr.msra.gmra.mxu0 %v7764_v63  ;;  %v554_v17 = vld [vmem:[%s7620_s29 + $0x9c8] sm:$0xff] }
  0x7f   : > { %3786 = vmatmul.mubr.f32.vlgmr.msra.gmra.mxu1 %v7769_v2  ;;  %v682_v18 = vld [vmem:[%s7620_s29 + $0xdc8] sm:$0xff]  ;;  %3792 = vmatprep.subr.mxu0 %v558_v13  ;;  %v553_v19 = vld [vmem:[%s7620_s29 + $0x9c0] sm:$0xff] }
  0x80   : > { %3863 = vmatprep.subr.mxu1 %v686_v14  ;;  %v681_v20 = vld [vmem:[%s7620_s29 + $0xdc0] sm:$0xff]  ;;  %3793 = vmatpush1.msra.mxu0 %v557_v15  ;;  %v550_v21 = vld [vmem:[%s7620_s29 + $0x9a8] sm:$0xff] }
  0x81   : > { %3864 = vmatpush1.msra.mxu1 %v685_v16  ;;  %v678_v22 = vld [vmem:[%s7620_s29 + $0xda8] sm:$0xff]  ;;  %3794 = vmatprep.subr.mxu0 %v554_v17  ;;  %v549_v23 = vld [vmem:[%s7620_s29 + $0x9a0] sm:$0xff] }
  0x82   : > { %3865 = vmatprep.subr.mxu1 %v682_v18  ;;  %v677_v24 = vld [vmem:[%s7620_s29 + $0xda0] sm:$0xff]  ;;  %3795 = vmatpush1.msra.mxu0 %v553_v19  ;;  %v546_v25 = vld [vmem:[%s7620_s29 + $0x988] sm:$0xff] }
  0x83   : > { %3866 = vmatpush1.msra.mxu1 %v681_v20  ;;  %v674_v26 = vld [vmem:[%s7620_s29 + $0xd88] sm:$0xff]  ;;  %3796 = vmatprep.subr.mxu0 %v550_v21  ;;  %v545_v27 = vld [vmem:[%s7620_s29 + $0x980] sm:$0xff] }
  0x84   : > { %3867 = vmatprep.subr.mxu1 %v678_v22  ;;  %v673_v28 = vld [vmem:[%s7620_s29 + $0xd80] sm:$0xff]  ;;  %3797 = vmatpush1.msra.mxu0 %v549_v23  ;;  %v542_v29 = vld [vmem:[%s7620_s29 + $0x968] sm:$0xff] }
  0x85   : > { %3868 = vmatpush1.msra.mxu1 %v677_v24  ;;  %v670_v30 = vld [vmem:[%s7620_s29 + $0xd68] sm:$0xff]  ;;  %3798 = vmatprep.subr.mxu0 %v546_v25  ;;  %v541_v31 = vld [vmem:[%s7620_s29 + $0x960] sm:$0xff] }
  0x86   : > { %3869 = vmatprep.subr.mxu1 %v674_v26  ;;  %v669_v32 = vld [vmem:[%s7620_s29 + $0xd60] sm:$0xff]  ;;  %3799 = vmatpush1.msra.mxu0 %v545_v27  ;;  %v538_v33 = vld [vmem:[%s7620_s29 + $0x948] sm:$0xff] }
  0x87   : > { %3870 = vmatpush1.msra.mxu1 %v673_v28  ;;  %v666_v34 = vld [vmem:[%s7620_s29 + $0xd48] sm:$0xff]  ;;  %3800 = vmatprep.subr.mxu0 %v542_v29  ;;  %v537_v35 = vld [vmem:[%s7620_s29 + $0x940] sm:$0xff] }
  0x88   : > { %3871 = vmatprep.subr.mxu1 %v670_v30  ;;  %v665_v36 = vld [vmem:[%s7620_s29 + $0xd40] sm:$0xff]  ;;  %3801 = vmatpush1.msra.mxu0 %v541_v31  ;;  %v534_v37 = vld [vmem:[%s7620_s29 + $0x928] sm:$0xff] }
  0x89   : > { %3872 = vmatpush1.msra.mxu1 %v669_v32  ;;  %v662_v38 = vld [vmem:[%s7620_s29 + $0xd28] sm:$0xff]  ;;  %3802 = vmatprep.subr.mxu0 %v538_v33  ;;  %v533_v39 = vld [vmem:[%s7620_s29 + $0x920] sm:$0xff] }
  0x8a   : > { %3873 = vmatprep.subr.mxu1 %v666_v34  ;;  %v661_v40 = vld [vmem:[%s7620_s29 + $0xd20] sm:$0xff]  ;;  %3803 = vmatpush1.msra.mxu0 %v537_v35  ;;  %v530_v41 = vld [vmem:[%s7620_s29 + $0x908] sm:$0xff] }
  0x8b   : > { %3874 = vmatpush1.msra.mxu1 %v665_v36  ;;  %v658_v42 = vld [vmem:[%s7620_s29 + $0xd08] sm:$0xff]  ;;  %3804 = vmatprep.subr.mxu0 %v534_v37  ;;  %v529_v43 = vld [vmem:[%s7620_s29 + $0x900] sm:$0xff] }
  0x8c   : > { %3875 = vmatprep.subr.mxu1 %v662_v38  ;;  %v657_v44 = vld [vmem:[%s7620_s29 + $0xd00] sm:$0xff]  ;;  %3805 = vmatpush1.msra.mxu0 %v533_v39  ;;  %v526_v45 = vld [vmem:[%s7620_s29 + $0x8e8] sm:$0xff] }
  0x8d   : > { %3876 = vmatpush1.msra.mxu1 %v661_v40  ;;  %v654_v46 = vld [vmem:[%s7620_s29 + $0xce8] sm:$0xff]  ;;  %3806 = vmatprep.subr.mxu0 %v530_v41  ;;  %v525_v47 = vld [vmem:[%s7620_s29 + $0x8e0] sm:$0xff] }
  0x8e   : > { %3877 = vmatprep.subr.mxu1 %v658_v42  ;;  %v653_v48 = vld [vmem:[%s7620_s29 + $0xce0] sm:$0xff]  ;;  %3807 = vmatpush1.msra.mxu0 %v529_v43  ;;  %v522_v49 = vld [vmem:[%s7620_s29 + $0x8c8] sm:$0xff] }
  0x8f   : > { %3878 = vmatpush1.msra.mxu1 %v657_v44  ;;  %v650_v50 = vld [vmem:[%s7620_s29 + $0xcc8] sm:$0xff]  ;;  %3808 = vmatprep.subr.mxu0 %v526_v45  ;;  %v521_v51 = vld [vmem:[%s7620_s29 + $0x8c0] sm:$0xff] }
  0x90   : > { %3879 = vmatprep.subr.mxu1 %v654_v46  ;;  %v649_v52 = vld [vmem:[%s7620_s29 + $0xcc0] sm:$0xff]  ;;  %3809 = vmatpush1.msra.mxu0 %v525_v47  ;;  %v518_v54 = vld [vmem:[%s7620_s29 + $0x8a8] sm:$0xff] }
  0x91   : > { %3880 = vmatpush1.msra.mxu1 %v653_v48  ;;  %v646_v55 = vld [vmem:[%s7620_s29 + $0xca8] sm:$0xff]  ;;  %3810 = vmatprep.subr.mxu0 %v522_v49  ;;  %v517_v56 = vld [vmem:[%s7620_s29 + $0x8a0] sm:$0xff] }
  0x92   : > { %3881 = vmatprep.subr.mxu1 %v650_v50  ;;  %v645_v57 = vld [vmem:[%s7620_s29 + $0xca0] sm:$0xff]  ;;  %3811 = vmatpush1.msra.mxu0 %v521_v51  ;;  %v514_v58 = vld [vmem:[%s7620_s29 + $0x888] sm:$0xff] }
  0x93   : > { %3882 = vmatpush1.msra.mxu1 %v649_v52  ;;  %v642_v59 = vld [vmem:[%s7620_s29 + $0xc88] sm:$0xff]  ;;  %3812 = vmatprep.subr.mxu0 %v518_v54  ;;  %v513_v60 = vld [vmem:[%s7620_s29 + $0x880] sm:$0xff] }
  0x94   : > { %3883 = vmatprep.subr.mxu1 %v646_v55  ;;  %v641_v61 = vld [vmem:[%s7620_s29 + $0xc80] sm:$0xff]  ;;  %3813 = vmatpush1.msra.mxu0 %v517_v56  ;;  %v510_v62 = vld [vmem:[%s7620_s29 + $0x868] sm:$0xff] }
  0x95   : > { %3884 = vmatpush1.msra.mxu1 %v645_v57  ;;  %v638_v0 = vld [vmem:[%s7620_s29 + $0xc68] sm:$0xff]  ;;  %3814 = vmatprep.subr.mxu0 %v514_v58  ;;  %v509_v1 = vld [vmem:[%s7620_s29 + $0x860] sm:$0xff] }
  0x96   : > { %3885 = vmatprep.subr.mxu1 %v642_v59  ;;  %v637_v3 = vld [vmem:[%s7620_s29 + $0xc60] sm:$0xff]  ;;  %3815 = vmatpush1.msra.mxu0 %v513_v60  ;;  %v506_v4 = vld [vmem:[%s7620_s29 + $0x848] sm:$0xff] }
  0x97   : > { %3886 = vmatpush1.msra.mxu1 %v641_v61  ;;  %v634_v5 = vld [vmem:[%s7620_s29 + $0xc48] sm:$0xff]  ;;  %3816 = vmatprep.subr.mxu0 %v510_v62  ;;  %v505_v6 = vld [vmem:[%s7620_s29 + $0x840] sm:$0xff] }
  0x98   : > { %3887 = vmatprep.subr.mxu1 %v638_v0  ;;  %v633_v7 = vld [vmem:[%s7620_s29 + $0xc40] sm:$0xff]  ;;  %3817 = vmatpush1.msra.mxu0 %v509_v1  ;;  %v502_v8 = vld [vmem:[%s7620_s29 + $0x828] sm:$0xff] }
  0x99   : > { %3888 = vmatpush1.msra.mxu1 %v637_v3  ;;  %v630_v10 = vld [vmem:[%s7620_s29 + $0xc28] sm:$0xff]  ;;  %3818 = vmatprep.subr.mxu0 %v506_v4  ;;  %v501_v12 = vld [vmem:[%s7620_s29 + $0x820] sm:$0xff] }
  0x9a   : > { %3889 = vmatprep.subr.mxu1 %v634_v5  ;;  %v629_v13 = vld [vmem:[%s7620_s29 + $0xc20] sm:$0xff]  ;;  %3819 = vmatpush1.msra.mxu0 %v505_v6  ;;  %v498_v14 = vld [vmem:[%s7620_s29 + $0x808] sm:$0xff] }
  0x9b   : > { %3890 = vmatpush1.msra.mxu1 %v633_v7  ;;  %v626_v15 = vld [vmem:[%s7620_s29 + $0xc08] sm:$0xff]  ;;  %3820 = vmatprep.subr.mxu0 %v502_v8  ;;  %v497_v16 = vld [vmem:[%s7620_s29 + $0x800] sm:$0xff] }
  0x9c   : > { %3891 = vmatprep.subr.mxu1 %v630_v10  ;;  %v625_v17 = vld [vmem:[%s7620_s29 + $0xc00] sm:$0xff]  ;;  %3821 = vmatpush1.msra.mxu0 %v501_v12  ;;  %v622_v18 = vld [vmem:[%s7620_s29 + $0xbe8] sm:$0xff] }
  0x9d   : > { %3892 = vmatpush1.msra.mxu1 %v629_v13  ;;  %v750_v19 = vld [vmem:[%s7620_s29 + $0xfe8] sm:$0xff]  ;;  %3822 = vmatprep.subr.mxu0 %v498_v14  ;;  %v621_v20 = vld [vmem:[%s7620_s29 + $0xbe0] sm:$0xff] }
  0x9e   : > { %3893 = vmatprep.subr.mxu1 %v626_v15  ;;  %v749_v21 = vld [vmem:[%s7620_s29 + $0xfe0] sm:$0xff]  ;;  %3823 = vmatpush1.msra.mxu0 %v497_v16  ;;  %v618_v22 = vld [vmem:[%s7620_s29 + $0xbc8] sm:$0xff] }
  0x9f   : > { %3894 = vmatpush1.msra.mxu1 %v625_v17  ;;  %v746_v23 = vld [vmem:[%s7620_s29 + $0xfc8] sm:$0xff]  ;;  %3824 = vmatprep.subr.mxu0 %v622_v18  ;;  %v617_v24 = vld [vmem:[%s7620_s29 + $0xbc0] sm:$0xff] }
  0xa0   : > { %3895 = vmatprep.subr.mxu1 %v750_v19  ;;  %v745_v25 = vld [vmem:[%s7620_s29 + $0xfc0] sm:$0xff]  ;;  %3825 = vmatpush2.msra.mxu0 %v621_v20  ;;  %v614_v26 = vld [vmem:[%s7620_s29 + $0xba8] sm:$0xff] }
  0xa1   : > { %3896 = vmatpush2.msra.mxu1 %v749_v21  ;;  %v742_v27 = vld [vmem:[%s7620_s29 + $0xfa8] sm:$0xff]  ;;  %3826 = vmatprep.subr.mxu0 %v618_v22  ;;  %v613_v28 = vld [vmem:[%s7620_s29 + $0xba0] sm:$0xff] }
  0xa2   : > { %3897 = vmatprep.subr.mxu1 %v746_v23  ;;  %v741_v29 = vld [vmem:[%s7620_s29 + $0xfa0] sm:$0xff]  ;;  %3827 = vmatpush2.msra.mxu0 %v617_v24  ;;  %v610_v30 = vld [vmem:[%s7620_s29 + $0xb88] sm:$0xff] }
  0xa3   : > { %3898 = vmatpush2.msra.mxu1 %v745_v25  ;;  %v738_v31 = vld [vmem:[%s7620_s29 + $0xf88] sm:$0xff]  ;;  %3828 = vmatprep.subr.mxu0 %v614_v26  ;;  %v609_v32 = vld [vmem:[%s7620_s29 + $0xb80] sm:$0xff] }
  0xa4   : > { %3899 = vmatprep.subr.mxu1 %v742_v27  ;;  %v737_v33 = vld [vmem:[%s7620_s29 + $0xf80] sm:$0xff]  ;;  %3829 = vmatpush2.msra.mxu0 %v613_v28  ;;  %v606_v34 = vld [vmem:[%s7620_s29 + $0xb68] sm:$0xff] }
  0xa5   : > { %3900 = vmatpush2.msra.mxu1 %v741_v29  ;;  %v734_v35 = vld [vmem:[%s7620_s29 + $0xf68] sm:$0xff]  ;;  %3830 = vmatprep.subr.mxu0 %v610_v30  ;;  %v605_v36 = vld [vmem:[%s7620_s29 + $0xb60] sm:$0xff] }
  0xa6   : > { %3901 = vmatprep.subr.mxu1 %v738_v31  ;;  %v733_v37 = vld [vmem:[%s7620_s29 + $0xf60] sm:$0xff]  ;;  %3831 = vmatpush2.msra.mxu0 %v609_v32  ;;  %v602_v38 = vld [vmem:[%s7620_s29 + $0xb48] sm:$0xff] }
  0xa7   : > { %3902 = vmatpush2.msra.mxu1 %v737_v33  ;;  %v730_v39 = vld [vmem:[%s7620_s29 + $0xf48] sm:$0xff]  ;;  %3832 = vmatprep.subr.mxu0 %v606_v34  ;;  %v601_v40 = vld [vmem:[%s7620_s29 + $0xb40] sm:$0xff] }
  0xa8   : > { %3903 = vmatprep.subr.mxu1 %v734_v35  ;;  %v729_v41 = vld [vmem:[%s7620_s29 + $0xf40] sm:$0xff]  ;;  %3833 = vmatpush2.msra.mxu0 %v605_v36  ;;  %v598_v42 = vld [vmem:[%s7620_s29 + $0xb28] sm:$0xff] }
  0xa9   : > { %3904 = vmatpush2.msra.mxu1 %v733_v37  ;;  %v726_v43 = vld [vmem:[%s7620_s29 + $0xf28] sm:$0xff]  ;;  %3834 = vmatprep.subr.mxu0 %v602_v38  ;;  %v597_v44 = vld [vmem:[%s7620_s29 + $0xb20] sm:$0xff] }
  0xaa   : > { %3905 = vmatprep.subr.mxu1 %v730_v39  ;;  %v725_v45 = vld [vmem:[%s7620_s29 + $0xf20] sm:$0xff]  ;;  %3835 = vmatpush2.msra.mxu0 %v601_v40  ;;  %v594_v46 = vld [vmem:[%s7620_s29 + $0xb08] sm:$0xff] }
  0xab   : > { %3906 = vmatpush2.msra.mxu1 %v729_v41  ;;  %v722_v47 = vld [vmem:[%s7620_s29 + $0xf08] sm:$0xff]  ;;  %3836 = vmatprep.subr.mxu0 %v598_v42  ;;  %v593_v48 = vld [vmem:[%s7620_s29 + $0xb00] sm:$0xff] }
  0xac   : > { %3907 = vmatprep.subr.mxu1 %v726_v43  ;;  %v721_v49 = vld [vmem:[%s7620_s29 + $0xf00] sm:$0xff]  ;;  %3837 = vmatpush2.msra.mxu0 %v597_v44  ;;  %v590_v50 = vld [vmem:[%s7620_s29 + $0xae8] sm:$0xff] }
  0xad   : > { %3908 = vmatpush2.msra.mxu1 %v725_v45  ;;  %v718_v51 = vld [vmem:[%s7620_s29 + $0xee8] sm:$0xff]  ;;  %3838 = vmatprep.subr.mxu0 %v594_v46  ;;  %v589_v52 = vld [vmem:[%s7620_s29 + $0xae0] sm:$0xff] }
  0xae   : > { %3909 = vmatprep.subr.mxu1 %v722_v47  ;;  %v717_v54 = vld [vmem:[%s7620_s29 + $0xee0] sm:$0xff]  ;;  %3839 = vmatpush2.msra.mxu0 %v593_v48  ;;  %v586_v55 = vld [vmem:[%s7620_s29 + $0xac8] sm:$0xff] }
  0xaf   : > { %3910 = vmatpush2.msra.mxu1 %v721_v49  ;;  %v714_v56 = vld [vmem:[%s7620_s29 + $0xec8] sm:$0xff]  ;;  %3840 = vmatprep.subr.mxu0 %v590_v50  ;;  %v585_v57 = vld [vmem:[%s7620_s29 + $0xac0] sm:$0xff] }
  0xb0   : > { %3911 = vmatprep.subr.mxu1 %v718_v51  ;;  %v713_v58 = vld [vmem:[%s7620_s29 + $0xec0] sm:$0xff]  ;;  %3841 = vmatpush2.msra.mxu0 %v589_v52  ;;  %v582_v59 = vld [vmem:[%s7620_s29 + $0xaa8] sm:$0xff] }
  0xb1   : > { %3912 = vmatpush2.msra.mxu1 %v717_v54  ;;  %v710_v60 = vld [vmem:[%s7620_s29 + $0xea8] sm:$0xff]  ;;  %3842 = vmatprep.subr.mxu0 %v586_v55  ;;  %v581_v61 = vld [vmem:[%s7620_s29 + $0xaa0] sm:$0xff] }
  0xb2   : > { %3913 = vmatprep.subr.mxu1 %v714_v56  ;;  %v709_v62 = vld [vmem:[%s7620_s29 + $0xea0] sm:$0xff]  ;;  %v229_v0 = vld [vmem:[%s7638_s22 + $0x8] sm:$0xff]  ;;  %3843 = vmatpush2.msra.mxu0 %v585_v57 }
  0xb3   : > { %3914 = vmatpush2.msra.mxu1 %v713_v58  ;;  %v578_v1 = vld [vmem:[%s7620_s29 + $0xa88] sm:$0xff]  ;;  %3844 = vmatprep.subr.mxu0 %v582_v59  ;;  %v577_v4 = vld [vmem:[%s7620_s29 + $0xa80] sm:$0xff]  ;;  %v3407_v8 = vcombine.high %v229_v0, %v229_v0  ;;  %v7911_v15 = vrot.slane %v229_v0, %v7753_v53 }
  0xb4   : > { %v706_v3 = vld [vmem:[%s7620_s29 + $0xe88] sm:$0xff]  ;;  %3915 = vmatprep.subr.mxu1 %v710_v60  ;;  %v705_v5 = vld [vmem:[%s7620_s29 + $0xe80] sm:$0xff]  ;;  %3845 = vmatpush2.msra.mxu0 %v581_v61 }
  0xb5   : > { %3916 = vmatpush2.msra.mxu1 %v709_v62  ;;  %v574_v6 = vld [vmem:[%s7620_s29 + $0xa68] sm:$0xff]  ;;  %3846 = vmatprep.subr.mxu0 %v578_v1  ;;  %v573_v10 = vld [vmem:[%s7620_s29 + $0xa60] sm:$0xff]  ;;  %v7918_v20 = vrot.slane %v3407_v8, %v7753_v53  ;;  %v7926_v25 = vcombine.high %v7911_v15, %v7911_v15 }
  0xb6   : > { %v702_v7 = vld [vmem:[%s7620_s29 + $0xe68] sm:$0xff]  ;;  %3917 = vmatprep.subr.mxu1 %v706_v3  ;;  %v701_v12 = vld [vmem:[%s7620_s29 + $0xe60] sm:$0xff]  ;;  %3847 = vmatpush2.msra.mxu0 %v577_v4 }
  0xb7   : > { %3918 = vmatpush2.msra.mxu1 %v705_v5  ;;  %v570_v13 = vld [vmem:[%s7620_s29 + $0xa48] sm:$0xff]  ;;  %3848 = vmatprep.subr.mxu0 %v574_v6  ;;  %v569_v16 = vld [vmem:[%s7620_s29 + $0xa40] sm:$0xff]  ;;  %v7932_v28 = vcombine.high %v7918_v20, %v7918_v20 }
  0xb8   : > { %v698_v14 = vld [vmem:[%s7620_s29 + $0xe48] sm:$0xff]  ;;  %3919 = vmatprep.subr.mxu1 %v702_v7  ;;  %v697_v17 = vld [vmem:[%s7620_s29 + $0xe40] sm:$0xff]  ;;  %3849 = vmatpush2.msra.mxu0 %v573_v10 }
  0xb9   : > { %3920 = vmatpush2.msra.mxu1 %v701_v12  ;;  %v566_v18 = vld [vmem:[%s7620_s29 + $0xa28] sm:$0xff]  ;;  %3850 = vmatprep.subr.mxu0 %v570_v13  ;;  %v565_v21 = vld [vmem:[%s7620_s29 + $0xa20] sm:$0xff] }
  0xba   : > { %v694_v19 = vld [vmem:[%s7620_s29 + $0xe28] sm:$0xff]  ;;  %3921 = vmatprep.subr.mxu1 %v698_v14  ;;  %v693_v22 = vld [vmem:[%s7620_s29 + $0xe20] sm:$0xff]  ;;  %3851 = vmatpush2.msra.mxu0 %v569_v16 }
  0xbb   : > { %3922 = vmatpush2.msra.mxu1 %v697_v17  ;;  %v562_v23 = vld [vmem:[%s7620_s29 + $0xa08] sm:$0xff]  ;;  %3852 = vmatprep.subr.mxu0 %v566_v18  ;;  %v561_v26 = vld [vmem:[%s7620_s29 + $0xa00] sm:$0xff] }
  0xbc   : > { %v690_v24 = vld [vmem:[%s7620_s29 + $0xe08] sm:$0xff]  ;;  %3923 = vmatprep.subr.mxu1 %v694_v19  ;;  %3853 = vmatpush2.msra.mxu0 %v565_v21  ;;  %v689_v27 = vld [vmem:[%s7620_s29 + $0xe00] sm:$0xff] }
  0xbd   : > { %3924 = vmatpush2.msra.mxu1 %v693_v22  ;;  %3854 = vmatprep.subr.mxu0 %v562_v23  ;;  %v814_v29 = vld [vmem:[%s7620_s29 + $0x11e8] sm:$0xff]  ;;  %v813_v31 = vld [vmem:[%s7620_s29 + $0x11e0] sm:$0xff] }
  0xbe   : > { %3925 = vmatprep.subr.mxu1 %v690_v24  ;;  %3855 = vmatpush2.msra.mxu0 %v561_v26  ;;  %v942_v30 = vld [vmem:[%s7620_s29 + $0x15e8] sm:$0xff]  ;;  %v941_v32 = vld [vmem:[%s7620_s29 + $0x15e0] sm:$0xff] }
  0xbf   : > { %3856 = vmatprep.mubr.f32.mxu0 %v7926_v25  ;;  %3926 = vmatpush2.msra.mxu1 %v689_v27  ;;  %v810_v33 = vld [vmem:[%s7620_s29 + $0x11c8] sm:$0xff]  ;;  %v809_v35 = vld [vmem:[%s7620_s29 + $0x11c0] sm:$0xff] }
  0xc0   : > { %3857 = vmatmul.mubr.f32.vlgmr.msra.gmra.mxu0 %v7911_v15  ;;  %3927 = vmatprep.mubr.f32.mxu1 %v7932_v28  ;;  %v938_v34 = vld [vmem:[%s7620_s29 + $0x15c8] sm:$0xff]  ;;  %v937_v36 = vld [vmem:[%s7620_s29 + $0x15c0] sm:$0xff] }
  0xc1   : > { %3934 = vmatprep.subr.mxu0 %v814_v29  ;;  %4005 = vmatprep.subr.mxu1 %v942_v30  ;;  %v806_v37 = vld [vmem:[%s7620_s29 + $0x11a8] sm:$0xff]  ;;  %v805_v39 = vld [vmem:[%s7620_s29 + $0x11a0] sm:$0xff] }
  0xc2   : > { %3928 = vmatmul.mubr.f32.vlgmr.msra.gmra.mxu1 %v7918_v20  ;;  %3935 = vmatpush1.msra.mxu0 %v813_v31  ;;  %v934_v38 = vld [vmem:[%s7620_s29 + $0x15a8] sm:$0xff]  ;;  %v933_v40 = vld [vmem:[%s7620_s29 + $0x15a0] sm:$0xff] }
  0xc3   : > { %4006 = vmatpush1.msra.mxu1 %v941_v32  ;;  %3936 = vmatprep.subr.mxu0 %v810_v33  ;;  %v802_v41 = vld [vmem:[%s7620_s29 + $0x1188] sm:$0xff]  ;;  %v801_v43 = vld [vmem:[%s7620_s29 + $0x1180] sm:$0xff] }
  0xc4   : > { %4007 = vmatprep.subr.mxu1 %v938_v34  ;;  %3937 = vmatpush1.msra.mxu0 %v809_v35  ;;  %v930_v42 = vld [vmem:[%s7620_s29 + $0x1588] sm:$0xff]  ;;  %v929_v44 = vld [vmem:[%s7620_s29 + $0x1580] sm:$0xff] }
  0xc5   : > { %4008 = vmatpush1.msra.mxu1 %v937_v36  ;;  %3938 = vmatprep.subr.mxu0 %v806_v37  ;;  %v798_v45 = vld [vmem:[%s7620_s29 + $0x1168] sm:$0xff]  ;;  %v797_v47 = vld [vmem:[%s7620_s29 + $0x1160] sm:$0xff] }
  0xc6   : > { %4009 = vmatprep.subr.mxu1 %v934_v38  ;;  %3939 = vmatpush1.msra.mxu0 %v805_v39  ;;  %v926_v46 = vld [vmem:[%s7620_s29 + $0x1568] sm:$0xff]  ;;  %v925_v48 = vld [vmem:[%s7620_s29 + $0x1560] sm:$0xff] }
  0xc7   : > { %4010 = vmatpush1.msra.mxu1 %v933_v40  ;;  %3940 = vmatprep.subr.mxu0 %v802_v41  ;;  %v794_v49 = vld [vmem:[%s7620_s29 + $0x1148] sm:$0xff]  ;;  %v793_v51 = vld [vmem:[%s7620_s29 + $0x1140] sm:$0xff] }
  0xc8   : > { %4011 = vmatprep.subr.mxu1 %v930_v42  ;;  %3941 = vmatpush1.msra.mxu0 %v801_v43  ;;  %v922_v50 = vld [vmem:[%s7620_s29 + $0x1548] sm:$0xff]  ;;  %v921_v52 = vld [vmem:[%s7620_s29 + $0x1540] sm:$0xff] }
  0xc9   : > { %4012 = vmatpush1.msra.mxu1 %v929_v44  ;;  %3942 = vmatprep.subr.mxu0 %v798_v45  ;;  %v790_v54 = vld [vmem:[%s7620_s29 + $0x1128] sm:$0xff]  ;;  %v789_v56 = vld [vmem:[%s7620_s29 + $0x1120] sm:$0xff] }
  0xca   : > { %4013 = vmatprep.subr.mxu1 %v926_v46  ;;  %3943 = vmatpush1.msra.mxu0 %v797_v47  ;;  %v918_v55 = vld [vmem:[%s7620_s29 + $0x1528] sm:$0xff]  ;;  %v917_v57 = vld [vmem:[%s7620_s29 + $0x1520] sm:$0xff] }
  0xcb   : > { %4014 = vmatpush1.msra.mxu1 %v925_v48  ;;  %3944 = vmatprep.subr.mxu0 %v794_v49  ;;  %v786_v58 = vld [vmem:[%s7620_s29 + $0x1108] sm:$0xff]  ;;  %v785_v60 = vld [vmem:[%s7620_s29 + $0x1100] sm:$0xff] }
  0xcc   : > { %4015 = vmatprep.subr.mxu1 %v922_v50  ;;  %3945 = vmatpush1.msra.mxu0 %v793_v51  ;;  %v914_v59 = vld [vmem:[%s7620_s29 + $0x1508] sm:$0xff]  ;;  %v913_v61 = vld [vmem:[%s7620_s29 + $0x1500] sm:$0xff] }
  0xcd   : > { %4016 = vmatpush1.msra.mxu1 %v921_v52  ;;  %3946 = vmatprep.subr.mxu0 %v790_v54  ;;  %v782_v62 = vld [vmem:[%s7620_s29 + $0x10e8] sm:$0xff]  ;;  %v781_v1 = vld [vmem:[%s7620_s29 + $0x10e0] sm:$0xff] }
  0xce   : > { %4017 = vmatprep.subr.mxu1 %v918_v55  ;;  %3947 = vmatpush1.msra.mxu0 %v789_v56  ;;  %v910_v0 = vld [vmem:[%s7620_s29 + $0x14e8] sm:$0xff]  ;;  %v909_v3 = vld [vmem:[%s7620_s29 + $0x14e0] sm:$0xff] }
  0xcf   : > { %4018 = vmatpush1.msra.mxu1 %v917_v57  ;;  %3948 = vmatprep.subr.mxu0 %v786_v58  ;;  %v778_v4 = vld [vmem:[%s7620_s29 + $0x10c8] sm:$0xff]  ;;  %v777_v6 = vld [vmem:[%s7620_s29 + $0x10c0] sm:$0xff] }
  0xd0   : > { %4019 = vmatprep.subr.mxu1 %v914_v59  ;;  %3949 = vmatpush1.msra.mxu0 %v785_v60  ;;  %v906_v5 = vld [vmem:[%s7620_s29 + $0x14c8] sm:$0xff]  ;;  %v905_v7 = vld [vmem:[%s7620_s29 + $0x14c0] sm:$0xff] }
  0xd1   : > { %4020 = vmatpush1.msra.mxu1 %v913_v61  ;;  %3950 = vmatprep.subr.mxu0 %v782_v62  ;;  %v774_v8 = vld [vmem:[%s7620_s29 + $0x10a8] sm:$0xff]  ;;  %v773_v12 = vld [vmem:[%s7620_s29 + $0x10a0] sm:$0xff] }
  0xd2   : > { %4021 = vmatprep.subr.mxu1 %v910_v0  ;;  %3951 = vmatpush1.msra.mxu0 %v781_v1  ;;  %v902_v10 = vld [vmem:[%s7620_s29 + $0x14a8] sm:$0xff]  ;;  %v901_v13 = vld [vmem:[%s7620_s29 + $0x14a0] sm:$0xff] }
  0xd3   : > { %4022 = vmatpush1.msra.mxu1 %v909_v3  ;;  %3952 = vmatprep.subr.mxu0 %v778_v4  ;;  %v770_v14 = vld [vmem:[%s7620_s29 + $0x1088] sm:$0xff]  ;;  %v769_v17 = vld [vmem:[%s7620_s29 + $0x1080] sm:$0xff] }
  0xd4   : > { %4023 = vmatprep.subr.mxu1 %v906_v5  ;;  %3953 = vmatpush1.msra.mxu0 %v777_v6  ;;  %v898_v16 = vld [vmem:[%s7620_s29 + $0x1488] sm:$0xff]  ;;  %v897_v18 = vld [vmem:[%s7620_s29 + $0x1480] sm:$0xff] }
  0xd5   : > { %4024 = vmatpush1.msra.mxu1 %v905_v7  ;;  %3954 = vmatprep.subr.mxu0 %v774_v8  ;;  %v766_v19 = vld [vmem:[%s7620_s29 + $0x1068] sm:$0xff]  ;;  %v765_v22 = vld [vmem:[%s7620_s29 + $0x1060] sm:$0xff] }
  0xd6   : > { %4025 = vmatprep.subr.mxu1 %v902_v10  ;;  %3955 = vmatpush1.msra.mxu0 %v773_v12  ;;  %v894_v21 = vld [vmem:[%s7620_s29 + $0x1468] sm:$0xff]  ;;  %v893_v23 = vld [vmem:[%s7620_s29 + $0x1460] sm:$0xff] }
  0xd7   : > { %4026 = vmatpush1.msra.mxu1 %v901_v13  ;;  %3956 = vmatprep.subr.mxu0 %v770_v14  ;;  %v762_v24 = vld [vmem:[%s7620_s29 + $0x1048] sm:$0xff]  ;;  %v761_v27 = vld [vmem:[%s7620_s29 + $0x1040] sm:$0xff] }
  0xd8   : > { %4027 = vmatprep.subr.mxu1 %v898_v16  ;;  %3957 = vmatpush1.msra.mxu0 %v769_v17  ;;  %v890_v26 = vld [vmem:[%s7620_s29 + $0x1448] sm:$0xff]  ;;  %v889_v29 = vld [vmem:[%s7620_s29 + $0x1440] sm:$0xff] }
  0xd9   : > { %4028 = vmatpush1.msra.mxu1 %v897_v18  ;;  %3958 = vmatprep.subr.mxu0 %v766_v19  ;;  %v758_v30 = vld [vmem:[%s7620_s29 + $0x1028] sm:$0xff]  ;;  %v757_v32 = vld [vmem:[%s7620_s29 + $0x1020] sm:$0xff] }
  0xda   : > { %4029 = vmatprep.subr.mxu1 %v894_v21  ;;  %3959 = vmatpush1.msra.mxu0 %v765_v22  ;;  %v886_v31 = vld [vmem:[%s7620_s29 + $0x1428] sm:$0xff]  ;;  %v885_v33 = vld [vmem:[%s7620_s29 + $0x1420] sm:$0xff] }
  0xdb   : > { %4030 = vmatpush1.msra.mxu1 %v893_v23  ;;  %3960 = vmatprep.subr.mxu0 %v762_v24  ;;  %v754_v34 = vld [vmem:[%s7620_s29 + $0x1008] sm:$0xff]  ;;  %v753_v36 = vld [vmem:[%s7620_s29 + $0x1000] sm:$0xff] }
  0xdc   : > { %4031 = vmatprep.subr.mxu1 %v890_v26  ;;  %3961 = vmatpush1.msra.mxu0 %v761_v27  ;;  %v882_v35 = vld [vmem:[%s7620_s29 + $0x1408] sm:$0xff]  ;;  %v881_v37 = vld [vmem:[%s7620_s29 + $0x1400] sm:$0xff]  ;;  %v230_v26 = vld [vmem:[%s7638_s22 + $0x10] sm:$0xff] }
  0xdd   : > { %4032 = vmatpush1.msra.mxu1 %v889_v29  ;;  %3962 = vmatprep.subr.mxu0 %v758_v30  ;;  %v878_v38 = vld [vmem:[%s7620_s29 + $0x13e8] sm:$0xff]  ;;  %v877_v40 = vld [vmem:[%s7620_s29 + $0x13e0] sm:$0xff] }
  0xde   : > { %4033 = vmatprep.subr.mxu1 %v886_v31  ;;  %3963 = vmatpush1.msra.mxu0 %v757_v32  ;;  %v1006_v39 = vld [vmem:[%s7620_s29 + $0x17e8] sm:$0xff]  ;;  %v1005_v41 = vld [vmem:[%s7620_s29 + $0x17e0] sm:$0xff] }
  0xdf   : > { %4034 = vmatpush1.msra.mxu1 %v885_v33  ;;  %3964 = vmatprep.subr.mxu0 %v754_v34  ;;  %v874_v42 = vld [vmem:[%s7620_s29 + $0x13c8] sm:$0xff]  ;;  %v873_v44 = vld [vmem:[%s7620_s29 + $0x13c0] sm:$0xff]  ;;  %v3424_v34 = vcombine.high %v230_v26, %v230_v26 }
  0xe0   : > { %4035 = vmatprep.subr.mxu1 %v882_v35  ;;  %3965 = vmatpush1.msra.mxu0 %v753_v36  ;;  %v1002_v43 = vld [vmem:[%s7620_s29 + $0x17c8] sm:$0xff]  ;;  %v1001_v45 = vld [vmem:[%s7620_s29 + $0x17c0] sm:$0xff] }
  0xe1   : > { %4036 = vmatpush1.msra.mxu1 %v881_v37  ;;  %3966 = vmatprep.subr.mxu0 %v878_v38  ;;  %v870_v46 = vld [vmem:[%s7620_s29 + $0x13a8] sm:$0xff]  ;;  %v869_v48 = vld [vmem:[%s7620_s29 + $0x13a0] sm:$0xff] }
  0xe2   : > { %4037 = vmatprep.subr.mxu1 %v1006_v39  ;;  %3967 = vmatpush2.msra.mxu0 %v877_v40  ;;  %v998_v47 = vld [vmem:[%s7620_s29 + $0x17a8] sm:$0xff]  ;;  %v997_v49 = vld [vmem:[%s7620_s29 + $0x17a0] sm:$0xff]  ;;  %v8058_v39 = vrot.slane %v230_v26, %v7753_v53 }
  0xe3   : > { %4038 = vmatpush2.msra.mxu1 %v1005_v41  ;;  %3968 = vmatprep.subr.mxu0 %v874_v42  ;;  %v866_v50 = vld [vmem:[%s7620_s29 + $0x1388] sm:$0xff]  ;;  %v865_v52 = vld [vmem:[%s7620_s29 + $0x1380] sm:$0xff] }
  0xe4   : > { %4039 = vmatprep.subr.mxu1 %v1002_v43  ;;  %3969 = vmatpush2.msra.mxu0 %v873_v44  ;;  %v994_v51 = vld [vmem:[%s7620_s29 + $0x1788] sm:$0xff]  ;;  %v993_v54 = vld [vmem:[%s7620_s29 + $0x1780] sm:$0xff]  ;;  %v8065_v44 = vrot.slane %v3424_v34, %v7753_v53 }
  0xe5   : > { %4040 = vmatpush2.msra.mxu1 %v1001_v45  ;;  %3970 = vmatprep.subr.mxu0 %v870_v46  ;;  %v862_v55 = vld [vmem:[%s7620_s29 + $0x1368] sm:$0xff]  ;;  %v861_v57 = vld [vmem:[%s7620_s29 + $0x1360] sm:$0xff] }
  0xe6   : > { %4041 = vmatprep.subr.mxu1 %v998_v47  ;;  %3971 = vmatpush2.msra.mxu0 %v869_v48  ;;  %v990_v56 = vld [vmem:[%s7620_s29 + $0x1768] sm:$0xff]  ;;  %v989_v58 = vld [vmem:[%s7620_s29 + $0x1760] sm:$0xff] }
  0xe7   : > { %4042 = vmatpush2.msra.mxu1 %v997_v49  ;;  %3972 = vmatprep.subr.mxu0 %v866_v50  ;;  %v858_v59 = vld [vmem:[%s7620_s29 + $0x1348] sm:$0xff]  ;;  %v857_v61 = vld [vmem:[%s7620_s29 + $0x1340] sm:$0xff]  ;;  %v8073_v49 = vcombine.high %v8058_v39, %v8058_v39 }
  0xe8   : > { %4043 = vmatprep.subr.mxu1 %v994_v51  ;;  %3973 = vmatpush2.msra.mxu0 %v865_v52  ;;  %v986_v60 = vld [vmem:[%s7620_s29 + $0x1748] sm:$0xff]  ;;  %v985_v62 = vld [vmem:[%s7620_s29 + $0x1740] sm:$0xff]  ;;  %v8079_v52 = vcombine.high %v8065_v44, %v8065_v44 }
  0xe9   : > { %4044 = vmatpush2.msra.mxu1 %v993_v54  ;;  %3974 = vmatprep.subr.mxu0 %v862_v55  ;;  %v854_v0 = vld [vmem:[%s7620_s29 + $0x1328] sm:$0xff]  ;;  %v853_v3 = vld [vmem:[%s7620_s29 + $0x1320] sm:$0xff] }
  0xea   : > { %4045 = vmatprep.subr.mxu1 %v990_v56  ;;  %3975 = vmatpush2.msra.mxu0 %v861_v57  ;;  %v982_v1 = vld [vmem:[%s7620_s29 + $0x1728] sm:$0xff]  ;;  %v981_v4 = vld [vmem:[%s7620_s29 + $0x1720] sm:$0xff] }
  0xeb   : > { %4046 = vmatpush2.msra.mxu1 %v989_v58  ;;  %3976 = vmatprep.subr.mxu0 %v858_v59  ;;  %v850_v5 = vld [vmem:[%s7620_s29 + $0x1308] sm:$0xff]  ;;  %v849_v7 = vld [vmem:[%s7620_s29 + $0x1300] sm:$0xff] }
  0xec   : > { %4047 = vmatprep.subr.mxu1 %v986_v60  ;;  %3977 = vmatpush2.msra.mxu0 %v857_v61  ;;  %v978_v6 = vld [vmem:[%s7620_s29 + $0x1708] sm:$0xff]  ;;  %v977_v8 = vld [vmem:[%s7620_s29 + $0x1700] sm:$0xff] }
  0xed   : > { %4048 = vmatpush2.msra.mxu1 %v985_v62  ;;  %3978 = vmatprep.subr.mxu0 %v854_v0  ;;  %v846_v10 = vld [vmem:[%s7620_s29 + $0x12e8] sm:$0xff]  ;;  %v845_v13 = vld [vmem:[%s7620_s29 + $0x12e0] sm:$0xff] }
  0xee   : > { %4049 = vmatprep.subr.mxu1 %v982_v1  ;;  %3979 = vmatpush2.msra.mxu0 %v853_v3  ;;  %v974_v12 = vld [vmem:[%s7620_s29 + $0x16e8] sm:$0xff]  ;;  %v973_v14 = vld [vmem:[%s7620_s29 + $0x16e0] sm:$0xff] }
  0xef   : > { %4050 = vmatpush2.msra.mxu1 %v981_v4  ;;  %3980 = vmatprep.subr.mxu0 %v850_v5  ;;  %v842_v16 = vld [vmem:[%s7620_s29 + $0x12c8] sm:$0xff]  ;;  %v841_v18 = vld [vmem:[%s7620_s29 + $0x12c0] sm:$0xff] }
  0xf0   : > { %4051 = vmatprep.subr.mxu1 %v978_v6  ;;  %3981 = vmatpush2.msra.mxu0 %v849_v7  ;;  %v970_v17 = vld [vmem:[%s7620_s29 + $0x16c8] sm:$0xff]  ;;  %v969_v19 = vld [vmem:[%s7620_s29 + $0x16c0] sm:$0xff] }
  0xf1   : > { %4052 = vmatpush2.msra.mxu1 %v977_v8  ;;  %3982 = vmatprep.subr.mxu0 %v846_v10  ;;  %v838_v21 = vld [vmem:[%s7620_s29 + $0x12a8] sm:$0xff]  ;;  %v837_v23 = vld [vmem:[%s7620_s29 + $0x12a0] sm:$0xff] }
  0xf2   : > { %4053 = vmatprep.subr.mxu1 %v974_v12  ;;  %3983 = vmatpush2.msra.mxu0 %v845_v13  ;;  %v966_v22 = vld [vmem:[%s7620_s29 + $0x16a8] sm:$0xff]  ;;  %v965_v24 = vld [vmem:[%s7620_s29 + $0x16a0] sm:$0xff] }
  0xf3   : > { %4054 = vmatpush2.msra.mxu1 %v973_v14  ;;  %3984 = vmatprep.subr.mxu0 %v842_v16  ;;  %v834_v27 = vld [vmem:[%s7620_s29 + $0x1288] sm:$0xff]  ;;  %v833_v30 = vld [vmem:[%s7620_s29 + $0x1280] sm:$0xff] }
  0xf4   : > { %4055 = vmatprep.subr.mxu1 %v970_v17  ;;  %3985 = vmatpush2.msra.mxu0 %v841_v18  ;;  %v962_v29 = vld [vmem:[%s7620_s29 + $0x1688] sm:$0xff]  ;;  %v961_v31 = vld [vmem:[%s7620_s29 + $0x1680] sm:$0xff] }
  0xf5   : > { %4056 = vmatpush2.msra.mxu1 %v969_v19  ;;  %3986 = vmatprep.subr.mxu0 %v838_v21  ;;  %v830_v32 = vld [vmem:[%s7620_s29 + $0x1268] sm:$0xff]  ;;  %v829_v35 = vld [vmem:[%s7620_s29 + $0x1260] sm:$0xff] }
  0xf6   : > { %4057 = vmatprep.subr.mxu1 %v966_v22  ;;  %3987 = vmatpush2.msra.mxu0 %v837_v23  ;;  %v958_v33 = vld [vmem:[%s7620_s29 + $0x1668] sm:$0xff]  ;;  %v957_v36 = vld [vmem:[%s7620_s29 + $0x1660] sm:$0xff] }
  0xf7   : > { %4058 = vmatpush2.msra.mxu1 %v965_v24  ;;  %3988 = vmatprep.subr.mxu0 %v834_v27  ;;  %v826_v37 = vld [vmem:[%s7620_s29 + $0x1248] sm:$0xff]  ;;  %v825_v40 = vld [vmem:[%s7620_s29 + $0x1240] sm:$0xff] }
  0xf8   : > { %4059 = vmatprep.subr.mxu1 %v962_v29  ;;  %3989 = vmatpush2.msra.mxu0 %v833_v30  ;;  %v954_v38 = vld [vmem:[%s7620_s29 + $0x1648] sm:$0xff]  ;;  %v953_v41 = vld [vmem:[%s7620_s29 + $0x1640] sm:$0xff] }
  0xf9   : > { %4060 = vmatpush2.msra.mxu1 %v961_v31  ;;  %3990 = vmatprep.subr.mxu0 %v830_v32  ;;  %v822_v42 = vld [vmem:[%s7620_s29 + $0x1228] sm:$0xff]  ;;  %v821_v45 = vld [vmem:[%s7620_s29 + $0x1220] sm:$0xff] }
  0xfa   : > { %4061 = vmatprep.subr.mxu1 %v958_v33  ;;  %3991 = vmatpush2.msra.mxu0 %v829_v35  ;;  %v950_v43 = vld [vmem:[%s7620_s29 + $0x1628] sm:$0xff]  ;;  %v949_v46 = vld [vmem:[%s7620_s29 + $0x1620] sm:$0xff] }
  0xfb   : > { %4062 = vmatpush2.msra.mxu1 %v957_v36  ;;  %3992 = vmatprep.subr.mxu0 %v826_v37  ;;  %v818_v47 = vld [vmem:[%s7620_s29 + $0x1208] sm:$0xff]  ;;  %v817_v50 = vld [vmem:[%s7620_s29 + $0x1200] sm:$0xff] }
  0xfc   : > { %4063 = vmatprep.subr.mxu1 %v954_v38  ;;  %3993 = vmatpush2.msra.mxu0 %v825_v40  ;;  %v946_v48 = vld [vmem:[%s7620_s29 + $0x1608] sm:$0xff]  ;;  %v945_v51 = vld [vmem:[%s7620_s29 + $0x1600] sm:$0xff] }
  0xfd   : > { %4064 = vmatpush2.msra.mxu1 %v953_v41  ;;  %3994 = vmatprep.subr.mxu0 %v822_v42  ;;  %v1070_v54 = vld [vmem:[%s7620_s29 + $0x19e8] sm:$0xff]  ;;  %v1069_v56 = vld [vmem:[%s7620_s29 + $0x19e0] sm:$0xff] }
  0xfe   : > { %4065 = vmatprep.subr.mxu1 %v950_v43  ;;  %3995 = vmatpush2.msra.mxu0 %v821_v45  ;;  %v1198_v55 = vld [vmem:[%s7620_s29 + $0x1de8] sm:$0xff]  ;;  %v1197_v57 = vld [vmem:[%s7620_s29 + $0x1de0] sm:$0xff] }
  0xff   : > { %4066 = vmatpush2.msra.mxu1 %v949_v46  ;;  %3996 = vmatprep.subr.mxu0 %v818_v47  ;;  %v1066_v58 = vld [vmem:[%s7620_s29 + $0x19c8] sm:$0xff]  ;;  %v1065_v60 = vld [vmem:[%s7620_s29 + $0x19c0] sm:$0xff] }
 0x100   : > { %4067 = vmatprep.subr.mxu1 %v946_v48  ;;  %3997 = vmatpush2.msra.mxu0 %v817_v50  ;;  %v1194_v59 = vld [vmem:[%s7620_s29 + $0x1dc8] sm:$0xff]  ;;  %v1193_v61 = vld [vmem:[%s7620_s29 + $0x1dc0] sm:$0xff] }
 0x101   : > { %3998 = vmatprep.mubr.f32.mxu0 %v8073_v49  ;;  %4068 = vmatpush2.msra.mxu1 %v945_v51  ;;  %v1062_v62 = vld [vmem:[%s7620_s29 + $0x19a8] sm:$0xff]  ;;  %v1061_v1 = vld [vmem:[%s7620_s29 + $0x19a0] sm:$0xff] }
 0x102   : > { %3999 = vmatmul.mubr.f32.vlgmr.msra.gmra.mxu0 %v8058_v39  ;;  %4069 = vmatprep.mubr.f32.mxu1 %v8079_v52  ;;  %v1190_v0 = vld [vmem:[%s7620_s29 + $0x1da8] sm:$0xff]  ;;  %v1189_v3 = vld [vmem:[%s7620_s29 + $0x1da0] sm:$0xff] }
 0x103   : > { %4076 = vmatprep.subr.mxu0 %v1070_v54  ;;  %4147 = vmatprep.subr.mxu1 %v1198_v55  ;;  %v1058_v4 = vld [vmem:[%s7620_s29 + $0x1988] sm:$0xff]  ;;  %v1057_v6 = vld [vmem:[%s7620_s29 + $0x1980] sm:$0xff] }
 0x104   : > { %4070 = vmatmul.mubr.f32.vlgmr.msra.gmra.mxu1 %v8065_v44  ;;  %4077 = vmatpush1.msra.mxu0 %v1069_v56  ;;  %v1186_v5 = vld [vmem:[%s7620_s29 + $0x1d88] sm:$0xff]  ;;  %v1185_v7 = vld [vmem:[%s7620_s29 + $0x1d80] sm:$0xff] }
 0x105   : > { %4148 = vmatpush1.msra.mxu1 %v1197_v57  ;;  %4078 = vmatprep.subr.mxu0 %v1066_v58  ;;  %v1054_v8 = vld [vmem:[%s7620_s29 + $0x1968] sm:$0xff]  ;;  %v1053_v12 = vld [vmem:[%s7620_s29 + $0x1960] sm:$0xff] }
 0x106   : > { %4149 = vmatprep.subr.mxu1 %v1194_v59  ;;  %4079 = vmatpush1.msra.mxu0 %v1065_v60  ;;  %v1182_v10 = vld [vmem:[%s7620_s29 + $0x1d68] sm:$0xff]  ;;  %v1181_v13 = vld [vmem:[%s7620_s29 + $0x1d60] sm:$0xff] }
 0x107   : > { %4150 = vmatpush1.msra.mxu1 %v1193_v61  ;;  %4080 = vmatprep.subr.mxu0 %v1062_v62  ;;  %v1050_v14 = vld [vmem:[%s7620_s29 + $0x1948] sm:$0xff]  ;;  %v1049_v17 = vld [vmem:[%s7620_s29 + $0x1940] sm:$0xff] }
 0x108   : > { %4151 = vmatprep.subr.mxu1 %v1190_v0  ;;  %4081 = vmatpush1.msra.mxu0 %v1061_v1  ;;  %v1178_v16 = vld [vmem:[%s7620_s29 + $0x1d48] sm:$0xff]  ;;  %v1177_v18 = vld [vmem:[%s7620_s29 + $0x1d40] sm:$0xff] }
 0x109   : > { %4152 = vmatpush1.msra.mxu1 %v1189_v3  ;;  %4082 = vmatprep.subr.mxu0 %v1058_v4  ;;  %v1046_v19 = vld [vmem:[%s7620_s29 + $0x1928] sm:$0xff]  ;;  %v1045_v22 = vld [vmem:[%s7620_s29 + $0x1920] sm:$0xff] }
 0x10a   : > { %4153 = vmatprep.subr.mxu1 %v1186_v5  ;;  %4083 = vmatpush1.msra.mxu0 %v1057_v6  ;;  %v1174_v21 = vld [vmem:[%s7620_s29 + $0x1d28] sm:$0xff]  ;;  %v1173_v23 = vld [vmem:[%s7620_s29 + $0x1d20] sm:$0xff] }
 0x10b   : > { %4154 = vmatpush1.msra.mxu1 %v1185_v7  ;;  %4084 = vmatprep.subr.mxu0 %v1054_v8  ;;  %v1042_v24 = vld [vmem:[%s7620_s29 + $0x1908] sm:$0xff]  ;;  %v1041_v27 = vld [vmem:[%s7620_s29 + $0x1900] sm:$0xff] }
 0x10c   : > { %4155 = vmatprep.subr.mxu1 %v1182_v10  ;;  %4085 = vmatpush1.msra.mxu0 %v1053_v12  ;;  %v1170_v26 = vld [vmem:[%s7620_s29 + $0x1d08] sm:$0xff]  ;;  %v1169_v29 = vld [vmem:[%s7620_s29 + $0x1d00] sm:$0xff] }
 0x10d   : > { %4156 = vmatpush1.msra.mxu1 %v1181_v13  ;;  %4086 = vmatprep.subr.mxu0 %v1050_v14  ;;  %v1038_v30 = vld [vmem:[%s7620_s29 + $0x18e8] sm:$0xff]  ;;  %v1037_v32 = vld [vmem:[%s7620_s29 + $0x18e0] sm:$0xff] }
 0x10e   : > { %4157 = vmatprep.subr.mxu1 %v1178_v16  ;;  %4087 = vmatpush1.msra.mxu0 %v1049_v17  ;;  %v1166_v31 = vld [vmem:[%s7620_s29 + $0x1ce8] sm:$0xff]  ;;  %v1165_v33 = vld [vmem:[%s7620_s29 + $0x1ce0] sm:$0xff] }
 0x10f   : > { %4158 = vmatpush1.msra.mxu1 %v1177_v18  ;;  %4088 = vmatprep.subr.mxu0 %v1046_v19  ;;  %v1034_v34 = vld [vmem:[%s7620_s29 + $0x18c8] sm:$0xff]  ;;  %v1033_v36 = vld [vmem:[%s7620_s29 + $0x18c0] sm:$0xff] }
 0x110   : > { %4159 = vmatprep.subr.mxu1 %v1174_v21  ;;  %4089 = vmatpush1.msra.mxu0 %v1045_v22  ;;  %v1162_v35 = vld [vmem:[%s7620_s29 + $0x1cc8] sm:$0xff]  ;;  %v1161_v37 = vld [vmem:[%s7620_s29 + $0x1cc0] sm:$0xff] }
 0x111   : > { %4160 = vmatpush1.msra.mxu1 %v1173_v23  ;;  %4090 = vmatprep.subr.mxu0 %v1042_v24  ;;  %v1030_v38 = vld [vmem:[%s7620_s29 + $0x18a8] sm:$0xff]  ;;  %v1029_v41 = vld [vmem:[%s7620_s29 + $0x18a0] sm:$0xff] }
 0x112   : > { %4161 = vmatprep.subr.mxu1 %v1170_v26  ;;  %4091 = vmatpush1.msra.mxu0 %v1041_v27  ;;  %v1158_v40 = vld [vmem:[%s7620_s29 + $0x1ca8] sm:$0xff]  ;;  %v1157_v42 = vld [vmem:[%s7620_s29 + $0x1ca0] sm:$0xff] }
 0x113   : > { %4162 = vmatpush1.msra.mxu1 %v1169_v29  ;;  %4092 = vmatprep.subr.mxu0 %v1038_v30  ;;  %v1026_v43 = vld [vmem:[%s7620_s29 + $0x1888] sm:$0xff]  ;;  %v1025_v46 = vld [vmem:[%s7620_s29 + $0x1880] sm:$0xff] }
 0x114   : > { %4163 = vmatprep.subr.mxu1 %v1166_v31  ;;  %4093 = vmatpush1.msra.mxu0 %v1037_v32  ;;  %v1154_v45 = vld [vmem:[%s7620_s29 + $0x1c88] sm:$0xff]  ;;  %v1153_v47 = vld [vmem:[%s7620_s29 + $0x1c80] sm:$0xff] }
 0x115   : > { %4164 = vmatpush1.msra.mxu1 %v1165_v33  ;;  %4094 = vmatprep.subr.mxu0 %v1034_v34  ;;  %v1022_v48 = vld [vmem:[%s7620_s29 + $0x1868] sm:$0xff]  ;;  %v1021_v51 = vld [vmem:[%s7620_s29 + $0x1860] sm:$0xff] }
 0x116   : > { %4165 = vmatprep.subr.mxu1 %v1162_v35  ;;  %4095 = vmatpush1.msra.mxu0 %v1033_v36  ;;  %v1150_v50 = vld [vmem:[%s7620_s29 + $0x1c68] sm:$0xff]  ;;  %v1149_v54 = vld [vmem:[%s7620_s29 + $0x1c60] sm:$0xff] }
 0x117   : > { %4166 = vmatpush1.msra.mxu1 %v1161_v37  ;;  %4096 = vmatprep.subr.mxu0 %v1030_v38  ;;  %v1018_v55 = vld [vmem:[%s7620_s29 + $0x1848] sm:$0xff]  ;;  %v1017_v57 = vld [vmem:[%s7620_s29 + $0x1840] sm:$0xff] }
 0x118   : > { %4167 = vmatprep.subr.mxu1 %v1158_v40  ;;  %4097 = vmatpush1.msra.mxu0 %v1029_v41  ;;  %v1146_v56 = vld [vmem:[%s7620_s29 + $0x1c48] sm:$0xff]  ;;  %v1145_v58 = vld [vmem:[%s7620_s29 + $0x1c40] sm:$0xff] }
 0x119   : > { %4168 = vmatpush1.msra.mxu1 %v1157_v42  ;;  %4098 = vmatprep.subr.mxu0 %v1026_v43  ;;  %v1014_v59 = vld [vmem:[%s7620_s29 + $0x1828] sm:$0xff]  ;;  %v1013_v61 = vld [vmem:[%s7620_s29 + $0x1820] sm:$0xff] }
 0x11a   : > { %4169 = vmatprep.subr.mxu1 %v1154_v45  ;;  %4099 = vmatpush1.msra.mxu0 %v1025_v46  ;;  %v1142_v60 = vld [vmem:[%s7620_s29 + $0x1c28] sm:$0xff]  ;;  %v1141_v62 = vld [vmem:[%s7620_s29 + $0x1c20] sm:$0xff] }
 0x11b   : > { %4170 = vmatpush1.msra.mxu1 %v1153_v47  ;;  %4100 = vmatprep.subr.mxu0 %v1022_v48  ;;  %v1010_v0 = vld [vmem:[%s7620_s29 + $0x1808] sm:$0xff]  ;;  %v1009_v3 = vld [vmem:[%s7620_s29 + $0x1800] sm:$0xff] }
 0x11c   : > { %4171 = vmatprep.subr.mxu1 %v1150_v50  ;;  %4101 = vmatpush1.msra.mxu0 %v1021_v51  ;;  %v1138_v1 = vld [vmem:[%s7620_s29 + $0x1c08] sm:$0xff]  ;;  %v1137_v4 = vld [vmem:[%s7620_s29 + $0x1c00] sm:$0xff] }
 0x11d   : > { %4172 = vmatpush1.msra.mxu1 %v1149_v54  ;;  %4102 = vmatprep.subr.mxu0 %v1018_v55  ;;  %v1134_v5 = vld [vmem:[%s7620_s29 + $0x1be8] sm:$0xff]  ;;  %v1133_v7 = vld [vmem:[%s7620_s29 + $0x1be0] sm:$0xff] }
 0x11e   : > { %4173 = vmatprep.subr.mxu1 %v1146_v56  ;;  %4103 = vmatpush1.msra.mxu0 %v1017_v57  ;;  %v1262_v6 = vld [vmem:[%s7620_s29 + $0x1fe8] sm:$0xff]  ;;  %v1261_v8 = vld [vmem:[%s7620_s29 + $0x1fe0] sm:$0xff] }
 0x11f   : > { %4174 = vmatpush1.msra.mxu1 %v1145_v58  ;;  %4104 = vmatprep.subr.mxu0 %v1014_v59  ;;  %v1130_v10 = vld [vmem:[%s7620_s29 + $0x1bc8] sm:$0xff]  ;;  %v1129_v13 = vld [vmem:[%s7620_s29 + $0x1bc0] sm:$0xff] }
 0x120   : > { %4175 = vmatprep.subr.mxu1 %v1142_v60  ;;  %4105 = vmatpush1.msra.mxu0 %v1013_v61  ;;  %v1258_v12 = vld [vmem:[%s7620_s29 + $0x1fc8] sm:$0xff]  ;;  %v1257_v14 = vld [vmem:[%s7620_s29 + $0x1fc0] sm:$0xff]  ;;  %v231_v60 = vld [vmem:[%s7638_s22 + $0x18] sm:$0xff] }
 0x121   : > { %4176 = vmatpush1.msra.mxu1 %v1141_v62  ;;  %4106 = vmatprep.subr.mxu0 %v1010_v0  ;;  %v1126_v16 = vld [vmem:[%s7620_s29 + $0x1ba8] sm:$0xff]  ;;  %v1125_v18 = vld [vmem:[%s7620_s29 + $0x1ba0] sm:$0xff] }
 0x122   : > { %4177 = vmatprep.subr.mxu1 %v1138_v1  ;;  %4107 = vmatpush1.msra.mxu0 %v1009_v3  ;;  %v1254_v17 = vld [vmem:[%s7620_s29 + $0x1fa8] sm:$0xff]  ;;  %v1253_v19 = vld [vmem:[%s7620_s29 + $0x1fa0] sm:$0xff] }
 0x123   : > { %4178 = vmatpush1.msra.mxu1 %v1137_v4  ;;  %4108 = vmatprep.subr.mxu0 %v1134_v5  ;;  %v1122_v21 = vld [vmem:[%s7620_s29 + $0x1b88] sm:$0xff]  ;;  %v1121_v23 = vld [vmem:[%s7620_s29 + $0x1b80] sm:$0xff]  ;;  %v3441_v5 = vcombine.high %v231_v60, %v231_v60 }
 0x124   : > { %4179 = vmatprep.subr.mxu1 %v1262_v6  ;;  %4109 = vmatpush2.msra.mxu0 %v1133_v7  ;;  %v1250_v22 = vld [vmem:[%s7620_s29 + $0x1f88] sm:$0xff]  ;;  %v1249_v24 = vld [vmem:[%s7620_s29 + $0x1f80] sm:$0xff] }
 0x125   : > { %4180 = vmatpush2.msra.mxu1 %v1261_v8  ;;  %4110 = vmatprep.subr.mxu0 %v1130_v10  ;;  %v1118_v26 = vld [vmem:[%s7620_s29 + $0x1b68] sm:$0xff]  ;;  %v1117_v29 = vld [vmem:[%s7620_s29 + $0x1b60] sm:$0xff] }
 0x126   : > { %4181 = vmatprep.subr.mxu1 %v1258_v12  ;;  %4111 = vmatpush2.msra.mxu0 %v1129_v13  ;;  %v1246_v27 = vld [vmem:[%s7620_s29 + $0x1f68] sm:$0xff]  ;;  %v1245_v30 = vld [vmem:[%s7620_s29 + $0x1f60] sm:$0xff]  ;;  %v8205_v12 = vrot.slane %v231_v60, %v7753_v53 }
 0x127   : > { %4182 = vmatpush2.msra.mxu1 %v1257_v14  ;;  %4112 = vmatprep.subr.mxu0 %v1126_v16  ;;  %v1114_v31 = vld [vmem:[%s7620_s29 + $0x1b48] sm:$0xff]  ;;  %v1113_v33 = vld [vmem:[%s7620_s29 + $0x1b40] sm:$0xff] }
 0x128   : > { %4183 = vmatprep.subr.mxu1 %v1254_v17  ;;  %4113 = vmatpush2.msra.mxu0 %v1125_v18  ;;  %v1242_v32 = vld [vmem:[%s7620_s29 + $0x1f48] sm:$0xff]  ;;  %v1241_v34 = vld [vmem:[%s7620_s29 + $0x1f40] sm:$0xff]  ;;  %v8212_v18 = vrot.slane %v3441_v5, %v7753_v53 }
 0x129   : > { %4184 = vmatpush2.msra.mxu1 %v1253_v19  ;;  %4114 = vmatprep.subr.mxu0 %v1122_v21  ;;  %v1110_v35 = vld [vmem:[%s7620_s29 + $0x1b28] sm:$0xff]  ;;  %v1109_v37 = vld [vmem:[%s7620_s29 + $0x1b20] sm:$0xff] }
 0x12a   : > { %4185 = vmatprep.subr.mxu1 %v1250_v22  ;;  %4115 = vmatpush2.msra.mxu0 %v1121_v23  ;;  %v1238_v36 = vld [vmem:[%s7620_s29 + $0x1f28] sm:$0xff]  ;;  %v1237_v38 = vld [vmem:[%s7620_s29 + $0x1f20] sm:$0xff] }
 0x12b   : > { %4186 = vmatpush2.msra.mxu1 %v1249_v24  ;;  %4116 = vmatprep.subr.mxu0 %v1118_v26  ;;  %v1106_v40 = vld [vmem:[%s7620_s29 + $0x1b08] sm:$0xff]  ;;  %v1105_v42 = vld [vmem:[%s7620_s29 + $0x1b00] sm:$0xff]  ;;  %v8220_v24 = vcombine.high %v8205_v12, %v8205_v12 }
 0x12c   : > { %4187 = vmatprep.subr.mxu1 %v1246_v27  ;;  %4117 = vmatpush2.msra.mxu0 %v1117_v29  ;;  %v1234_v41 = vld [vmem:[%s7620_s29 + $0x1f08] sm:$0xff]  ;;  %v1233_v43 = vld [vmem:[%s7620_s29 + $0x1f00] sm:$0xff]  ;;  %v8226_v29 = vcombine.high %v8212_v18, %v8212_v18 }
 0x12d   : > { %4188 = vmatpush2.msra.mxu1 %v1245_v30  ;;  %4118 = vmatprep.subr.mxu0 %v1114_v31  ;;  %v1102_v45 = vld [vmem:[%s7620_s29 + $0x1ae8] sm:$0xff]  ;;  %v1101_v47 = vld [vmem:[%s7620_s29 + $0x1ae0] sm:$0xff] }
 0x12e   : > { %4189 = vmatprep.subr.mxu1 %v1242_v32  ;;  %4119 = vmatpush2.msra.mxu0 %v1113_v33  ;;  %v1230_v46 = vld [vmem:[%s7620_s29 + $0x1ee8] sm:$0xff]  ;;  %v1229_v48 = vld [vmem:[%s7620_s29 + $0x1ee0] sm:$0xff] }
 0x12f   : > { %4190 = vmatpush2.msra.mxu1 %v1241_v34  ;;  %4120 = vmatprep.subr.mxu0 %v1110_v35  ;;  %v1098_v50 = vld [vmem:[%s7620_s29 + $0x1ac8] sm:$0xff]  ;;  %v1097_v54 = vld [vmem:[%s7620_s29 + $0x1ac0] sm:$0xff] }
 0x130   : > { %4191 = vmatprep.subr.mxu1 %v1238_v36  ;;  %4121 = vmatpush2.msra.mxu0 %v1109_v37  ;;  %v1226_v51 = vld [vmem:[%s7620_s29 + $0x1ec8] sm:$0xff]  ;;  %v1225_v55 = vld [vmem:[%s7620_s29 + $0x1ec0] sm:$0xff] }
 0x131   : > { %4192 = vmatpush2.msra.mxu1 %v1237_v38  ;;  %4122 = vmatprep.subr.mxu0 %v1106_v40  ;;  %v1094_v56 = vld [vmem:[%s7620_s29 + $0x1aa8] sm:$0xff]  ;;  %v1093_v58 = vld [vmem:[%s7620_s29 + $0x1aa0] sm:$0xff] }
 0x132   : > { %4193 = vmatprep.subr.mxu1 %v1234_v41  ;;  %4123 = vmatpush2.msra.mxu0 %v1105_v42  ;;  %v1222_v57 = vld [vmem:[%s7620_s29 + $0x1ea8] sm:$0xff]  ;;  %v1221_v59 = vld [vmem:[%s7620_s29 + $0x1ea0] sm:$0xff] }
 0x133   : > { %4194 = vmatpush2.msra.mxu1 %v1233_v43  ;;  %4124 = vmatprep.subr.mxu0 %v1102_v45  ;;  %v1090_v61 = vld [vmem:[%s7620_s29 + $0x1a88] sm:$0xff]  ;;  %v1089_v0 = vld [vmem:[%s7620_s29 + $0x1a80] sm:$0xff] }
 0x134   : > { %4195 = vmatprep.subr.mxu1 %v1230_v46  ;;  %4125 = vmatpush2.msra.mxu0 %v1101_v47  ;;  %v1218_v62 = vld [vmem:[%s7620_s29 + $0x1e88] sm:$0xff]  ;;  %v1217_v1 = vld [vmem:[%s7620_s29 + $0x1e80] sm:$0xff] }
 0x135   : > { %4196 = vmatpush2.msra.mxu1 %v1229_v48  ;;  %4126 = vmatprep.subr.mxu0 %v1098_v50  ;;  %v1086_v3 = vld [vmem:[%s7620_s29 + $0x1a68] sm:$0xff]  ;;  %v1085_v6 = vld [vmem:[%s7620_s29 + $0x1a60] sm:$0xff] }
 0x136   : > { %4197 = vmatprep.subr.mxu1 %v1226_v51  ;;  %4127 = vmatpush2.msra.mxu0 %v1097_v54  ;;  %v1214_v4 = vld [vmem:[%s7620_s29 + $0x1e68] sm:$0xff]  ;;  %v1213_v7 = vld [vmem:[%s7620_s29 + $0x1e60] sm:$0xff] }
 0x137   : > { %4198 = vmatpush2.msra.mxu1 %v1225_v55  ;;  %4128 = vmatprep.subr.mxu0 %v1094_v56  ;;  %v1082_v8 = vld [vmem:[%s7620_s29 + $0x1a48] sm:$0xff]  ;;  %v1081_v13 = vld [vmem:[%s7620_s29 + $0x1a40] sm:$0xff] }
 0x138   : > { %4199 = vmatprep.subr.mxu1 %v1222_v57  ;;  %4129 = vmatpush2.msra.mxu0 %v1093_v58  ;;  %v1210_v10 = vld [vmem:[%s7620_s29 + $0x1e48] sm:$0xff]  ;;  %v1209_v14 = vld [vmem:[%s7620_s29 + $0x1e40] sm:$0xff] }
 0x139   : > { %4200 = vmatpush2.msra.mxu1 %v1221_v59  ;;  %4130 = vmatprep.subr.mxu0 %v1090_v61  ;;  %v1078_v16 = vld [vmem:[%s7620_s29 + $0x1a28] sm:$0xff]  ;;  %v1077_v19 = vld [vmem:[%s7620_s29 + $0x1a20] sm:$0xff] }
 0x13a   : > { %4201 = vmatprep.subr.mxu1 %v1218_v62  ;;  %4131 = vmatpush2.msra.mxu0 %v1089_v0  ;;  %v1206_v17 = vld [vmem:[%s7620_s29 + $0x1e28] sm:$0xff]  ;;  %v1205_v21 = vld [vmem:[%s7620_s29 + $0x1e20] sm:$0xff] }
 0x13b   : > { %4202 = vmatpush2.msra.mxu1 %v1217_v1  ;;  %4132 = vmatprep.subr.mxu0 %v1086_v3  ;;  %v1074_v22 = vld [vmem:[%s7620_s29 + $0x1a08] sm:$0xff]  ;;  %v1073_v26 = vld [vmem:[%s7620_s29 + $0x1a00] sm:$0xff] }
 0x13c   : > { %4203 = vmatprep.subr.mxu1 %v1214_v4  ;;  %4133 = vmatpush2.msra.mxu0 %v1085_v6  ;;  %v1202_v23 = vld [vmem:[%s7620_s29 + $0x1e08] sm:$0xff]  ;;  %v1201_v27 = vld [vmem:[%s7620_s29 + $0x1e00] sm:$0xff] }
 0x13d   : > { %4204 = vmatpush2.msra.mxu1 %v1213_v7  ;;  %4134 = vmatprep.subr.mxu0 %v1082_v8  ;;  %v1326_v30 = vld [vmem:[%s7620_s29 + $0x21e8] sm:$0xff]  ;;  %v1325_v32 = vld [vmem:[%s7620_s29 + $0x21e0] sm:$0xff] }
 0x13e   : > { %4205 = vmatprep.subr.mxu1 %v1210_v10  ;;  %4135 = vmatpush2.msra.mxu0 %v1081_v13  ;;  %v1454_v31 = vld [vmem:[%s7620_s29 + $0x25e8] sm:$0xff]  ;;  %v1453_v33 = vld [vmem:[%s7620_s29 + $0x25e0] sm:$0xff] }
 0x13f   : > { %4206 = vmatpush2.msra.mxu1 %v1209_v14  ;;  %4136 = vmatprep.subr.mxu0 %v1078_v16  ;;  %v1322_v34 = vld [vmem:[%s7620_s29 + $0x21c8] sm:$0xff]  ;;  %v1321_v36 = vld [vmem:[%s7620_s29 + $0x21c0] sm:$0xff] }
 0x140   : > { %4207 = vmatprep.subr.mxu1 %v1206_v17  ;;  %4137 = vmatpush2.msra.mxu0 %v1077_v19  ;;  %v1450_v35 = vld [vmem:[%s7620_s29 + $0x25c8] sm:$0xff]  ;;  %v1449_v37 = vld [vmem:[%s7620_s29 + $0x25c0] sm:$0xff] }
 0x141   : > { %4208 = vmatpush2.msra.mxu1 %v1205_v21  ;;  %4138 = vmatprep.subr.mxu0 %v1074_v22  ;;  %v1318_v38 = vld [vmem:[%s7620_s29 + $0x21a8] sm:$0xff]  ;;  %v1317_v41 = vld [vmem:[%s7620_s29 + $0x21a0] sm:$0xff] }
 0x142   : > { %4209 = vmatprep.subr.mxu1 %v1202_v23  ;;  %4139 = vmatpush2.msra.mxu0 %v1073_v26  ;;  %v1446_v40 = vld [vmem:[%s7620_s29 + $0x25a8] sm:$0xff]  ;;  %v1445_v42 = vld [vmem:[%s7620_s29 + $0x25a0] sm:$0xff] }
 0x143   : > { %4140 = vmatprep.mubr.f32.mxu0 %v8220_v24  ;;  %4210 = vmatpush2.msra.mxu1 %v1201_v27  ;;  %v1314_v43 = vld [vmem:[%s7620_s29 + $0x2188] sm:$0xff]  ;;  %v1313_v46 = vld [vmem:[%s7620_s29 + $0x2180] sm:$0xff] }
 0x144   : > { %4141 = vmatmul.mubr.f32.vlgmr.msra.gmra.mxu0 %v8205_v12  ;;  %4211 = vmatprep.mubr.f32.mxu1 %v8226_v29  ;;  %v1442_v45 = vld [vmem:[%s7620_s29 + $0x2588] sm:$0xff]  ;;  %v1441_v47 = vld [vmem:[%s7620_s29 + $0x2580] sm:$0xff] }
 0x145   : > { %4218 = vmatprep.subr.mxu0 %v1326_v30  ;;  %4289 = vmatprep.subr.mxu1 %v1454_v31  ;;  %v1310_v48 = vld [vmem:[%s7620_s29 + $0x2168] sm:$0xff]  ;;  %v1309_v51 = vld [vmem:[%s7620_s29 + $0x2160] sm:$0xff] }
 0x146   : > { %4212 = vmatmul.mubr.f32.vlgmr.msra.gmra.mxu1 %v8212_v18  ;;  %4219 = vmatpush1.msra.mxu0 %v1325_v32  ;;  %v1438_v50 = vld [vmem:[%s7620_s29 + $0x2568] sm:$0xff]  ;;  %v1437_v54 = vld [vmem:[%s7620_s29 + $0x2560] sm:$0xff] }
 0x147   : > { %4290 = vmatpush1.msra.mxu1 %v1453_v33  ;;  %4220 = vmatprep.subr.mxu0 %v1322_v34  ;;  %v1306_v55 = vld [vmem:[%s7620_s29 + $0x2148] sm:$0xff]  ;;  %v1305_v57 = vld [vmem:[%s7620_s29 + $0x2140] sm:$0xff] }
 0x148   : > { %4291 = vmatprep.subr.mxu1 %v1450_v35  ;;  %4221 = vmatpush1.msra.mxu0 %v1321_v36  ;;  %v1434_v56 = vld [vmem:[%s7620_s29 + $0x2548] sm:$0xff]  ;;  %v1433_v58 = vld [vmem:[%s7620_s29 + $0x2540] sm:$0xff] }
 0x149   : > { %4292 = vmatpush1.msra.mxu1 %v1449_v37  ;;  %4222 = vmatprep.subr.mxu0 %v1318_v38  ;;  %v1302_v59 = vld [vmem:[%s7620_s29 + $0x2128] sm:$0xff]  ;;  %v1301_v61 = vld [vmem:[%s7620_s29 + $0x2120] sm:$0xff] }
 0x14a   : > { %4293 = vmatprep.subr.mxu1 %v1446_v40  ;;  %4223 = vmatpush1.msra.mxu0 %v1317_v41  ;;  %v1430_v60 = vld [vmem:[%s7620_s29 + $0x2528] sm:$0xff]  ;;  %v1429_v62 = vld [vmem:[%s7620_s29 + $0x2520] sm:$0xff] }
 0x14b   : > { %4294 = vmatpush1.msra.mxu1 %v1445_v42  ;;  %4224 = vmatprep.subr.mxu0 %v1314_v43  ;;  %v1298_v0 = vld [vmem:[%s7620_s29 + $0x2108] sm:$0xff]  ;;  %v1297_v3 = vld [vmem:[%s7620_s29 + $0x2100] sm:$0xff] }
 0x14c   : > { %4295 = vmatprep.subr.mxu1 %v1442_v45  ;;  %4225 = vmatpush1.msra.mxu0 %v1313_v46  ;;  %v1426_v1 = vld [vmem:[%s7620_s29 + $0x2508] sm:$0xff]  ;;  %v1425_v4 = vld [vmem:[%s7620_s29 + $0x2500] sm:$0xff] }
 0x14d   : > { %4296 = vmatpush1.msra.mxu1 %v1441_v47  ;;  %4226 = vmatprep.subr.mxu0 %v1310_v48  ;;  %v1294_v5 = vld [vmem:[%s7620_s29 + $0x20e8] sm:$0xff]  ;;  %v1293_v7 = vld [vmem:[%s7620_s29 + $0x20e0] sm:$0xff] }
 0x14e   : > { %4297 = vmatprep.subr.mxu1 %v1438_v50  ;;  %4227 = vmatpush1.msra.mxu0 %v1309_v51  ;;  %v1422_v6 = vld [vmem:[%s7620_s29 + $0x24e8] sm:$0xff]  ;;  %v1421_v8 = vld [vmem:[%s7620_s29 + $0x24e0] sm:$0xff] }
 0x14f   : > { %4298 = vmatpush1.msra.mxu1 %v1437_v54  ;;  %4228 = vmatprep.subr.mxu0 %v1306_v55  ;;  %v1290_v10 = vld [vmem:[%s7620_s29 + $0x20c8] sm:$0xff]  ;;  %v1289_v14 = vld [vmem:[%s7620_s29 + $0x20c0] sm:$0xff] }
 0x150   : > { %4299 = vmatprep.subr.mxu1 %v1434_v56  ;;  %4229 = vmatpush1.msra.mxu0 %v1305_v57  ;;  %v1418_v13 = vld [vmem:[%s7620_s29 + $0x24c8] sm:$0xff]  ;;  %v1417_v16 = vld [vmem:[%s7620_s29 + $0x24c0] sm:$0xff] }
 0x151   : > { %4300 = vmatpush1.msra.mxu1 %v1433_v58  ;;  %4230 = vmatprep.subr.mxu0 %v1302_v59  ;;  %v1286_v17 = vld [vmem:[%s7620_s29 + $0x20a8] sm:$0xff]  ;;  %v1285_v21 = vld [vmem:[%s7620_s29 + $0x20a0] sm:$0xff] }
 0x152   : > { %4301 = vmatprep.subr.mxu1 %v1430_v60  ;;  %4231 = vmatpush1.msra.mxu0 %v1301_v61  ;;  %v1414_v19 = vld [vmem:[%s7620_s29 + $0x24a8] sm:$0xff]  ;;  %v1413_v22 = vld [vmem:[%s7620_s29 + $0x24a0] sm:$0xff] }
 0x153   : > { %4302 = vmatpush1.msra.mxu1 %v1429_v62  ;;  %4232 = vmatprep.subr.mxu0 %v1298_v0  ;;  %v1282_v23 = vld [vmem:[%s7620_s29 + $0x2088] sm:$0xff]  ;;  %v1281_v27 = vld [vmem:[%s7620_s29 + $0x2080] sm:$0xff] }
 0x154   : > { %4303 = vmatprep.subr.mxu1 %v1426_v1  ;;  %4233 = vmatpush1.msra.mxu0 %v1297_v3  ;;  %v1410_v26 = vld [vmem:[%s7620_s29 + $0x2488] sm:$0xff]  ;;  %v1409_v30 = vld [vmem:[%s7620_s29 + $0x2480] sm:$0xff] }
 0x155   : > { %4304 = vmatpush1.msra.mxu1 %v1425_v4  ;;  %4234 = vmatprep.subr.mxu0 %v1294_v5  ;;  %v1278_v31 = vld [vmem:[%s7620_s29 + $0x2068] sm:$0xff]  ;;  %v1277_v33 = vld [vmem:[%s7620_s29 + $0x2060] sm:$0xff] }
 0x156   : > { %4305 = vmatprep.subr.mxu1 %v1422_v6  ;;  %4235 = vmatpush1.msra.mxu0 %v1293_v7  ;;  %v1406_v32 = vld [vmem:[%s7620_s29 + $0x2468] sm:$0xff]  ;;  %v1405_v34 = vld [vmem:[%s7620_s29 + $0x2460] sm:$0xff] }
 0x157   : > { %4306 = vmatpush1.msra.mxu1 %v1421_v8  ;;  %4236 = vmatprep.subr.mxu0 %v1290_v10  ;;  %v1274_v35 = vld [vmem:[%s7620_s29 + $0x2048] sm:$0xff]  ;;  %v1273_v37 = vld [vmem:[%s7620_s29 + $0x2040] sm:$0xff] }
 0x158   : > { %4307 = vmatprep.subr.mxu1 %v1418_v13  ;;  %4237 = vmatpush1.msra.mxu0 %v1289_v14  ;;  %v1402_v36 = vld [vmem:[%s7620_s29 + $0x2448] sm:$0xff]  ;;  %v1401_v38 = vld [vmem:[%s7620_s29 + $0x2440] sm:$0xff] }
 0x159   : > { %4308 = vmatpush1.msra.mxu1 %v1417_v16  ;;  %4238 = vmatprep.subr.mxu0 %v1286_v17  ;;  %v1270_v40 = vld [vmem:[%s7620_s29 + $0x2028] sm:$0xff]  ;;  %v1269_v42 = vld [vmem:[%s7620_s29 + $0x2020] sm:$0xff] }
 0x15a   : > { %4309 = vmatprep.subr.mxu1 %v1414_v19  ;;  %4239 = vmatpush1.msra.mxu0 %v1285_v21  ;;  %v1398_v41 = vld [vmem:[%s7620_s29 + $0x2428] sm:$0xff]  ;;  %v1397_v43 = vld [vmem:[%s7620_s29 + $0x2420] sm:$0xff] }
 0x15b   : > { %4310 = vmatpush1.msra.mxu1 %v1413_v22  ;;  %4240 = vmatprep.subr.mxu0 %v1282_v23  ;;  %v1266_v45 = vld [vmem:[%s7620_s29 + $0x2008] sm:$0xff]  ;;  %v1265_v47 = vld [vmem:[%s7620_s29 + $0x2000] sm:$0xff] }
 0x15c   : > { %4311 = vmatprep.subr.mxu1 %v1410_v26  ;;  %4241 = vmatpush1.msra.mxu0 %v1281_v27  ;;  %v1394_v46 = vld [vmem:[%s7620_s29 + $0x2408] sm:$0xff]  ;;  %v1393_v48 = vld [vmem:[%s7620_s29 + $0x2400] sm:$0xff] }
 0x15d   : > { %4312 = vmatpush1.msra.mxu1 %v1409_v30  ;;  %4242 = vmatprep.subr.mxu0 %v1278_v31  ;;  %v1390_v50 = vld [vmem:[%s7620_s29 + $0x23e8] sm:$0xff]  ;;  %v1389_v54 = vld [vmem:[%s7620_s29 + $0x23e0] sm:$0xff] }
 0x15e   : > { %4313 = vmatprep.subr.mxu1 %v1406_v32  ;;  %4243 = vmatpush1.msra.mxu0 %v1277_v33  ;;  %v1518_v51 = vld [vmem:[%s7620_s29 + $0x27e8] sm:$0xff]  ;;  %v1517_v55 = vld [vmem:[%s7620_s29 + $0x27e0] sm:$0xff] }
 0x15f   : > { %4314 = vmatpush1.msra.mxu1 %v1405_v34  ;;  %4244 = vmatprep.subr.mxu0 %v1274_v35  ;;  %v1386_v56 = vld [vmem:[%s7620_s29 + $0x23c8] sm:$0xff]  ;;  %v1385_v58 = vld [vmem:[%s7620_s29 + $0x23c0] sm:$0xff] }
 0x160   : > { %4315 = vmatprep.subr.mxu1 %v1402_v36  ;;  %4245 = vmatpush1.msra.mxu0 %v1273_v37  ;;  %v1514_v57 = vld [vmem:[%s7620_s29 + $0x27c8] sm:$0xff]  ;;  %v1513_v59 = vld [vmem:[%s7620_s29 + $0x27c0] sm:$0xff] }
 0x161   : > { %4316 = vmatpush1.msra.mxu1 %v1401_v38  ;;  %4246 = vmatprep.subr.mxu0 %v1270_v40  ;;  %v1382_v60 = vld [vmem:[%s7620_s29 + $0x23a8] sm:$0xff]  ;;  %v1381_v62 = vld [vmem:[%s7620_s29 + $0x23a0] sm:$0xff] }
 0x162   : > { %4317 = vmatprep.subr.mxu1 %v1398_v41  ;;  %4247 = vmatpush1.msra.mxu0 %v1269_v42  ;;  %v1510_v61 = vld [vmem:[%s7620_s29 + $0x27a8] sm:$0xff]  ;;  %v1509_v0 = vld [vmem:[%s7620_s29 + $0x27a0] sm:$0xff] }
 0x163   : > { %4318 = vmatpush1.msra.mxu1 %v1397_v43  ;;  %4248 = vmatprep.subr.mxu0 %v1266_v45  ;;  %v1378_v1 = vld [vmem:[%s7620_s29 + $0x2388] sm:$0xff]  ;;  %v1377_v4 = vld [vmem:[%s7620_s29 + $0x2380] sm:$0xff] }
 0x164   : > { %4319 = vmatprep.subr.mxu1 %v1394_v46  ;;  %4249 = vmatpush1.msra.mxu0 %v1265_v47  ;;  %v1506_v3 = vld [vmem:[%s7620_s29 + $0x2788] sm:$0xff]  ;;  %v1505_v5 = vld [vmem:[%s7620_s29 + $0x2780] sm:$0xff] }
 0x165   : > { %4320 = vmatpush1.msra.mxu1 %v1393_v48  ;;  %4250 = vmatprep.subr.mxu0 %v1390_v50  ;;  %v1374_v6 = vld [vmem:[%s7620_s29 + $0x2368] sm:$0xff]  ;;  %v1373_v8 = vld [vmem:[%s7620_s29 + $0x2360] sm:$0xff] }
 0x166   : > { %4321 = vmatprep.subr.mxu1 %v1518_v51  ;;  %4251 = vmatpush2.msra.mxu0 %v1389_v54  ;;  %v1502_v7 = vld [vmem:[%s7620_s29 + $0x2768] sm:$0xff]  ;;  %v1501_v10 = vld [vmem:[%s7620_s29 + $0x2760] sm:$0xff] }
 0x167   : > { %4322 = vmatpush2.msra.mxu1 %v1517_v55  ;;  %4252 = vmatprep.subr.mxu0 %v1386_v56  ;;  %v1370_v13 = vld [vmem:[%s7620_s29 + $0x2348] sm:$0xff]  ;;  %v1369_v16 = vld [vmem:[%s7620_s29 + $0x2340] sm:$0xff] }
 0x168   : > { %4323 = vmatprep.subr.mxu1 %v1514_v57  ;;  %4253 = vmatpush2.msra.mxu0 %v1385_v58  ;;  %v1498_v14 = vld [vmem:[%s7620_s29 + $0x2748] sm:$0xff]  ;;  %v1497_v17 = vld [vmem:[%s7620_s29 + $0x2740] sm:$0xff] }
 0x169   : > { %4324 = vmatpush2.msra.mxu1 %v1513_v59  ;;  %4254 = vmatprep.subr.mxu0 %v1382_v60  ;;  %v1366_v19 = vld [vmem:[%s7620_s29 + $0x2328] sm:$0xff]  ;;  %v1365_v22 = vld [vmem:[%s7620_s29 + $0x2320] sm:$0xff] }
 0x16a   : > { %4325 = vmatprep.subr.mxu1 %v1510_v61  ;;  %4255 = vmatpush2.msra.mxu0 %v1381_v62  ;;  %v1494_v21 = vld [vmem:[%s7620_s29 + $0x2728] sm:$0xff]  ;;  %v1493_v23 = vld [vmem:[%s7620_s29 + $0x2720] sm:$0xff] }
 0x16b   : > { %4326 = vmatpush2.msra.mxu1 %v1509_v0  ;;  %4256 = vmatprep.subr.mxu0 %v1378_v1  ;;  %v1362_v26 = vld [vmem:[%s7620_s29 + $0x2308] sm:$0xff]  ;;  %v1361_v30 = vld [vmem:[%s7620_s29 + $0x2300] sm:$0xff] }
 0x16c   : > { %4327 = vmatprep.subr.mxu1 %v1506_v3  ;;  %4257 = vmatpush2.msra.mxu0 %v1377_v4  ;;  %v1490_v27 = vld [vmem:[%s7620_s29 + $0x2708] sm:$0xff]  ;;  %v1489_v31 = vld [vmem:[%s7620_s29 + $0x2700] sm:$0xff] }
 0x16d   : > { %4328 = vmatpush2.msra.mxu1 %v1505_v5  ;;  %4258 = vmatprep.subr.mxu0 %v1374_v6  ;;  %v1358_v32 = vld [vmem:[%s7620_s29 + $0x22e8] sm:$0xff]  ;;  %v1357_v34 = vld [vmem:[%s7620_s29 + $0x22e0] sm:$0xff] }
 0x16e   : > { %4329 = vmatprep.subr.mxu1 %v1502_v7  ;;  %4259 = vmatpush2.msra.mxu0 %v1373_v8  ;;  %v1486_v33 = vld [vmem:[%s7620_s29 + $0x26e8] sm:$0xff]  ;;  %v1485_v35 = vld [vmem:[%s7620_s29 + $0x26e0] sm:$0xff] }
 0x16f   : > { %4330 = vmatpush2.msra.mxu1 %v1501_v10  ;;  %4260 = vmatprep.subr.mxu0 %v1370_v13  ;;  %v1354_v36 = vld [vmem:[%s7620_s29 + $0x22c8] sm:$0xff]  ;;  %v1353_v38 = vld [vmem:[%s7620_s29 + $0x22c0] sm:$0xff] }
 0x170   : > { %4331 = vmatprep.subr.mxu1 %v1498_v14  ;;  %4261 = vmatpush2.msra.mxu0 %v1369_v16  ;;  %v1482_v37 = vld [vmem:[%s7620_s29 + $0x26c8] sm:$0xff]  ;;  %v1481_v40 = vld [vmem:[%s7620_s29 + $0x26c0] sm:$0xff] }
 0x171   : > { %4332 = vmatpush2.msra.mxu1 %v1497_v17  ;;  %4262 = vmatprep.subr.mxu0 %v1366_v19  ;;  %v1350_v41 = vld [vmem:[%s7620_s29 + $0x22a8] sm:$0xff]  ;;  %v1349_v43 = vld [vmem:[%s7620_s29 + $0x22a0] sm:$0xff] }
 0x172   : > { %4333 = vmatprep.subr.mxu1 %v1494_v21  ;;  %4263 = vmatpush2.msra.mxu0 %v1365_v22  ;;  %v1478_v42 = vld [vmem:[%s7620_s29 + $0x26a8] sm:$0xff]  ;;  %v1477_v45 = vld [vmem:[%s7620_s29 + $0x26a0] sm:$0xff] }
 0x173   : > { %4334 = vmatpush2.msra.mxu1 %v1493_v23  ;;  %4264 = vmatprep.subr.mxu0 %v1362_v26  ;;  %v232_v46 = vld [vmem:[%s7638_s22 + $0x20] sm:$0xff]  ;;  %v1346_v47 = vld [vmem:[%s7620_s29 + $0x2288] sm:$0xff] }
 0x174   : > { %4335 = vmatprep.subr.mxu1 %v1490_v27  ;;  %4265 = vmatpush2.msra.mxu0 %v1361_v30  ;;  %v1474_v48 = vld [vmem:[%s7620_s29 + $0x2688] sm:$0xff]  ;;  %v1345_v50 = vld [vmem:[%s7620_s29 + $0x2280] sm:$0xff]  ;;  %v3458_v56 = vcombine.high %v232_v46, %v232_v46  ;;  %v8352_v61 = vrot.slane %v232_v46, %v7753_v53 }
 0x175   : > { %4336 = vmatpush2.msra.mxu1 %v1489_v31  ;;  %4266 = vmatprep.subr.mxu0 %v1358_v32  ;;  %v1473_v51 = vld [vmem:[%s7620_s29 + $0x2680] sm:$0xff]  ;;  %v1342_v54 = vld [vmem:[%s7620_s29 + $0x2268] sm:$0xff] }
 0x176   : > { %4337 = vmatprep.subr.mxu1 %v1486_v33  ;;  %4267 = vmatpush2.msra.mxu0 %v1357_v34  ;;  %v1470_v55 = vld [vmem:[%s7620_s29 + $0x2668] sm:$0xff]  ;;  %v1341_v57 = vld [vmem:[%s7620_s29 + $0x2260] sm:$0xff]  ;;  %v8359_v4 = vrot.slane %v3458_v56, %v7753_v53  ;;  %v8367_v10 = vcombine.high %v8352_v61, %v8352_v61 }
 0x177   : > { %4338 = vmatpush2.msra.mxu1 %v1485_v35  ;;  %4268 = vmatprep.subr.mxu0 %v1354_v36  ;;  %v1469_v58 = vld [vmem:[%s7620_s29 + $0x2660] sm:$0xff]  ;;  %v1338_v59 = vld [vmem:[%s7620_s29 + $0x2248] sm:$0xff] }
 0x178   : > { %4339 = vmatprep.subr.mxu1 %v1482_v37  ;;  %4269 = vmatpush2.msra.mxu0 %v1353_v38  ;;  %v1466_v60 = vld [vmem:[%s7620_s29 + $0x2648] sm:$0xff]  ;;  %v1337_v62 = vld [vmem:[%s7620_s29 + $0x2240] sm:$0xff]  ;;  %v8373_v16 = vcombine.high %v8359_v4, %v8359_v4 }
 0x179   : > { %4340 = vmatpush2.msra.mxu1 %v1481_v40  ;;  %4270 = vmatprep.subr.mxu0 %v1350_v41  ;;  %v1465_v0 = vld [vmem:[%s7620_s29 + $0x2640] sm:$0xff]  ;;  %v1334_v1 = vld [vmem:[%s7620_s29 + $0x2228] sm:$0xff] }
 0x17a   : > { %4341 = vmatprep.subr.mxu1 %v1478_v42  ;;  %4271 = vmatpush2.msra.mxu0 %v1349_v43  ;;  %v1462_v3 = vld [vmem:[%s7620_s29 + $0x2628] sm:$0xff]  ;;  %v1333_v5 = vld [vmem:[%s7620_s29 + $0x2220] sm:$0xff] }
 0x17b   : > { %4342 = vmatpush2.msra.mxu1 %v1477_v45  ;;  %4272 = vmatprep.subr.mxu0 %v1346_v47  ;;  %v1461_v6 = vld [vmem:[%s7620_s29 + $0x2620] sm:$0xff]  ;;  %v1330_v7 = vld [vmem:[%s7620_s29 + $0x2208] sm:$0xff] }
 0x17c   : > { %4343 = vmatprep.subr.mxu1 %v1474_v48  ;;  %4273 = vmatpush2.msra.mxu0 %v1345_v50  ;;  %v1458_v8 = vld [vmem:[%s7620_s29 + $0x2608] sm:$0xff]  ;;  %v1329_v13 = vld [vmem:[%s7620_s29 + $0x2200] sm:$0xff] }
 0x17d   : > { %4344 = vmatpush2.msra.mxu1 %v1473_v51  ;;  %4274 = vmatprep.subr.mxu0 %v1342_v54  ;;  %v1457_v14 = vld [vmem:[%s7620_s29 + $0x2600] sm:$0xff]  ;;  %v1582_v17 = vld [vmem:[%s7620_s29 + $0x29e8] sm:$0xff] }
 0x17e   : > { %4345 = vmatprep.subr.mxu1 %v1470_v55  ;;  %4275 = vmatpush2.msra.mxu0 %v1341_v57  ;;  %v1710_v19 = vld [vmem:[%s7620_s29 + $0x2de8] sm:$0xff]  ;;  %v1581_v21 = vld [vmem:[%s7620_s29 + $0x29e0] sm:$0xff] }
 0x17f   : > { %4346 = vmatpush2.msra.mxu1 %v1469_v58  ;;  %4276 = vmatprep.subr.mxu0 %v1338_v59  ;;  %v1709_v22 = vld [vmem:[%s7620_s29 + $0x2de0] sm:$0xff]  ;;  %v1578_v23 = vld [vmem:[%s7620_s29 + $0x29c8] sm:$0xff] }
 0x180   : > { %4347 = vmatprep.subr.mxu1 %v1466_v60  ;;  %4277 = vmatpush2.msra.mxu0 %v1337_v62  ;;  %v1706_v26 = vld [vmem:[%s7620_s29 + $0x2dc8] sm:$0xff]  ;;  %v1577_v27 = vld [vmem:[%s7620_s29 + $0x29c0] sm:$0xff] }
 0x181   : > { %4348 = vmatpush2.msra.mxu1 %v1465_v0  ;;  %4278 = vmatprep.subr.mxu0 %v1334_v1  ;;  %v1705_v30 = vld [vmem:[%s7620_s29 + $0x2dc0] sm:$0xff]  ;;  %v1574_v31 = vld [vmem:[%s7620_s29 + $0x29a8] sm:$0xff] }
 0x182   : > { %4349 = vmatprep.subr.mxu1 %v1462_v3  ;;  %4279 = vmatpush2.msra.mxu0 %v1333_v5  ;;  %v1702_v32 = vld [vmem:[%s7620_s29 + $0x2da8] sm:$0xff]  ;;  %v1573_v33 = vld [vmem:[%s7620_s29 + $0x29a0] sm:$0xff] }
 0x183   : > { %4350 = vmatpush2.msra.mxu1 %v1461_v6  ;;  %4280 = vmatprep.subr.mxu0 %v1330_v7  ;;  %v1701_v34 = vld [vmem:[%s7620_s29 + $0x2da0] sm:$0xff]  ;;  %v1570_v35 = vld [vmem:[%s7620_s29 + $0x2988] sm:$0xff] }
 0x184   : > { %4351 = vmatprep.subr.mxu1 %v1458_v8  ;;  %4281 = vmatpush2.msra.mxu0 %v1329_v13  ;;  %v1698_v36 = vld [vmem:[%s7620_s29 + $0x2d88] sm:$0xff]  ;;  %v1569_v37 = vld [vmem:[%s7620_s29 + $0x2980] sm:$0xff] }
 0x185   : > { %4282 = vmatprep.mubr.f32.mxu0 %v8367_v10  ;;  %4352 = vmatpush2.msra.mxu1 %v1457_v14  ;;  %v1697_v38 = vld [vmem:[%s7620_s29 + $0x2d80] sm:$0xff]  ;;  %v1566_v40 = vld [vmem:[%s7620_s29 + $0x2968] sm:$0xff] }
 0x186   : > { %4283 = vmatmul.mubr.f32.vlgmr.msra.gmra.mxu0 %v8352_v61  ;;  %4353 = vmatprep.mubr.f32.mxu1 %v8373_v16  ;;  %v1694_v41 = vld [vmem:[%s7620_s29 + $0x2d68] sm:$0xff]  ;;  %v1565_v42 = vld [vmem:[%s7620_s29 + $0x2960] sm:$0xff] }
 0x187   : > { %4360 = vmatprep.subr.mxu0 %v1582_v17  ;;  %4431 = vmatprep.subr.mxu1 %v1710_v19  ;;  %v1693_v43 = vld [vmem:[%s7620_s29 + $0x2d60] sm:$0xff]  ;;  %v1562_v45 = vld [vmem:[%s7620_s29 + $0x2948] sm:$0xff] }
 0x188   : > { %4354 = vmatmul.mubr.f32.vlgmr.msra.gmra.mxu1 %v8359_v4  ;;  %4361 = vmatpush1.msra.mxu0 %v1581_v21  ;;  %v1690_v46 = vld [vmem:[%s7620_s29 + $0x2d48] sm:$0xff]  ;;  %v1561_v47 = vld [vmem:[%s7620_s29 + $0x2940] sm:$0xff] }
 0x189   : > { %4432 = vmatpush1.msra.mxu1 %v1709_v22  ;;  %4362 = vmatprep.subr.mxu0 %v1578_v23  ;;  %v1689_v48 = vld [vmem:[%s7620_s29 + $0x2d40] sm:$0xff]  ;;  %v1558_v50 = vld [vmem:[%s7620_s29 + $0x2928] sm:$0xff] }
 0x18a   : > { %4433 = vmatprep.subr.mxu1 %v1706_v26  ;;  %4363 = vmatpush1.msra.mxu0 %v1577_v27  ;;  %v1686_v51 = vld [vmem:[%s7620_s29 + $0x2d28] sm:$0xff]  ;;  %v1557_v54 = vld [vmem:[%s7620_s29 + $0x2920] sm:$0xff] }
 0x18b   : > { %4434 = vmatpush1.msra.mxu1 %v1705_v30  ;;  %4364 = vmatprep.subr.mxu0 %v1574_v31  ;;  %v1685_v55 = vld [vmem:[%s7620_s29 + $0x2d20] sm:$0xff]  ;;  %v1554_v56 = vld [vmem:[%s7620_s29 + $0x2908] sm:$0xff] }
 0x18c   : > { %4435 = vmatprep.subr.mxu1 %v1702_v32  ;;  %4365 = vmatpush1.msra.mxu0 %v1573_v33  ;;  %v1682_v57 = vld [vmem:[%s7620_s29 + $0x2d08] sm:$0xff]  ;;  %v1553_v58 = vld [vmem:[%s7620_s29 + $0x2900] sm:$0xff] }
 0x18d   : > { %4436 = vmatpush1.msra.mxu1 %v1701_v34  ;;  %4366 = vmatprep.subr.mxu0 %v1570_v35  ;;  %v1681_v59 = vld [vmem:[%s7620_s29 + $0x2d00] sm:$0xff]  ;;  %v1550_v60 = vld [vmem:[%s7620_s29 + $0x28e8] sm:$0xff] }
 0x18e   : > { %4437 = vmatprep.subr.mxu1 %v1698_v36  ;;  %4367 = vmatpush1.msra.mxu0 %v1569_v37  ;;  %v1678_v62 = vld [vmem:[%s7620_s29 + $0x2ce8] sm:$0xff]  ;;  %v1549_v0 = vld [vmem:[%s7620_s29 + $0x28e0] sm:$0xff] }
 0x18f   : > { %4438 = vmatpush1.msra.mxu1 %v1697_v38  ;;  %4368 = vmatprep.subr.mxu0 %v1566_v40  ;;  %v1677_v1 = vld [vmem:[%s7620_s29 + $0x2ce0] sm:$0xff]  ;;  %v1546_v3 = vld [vmem:[%s7620_s29 + $0x28c8] sm:$0xff] }
 0x190   : > { %4439 = vmatprep.subr.mxu1 %v1694_v41  ;;  %4369 = vmatpush1.msra.mxu0 %v1565_v42  ;;  %v1674_v5 = vld [vmem:[%s7620_s29 + $0x2cc8] sm:$0xff]  ;;  %v1545_v6 = vld [vmem:[%s7620_s29 + $0x28c0] sm:$0xff] }
 0x191   : > { %4440 = vmatpush1.msra.mxu1 %v1693_v43  ;;  %4370 = vmatprep.subr.mxu0 %v1562_v45  ;;  %v1673_v7 = vld [vmem:[%s7620_s29 + $0x2cc0] sm:$0xff]  ;;  %v1542_v8 = vld [vmem:[%s7620_s29 + $0x28a8] sm:$0xff] }
 0x192   : > { %4441 = vmatprep.subr.mxu1 %v1690_v46  ;;  %4371 = vmatpush1.msra.mxu0 %v1561_v47  ;;  %v1670_v13 = vld [vmem:[%s7620_s29 + $0x2ca8] sm:$0xff]  ;;  %v1541_v14 = vld [vmem:[%s7620_s29 + $0x28a0] sm:$0xff] }
 0x193   : > { %4442 = vmatpush1.msra.mxu1 %v1689_v48  ;;  %4372 = vmatprep.subr.mxu0 %v1558_v50  ;;  %v1669_v17 = vld [vmem:[%s7620_s29 + $0x2ca0] sm:$0xff]  ;;  %v1538_v19 = vld [vmem:[%s7620_s29 + $0x2888] sm:$0xff] }
 0x194   : > { %4443 = vmatprep.subr.mxu1 %v1686_v51  ;;  %4373 = vmatpush1.msra.mxu0 %v1557_v54  ;;  %v1666_v21 = vld [vmem:[%s7620_s29 + $0x2c88] sm:$0xff]  ;;  %v1537_v22 = vld [vmem:[%s7620_s29 + $0x2880] sm:$0xff] }
 0x195   : > { %4444 = vmatpush1.msra.mxu1 %v1685_v55  ;;  %4374 = vmatprep.subr.mxu0 %v1554_v56  ;;  %v1665_v23 = vld [vmem:[%s7620_s29 + $0x2c80] sm:$0xff]  ;;  %v1534_v26 = vld [vmem:[%s7620_s29 + $0x2868] sm:$0xff] }
 0x196   : > { %4445 = vmatprep.subr.mxu1 %v1682_v57  ;;  %4375 = vmatpush1.msra.mxu0 %v1553_v58  ;;  %v1662_v27 = vld [vmem:[%s7620_s29 + $0x2c68] sm:$0xff]  ;;  %v1533_v30 = vld [vmem:[%s7620_s29 + $0x2860] sm:$0xff] }
 0x197   : > { %4446 = vmatpush1.msra.mxu1 %v1681_v59  ;;  %4376 = vmatprep.subr.mxu0 %v1550_v60  ;;  %v1661_v31 = vld [vmem:[%s7620_s29 + $0x2c60] sm:$0xff]  ;;  %v1530_v32 = vld [vmem:[%s7620_s29 + $0x2848] sm:$0xff] }
 0x198   : > { %4447 = vmatprep.subr.mxu1 %v1678_v62  ;;  %4377 = vmatpush1.msra.mxu0 %v1549_v0  ;;  %v1658_v33 = vld [vmem:[%s7620_s29 + $0x2c48] sm:$0xff]  ;;  %v1529_v34 = vld [vmem:[%s7620_s29 + $0x2840] sm:$0xff] }
 0x199   : > { %4448 = vmatpush1.msra.mxu1 %v1677_v1  ;;  %4378 = vmatprep.subr.mxu0 %v1546_v3  ;;  %v1657_v35 = vld [vmem:[%s7620_s29 + $0x2c40] sm:$0xff]  ;;  %v1526_v36 = vld [vmem:[%s7620_s29 + $0x2828] sm:$0xff] }
 0x19a   : > { %4449 = vmatprep.subr.mxu1 %v1674_v5  ;;  %4379 = vmatpush1.msra.mxu0 %v1545_v6  ;;  %v1654_v37 = vld [vmem:[%s7620_s29 + $0x2c28] sm:$0xff]  ;;  %v1525_v38 = vld [vmem:[%s7620_s29 + $0x2820] sm:$0xff] }
 0x19b   : > { %4450 = vmatpush1.msra.mxu1 %v1673_v7  ;;  %4380 = vmatprep.subr.mxu0 %v1542_v8  ;;  %v1653_v40 = vld [vmem:[%s7620_s29 + $0x2c20] sm:$0xff]  ;;  %v1522_v41 = vld [vmem:[%s7620_s29 + $0x2808] sm:$0xff] }
 0x19c   : > { %4451 = vmatprep.subr.mxu1 %v1670_v13  ;;  %4381 = vmatpush1.msra.mxu0 %v1541_v14  ;;  %v1650_v42 = vld [vmem:[%s7620_s29 + $0x2c08] sm:$0xff]  ;;  %v1521_v43 = vld [vmem:[%s7620_s29 + $0x2800] sm:$0xff] }
 0x19d   : > { %4452 = vmatpush1.msra.mxu1 %v1669_v17  ;;  %4382 = vmatprep.subr.mxu0 %v1538_v19  ;;  %v1649_v45 = vld [vmem:[%s7620_s29 + $0x2c00] sm:$0xff]  ;;  %v1646_v46 = vld [vmem:[%s7620_s29 + $0x2be8] sm:$0xff] }
 0x19e   : > { %4453 = vmatprep.subr.mxu1 %v1666_v21  ;;  %4383 = vmatpush1.msra.mxu0 %v1537_v22  ;;  %v1774_v47 = vld [vmem:[%s7620_s29 + $0x2fe8] sm:$0xff]  ;;  %v1645_v48 = vld [vmem:[%s7620_s29 + $0x2be0] sm:$0xff] }
 0x19f   : > { %4454 = vmatpush1.msra.mxu1 %v1665_v23  ;;  %4384 = vmatprep.subr.mxu0 %v1534_v26  ;;  %v1773_v50 = vld [vmem:[%s7620_s29 + $0x2fe0] sm:$0xff]  ;;  %v1642_v51 = vld [vmem:[%s7620_s29 + $0x2bc8] sm:$0xff] }
 0x1a0   : > { %4455 = vmatprep.subr.mxu1 %v1662_v27  ;;  %4385 = vmatpush1.msra.mxu0 %v1533_v30  ;;  %v1770_v54 = vld [vmem:[%s7620_s29 + $0x2fc8] sm:$0xff]  ;;  %v1641_v55 = vld [vmem:[%s7620_s29 + $0x2bc0] sm:$0xff] }
 0x1a1   : > { %4456 = vmatpush1.msra.mxu1 %v1661_v31  ;;  %4386 = vmatprep.subr.mxu0 %v1530_v32  ;;  %v1769_v56 = vld [vmem:[%s7620_s29 + $0x2fc0] sm:$0xff]  ;;  %v1638_v57 = vld [vmem:[%s7620_s29 + $0x2ba8] sm:$0xff] }
 0x1a2   : > { %4457 = vmatprep.subr.mxu1 %v1658_v33  ;;  %4387 = vmatpush1.msra.mxu0 %v1529_v34  ;;  %v1766_v58 = vld [vmem:[%s7620_s29 + $0x2fa8] sm:$0xff]  ;;  %v1637_v59 = vld [vmem:[%s7620_s29 + $0x2ba0] sm:$0xff] }
 0x1a3   : > { %4458 = vmatpush1.msra.mxu1 %v1657_v35  ;;  %4388 = vmatprep.subr.mxu0 %v1526_v36  ;;  %v1765_v60 = vld [vmem:[%s7620_s29 + $0x2fa0] sm:$0xff]  ;;  %v1634_v62 = vld [vmem:[%s7620_s29 + $0x2b88] sm:$0xff] }
 0x1a4   : > { %4459 = vmatprep.subr.mxu1 %v1654_v37  ;;  %4389 = vmatpush1.msra.mxu0 %v1525_v38  ;;  %v1762_v0 = vld [vmem:[%s7620_s29 + $0x2f88] sm:$0xff]  ;;  %v1633_v1 = vld [vmem:[%s7620_s29 + $0x2b80] sm:$0xff] }
 0x1a5   : > { %4460 = vmatpush1.msra.mxu1 %v1653_v40  ;;  %4390 = vmatprep.subr.mxu0 %v1522_v41  ;;  %v1761_v3 = vld [vmem:[%s7620_s29 + $0x2f80] sm:$0xff]  ;;  %v1630_v5 = vld [vmem:[%s7620_s29 + $0x2b68] sm:$0xff] }
 0x1a6   : > { %4461 = vmatprep.subr.mxu1 %v1650_v42  ;;  %4391 = vmatpush1.msra.mxu0 %v1521_v43  ;;  %v1758_v6 = vld [vmem:[%s7620_s29 + $0x2f68] sm:$0xff]  ;;  %v1629_v7 = vld [vmem:[%s7620_s29 + $0x2b60] sm:$0xff] }
 0x1a7   : > { %4462 = vmatpush1.msra.mxu1 %v1649_v45  ;;  %4392 = vmatprep.subr.mxu0 %v1646_v46  ;;  %v1757_v8 = vld [vmem:[%s7620_s29 + $0x2f60] sm:$0xff]  ;;  %v1626_v13 = vld [vmem:[%s7620_s29 + $0x2b48] sm:$0xff] }
 0x1a8   : > { %4463 = vmatprep.subr.mxu1 %v1774_v47  ;;  %4393 = vmatpush2.msra.mxu0 %v1645_v48  ;;  %v1754_v14 = vld [vmem:[%s7620_s29 + $0x2f48] sm:$0xff]  ;;  %v1625_v17 = vld [vmem:[%s7620_s29 + $0x2b40] sm:$0xff] }
 0x1a9   : > { %4464 = vmatpush2.msra.mxu1 %v1773_v50  ;;  %4394 = vmatprep.subr.mxu0 %v1642_v51  ;;  %v1753_v19 = vld [vmem:[%s7620_s29 + $0x2f40] sm:$0xff]  ;;  %v1622_v21 = vld [vmem:[%s7620_s29 + $0x2b28] sm:$0xff] }
 0x1aa   : > { %4465 = vmatprep.subr.mxu1 %v1770_v54  ;;  %4395 = vmatpush2.msra.mxu0 %v1641_v55  ;;  %v1750_v22 = vld [vmem:[%s7620_s29 + $0x2f28] sm:$0xff]  ;;  %v1621_v23 = vld [vmem:[%s7620_s29 + $0x2b20] sm:$0xff] }
 0x1ab   : > { %4466 = vmatpush2.msra.mxu1 %v1769_v56  ;;  %4396 = vmatprep.subr.mxu0 %v1638_v57  ;;  %v1749_v26 = vld [vmem:[%s7620_s29 + $0x2f20] sm:$0xff]  ;;  %v1618_v27 = vld [vmem:[%s7620_s29 + $0x2b08] sm:$0xff] }
 0x1ac   : > { %4467 = vmatprep.subr.mxu1 %v1766_v58  ;;  %4397 = vmatpush2.msra.mxu0 %v1637_v59  ;;  %v1746_v30 = vld [vmem:[%s7620_s29 + $0x2f08] sm:$0xff]  ;;  %v1617_v31 = vld [vmem:[%s7620_s29 + $0x2b00] sm:$0xff] }
 0x1ad   : > { %4468 = vmatpush2.msra.mxu1 %v1765_v60  ;;  %4398 = vmatprep.subr.mxu0 %v1634_v62  ;;  %v1745_v32 = vld [vmem:[%s7620_s29 + $0x2f00] sm:$0xff]  ;;  %v1614_v33 = vld [vmem:[%s7620_s29 + $0x2ae8] sm:$0xff] }
 0x1ae   : > { %4469 = vmatprep.subr.mxu1 %v1762_v0  ;;  %4399 = vmatpush2.msra.mxu0 %v1633_v1  ;;  %v1742_v34 = vld [vmem:[%s7620_s29 + $0x2ee8] sm:$0xff]  ;;  %v1613_v35 = vld [vmem:[%s7620_s29 + $0x2ae0] sm:$0xff] }
 0x1af   : > { %4470 = vmatpush2.msra.mxu1 %v1761_v3  ;;  %4400 = vmatprep.subr.mxu0 %v1630_v5  ;;  %v1741_v36 = vld [vmem:[%s7620_s29 + $0x2ee0] sm:$0xff]  ;;  %v1610_v37 = vld [vmem:[%s7620_s29 + $0x2ac8] sm:$0xff] }
 0x1b0   : > { %4471 = vmatprep.subr.mxu1 %v1758_v6  ;;  %4401 = vmatpush2.msra.mxu0 %v1629_v7  ;;  %v1738_v38 = vld [vmem:[%s7620_s29 + $0x2ec8] sm:$0xff]  ;;  %v1609_v40 = vld [vmem:[%s7620_s29 + $0x2ac0] sm:$0xff] }
 0x1b1   : > { %4472 = vmatpush2.msra.mxu1 %v1757_v8  ;;  %4402 = vmatprep.subr.mxu0 %v1626_v13  ;;  %v1737_v41 = vld [vmem:[%s7620_s29 + $0x2ec0] sm:$0xff]  ;;  %v1606_v42 = vld [vmem:[%s7620_s29 + $0x2aa8] sm:$0xff] }
 0x1b2   : > { %4473 = vmatprep.subr.mxu1 %v1754_v14  ;;  %4403 = vmatpush2.msra.mxu0 %v1625_v17  ;;  %v1734_v43 = vld [vmem:[%s7620_s29 + $0x2ea8] sm:$0xff]  ;;  %v1605_v45 = vld [vmem:[%s7620_s29 + $0x2aa0] sm:$0xff] }
 0x1b3   : > { %4474 = vmatpush2.msra.mxu1 %v1753_v19  ;;  %4404 = vmatprep.subr.mxu0 %v1622_v21  ;;  %v1733_v46 = vld [vmem:[%s7620_s29 + $0x2ea0] sm:$0xff]  ;;  %v233_v47 = vld [vmem:[%s7638_s22 + $0x28] sm:$0xff] }
 0x1b4   : > { %4475 = vmatprep.subr.mxu1 %v1750_v22  ;;  %4405 = vmatpush2.msra.mxu0 %v1621_v23  ;;  %v1602_v48 = vld [vmem:[%s7620_s29 + $0x2a88] sm:$0xff]  ;;  %v1601_v51 = vld [vmem:[%s7620_s29 + $0x2a80] sm:$0xff]  ;;  %v3475_v57 = vcombine.high %v233_v47, %v233_v47  ;;  %v8499_v0 = vrot.slane %v233_v47, %v7753_v53 }
 0x1b5   : > { %4476 = vmatpush2.msra.mxu1 %v1749_v26  ;;  %4406 = vmatprep.subr.mxu0 %v1618_v27  ;;  %v1730_v50 = vld [vmem:[%s7620_s29 + $0x2e88] sm:$0xff]  ;;  %v1729_v54 = vld [vmem:[%s7620_s29 + $0x2e80] sm:$0xff] }
 0x1b6   : > { %4477 = vmatprep.subr.mxu1 %v1746_v30  ;;  %4407 = vmatpush2.msra.mxu0 %v1617_v31  ;;  %v1598_v55 = vld [vmem:[%s7620_s29 + $0x2a68] sm:$0xff]  ;;  %v1597_v58 = vld [vmem:[%s7620_s29 + $0x2a60] sm:$0xff]  ;;  %v8506_v7 = vrot.slane %v3475_v57, %v7753_v53  ;;  %v8514_v19 = vcombine.high %v8499_v0, %v8499_v0 }
 0x1b7   : > { %4478 = vmatpush2.msra.mxu1 %v1745_v32  ;;  %4408 = vmatprep.subr.mxu0 %v1614_v33  ;;  %v1726_v56 = vld [vmem:[%s7620_s29 + $0x2e68] sm:$0xff]  ;;  %v1725_v59 = vld [vmem:[%s7620_s29 + $0x2e60] sm:$0xff] }
 0x1b8   : > { %4479 = vmatprep.subr.mxu1 %v1742_v34  ;;  %4409 = vmatpush2.msra.mxu0 %v1613_v35  ;;  %v1594_v60 = vld [vmem:[%s7620_s29 + $0x2a48] sm:$0xff]  ;;  %v1593_v1 = vld [vmem:[%s7620_s29 + $0x2a40] sm:$0xff]  ;;  %v8520_v23 = vcombine.high %v8506_v7, %v8506_v7 }
 0x1b9   : > { %4480 = vmatpush2.msra.mxu1 %v1741_v36  ;;  %4410 = vmatprep.subr.mxu0 %v1610_v37  ;;  %v1722_v62 = vld [vmem:[%s7620_s29 + $0x2e48] sm:$0xff]  ;;  %v1721_v3 = vld [vmem:[%s7620_s29 + $0x2e40] sm:$0xff] }
 0x1ba   : > { %4481 = vmatprep.subr.mxu1 %v1738_v38  ;;  %4411 = vmatpush2.msra.mxu0 %v1609_v40  ;;  %v1590_v5 = vld [vmem:[%s7620_s29 + $0x2a28] sm:$0xff]  ;;  %v1589_v8 = vld [vmem:[%s7620_s29 + $0x2a20] sm:$0xff] }
 0x1bb   : > { %4482 = vmatpush2.msra.mxu1 %v1737_v41  ;;  %4412 = vmatprep.subr.mxu0 %v1606_v42  ;;  %v1718_v6 = vld [vmem:[%s7620_s29 + $0x2e28] sm:$0xff]  ;;  %v1717_v13 = vld [vmem:[%s7620_s29 + $0x2e20] sm:$0xff] }
 0x1bc   : > { %4483 = vmatprep.subr.mxu1 %v1734_v43  ;;  %4413 = vmatpush2.msra.mxu0 %v1605_v45  ;;  %v1586_v14 = vld [vmem:[%s7620_s29 + $0x2a08] sm:$0xff]  ;;  %v1585_v21 = vld [vmem:[%s7620_s29 + $0x2a00] sm:$0xff] }
 0x1bd   : > { %4484 = vmatpush2.msra.mxu1 %v1733_v46  ;;  %4414 = vmatprep.subr.mxu0 %v1602_v48  ;;  %v1714_v17 = vld [vmem:[%s7620_s29 + $0x2e08] sm:$0xff]  ;;  %v1713_v22 = vld [vmem:[%s7620_s29 + $0x2e00] sm:$0xff] }
 0x1be   : > { %4485 = vmatprep.subr.mxu1 %v1730_v50  ;;  %4415 = vmatpush2.msra.mxu0 %v1601_v51  ;;  %v1838_v26 = vld [vmem:[%s7620_s29 + $0x31e8] sm:$0xff]  ;;  %v1837_v30 = vld [vmem:[%s7620_s29 + $0x31e0] sm:$0xff] }
 0x1bf   : > { %4486 = vmatpush2.msra.mxu1 %v1729_v54  ;;  %4416 = vmatprep.subr.mxu0 %v1598_v55  ;;  %v1966_v27 = vld [vmem:[%s7620_s29 + $0x35e8] sm:$0xff]  ;;  %v1965_v31 = vld [vmem:[%s7620_s29 + $0x35e0] sm:$0xff] }
 0x1c0   : > { %4487 = vmatprep.subr.mxu1 %v1726_v56  ;;  %4417 = vmatpush2.msra.mxu0 %v1597_v58  ;;  %v1834_v32 = vld [vmem:[%s7620_s29 + $0x31c8] sm:$0xff]  ;;  %v1833_v34 = vld [vmem:[%s7620_s29 + $0x31c0] sm:$0xff] }
 0x1c1   : > { %4488 = vmatpush2.msra.mxu1 %v1725_v59  ;;  %4418 = vmatprep.subr.mxu0 %v1594_v60  ;;  %v1962_v33 = vld [vmem:[%s7620_s29 + $0x35c8] sm:$0xff]  ;;  %v1961_v35 = vld [vmem:[%s7620_s29 + $0x35c0] sm:$0xff] }
 0x1c2   : > { %4489 = vmatprep.subr.mxu1 %v1722_v62  ;;  %4419 = vmatpush2.msra.mxu0 %v1593_v1  ;;  %v1830_v36 = vld [vmem:[%s7620_s29 + $0x31a8] sm:$0xff]  ;;  %v1829_v38 = vld [vmem:[%s7620_s29 + $0x31a0] sm:$0xff] }
 0x1c3   : > { %4490 = vmatpush2.msra.mxu1 %v1721_v3  ;;  %4420 = vmatprep.subr.mxu0 %v1590_v5  ;;  %v1958_v37 = vld [vmem:[%s7620_s29 + $0x35a8] sm:$0xff]  ;;  %v1957_v40 = vld [vmem:[%s7620_s29 + $0x35a0] sm:$0xff] }
 0x1c4   : > { %4491 = vmatprep.subr.mxu1 %v1718_v6  ;;  %4421 = vmatpush2.msra.mxu0 %v1589_v8  ;;  %v1826_v41 = vld [vmem:[%s7620_s29 + $0x3188] sm:$0xff]  ;;  %v1825_v43 = vld [vmem:[%s7620_s29 + $0x3180] sm:$0xff] }
 0x1c5   : > { %4492 = vmatpush2.msra.mxu1 %v1717_v13  ;;  %4422 = vmatprep.subr.mxu0 %v1586_v14  ;;  %v1954_v42 = vld [vmem:[%s7620_s29 + $0x3588] sm:$0xff]  ;;  %v1953_v45 = vld [vmem:[%s7620_s29 + $0x3580] sm:$0xff] }
 0x1c6   : > { %4493 = vmatprep.subr.mxu1 %v1714_v17  ;;  %4423 = vmatpush2.msra.mxu0 %v1585_v21  ;;  %v1822_v46 = vld [vmem:[%s7620_s29 + $0x3168] sm:$0xff]  ;;  %v1821_v48 = vld [vmem:[%s7620_s29 + $0x3160] sm:$0xff] }
 0x1c7   : > { %4424 = vmatprep.mubr.f32.mxu0 %v8514_v19  ;;  %4494 = vmatpush2.msra.mxu1 %v1713_v22  ;;  %v1950_v47 = vld [vmem:[%s7620_s29 + $0x3568] sm:$0xff]  ;;  %v1949_v50 = vld [vmem:[%s7620_s29 + $0x3560] sm:$0xff] }
 0x1c8   : > { %4425 = vmatmul.mubr.f32.vlgmr.msra.gmra.mxu0 %v8499_v0  ;;  %4495 = vmatprep.mubr.f32.mxu1 %v8520_v23  ;;  %v1818_v51 = vld [vmem:[%s7620_s29 + $0x3148] sm:$0xff]  ;;  %v1817_v55 = vld [vmem:[%s7620_s29 + $0x3140] sm:$0xff] }
 0x1c9   : > { %4502 = vmatprep.subr.mxu0 %v1838_v26  ;;  %4573 = vmatprep.subr.mxu1 %v1966_v27  ;;  %v1946_v54 = vld [vmem:[%s7620_s29 + $0x3548] sm:$0xff]  ;;  %v1945_v56 = vld [vmem:[%s7620_s29 + $0x3540] sm:$0xff] }
 0x1ca   : > { %4496 = vmatmul.mubr.f32.vlgmr.msra.gmra.mxu1 %v8506_v7  ;;  %4503 = vmatpush1.msra.mxu0 %v1837_v30  ;;  %v1814_v57 = vld [vmem:[%s7620_s29 + $0x3128] sm:$0xff]  ;;  %v1813_v59 = vld [vmem:[%s7620_s29 + $0x3120] sm:$0xff] }
 0x1cb   : > { %4574 = vmatpush1.msra.mxu1 %v1965_v31  ;;  %4504 = vmatprep.subr.mxu0 %v1834_v32  ;;  %v1942_v58 = vld [vmem:[%s7620_s29 + $0x3528] sm:$0xff]  ;;  %v1941_v60 = vld [vmem:[%s7620_s29 + $0x3520] sm:$0xff] }
 0x1cc   : > { %4575 = vmatprep.subr.mxu1 %v1962_v33  ;;  %4505 = vmatpush1.msra.mxu0 %v1833_v34  ;;  %v1810_v62 = vld [vmem:[%s7620_s29 + $0x3108] sm:$0xff]  ;;  %v1809_v3 = vld [vmem:[%s7620_s29 + $0x3100] sm:$0xff] }
 0x1cd   : > { %4576 = vmatpush1.msra.mxu1 %v1961_v35  ;;  %4506 = vmatprep.subr.mxu0 %v1830_v36  ;;  %v1938_v1 = vld [vmem:[%s7620_s29 + $0x3508] sm:$0xff]  ;;  %v1937_v5 = vld [vmem:[%s7620_s29 + $0x3500] sm:$0xff] }
 0x1ce   : > { %4577 = vmatprep.subr.mxu1 %v1958_v37  ;;  %4507 = vmatpush1.msra.mxu0 %v1829_v38  ;;  %v1806_v6 = vld [vmem:[%s7620_s29 + $0x30e8] sm:$0xff]  ;;  %v1805_v13 = vld [vmem:[%s7620_s29 + $0x30e0] sm:$0xff] }
 0x1cf   : > { %4578 = vmatpush1.msra.mxu1 %v1957_v40  ;;  %4508 = vmatprep.subr.mxu0 %v1826_v41  ;;  %v1934_v8 = vld [vmem:[%s7620_s29 + $0x34e8] sm:$0xff]  ;;  %v1933_v14 = vld [vmem:[%s7620_s29 + $0x34e0] sm:$0xff] }
 0x1d0   : > { %4579 = vmatprep.subr.mxu1 %v1954_v42  ;;  %4509 = vmatpush1.msra.mxu0 %v1825_v43  ;;  %v1802_v17 = vld [vmem:[%s7620_s29 + $0x30c8] sm:$0xff]  ;;  %v1801_v22 = vld [vmem:[%s7620_s29 + $0x30c0] sm:$0xff] }
 0x1d1   : > { %4580 = vmatpush1.msra.mxu1 %v1953_v45  ;;  %4510 = vmatprep.subr.mxu0 %v1822_v46  ;;  %v1930_v21 = vld [vmem:[%s7620_s29 + $0x34c8] sm:$0xff]  ;;  %v1929_v26 = vld [vmem:[%s7620_s29 + $0x34c0] sm:$0xff] }
 0x1d2   : > { %4581 = vmatprep.subr.mxu1 %v1950_v47  ;;  %4511 = vmatpush1.msra.mxu0 %v1821_v48  ;;  %v1798_v27 = vld [vmem:[%s7620_s29 + $0x30a8] sm:$0xff]  ;;  %v1797_v31 = vld [vmem:[%s7620_s29 + $0x30a0] sm:$0xff] }
 0x1d3   : > { %4582 = vmatpush1.msra.mxu1 %v1949_v50  ;;  %4512 = vmatprep.subr.mxu0 %v1818_v51  ;;  %v1926_v30 = vld [vmem:[%s7620_s29 + $0x34a8] sm:$0xff]  ;;  %v1925_v32 = vld [vmem:[%s7620_s29 + $0x34a0] sm:$0xff] }
 0x1d4   : > { %4583 = vmatprep.subr.mxu1 %v1946_v54  ;;  %4513 = vmatpush1.msra.mxu0 %v1817_v55  ;;  %v1794_v33 = vld [vmem:[%s7620_s29 + $0x3088] sm:$0xff]  ;;  %v1793_v35 = vld [vmem:[%s7620_s29 + $0x3080] sm:$0xff] }
 0x1d5   : > { %4584 = vmatpush1.msra.mxu1 %v1945_v56  ;;  %4514 = vmatprep.subr.mxu0 %v1814_v57  ;;  %v1922_v34 = vld [vmem:[%s7620_s29 + $0x3488] sm:$0xff]  ;;  %v1921_v36 = vld [vmem:[%s7620_s29 + $0x3480] sm:$0xff] }
 0x1d6   : > { %4585 = vmatprep.subr.mxu1 %v1942_v58  ;;  %4515 = vmatpush1.msra.mxu0 %v1813_v59  ;;  %v1790_v37 = vld [vmem:[%s7620_s29 + $0x3068] sm:$0xff]  ;;  %v1789_v40 = vld [vmem:[%s7620_s29 + $0x3060] sm:$0xff] }
 0x1d7   : > { %4586 = vmatpush1.msra.mxu1 %v1941_v60  ;;  %4516 = vmatprep.subr.mxu0 %v1810_v62  ;;  %v1918_v38 = vld [vmem:[%s7620_s29 + $0x3468] sm:$0xff]  ;;  %v1917_v41 = vld [vmem:[%s7620_s29 + $0x3460] sm:$0xff] }
 0x1d8   : > { %4587 = vmatprep.subr.mxu1 %v1938_v1  ;;  %4517 = vmatpush1.msra.mxu0 %v1809_v3  ;;  %v1786_v42 = vld [vmem:[%s7620_s29 + $0x3048] sm:$0xff]  ;;  %v1785_v45 = vld [vmem:[%s7620_s29 + $0x3040] sm:$0xff] }
 0x1d9   : > { %4588 = vmatpush1.msra.mxu1 %v1937_v5  ;;  %4518 = vmatprep.subr.mxu0 %v1806_v6  ;;  %v1914_v43 = vld [vmem:[%s7620_s29 + $0x3448] sm:$0xff]  ;;  %v1913_v46 = vld [vmem:[%s7620_s29 + $0x3440] sm:$0xff] }
 0x1da   : > { %4589 = vmatprep.subr.mxu1 %v1934_v8  ;;  %4519 = vmatpush1.msra.mxu0 %v1805_v13  ;;  %v1782_v47 = vld [vmem:[%s7620_s29 + $0x3028] sm:$0xff]  ;;  %v1781_v50 = vld [vmem:[%s7620_s29 + $0x3020] sm:$0xff] }
 0x1db   : > { %4590 = vmatpush1.msra.mxu1 %v1933_v14  ;;  %4520 = vmatprep.subr.mxu0 %v1802_v17  ;;  %v1910_v48 = vld [vmem:[%s7620_s29 + $0x3428] sm:$0xff]  ;;  %v1909_v51 = vld [vmem:[%s7620_s29 + $0x3420] sm:$0xff] }
 0x1dc   : > { %4591 = vmatprep.subr.mxu1 %v1930_v21  ;;  %4521 = vmatpush1.msra.mxu0 %v1801_v22  ;;  %v1778_v54 = vld [vmem:[%s7620_s29 + $0x3008] sm:$0xff]  ;;  %v1777_v56 = vld [vmem:[%s7620_s29 + $0x3000] sm:$0xff] }
 0x1dd   : > { %4592 = vmatpush1.msra.mxu1 %v1929_v26  ;;  %4522 = vmatprep.subr.mxu0 %v1798_v27  ;;  %v1906_v55 = vld [vmem:[%s7620_s29 + $0x3408] sm:$0xff]  ;;  %v1905_v57 = vld [vmem:[%s7620_s29 + $0x3400] sm:$0xff] }
 0x1de   : > { %4593 = vmatprep.subr.mxu1 %v1926_v30  ;;  %4523 = vmatpush1.msra.mxu0 %v1797_v31  ;;  %v1902_v58 = vld [vmem:[%s7620_s29 + $0x33e8] sm:$0xff]  ;;  %v1901_v60 = vld [vmem:[%s7620_s29 + $0x33e0] sm:$0xff] }
 0x1df   : > { %4594 = vmatpush1.msra.mxu1 %v1925_v32  ;;  %4524 = vmatprep.subr.mxu0 %v1794_v33  ;;  %v2030_v59 = vld [vmem:[%s7620_s29 + $0x37e8] sm:$0xff]  ;;  %v2029_v62 = vld [vmem:[%s7620_s29 + $0x37e0] sm:$0xff] }
 0x1e0   : > { %4595 = vmatprep.subr.mxu1 %v1922_v34  ;;  %4525 = vmatpush1.msra.mxu0 %v1793_v35  ;;  %v1898_v1 = vld [vmem:[%s7620_s29 + $0x33c8] sm:$0xff]  ;;  %v1897_v5 = vld [vmem:[%s7620_s29 + $0x33c0] sm:$0xff] }
 0x1e1   : > { %4596 = vmatpush1.msra.mxu1 %v1921_v36  ;;  %4526 = vmatprep.subr.mxu0 %v1790_v37  ;;  %v2026_v3 = vld [vmem:[%s7620_s29 + $0x37c8] sm:$0xff]  ;;  %v2025_v6 = vld [vmem:[%s7620_s29 + $0x37c0] sm:$0xff] }
 0x1e2   : > { %4597 = vmatprep.subr.mxu1 %v1918_v38  ;;  %4527 = vmatpush1.msra.mxu0 %v1789_v40  ;;  %v1894_v8 = vld [vmem:[%s7620_s29 + $0x33a8] sm:$0xff]  ;;  %v1893_v14 = vld [vmem:[%s7620_s29 + $0x33a0] sm:$0xff] }
 0x1e3   : > { %4598 = vmatpush1.msra.mxu1 %v1917_v41  ;;  %4528 = vmatprep.subr.mxu0 %v1786_v42  ;;  %v2022_v13 = vld [vmem:[%s7620_s29 + $0x37a8] sm:$0xff]  ;;  %v2021_v17 = vld [vmem:[%s7620_s29 + $0x37a0] sm:$0xff] }
 0x1e4   : > { %4599 = vmatprep.subr.mxu1 %v1914_v43  ;;  %4529 = vmatpush1.msra.mxu0 %v1785_v45  ;;  %v1890_v21 = vld [vmem:[%s7620_s29 + $0x3388] sm:$0xff]  ;;  %v1889_v26 = vld [vmem:[%s7620_s29 + $0x3380] sm:$0xff] }
 0x1e5   : > { %4600 = vmatpush1.msra.mxu1 %v1913_v46  ;;  %4530 = vmatprep.subr.mxu0 %v1782_v47  ;;  %v2018_v22 = vld [vmem:[%s7620_s29 + $0x3788] sm:$0xff]  ;;  %v2017_v27 = vld [vmem:[%s7620_s29 + $0x3780] sm:$0xff] }
 0x1e6   : > { %4601 = vmatprep.subr.mxu1 %v1910_v48  ;;  %4531 = vmatpush1.msra.mxu0 %v1781_v50  ;;  %v1886_v30 = vld [vmem:[%s7620_s29 + $0x3368] sm:$0xff]  ;;  %v1885_v32 = vld [vmem:[%s7620_s29 + $0x3360] sm:$0xff] }
 0x1e7   : > { %4602 = vmatpush1.msra.mxu1 %v1909_v51  ;;  %4532 = vmatprep.subr.mxu0 %v1778_v54  ;;  %v2014_v31 = vld [vmem:[%s7620_s29 + $0x3768] sm:$0xff]  ;;  %v2013_v33 = vld [vmem:[%s7620_s29 + $0x3760] sm:$0xff] }
 0x1e8   : > { %4603 = vmatprep.subr.mxu1 %v1906_v55  ;;  %4533 = vmatpush1.msra.mxu0 %v1777_v56  ;;  %v1882_v34 = vld [vmem:[%s7620_s29 + $0x3348] sm:$0xff]  ;;  %v1881_v36 = vld [vmem:[%s7620_s29 + $0x3340] sm:$0xff] }
 0x1e9   : > { %4604 = vmatpush1.msra.mxu1 %v1905_v57  ;;  %4534 = vmatprep.subr.mxu0 %v1902_v58  ;;  %v2010_v35 = vld [vmem:[%s7620_s29 + $0x3748] sm:$0xff]  ;;  %v2009_v37 = vld [vmem:[%s7620_s29 + $0x3740] sm:$0xff] }
 0x1ea   : > { %4605 = vmatprep.subr.mxu1 %v2030_v59  ;;  %4535 = vmatpush2.msra.mxu0 %v1901_v60  ;;  %v1878_v38 = vld [vmem:[%s7620_s29 + $0x3328] sm:$0xff]  ;;  %v1877_v41 = vld [vmem:[%s7620_s29 + $0x3320] sm:$0xff] }
 0x1eb   : > { %4606 = vmatpush2.msra.mxu1 %v2029_v62  ;;  %4536 = vmatprep.subr.mxu0 %v1898_v1  ;;  %v2006_v40 = vld [vmem:[%s7620_s29 + $0x3728] sm:$0xff]  ;;  %v2005_v42 = vld [vmem:[%s7620_s29 + $0x3720] sm:$0xff] }
 0x1ec   : > { %4607 = vmatprep.subr.mxu1 %v2026_v3  ;;  %4537 = vmatpush2.msra.mxu0 %v1897_v5  ;;  %v1874_v43 = vld [vmem:[%s7620_s29 + $0x3308] sm:$0xff]  ;;  %v1873_v46 = vld [vmem:[%s7620_s29 + $0x3300] sm:$0xff]  ;;  %v234_v3 = vld [vmem:[%s7638_s22 + $0x30] sm:$0xff] }
 0x1ed   : > { %4608 = vmatpush2.msra.mxu1 %v2025_v6  ;;  %4538 = vmatprep.subr.mxu0 %v1894_v8  ;;  %v2002_v45 = vld [vmem:[%s7620_s29 + $0x3708] sm:$0xff]  ;;  %v2001_v47 = vld [vmem:[%s7620_s29 + $0x3700] sm:$0xff] }
 0x1ee   : > { %4609 = vmatprep.subr.mxu1 %v2022_v13  ;;  %4539 = vmatpush2.msra.mxu0 %v1893_v14  ;;  %v1870_v48 = vld [vmem:[%s7620_s29 + $0x32e8] sm:$0xff]  ;;  %v1869_v51 = vld [vmem:[%s7620_s29 + $0x32e0] sm:$0xff] }
 0x1ef   : > { %4610 = vmatpush2.msra.mxu1 %v2021_v17  ;;  %4540 = vmatprep.subr.mxu0 %v1890_v21  ;;  %v1998_v50 = vld [vmem:[%s7620_s29 + $0x36e8] sm:$0xff]  ;;  %v1997_v54 = vld [vmem:[%s7620_s29 + $0x36e0] sm:$0xff]  ;;  %v3492_v21 = vcombine.high %v234_v3, %v234_v3 }
 0x1f0   : > { %4611 = vmatprep.subr.mxu1 %v2018_v22  ;;  %4541 = vmatpush2.msra.mxu0 %v1889_v26  ;;  %v1866_v55 = vld [vmem:[%s7620_s29 + $0x32c8] sm:$0xff]  ;;  %v1865_v57 = vld [vmem:[%s7620_s29 + $0x32c0] sm:$0xff] }
 0x1f1   : > { %4612 = vmatpush2.msra.mxu1 %v2017_v27  ;;  %4542 = vmatprep.subr.mxu0 %v1886_v30  ;;  %v1994_v56 = vld [vmem:[%s7620_s29 + $0x36c8] sm:$0xff]  ;;  %v1993_v58 = vld [vmem:[%s7620_s29 + $0x36c0] sm:$0xff] }
 0x1f2   : > { %4613 = vmatprep.subr.mxu1 %v2014_v31  ;;  %4543 = vmatpush2.msra.mxu0 %v1885_v32  ;;  %v1862_v59 = vld [vmem:[%s7620_s29 + $0x32a8] sm:$0xff]  ;;  %v1861_v62 = vld [vmem:[%s7620_s29 + $0x32a0] sm:$0xff]  ;;  %v8646_v31 = vrot.slane %v234_v3, %v7753_v53 }
 0x1f3   : > { %4614 = vmatpush2.msra.mxu1 %v2013_v33  ;;  %4544 = vmatprep.subr.mxu0 %v1882_v34  ;;  %v1990_v60 = vld [vmem:[%s7620_s29 + $0x36a8] sm:$0xff]  ;;  %v1989_v1 = vld [vmem:[%s7620_s29 + $0x36a0] sm:$0xff] }
 0x1f4   : > { %4615 = vmatprep.subr.mxu1 %v2010_v35  ;;  %4545 = vmatpush2.msra.mxu0 %v1881_v36  ;;  %v1858_v5 = vld [vmem:[%s7620_s29 + $0x3288] sm:$0xff]  ;;  %v1857_v8 = vld [vmem:[%s7620_s29 + $0x3280] sm:$0xff]  ;;  %v8653_v36 = vrot.slane %v3492_v21, %v7753_v53 }
 0x1f5   : > { %4616 = vmatpush2.msra.mxu1 %v2009_v37  ;;  %4546 = vmatprep.subr.mxu0 %v1878_v38  ;;  %v1986_v6 = vld [vmem:[%s7620_s29 + $0x3688] sm:$0xff]  ;;  %v1985_v13 = vld [vmem:[%s7620_s29 + $0x3680] sm:$0xff] }
 0x1f6   : > { %4617 = vmatprep.subr.mxu1 %v2006_v40  ;;  %4547 = vmatpush2.msra.mxu0 %v1877_v41  ;;  %v1854_v14 = vld [vmem:[%s7620_s29 + $0x3268] sm:$0xff]  ;;  %v1853_v22 = vld [vmem:[%s7620_s29 + $0x3260] sm:$0xff] }
 0x1f7   : > { %4618 = vmatpush2.msra.mxu1 %v2005_v42  ;;  %4548 = vmatprep.subr.mxu0 %v1874_v43  ;;  %v1982_v17 = vld [vmem:[%s7620_s29 + $0x3668] sm:$0xff]  ;;  %v1981_v26 = vld [vmem:[%s7620_s29 + $0x3660] sm:$0xff]  ;;  %v8661_v42 = vcombine.high %v8646_v31, %v8646_v31 }
 0x1f8   : > { %4619 = vmatprep.subr.mxu1 %v2002_v45  ;;  %4549 = vmatpush2.msra.mxu0 %v1873_v46  ;;  %v1850_v27 = vld [vmem:[%s7620_s29 + $0x3248] sm:$0xff]  ;;  %v1849_v32 = vld [vmem:[%s7620_s29 + $0x3240] sm:$0xff]  ;;  %v8667_v46 = vcombine.high %v8653_v36, %v8653_v36 }
 0x1f9   : > { %4620 = vmatpush2.msra.mxu1 %v2001_v47  ;;  %4550 = vmatprep.subr.mxu0 %v1870_v48  ;;  %v1978_v30 = vld [vmem:[%s7620_s29 + $0x3648] sm:$0xff]  ;;  %v1977_v33 = vld [vmem:[%s7620_s29 + $0x3640] sm:$0xff] }
 0x1fa   : > { %4621 = vmatprep.subr.mxu1 %v1998_v50  ;;  %4551 = vmatpush2.msra.mxu0 %v1869_v51  ;;  %v1846_v34 = vld [vmem:[%s7620_s29 + $0x3228] sm:$0xff]  ;;  %v1845_v37 = vld [vmem:[%s7620_s29 + $0x3220] sm:$0xff] }
 0x1fb   : > { %4622 = vmatpush2.msra.mxu1 %v1997_v54  ;;  %4552 = vmatprep.subr.mxu0 %v1866_v55  ;;  %v1974_v35 = vld [vmem:[%s7620_s29 + $0x3628] sm:$0xff]  ;;  %v1973_v38 = vld [vmem:[%s7620_s29 + $0x3620] sm:$0xff] }
 0x1fc   : > { %4623 = vmatprep.subr.mxu1 %v1994_v56  ;;  %4553 = vmatpush2.msra.mxu0 %v1865_v57  ;;  %v1842_v40 = vld [vmem:[%s7620_s29 + $0x3208] sm:$0xff]  ;;  %v1841_v43 = vld [vmem:[%s7620_s29 + $0x3200] sm:$0xff] }
 0x1fd   : > { %4624 = vmatpush2.msra.mxu1 %v1993_v58  ;;  %4554 = vmatprep.subr.mxu0 %v1862_v59  ;;  %v1970_v41 = vld [vmem:[%s7620_s29 + $0x3608] sm:$0xff]  ;;  %v1969_v45 = vld [vmem:[%s7620_s29 + $0x3600] sm:$0xff] }
 0x1fe   : > { %4625 = vmatprep.subr.mxu1 %v1990_v60  ;;  %4555 = vmatpush2.msra.mxu0 %v1861_v62  ;;  %v2094_v47 = vld [vmem:[%s7620_s29 + $0x39e8] sm:$0xff]  ;;  %v2093_v50 = vld [vmem:[%s7620_s29 + $0x39e0] sm:$0xff] }
 0x1ff   : > { %4626 = vmatpush2.msra.mxu1 %v1989_v1  ;;  %4556 = vmatprep.subr.mxu0 %v1858_v5  ;;  %v2222_v48 = vld [vmem:[%s7620_s29 + $0x3de8] sm:$0xff]  ;;  %v2221_v51 = vld [vmem:[%s7620_s29 + $0x3de0] sm:$0xff] }
 0x200   : > { %4627 = vmatprep.subr.mxu1 %v1986_v6  ;;  %4557 = vmatpush2.msra.mxu0 %v1857_v8  ;;  %v2090_v54 = vld [vmem:[%s7620_s29 + $0x39c8] sm:$0xff]  ;;  %v2089_v56 = vld [vmem:[%s7620_s29 + $0x39c0] sm:$0xff] }
 0x201   : > { %4628 = vmatpush2.msra.mxu1 %v1985_v13  ;;  %4558 = vmatprep.subr.mxu0 %v1854_v14  ;;  %v2218_v55 = vld [vmem:[%s7620_s29 + $0x3dc8] sm:$0xff]  ;;  %v2217_v57 = vld [vmem:[%s7620_s29 + $0x3dc0] sm:$0xff] }
 0x202   : > { %4629 = vmatprep.subr.mxu1 %v1982_v17  ;;  %4559 = vmatpush2.msra.mxu0 %v1853_v22  ;;  %v2086_v58 = vld [vmem:[%s7620_s29 + $0x39a8] sm:$0xff]  ;;  %v2085_v60 = vld [vmem:[%s7620_s29 + $0x39a0] sm:$0xff] }
 0x203   : > { %4630 = vmatpush2.msra.mxu1 %v1981_v26  ;;  %4560 = vmatprep.subr.mxu0 %v1850_v27  ;;  %v2214_v59 = vld [vmem:[%s7620_s29 + $0x3da8] sm:$0xff]  ;;  %v2213_v62 = vld [vmem:[%s7620_s29 + $0x3da0] sm:$0xff] }
 0x204   : > { %4631 = vmatprep.subr.mxu1 %v1978_v30  ;;  %4561 = vmatpush2.msra.mxu0 %v1849_v32  ;;  %v2082_v1 = vld [vmem:[%s7620_s29 + $0x3988] sm:$0xff]  ;;  %v2081_v5 = vld [vmem:[%s7620_s29 + $0x3980] sm:$0xff] }
 0x205   : > { %4632 = vmatpush2.msra.mxu1 %v1977_v33  ;;  %4562 = vmatprep.subr.mxu0 %v1846_v34  ;;  %v2210_v3 = vld [vmem:[%s7620_s29 + $0x3d88] sm:$0xff]  ;;  %v2209_v6 = vld [vmem:[%s7620_s29 + $0x3d80] sm:$0xff] }
 0x206   : > { %4633 = vmatprep.subr.mxu1 %v1974_v35  ;;  %4563 = vmatpush2.msra.mxu0 %v1845_v37  ;;  %v2078_v8 = vld [vmem:[%s7620_s29 + $0x3968] sm:$0xff]  ;;  %v2077_v14 = vld [vmem:[%s7620_s29 + $0x3960] sm:$0xff] }
 0x207   : > { %4634 = vmatpush2.msra.mxu1 %v1973_v38  ;;  %4564 = vmatprep.subr.mxu0 %v1842_v40  ;;  %v2206_v13 = vld [vmem:[%s7620_s29 + $0x3d68] sm:$0xff]  ;;  %v2205_v17 = vld [vmem:[%s7620_s29 + $0x3d60] sm:$0xff] }
 0x208   : > { %4635 = vmatprep.subr.mxu1 %v1970_v41  ;;  %4565 = vmatpush2.msra.mxu0 %v1841_v43  ;;  %v2074_v21 = vld [vmem:[%s7620_s29 + $0x3948] sm:$0xff]  ;;  %v2073_v26 = vld [vmem:[%s7620_s29 + $0x3940] sm:$0xff] }
 0x209   : > { %4566 = vmatprep.mubr.f32.mxu0 %v8661_v42  ;;  %4636 = vmatpush2.msra.mxu1 %v1969_v45  ;;  %v2202_v22 = vld [vmem:[%s7620_s29 + $0x3d48] sm:$0xff]  ;;  %v2201_v27 = vld [vmem:[%s7620_s29 + $0x3d40] sm:$0xff] }
 0x20a   : > { %4567 = vmatmul.mubr.f32.vlgmr.msra.gmra.mxu0 %v8646_v31  ;;  %4637 = vmatprep.mubr.f32.mxu1 %v8667_v46  ;;  %v2070_v30 = vld [vmem:[%s7620_s29 + $0x3928] sm:$0xff]  ;;  %v2069_v33 = vld [vmem:[%s7620_s29 + $0x3920] sm:$0xff] }
 0x20b   : > { %4644 = vmatprep.subr.mxu0 %v2094_v47  ;;  %4715 = vmatprep.subr.mxu1 %v2222_v48  ;;  %v2198_v32 = vld [vmem:[%s7620_s29 + $0x3d28] sm:$0xff]  ;;  %v2197_v34 = vld [vmem:[%s7620_s29 + $0x3d20] sm:$0xff] }
 0x20c   : > { %4638 = vmatmul.mubr.f32.vlgmr.msra.gmra.mxu1 %v8653_v36  ;;  %4645 = vmatpush1.msra.mxu0 %v2093_v50  ;;  %v2066_v35 = vld [vmem:[%s7620_s29 + $0x3908] sm:$0xff]  ;;  %v2065_v38 = vld [vmem:[%s7620_s29 + $0x3900] sm:$0xff] }
 0x20d   : > { %4716 = vmatpush1.msra.mxu1 %v2221_v51  ;;  %4646 = vmatprep.subr.mxu0 %v2090_v54  ;;  %v2194_v37 = vld [vmem:[%s7620_s29 + $0x3d08] sm:$0xff]  ;;  %v2193_v40 = vld [vmem:[%s7620_s29 + $0x3d00] sm:$0xff] }
 0x20e   : > { %4717 = vmatprep.subr.mxu1 %v2218_v55  ;;  %4647 = vmatpush1.msra.mxu0 %v2089_v56  ;;  %v2062_v41 = vld [vmem:[%s7620_s29 + $0x38e8] sm:$0xff]  ;;  %v2061_v45 = vld [vmem:[%s7620_s29 + $0x38e0] sm:$0xff] }
 0x20f   : > { %4718 = vmatpush1.msra.mxu1 %v2217_v57  ;;  %4648 = vmatprep.subr.mxu0 %v2086_v58  ;;  %v2190_v43 = vld [vmem:[%s7620_s29 + $0x3ce8] sm:$0xff]  ;;  %v2189_v47 = vld [vmem:[%s7620_s29 + $0x3ce0] sm:$0xff] }
 0x210   : > { %4719 = vmatprep.subr.mxu1 %v2214_v59  ;;  %4649 = vmatpush1.msra.mxu0 %v2085_v60  ;;  %v2058_v48 = vld [vmem:[%s7620_s29 + $0x38c8] sm:$0xff]  ;;  %v2057_v51 = vld [vmem:[%s7620_s29 + $0x38c0] sm:$0xff] }
 0x211   : > { %4720 = vmatpush1.msra.mxu1 %v2213_v62  ;;  %4650 = vmatprep.subr.mxu0 %v2082_v1  ;;  %v2186_v50 = vld [vmem:[%s7620_s29 + $0x3cc8] sm:$0xff]  ;;  %v2185_v54 = vld [vmem:[%s7620_s29 + $0x3cc0] sm:$0xff] }
 0x212   : > { %4721 = vmatprep.subr.mxu1 %v2210_v3  ;;  %4651 = vmatpush1.msra.mxu0 %v2081_v5  ;;  %v2054_v55 = vld [vmem:[%s7620_s29 + $0x38a8] sm:$0xff]  ;;  %v2053_v57 = vld [vmem:[%s7620_s29 + $0x38a0] sm:$0xff] }
 0x213   : > { %4722 = vmatpush1.msra.mxu1 %v2209_v6  ;;  %4652 = vmatprep.subr.mxu0 %v2078_v8  ;;  %v2182_v56 = vld [vmem:[%s7620_s29 + $0x3ca8] sm:$0xff]  ;;  %v2181_v58 = vld [vmem:[%s7620_s29 + $0x3ca0] sm:$0xff] }
 0x214   : > { %4723 = vmatprep.subr.mxu1 %v2206_v13  ;;  %4653 = vmatpush1.msra.mxu0 %v2077_v14  ;;  %v2050_v59 = vld [vmem:[%s7620_s29 + $0x3888] sm:$0xff]  ;;  %v2049_v62 = vld [vmem:[%s7620_s29 + $0x3880] sm:$0xff] }
 0x215   : > { %4724 = vmatpush1.msra.mxu1 %v2205_v17  ;;  %4654 = vmatprep.subr.mxu0 %v2074_v21  ;;  %v2178_v60 = vld [vmem:[%s7620_s29 + $0x3c88] sm:$0xff]  ;;  %v2177_v1 = vld [vmem:[%s7620_s29 + $0x3c80] sm:$0xff] }
 0x216   : > { %4725 = vmatprep.subr.mxu1 %v2202_v22  ;;  %4655 = vmatpush1.msra.mxu0 %v2073_v26  ;;  %v2046_v3 = vld [vmem:[%s7620_s29 + $0x3868] sm:$0xff]  ;;  %v2045_v6 = vld [vmem:[%s7620_s29 + $0x3860] sm:$0xff] }
 0x217   : > { %4726 = vmatpush1.msra.mxu1 %v2201_v27  ;;  %4656 = vmatprep.subr.mxu0 %v2070_v30  ;;  %v2174_v5 = vld [vmem:[%s7620_s29 + $0x3c68] sm:$0xff]  ;;  %v2173_v8 = vld [vmem:[%s7620_s29 + $0x3c60] sm:$0xff] }
 0x218   : > { %4727 = vmatprep.subr.mxu1 %v2198_v32  ;;  %4657 = vmatpush1.msra.mxu0 %v2069_v33  ;;  %v2042_v13 = vld [vmem:[%s7620_s29 + $0x3848] sm:$0xff]  ;;  %v2041_v17 = vld [vmem:[%s7620_s29 + $0x3840] sm:$0xff] }
 0x219   : > { %4728 = vmatpush1.msra.mxu1 %v2197_v34  ;;  %4658 = vmatprep.subr.mxu0 %v2066_v35  ;;  %v2170_v14 = vld [vmem:[%s7620_s29 + $0x3c48] sm:$0xff]  ;;  %v2169_v21 = vld [vmem:[%s7620_s29 + $0x3c40] sm:$0xff] }
 0x21a   : > { %4729 = vmatprep.subr.mxu1 %v2194_v37  ;;  %4659 = vmatpush1.msra.mxu0 %v2065_v38  ;;  %v2038_v22 = vld [vmem:[%s7620_s29 + $0x3828] sm:$0xff]  ;;  %v2037_v27 = vld [vmem:[%s7620_s29 + $0x3820] sm:$0xff] }
 0x21b   : > { %4730 = vmatpush1.msra.mxu1 %v2193_v40  ;;  %4660 = vmatprep.subr.mxu0 %v2062_v41  ;;  %v2166_v26 = vld [vmem:[%s7620_s29 + $0x3c28] sm:$0xff]  ;;  %v2165_v30 = vld [vmem:[%s7620_s29 + $0x3c20] sm:$0xff] }
 0x21c   : > { %4731 = vmatprep.subr.mxu1 %v2190_v43  ;;  %4661 = vmatpush1.msra.mxu0 %v2061_v45  ;;  %v2034_v32 = vld [vmem:[%s7620_s29 + $0x3808] sm:$0xff]  ;;  %v2033_v34 = vld [vmem:[%s7620_s29 + $0x3800] sm:$0xff] }
 0x21d   : > { %4732 = vmatpush1.msra.mxu1 %v2189_v47  ;;  %4662 = vmatprep.subr.mxu0 %v2058_v48  ;;  %v2162_v33 = vld [vmem:[%s7620_s29 + $0x3c08] sm:$0xff]  ;;  %v2161_v35 = vld [vmem:[%s7620_s29 + $0x3c00] sm:$0xff] }
 0x21e   : > { %4733 = vmatprep.subr.mxu1 %v2186_v50  ;;  %4663 = vmatpush1.msra.mxu0 %v2057_v51  ;;  %v2158_v37 = vld [vmem:[%s7620_s29 + $0x3be8] sm:$0xff]  ;;  %v2157_v40 = vld [vmem:[%s7620_s29 + $0x3be0] sm:$0xff] }
 0x21f   : > { %4734 = vmatpush1.msra.mxu1 %v2185_v54  ;;  %4664 = vmatprep.subr.mxu0 %v2054_v55  ;;  %v2286_v38 = vld [vmem:[%s7620_s29 + $0x3fe8] sm:$0xff]  ;;  %v2285_v41 = vld [vmem:[%s7620_s29 + $0x3fe0] sm:$0xff] }
 0x220   : > { %4735 = vmatprep.subr.mxu1 %v2182_v56  ;;  %4665 = vmatpush1.msra.mxu0 %v2053_v57  ;;  %v2154_v43 = vld [vmem:[%s7620_s29 + $0x3bc8] sm:$0xff]  ;;  %v2153_v47 = vld [vmem:[%s7620_s29 + $0x3bc0] sm:$0xff] }
 0x221   : > { %4736 = vmatpush1.msra.mxu1 %v2181_v58  ;;  %4666 = vmatprep.subr.mxu0 %v2050_v59  ;;  %v2282_v45 = vld [vmem:[%s7620_s29 + $0x3fc8] sm:$0xff]  ;;  %v2281_v48 = vld [vmem:[%s7620_s29 + $0x3fc0] sm:$0xff] }
 0x222   : > { %4737 = vmatprep.subr.mxu1 %v2178_v60  ;;  %4667 = vmatpush1.msra.mxu0 %v2049_v62  ;;  %v2150_v50 = vld [vmem:[%s7620_s29 + $0x3ba8] sm:$0xff]  ;;  %v2149_v54 = vld [vmem:[%s7620_s29 + $0x3ba0] sm:$0xff] }
 0x223   : > { %4738 = vmatpush1.msra.mxu1 %v2177_v1  ;;  %4668 = vmatprep.subr.mxu0 %v2046_v3  ;;  %v2278_v51 = vld [vmem:[%s7620_s29 + $0x3fa8] sm:$0xff]  ;;  %v2277_v55 = vld [vmem:[%s7620_s29 + $0x3fa0] sm:$0xff] }
 0x224   : > { %4739 = vmatprep.subr.mxu1 %v2174_v5  ;;  %4669 = vmatpush1.msra.mxu0 %v2045_v6  ;;  %v2146_v56 = vld [vmem:[%s7620_s29 + $0x3b88] sm:$0xff]  ;;  %v2145_v58 = vld [vmem:[%s7620_s29 + $0x3b80] sm:$0xff] }
 0x225   : > { %4740 = vmatpush1.msra.mxu1 %v2173_v8  ;;  %4670 = vmatprep.subr.mxu0 %v2042_v13  ;;  %v2274_v57 = vld [vmem:[%s7620_s29 + $0x3f88] sm:$0xff]  ;;  %v2273_v59 = vld [vmem:[%s7620_s29 + $0x3f80] sm:$0xff] }
 0x226   : > { %4741 = vmatprep.subr.mxu1 %v2170_v14  ;;  %4671 = vmatpush1.msra.mxu0 %v2041_v17  ;;  %v2142_v60 = vld [vmem:[%s7620_s29 + $0x3b68] sm:$0xff]  ;;  %v2141_v1 = vld [vmem:[%s7620_s29 + $0x3b60] sm:$0xff] }
 0x227   : > { %4742 = vmatpush1.msra.mxu1 %v2169_v21  ;;  %4672 = vmatprep.subr.mxu0 %v2038_v22  ;;  %v2270_v62 = vld [vmem:[%s7620_s29 + $0x3f68] sm:$0xff]  ;;  %v2269_v3 = vld [vmem:[%s7620_s29 + $0x3f60] sm:$0xff] }
 0x228   : > { %4743 = vmatprep.subr.mxu1 %v2166_v26  ;;  %4673 = vmatpush1.msra.mxu0 %v2037_v27  ;;  %v2138_v5 = vld [vmem:[%s7620_s29 + $0x3b48] sm:$0xff]  ;;  %v2137_v8 = vld [vmem:[%s7620_s29 + $0x3b40] sm:$0xff] }
 0x229   : > { %4744 = vmatpush1.msra.mxu1 %v2165_v30  ;;  %4674 = vmatprep.subr.mxu0 %v2034_v32  ;;  %v2266_v6 = vld [vmem:[%s7620_s29 + $0x3f48] sm:$0xff]  ;;  %v2265_v13 = vld [vmem:[%s7620_s29 + $0x3f40] sm:$0xff] }
 0x22a   : > { %4745 = vmatprep.subr.mxu1 %v2162_v33  ;;  %4675 = vmatpush1.msra.mxu0 %v2033_v34  ;;  %v2134_v14 = vld [vmem:[%s7620_s29 + $0x3b28] sm:$0xff]  ;;  %v2133_v21 = vld [vmem:[%s7620_s29 + $0x3b20] sm:$0xff] }
 0x22b   : > { %4746 = vmatpush1.msra.mxu1 %v2161_v35  ;;  %4676 = vmatprep.subr.mxu0 %v2158_v37  ;;  %v2262_v17 = vld [vmem:[%s7620_s29 + $0x3f28] sm:$0xff]  ;;  %v2261_v22 = vld [vmem:[%s7620_s29 + $0x3f20] sm:$0xff] }
 0x22c   : > { %4747 = vmatprep.subr.mxu1 %v2286_v38  ;;  %4677 = vmatpush2.msra.mxu0 %v2157_v40  ;;  %v2130_v26 = vld [vmem:[%s7620_s29 + $0x3b08] sm:$0xff]  ;;  %v2129_v30 = vld [vmem:[%s7620_s29 + $0x3b00] sm:$0xff] }
 0x22d   : > { %4748 = vmatpush2.msra.mxu1 %v2285_v41  ;;  %4678 = vmatprep.subr.mxu0 %v2154_v43  ;;  %v2258_v27 = vld [vmem:[%s7620_s29 + $0x3f08] sm:$0xff]  ;;  %v2257_v32 = vld [vmem:[%s7620_s29 + $0x3f00] sm:$0xff] }
 0x22e   : > { %4749 = vmatprep.subr.mxu1 %v2282_v45  ;;  %4679 = vmatpush2.msra.mxu0 %v2153_v47  ;;  %v2126_v33 = vld [vmem:[%s7620_s29 + $0x3ae8] sm:$0xff]  ;;  %v2125_v35 = vld [vmem:[%s7620_s29 + $0x3ae0] sm:$0xff] }
 0x22f   : > { %4750 = vmatpush2.msra.mxu1 %v2281_v48  ;;  %4680 = vmatprep.subr.mxu0 %v2150_v50  ;;  %v2254_v34 = vld [vmem:[%s7620_s29 + $0x3ee8] sm:$0xff]  ;;  %v2253_v37 = vld [vmem:[%s7620_s29 + $0x3ee0] sm:$0xff] }
 0x230   : > { %4751 = vmatprep.subr.mxu1 %v2278_v51  ;;  %4681 = vmatpush2.msra.mxu0 %v2149_v54  ;;  %v2122_v38 = vld [vmem:[%s7620_s29 + $0x3ac8] sm:$0xff]  ;;  %v2121_v41 = vld [vmem:[%s7620_s29 + $0x3ac0] sm:$0xff]  ;;  %v235_v51 = vld [vmem:[%s7638_s22 + $0x38] sm:$0xff] }
 0x231   : > { %4752 = vmatpush2.msra.mxu1 %v2277_v55  ;;  %4682 = vmatprep.subr.mxu0 %v2146_v56  ;;  %v2250_v40 = vld [vmem:[%s7620_s29 + $0x3ec8] sm:$0xff]  ;;  %v2249_v43 = vld [vmem:[%s7620_s29 + $0x3ec0] sm:$0xff] }
 0x232   : > { %4753 = vmatprep.subr.mxu1 %v2274_v57  ;;  %4683 = vmatpush2.msra.mxu0 %v2145_v58  ;;  %v2118_v45 = vld [vmem:[%s7620_s29 + $0x3aa8] sm:$0xff]  ;;  %v2117_v48 = vld [vmem:[%s7620_s29 + $0x3aa0] sm:$0xff] }
 0x233   : > { %4754 = vmatpush2.msra.mxu1 %v2273_v59  ;;  %4684 = vmatprep.subr.mxu0 %v2142_v60  ;;  %v2246_v47 = vld [vmem:[%s7620_s29 + $0x3ea8] sm:$0xff]  ;;  %v2245_v50 = vld [vmem:[%s7620_s29 + $0x3ea0] sm:$0xff]  ;;  %v3509_v60 = vcombine.high %v235_v51, %v235_v51 }
 0x234   : > { %4755 = vmatprep.subr.mxu1 %v2270_v62  ;;  %4685 = vmatpush2.msra.mxu0 %v2141_v1  ;;  %v2114_v54 = vld [vmem:[%s7620_s29 + $0x3a88] sm:$0xff]  ;;  %v2113_v56 = vld [vmem:[%s7620_s29 + $0x3a80] sm:$0xff] }
 0x235   : > { %4756 = vmatpush2.msra.mxu1 %v2269_v3  ;;  %4686 = vmatprep.subr.mxu0 %v2138_v5  ;;  %v2242_v55 = vld [vmem:[%s7620_s29 + $0x3e88] sm:$0xff]  ;;  %v2241_v57 = vld [vmem:[%s7620_s29 + $0x3e80] sm:$0xff] }
 0x236   : > { %4757 = vmatprep.subr.mxu1 %v2266_v6  ;;  %4687 = vmatpush2.msra.mxu0 %v2137_v8  ;;  %v2110_v58 = vld [vmem:[%s7620_s29 + $0x3a68] sm:$0xff]  ;;  %v2109_v62 = vld [vmem:[%s7620_s29 + $0x3a60] sm:$0xff]  ;;  %v8793_v6 = vrot.slane %v235_v51, %v7753_v53 }
 0x237   : > { %4758 = vmatpush2.msra.mxu1 %v2265_v13  ;;  %4688 = vmatprep.subr.mxu0 %v2134_v14  ;;  %v2238_v59 = vld [vmem:[%s7620_s29 + $0x3e68] sm:$0xff]  ;;  %v2237_v1 = vld [vmem:[%s7620_s29 + $0x3e60] sm:$0xff] }
 0x238   : > { %4759 = vmatprep.subr.mxu1 %v2262_v17  ;;  %4689 = vmatpush2.msra.mxu0 %v2133_v21  ;;  %v2106_v3 = vld [vmem:[%s7620_s29 + $0x3a48] sm:$0xff]  ;;  %v2105_v8 = vld [vmem:[%s7620_s29 + $0x3a40] sm:$0xff]  ;;  %v8800_v21 = vrot.slane %v3509_v60, %v7753_v53 }
 0x239   : > { %4760 = vmatpush2.msra.mxu1 %v2261_v22  ;;  %4690 = vmatprep.subr.mxu0 %v2130_v26  ;;  %v2234_v5 = vld [vmem:[%s7620_s29 + $0x3e48] sm:$0xff]  ;;  %v2233_v13 = vld [vmem:[%s7620_s29 + $0x3e40] sm:$0xff] }
 0x23a   : > { %4761 = vmatprep.subr.mxu1 %v2258_v27  ;;  %4691 = vmatpush2.msra.mxu0 %v2129_v30  ;;  %v2102_v14 = vld [vmem:[%s7620_s29 + $0x3a28] sm:$0xff]  ;;  %v2101_v22 = vld [vmem:[%s7620_s29 + $0x3a20] sm:$0xff] }
 0x23b   : > { %4762 = vmatpush2.msra.mxu1 %v2257_v32  ;;  %4692 = vmatprep.subr.mxu0 %v2126_v33  ;;  %v2230_v17 = vld [vmem:[%s7620_s29 + $0x3e28] sm:$0xff]  ;;  %v2229_v26 = vld [vmem:[%s7620_s29 + $0x3e20] sm:$0xff]  ;;  %v8808_v32 = vcombine.high %v8793_v6, %v8793_v6 }
 0x23c   : > { %4763 = vmatprep.subr.mxu1 %v2254_v34  ;;  %4693 = vmatpush2.msra.mxu0 %v2125_v35  ;;  %v2098_v27 = vld [vmem:[%s7620_s29 + $0x3a08] sm:$0xff]  ;;  %v2097_v33 = vld [vmem:[%s7620_s29 + $0x3a00] sm:$0xff]  ;;  %v8814_v35 = vcombine.high %v8800_v21, %v8800_v21 }
 0x23d   : > { %4764 = vmatpush2.msra.mxu1 %v2253_v37  ;;  %4694 = vmatprep.subr.mxu0 %v2122_v38  ;;  %v2226_v30 = vld [vmem:[%s7620_s29 + $0x3e08] sm:$0xff]  ;;  %v2225_v34 = vld [vmem:[%s7620_s29 + $0x3e00] sm:$0xff] }
 0x23e   : > { %4765 = vmatprep.subr.mxu1 %v2250_v40  ;;  %4695 = vmatpush2.msra.mxu0 %v2121_v41  ;;  %v2350_v37 = vld [vmem:[%s7620_s29 + $0x41e8] sm:$0xff]  ;;  %v2349_v40 = vld [vmem:[%s7620_s29 + $0x41e0] sm:$0xff] }
 0x23f   : > { %4766 = vmatpush2.msra.mxu1 %v2249_v43  ;;  %4696 = vmatprep.subr.mxu0 %v2118_v45  ;;  %v2478_v38 = vld [vmem:[%s7620_s29 + $0x45e8] sm:$0xff]  ;;  %v2477_v41 = vld [vmem:[%s7620_s29 + $0x45e0] sm:$0xff] }
 0x240   : > { %4767 = vmatprep.subr.mxu1 %v2246_v47  ;;  %4697 = vmatpush2.msra.mxu0 %v2117_v48  ;;  %v2346_v43 = vld [vmem:[%s7620_s29 + $0x41c8] sm:$0xff]  ;;  %v2345_v47 = vld [vmem:[%s7620_s29 + $0x41c0] sm:$0xff] }
 0x241   : > { %4768 = vmatpush2.msra.mxu1 %v2245_v50  ;;  %4698 = vmatprep.subr.mxu0 %v2114_v54  ;;  %v2474_v45 = vld [vmem:[%s7620_s29 + $0x45c8] sm:$0xff]  ;;  %v2473_v48 = vld [vmem:[%s7620_s29 + $0x45c0] sm:$0xff] }
 0x242   : > { %4769 = vmatprep.subr.mxu1 %v2242_v55  ;;  %4699 = vmatpush2.msra.mxu0 %v2113_v56  ;;  %v2342_v50 = vld [vmem:[%s7620_s29 + $0x41a8] sm:$0xff]  ;;  %v2341_v54 = vld [vmem:[%s7620_s29 + $0x41a0] sm:$0xff] }
 0x243   : > { %4770 = vmatpush2.msra.mxu1 %v2241_v57  ;;  %4700 = vmatprep.subr.mxu0 %v2110_v58  ;;  %v2470_v51 = vld [vmem:[%s7620_s29 + $0x45a8] sm:$0xff]  ;;  %v2469_v55 = vld [vmem:[%s7620_s29 + $0x45a0] sm:$0xff] }
 0x244   : > { %4771 = vmatprep.subr.mxu1 %v2238_v59  ;;  %4701 = vmatpush2.msra.mxu0 %v2109_v62  ;;  %v2338_v56 = vld [vmem:[%s7620_s29 + $0x4188] sm:$0xff]  ;;  %v2337_v58 = vld [vmem:[%s7620_s29 + $0x4180] sm:$0xff] }
 0x245   : > { %4772 = vmatpush2.msra.mxu1 %v2237_v1  ;;  %4702 = vmatprep.subr.mxu0 %v2106_v3  ;;  %v2466_v57 = vld [vmem:[%s7620_s29 + $0x4588] sm:$0xff]  ;;  %v2465_v59 = vld [vmem:[%s7620_s29 + $0x4580] sm:$0xff] }
 0x246   : > { %4773 = vmatprep.subr.mxu1 %v2234_v5  ;;  %4703 = vmatpush2.msra.mxu0 %v2105_v8  ;;  %v2334_v60 = vld [vmem:[%s7620_s29 + $0x4168] sm:$0xff]  ;;  %v2333_v1 = vld [vmem:[%s7620_s29 + $0x4160] sm:$0xff] }
 0x247   : > { %4774 = vmatpush2.msra.mxu1 %v2233_v13  ;;  %4704 = vmatprep.subr.mxu0 %v2102_v14  ;;  %v2462_v62 = vld [vmem:[%s7620_s29 + $0x4568] sm:$0xff]  ;;  %v2461_v3 = vld [vmem:[%s7620_s29 + $0x4560] sm:$0xff] }
 0x248   : > { %4775 = vmatprep.subr.mxu1 %v2230_v17  ;;  %4705 = vmatpush2.msra.mxu0 %v2101_v22  ;;  %v2330_v5 = vld [vmem:[%s7620_s29 + $0x4148] sm:$0xff]  ;;  %v2329_v13 = vld [vmem:[%s7620_s29 + $0x4140] sm:$0xff] }
 0x249   : > { %4776 = vmatpush2.msra.mxu1 %v2229_v26  ;;  %4706 = vmatprep.subr.mxu0 %v2098_v27  ;;  %v2458_v8 = vld [vmem:[%s7620_s29 + $0x4548] sm:$0xff]  ;;  %v2457_v14 = vld [vmem:[%s7620_s29 + $0x4540] sm:$0xff] }
 0x24a   : > { %4777 = vmatprep.subr.mxu1 %v2226_v30  ;;  %4707 = vmatpush2.msra.mxu0 %v2097_v33  ;;  %v2326_v17 = vld [vmem:[%s7620_s29 + $0x4128] sm:$0xff]  ;;  %v2325_v26 = vld [vmem:[%s7620_s29 + $0x4120] sm:$0xff] }
 0x24b   : > { %4708 = vmatprep.mubr.f32.mxu0 %v8808_v32  ;;  %4778 = vmatpush2.msra.mxu1 %v2225_v34  ;;  %v2454_v22 = vld [vmem:[%s7620_s29 + $0x4528] sm:$0xff]  ;;  %v2453_v27 = vld [vmem:[%s7620_s29 + $0x4520] sm:$0xff] }
 0x24c   : > { %4709 = vmatmul.mubr.f32.vlgmr.msra.gmra.mxu0 %v8793_v6  ;;  %4779 = vmatprep.mubr.f32.mxu1 %v8814_v35  ;;  %v2322_v30 = vld [vmem:[%s7620_s29 + $0x4108] sm:$0xff]  ;;  %v2321_v34 = vld [vmem:[%s7620_s29 + $0x4100] sm:$0xff] }
 0x24d   : > { %4786 = vmatprep.subr.mxu0 %v2350_v37  ;;  %4857 = vmatprep.subr.mxu1 %v2478_v38  ;;  %v2450_v33 = vld [vmem:[%s7620_s29 + $0x4508] sm:$0xff]  ;;  %v2449_v37 = vld [vmem:[%s7620_s29 + $0x4500] sm:$0xff] }
 0x24e   : > { %4780 = vmatmul.mubr.f32.vlgmr.msra.gmra.mxu1 %v8800_v21  ;;  %4787 = vmatpush1.msra.mxu0 %v2349_v40  ;;  %v2318_v38 = vld [vmem:[%s7620_s29 + $0x40e8] sm:$0xff] }
 0x24f   : > { %4858 = vmatpush1.msra.mxu1 %v2477_v41  ;;  %4788 = vmatprep.subr.mxu0 %v2346_v43  ;;  %v2446_v40 = vld [vmem:[%s7620_s29 + $0x44e8] sm:$0xff]  ;;  %v2317_v41 = vld [vmem:[%s7620_s29 + $0x40e0] sm:$0xff] }
 0x250   : > { %4859 = vmatprep.subr.mxu1 %v2474_v45  ;;  %4789 = vmatpush1.msra.mxu0 %v2345_v47  ;;  %v2445_v43 = vld [vmem:[%s7620_s29 + $0x44e0] sm:$0xff]  ;;  %v2314_v45 = vld [vmem:[%s7620_s29 + $0x40c8] sm:$0xff] }
 0x251   : > { %4860 = vmatpush1.msra.mxu1 %v2473_v48  ;;  %4790 = vmatprep.subr.mxu0 %v2342_v50  ;;  %v2442_v47 = vld [vmem:[%s7620_s29 + $0x44c8] sm:$0xff]  ;;  %v2313_v48 = vld [vmem:[%s7620_s29 + $0x40c0] sm:$0xff] }
 0x252   : > { %4861 = vmatprep.subr.mxu1 %v2470_v51  ;;  %4791 = vmatpush1.msra.mxu0 %v2341_v54  ;;  %v2441_v50 = vld [vmem:[%s7620_s29 + $0x44c0] sm:$0xff]  ;;  %v2310_v51 = vld [vmem:[%s7620_s29 + $0x40a8] sm:$0xff] }
 0x253   : > { %4862 = vmatpush1.msra.mxu1 %v2469_v55  ;;  %4792 = vmatprep.subr.mxu0 %v2338_v56  ;;  %v2438_v54 = vld [vmem:[%s7620_s29 + $0x44a8] sm:$0xff]  ;;  %v2309_v55 = vld [vmem:[%s7620_s29 + $0x40a0] sm:$0xff] }
 0x254   : > { %4863 = vmatprep.subr.mxu1 %v2466_v57  ;;  %4793 = vmatpush1.msra.mxu0 %v2337_v58  ;;  %v2437_v56 = vld [vmem:[%s7620_s29 + $0x44a0] sm:$0xff]  ;;  %v2306_v57 = vld [vmem:[%s7620_s29 + $0x4088] sm:$0xff] }
 0x255   : > { %4864 = vmatpush1.msra.mxu1 %v2465_v59  ;;  %4794 = vmatprep.subr.mxu0 %v2334_v60  ;;  %v2434_v58 = vld [vmem:[%s7620_s29 + $0x4488] sm:$0xff]  ;;  %v2305_v59 = vld [vmem:[%s7620_s29 + $0x4080] sm:$0xff] }
 0x256   : > { %4865 = vmatprep.subr.mxu1 %v2462_v62  ;;  %4795 = vmatpush1.msra.mxu0 %v2333_v1  ;;  %v2433_v60 = vld [vmem:[%s7620_s29 + $0x4480] sm:$0xff]  ;;  %v2302_v62 = vld [vmem:[%s7620_s29 + $0x4068] sm:$0xff] }
 0x257   : > { %4866 = vmatpush1.msra.mxu1 %v2461_v3  ;;  %4796 = vmatprep.subr.mxu0 %v2330_v5  ;;  %v2430_v1 = vld [vmem:[%s7620_s29 + $0x4468] sm:$0xff]  ;;  %v2301_v3 = vld [vmem:[%s7620_s29 + $0x4060] sm:$0xff] }
 0x258   : > { %4867 = vmatprep.subr.mxu1 %v2458_v8  ;;  %4797 = vmatpush1.msra.mxu0 %v2329_v13  ;;  %v2429_v5 = vld [vmem:[%s7620_s29 + $0x4460] sm:$0xff]  ;;  %v2298_v8 = vld [vmem:[%s7620_s29 + $0x4048] sm:$0xff] }
 0x259   : > { %4868 = vmatpush1.msra.mxu1 %v2457_v14  ;;  %4798 = vmatprep.subr.mxu0 %v2326_v17  ;;  %v2426_v13 = vld [vmem:[%s7620_s29 + $0x4448] sm:$0xff]  ;;  %v2297_v14 = vld [vmem:[%s7620_s29 + $0x4040] sm:$0xff] }
 0x25a   : > { %4869 = vmatprep.subr.mxu1 %v2454_v22  ;;  %4799 = vmatpush1.msra.mxu0 %v2325_v26  ;;  %v2425_v17 = vld [vmem:[%s7620_s29 + $0x4440] sm:$0xff]  ;;  %v2294_v22 = vld [vmem:[%s7620_s29 + $0x4028] sm:$0xff] }
 0x25b   : > { %4870 = vmatpush1.msra.mxu1 %v2453_v27  ;;  %4800 = vmatprep.subr.mxu0 %v2322_v30  ;;  %v2422_v26 = vld [vmem:[%s7620_s29 + $0x4428] sm:$0xff]  ;;  %v2293_v27 = vld [vmem:[%s7620_s29 + $0x4020] sm:$0xff] }
 0x25c   : > { %4871 = vmatprep.subr.mxu1 %v2450_v33  ;;  %4801 = vmatpush1.msra.mxu0 %v2321_v34  ;;  %v2421_v30 = vld [vmem:[%s7620_s29 + $0x4420] sm:$0xff]  ;;  %v2290_v33 = vld [vmem:[%s7620_s29 + $0x4008] sm:$0xff] }
 0x25d   : > { %4872 = vmatpush1.msra.mxu1 %v2449_v37  ;;  %4802 = vmatprep.subr.mxu0 %v2318_v38  ;;  %v2418_v34 = vld [vmem:[%s7620_s29 + $0x4408] sm:$0xff]  ;;  %v2289_v37 = vld [vmem:[%s7620_s29 + $0x4000] sm:$0xff] }
 0x25e   : > { %4873 = vmatprep.subr.mxu1 %v2446_v40  ;;  %4803 = vmatpush1.msra.mxu0 %v2317_v41  ;;  %v2417_v38 = vld [vmem:[%s7620_s29 + $0x4400] sm:$0xff]  ;;  %v2414_v40 = vld [vmem:[%s7620_s29 + $0x43e8] sm:$0xff] }
 0x25f   : > { %4874 = vmatpush1.msra.mxu1 %v2445_v43  ;;  %4804 = vmatprep.subr.mxu0 %v2314_v45  ;;  %v2542_v41 = vld [vmem:[%s7620_s29 + $0x47e8] sm:$0xff]  ;;  %v2413_v43 = vld [vmem:[%s7620_s29 + $0x43e0] sm:$0xff] }
 0x260   : > { %4875 = vmatprep.subr.mxu1 %v2442_v47  ;;  %4805 = vmatpush1.msra.mxu0 %v2313_v48  ;;  %v2541_v45 = vld [vmem:[%s7620_s29 + $0x47e0] sm:$0xff]  ;;  %v2410_v47 = vld [vmem:[%s7620_s29 + $0x43c8] sm:$0xff] }
 0x261   : > { %4876 = vmatpush1.msra.mxu1 %v2441_v50  ;;  %4806 = vmatprep.subr.mxu0 %v2310_v51  ;;  %v2538_v48 = vld [vmem:[%s7620_s29 + $0x47c8] sm:$0xff]  ;;  %v2409_v50 = vld [vmem:[%s7620_s29 + $0x43c0] sm:$0xff] }
 0x262   : > { %4877 = vmatprep.subr.mxu1 %v2438_v54  ;;  %4807 = vmatpush1.msra.mxu0 %v2309_v55  ;;  %v2537_v51 = vld [vmem:[%s7620_s29 + $0x47c0] sm:$0xff]  ;;  %v2406_v54 = vld [vmem:[%s7620_s29 + $0x43a8] sm:$0xff] }
 0x263   : > { %4878 = vmatpush1.msra.mxu1 %v2437_v56  ;;  %4808 = vmatprep.subr.mxu0 %v2306_v57  ;;  %v2534_v55 = vld [vmem:[%s7620_s29 + $0x47a8] sm:$0xff]  ;;  %v2405_v56 = vld [vmem:[%s7620_s29 + $0x43a0] sm:$0xff] }
 0x264   : > { %4879 = vmatprep.subr.mxu1 %v2434_v58  ;;  %4809 = vmatpush1.msra.mxu0 %v2305_v59  ;;  %v2533_v57 = vld [vmem:[%s7620_s29 + $0x47a0] sm:$0xff]  ;;  %v2402_v58 = vld [vmem:[%s7620_s29 + $0x4388] sm:$0xff] }
 0x265   : > { %4880 = vmatpush1.msra.mxu1 %v2433_v60  ;;  %4810 = vmatprep.subr.mxu0 %v2302_v62  ;;  %v2530_v59 = vld [vmem:[%s7620_s29 + $0x4788] sm:$0xff]  ;;  %v2401_v60 = vld [vmem:[%s7620_s29 + $0x4380] sm:$0xff] }
 0x266   : > { %4881 = vmatprep.subr.mxu1 %v2430_v1  ;;  %4811 = vmatpush1.msra.mxu0 %v2301_v3  ;;  %v2529_v62 = vld [vmem:[%s7620_s29 + $0x4780] sm:$0xff]  ;;  %v2398_v1 = vld [vmem:[%s7620_s29 + $0x4368] sm:$0xff] }
 0x267   : > { %4882 = vmatpush1.msra.mxu1 %v2429_v5  ;;  %4812 = vmatprep.subr.mxu0 %v2298_v8  ;;  %v2526_v3 = vld [vmem:[%s7620_s29 + $0x4768] sm:$0xff]  ;;  %v2397_v5 = vld [vmem:[%s7620_s29 + $0x4360] sm:$0xff] }
 0x268   : > { %4883 = vmatprep.subr.mxu1 %v2426_v13  ;;  %4813 = vmatpush1.msra.mxu0 %v2297_v14  ;;  %v2525_v8 = vld [vmem:[%s7620_s29 + $0x4760] sm:$0xff]  ;;  %v2394_v13 = vld [vmem:[%s7620_s29 + $0x4348] sm:$0xff] }
 0x269   : > { %4884 = vmatpush1.msra.mxu1 %v2425_v17  ;;  %4814 = vmatprep.subr.mxu0 %v2294_v22  ;;  %v2522_v14 = vld [vmem:[%s7620_s29 + $0x4748] sm:$0xff]  ;;  %v2393_v17 = vld [vmem:[%s7620_s29 + $0x4340] sm:$0xff] }
 0x26a   : > { %4885 = vmatprep.subr.mxu1 %v2422_v26  ;;  %4815 = vmatpush1.msra.mxu0 %v2293_v27  ;;  %v2521_v22 = vld [vmem:[%s7620_s29 + $0x4740] sm:$0xff]  ;;  %v2390_v26 = vld [vmem:[%s7620_s29 + $0x4328] sm:$0xff] }
 0x26b   : > { %4886 = vmatpush1.msra.mxu1 %v2421_v30  ;;  %4816 = vmatprep.subr.mxu0 %v2290_v33  ;;  %v2518_v27 = vld [vmem:[%s7620_s29 + $0x4728] sm:$0xff]  ;;  %v2389_v30 = vld [vmem:[%s7620_s29 + $0x4320] sm:$0xff] }
 0x26c   : > { %4887 = vmatprep.subr.mxu1 %v2418_v34  ;;  %4817 = vmatpush1.msra.mxu0 %v2289_v37  ;;  %v2517_v33 = vld [vmem:[%s7620_s29 + $0x4720] sm:$0xff]  ;;  %v2386_v34 = vld [vmem:[%s7620_s29 + $0x4308] sm:$0xff] }
 0x26d   : > { %4888 = vmatpush1.msra.mxu1 %v2417_v38  ;;  %4818 = vmatprep.subr.mxu0 %v2414_v40  ;;  %v2514_v37 = vld [vmem:[%s7620_s29 + $0x4708] sm:$0xff]  ;;  %v2385_v38 = vld [vmem:[%s7620_s29 + $0x4300] sm:$0xff] }
 0x26e   : > { %4889 = vmatprep.subr.mxu1 %v2542_v41  ;;  %4819 = vmatpush2.msra.mxu0 %v2413_v43  ;;  %v2513_v40 = vld [vmem:[%s7620_s29 + $0x4700] sm:$0xff]  ;;  %v2382_v41 = vld [vmem:[%s7620_s29 + $0x42e8] sm:$0xff] }
 0x26f   : > { %4890 = vmatpush2.msra.mxu1 %v2541_v45  ;;  %4820 = vmatprep.subr.mxu0 %v2410_v47  ;;  %v2510_v43 = vld [vmem:[%s7620_s29 + $0x46e8] sm:$0xff]  ;;  %v2381_v45 = vld [vmem:[%s7620_s29 + $0x42e0] sm:$0xff] }
 0x270   : > { %4891 = vmatprep.subr.mxu1 %v2538_v48  ;;  %4821 = vmatpush2.msra.mxu0 %v2409_v50  ;;  %v2509_v47 = vld [vmem:[%s7620_s29 + $0x46e0] sm:$0xff]  ;;  %v2378_v48 = vld [vmem:[%s7620_s29 + $0x42c8] sm:$0xff] }
 0x271   : > { %4892 = vmatpush2.msra.mxu1 %v2537_v51  ;;  %4822 = vmatprep.subr.mxu0 %v2406_v54  ;;  %v2506_v50 = vld [vmem:[%s7620_s29 + $0x46c8] sm:$0xff]  ;;  %v2377_v51 = vld [vmem:[%s7620_s29 + $0x42c0] sm:$0xff] }
 0x272   : > { %4893 = vmatprep.subr.mxu1 %v2534_v55  ;;  %4823 = vmatpush2.msra.mxu0 %v2405_v56  ;;  %v2505_v54 = vld [vmem:[%s7620_s29 + $0x46c0] sm:$0xff]  ;;  %v2374_v55 = vld [vmem:[%s7620_s29 + $0x42a8] sm:$0xff] }
 0x273   : > { %4894 = vmatpush2.msra.mxu1 %v2533_v57  ;;  %4824 = vmatprep.subr.mxu0 %v2402_v58  ;;  %v2502_v56 = vld [vmem:[%s7620_s29 + $0x46a8] sm:$0xff]  ;;  %v2373_v57 = vld [vmem:[%s7620_s29 + $0x42a0] sm:$0xff] }
 0x274   : > { %4895 = vmatprep.subr.mxu1 %v2530_v59  ;;  %4825 = vmatpush2.msra.mxu0 %v2401_v60  ;;  %v2501_v58 = vld [vmem:[%s7620_s29 + $0x46a0] sm:$0xff]  ;;  %v2370_v60 = vld [vmem:[%s7620_s29 + $0x4288] sm:$0xff] }
 0x275   : > { %4896 = vmatpush2.msra.mxu1 %v2529_v62  ;;  %4826 = vmatprep.subr.mxu0 %v2398_v1  ;;  %v236_v59 = vld [vmem:[%s7638_s22 + $0x40] sm:$0xff]  ;;  %v2498_v62 = vld [vmem:[%s7620_s29 + $0x4688] sm:$0xff] }
 0x276   : > { %4897 = vmatprep.subr.mxu1 %v2526_v3  ;;  %4827 = vmatpush2.msra.mxu0 %v2397_v5  ;;  %v2369_v1 = vld [vmem:[%s7620_s29 + $0x4280] sm:$0xff]  ;;  %v2366_v5 = vld [vmem:[%s7620_s29 + $0x4268] sm:$0xff] }
 0x277   : > { %4898 = vmatpush2.msra.mxu1 %v2525_v8  ;;  %4828 = vmatprep.subr.mxu0 %v2394_v13  ;;  %v2497_v3 = vld [vmem:[%s7620_s29 + $0x4680] sm:$0xff]  ;;  %v2494_v8 = vld [vmem:[%s7620_s29 + $0x4668] sm:$0xff]  ;;  %v3526_v13 = vcombine.high %v236_v59, %v236_v59 }
 0x278   : > { %4899 = vmatprep.subr.mxu1 %v2522_v14  ;;  %4829 = vmatpush2.msra.mxu0 %v2393_v17  ;;  %v2365_v14 = vld [vmem:[%s7620_s29 + $0x4260] sm:$0xff] }
 0x279   : > { %4900 = vmatpush2.msra.mxu1 %v2521_v22  ;;  %4830 = vmatprep.subr.mxu0 %v2390_v26  ;;  %v2493_v17 = vld [vmem:[%s7620_s29 + $0x4660] sm:$0xff]  ;;  %v2362_v22 = vld [vmem:[%s7620_s29 + $0x4248] sm:$0xff] }
 0x27a   : > { %4901 = vmatprep.subr.mxu1 %v2518_v27  ;;  %4831 = vmatpush2.msra.mxu0 %v2389_v30  ;;  %v2490_v26 = vld [vmem:[%s7620_s29 + $0x4648] sm:$0xff]  ;;  %v8940_v27 = vrot.slane %v236_v59, %v7753_v53  ;;  %v2361_v30 = vld [vmem:[%s7620_s29 + $0x4240] sm:$0xff] }
 0x27b   : > { %4902 = vmatpush2.msra.mxu1 %v2517_v33  ;;  %4832 = vmatprep.subr.mxu0 %v2386_v34  ;;  %v2489_v33 = vld [vmem:[%s7620_s29 + $0x4640] sm:$0xff]  ;;  %v2358_v34 = vld [vmem:[%s7620_s29 + $0x4228] sm:$0xff] }
 0x27c   : > { %4903 = vmatprep.subr.mxu1 %v2514_v37  ;;  %4833 = vmatpush2.msra.mxu0 %v2385_v38  ;;  %v2486_v37 = vld [vmem:[%s7620_s29 + $0x4628] sm:$0xff]  ;;  %v8947_v38 = vrot.slane %v3526_v13, %v7753_v53 }
 0x27d   : > { %4904 = vmatpush2.msra.mxu1 %v2513_v40  ;;  %4834 = vmatprep.subr.mxu0 %v2382_v41  ;;  %v2357_v40 = vld [vmem:[%s7620_s29 + $0x4220] sm:$0xff]  ;;  %v2730_v59 = vld [vmem:[%s7620_s29 + $0x4dc8] sm:$0xff] }
 0x27e   : > { %4905 = vmatprep.subr.mxu1 %v2510_v43  ;;  %4835 = vmatpush2.msra.mxu0 %v2381_v45  ;;  %v2485_v41 = vld [vmem:[%s7620_s29 + $0x4620] sm:$0xff]  ;;  %v2354_v43 = vld [vmem:[%s7620_s29 + $0x4208] sm:$0xff] }
 0x27f   : > { %4906 = vmatpush2.msra.mxu1 %v2509_v47  ;;  %4836 = vmatprep.subr.mxu0 %v2378_v48  ;;  %v2482_v45 = vld [vmem:[%s7620_s29 + $0x4608] sm:$0xff]  ;;  %v8955_v47 = vcombine.high %v8940_v27, %v8940_v27  ;;  %v2353_v48 = vld [vmem:[%s7620_s29 + $0x4200] sm:$0xff] }
 0x280   : > { %4907 = vmatprep.subr.mxu1 %v2506_v50  ;;  %4837 = vmatpush2.msra.mxu0 %v2377_v51  ;;  %v2481_v50 = vld [vmem:[%s7620_s29 + $0x4600] sm:$0xff]  ;;  %v8961_v51 = vcombine.high %v8947_v38, %v8947_v38  ;;  %v2594_v13 = vld [vmem:[%s7620_s29 + $0x4988] sm:$0xff] }
 0x281   : > { %4908 = vmatpush2.msra.mxu1 %v2505_v54  ;;  %4838 = vmatprep.subr.mxu0 %v2374_v55  ;;  %v2606_v54 = vld [vmem:[%s7620_s29 + $0x49e8] sm:$0xff] }
 0x282   : > { %4909 = vmatprep.subr.mxu1 %v2502_v56  ;;  %4839 = vmatpush2.msra.mxu0 %v2373_v57  ;;  %v2734_v55 = vld [vmem:[%s7620_s29 + $0x4de8] sm:$0xff]  ;;  %v2605_v56 = vld [vmem:[%s7620_s29 + $0x49e0] sm:$0xff] }
 0x283   : > { %4910 = vmatpush2.msra.mxu1 %v2501_v58  ;;  %4840 = vmatprep.subr.mxu0 %v2370_v60  ;;  %v2733_v57 = vld [vmem:[%s7620_s29 + $0x4de0] sm:$0xff]  ;;  %v2602_v58 = vld [vmem:[%s7620_s29 + $0x49c8] sm:$0xff] }
 0x284   : > { %4911 = vmatprep.subr.mxu1 %v2498_v62  ;;  %4841 = vmatpush2.msra.mxu0 %v2369_v1  ;;  %v2601_v60 = vld [vmem:[%s7620_s29 + $0x49c0] sm:$0xff]  ;;  %v2598_v1 = vld [vmem:[%s7620_s29 + $0x49a8] sm:$0xff] }
 0x285   : > { %4912 = vmatpush2.msra.mxu1 %v2497_v3  ;;  %4842 = vmatprep.subr.mxu0 %v2366_v5  ;;  %v2729_v62 = vld [vmem:[%s7620_s29 + $0x4dc0] sm:$0xff]  ;;  %v2726_v3 = vld [vmem:[%s7620_s29 + $0x4da8] sm:$0xff] }
 0x286   : > { %4913 = vmatprep.subr.mxu1 %v2494_v8  ;;  %4843 = vmatpush2.msra.mxu0 %v2365_v14  ;;  %v2597_v5 = vld [vmem:[%s7620_s29 + $0x49a0] sm:$0xff]  ;;  %v2722_v14 = vld [vmem:[%s7620_s29 + $0x4d88] sm:$0xff] }
 0x287   : > { %4914 = vmatpush2.msra.mxu1 %v2493_v17  ;;  %4844 = vmatprep.subr.mxu0 %v2362_v22  ;;  %v2725_v8 = vld [vmem:[%s7620_s29 + $0x4da0] sm:$0xff] }
 0x288   : > { %4915 = vmatprep.subr.mxu1 %v2490_v26  ;;  %4845 = vmatpush2.msra.mxu0 %v2361_v30  ;;  %v2593_v17 = vld [vmem:[%s7620_s29 + $0x4980] sm:$0xff]  ;;  %v2590_v26 = vld [vmem:[%s7620_s29 + $0x4968] sm:$0xff] }
 0x289   : > { %4916 = vmatpush2.msra.mxu1 %v2489_v33  ;;  %4846 = vmatprep.subr.mxu0 %v2358_v34  ;;  %v2721_v22 = vld [vmem:[%s7620_s29 + $0x4d80] sm:$0xff]  ;;  %v2718_v30 = vld [vmem:[%s7620_s29 + $0x4d68] sm:$0xff] }
 0x28a   : > { %4917 = vmatprep.subr.mxu1 %v2486_v37  ;;  %4847 = vmatpush2.msra.mxu0 %v2357_v40  ;;  %v2589_v33 = vld [vmem:[%s7620_s29 + $0x4960] sm:$0xff]  ;;  %v2586_v37 = vld [vmem:[%s7620_s29 + $0x4948] sm:$0xff] }
 0x28b   : > { %4918 = vmatpush2.msra.mxu1 %v2485_v41  ;;  %4848 = vmatprep.subr.mxu0 %v2354_v43  ;;  %v2717_v34 = vld [vmem:[%s7620_s29 + $0x4d60] sm:$0xff]  ;;  %v2714_v40 = vld [vmem:[%s7620_s29 + $0x4d48] sm:$0xff] }
 0x28c   : > { %4919 = vmatprep.subr.mxu1 %v2482_v45  ;;  %4849 = vmatpush2.msra.mxu0 %v2353_v48  ;;  %v2585_v41 = vld [vmem:[%s7620_s29 + $0x4940] sm:$0xff]  ;;  %v2582_v45 = vld [vmem:[%s7620_s29 + $0x4928] sm:$0xff] }
 0x28d   : > { %4850 = vmatprep.mubr.f32.mxu0 %v8955_v47  ;;  %4920 = vmatpush2.msra.mxu1 %v2481_v50  ;;  %v2713_v43 = vld [vmem:[%s7620_s29 + $0x4d40] sm:$0xff]  ;;  %v2710_v48 = vld [vmem:[%s7620_s29 + $0x4d28] sm:$0xff] }
 0x28e   : > { %4851 = vmatmul.mubr.f32.vlgmr.msra.gmra.mxu0 %v8940_v27  ;;  %4921 = vmatprep.mubr.f32.mxu1 %v8961_v51  ;;  %v2581_v50 = vld [vmem:[%s7620_s29 + $0x4920] sm:$0xff] }
 0x28f   : > { %4928 = vmatprep.subr.mxu0 %v2606_v54  ;;  %4999 = vmatprep.subr.mxu1 %v2734_v55  ;;  %v2709_v54 = vld [vmem:[%s7620_s29 + $0x4d20] sm:$0xff]  ;;  %v2578_v55 = vld [vmem:[%s7620_s29 + $0x4908] sm:$0xff] }
 0x290   : > { %4922 = vmatmul.mubr.f32.vlgmr.msra.gmra.mxu1 %v8947_v38  ;;  %4929 = vmatpush1.msra.mxu0 %v2605_v56  ;;  %v2706_v56 = vld [vmem:[%s7620_s29 + $0x4d08] sm:$0xff] }
 0x291   : > { %5000 = vmatpush1.msra.mxu1 %v2733_v57  ;;  %4930 = vmatprep.subr.mxu0 %v2602_v58  ;;  %v2577_v57 = vld [vmem:[%s7620_s29 + $0x4900] sm:$0xff] }
 0x292   : > { %5001 = vmatprep.subr.mxu1 %v2730_v59  ;;  %4931 = vmatpush1.msra.mxu0 %v2601_v60  ;;  %v2705_v58 = vld [vmem:[%s7620_s29 + $0x4d00] sm:$0xff]  ;;  %v2574_v59 = vld [vmem:[%s7620_s29 + $0x48e8] sm:$0xff] }
 0x293   : > { %5002 = vmatpush1.msra.mxu1 %v2729_v62  ;;  %4932 = vmatprep.subr.mxu0 %v2598_v1  ;;  %v2702_v60 = vld [vmem:[%s7620_s29 + $0x4ce8] sm:$0xff]  ;;  %v2573_v62 = vld [vmem:[%s7620_s29 + $0x48e0] sm:$0xff] }
 0x294   : > { %5003 = vmatprep.subr.mxu1 %v2726_v3  ;;  %4933 = vmatpush1.msra.mxu0 %v2597_v5  ;;  %v2701_v1 = vld [vmem:[%s7620_s29 + $0x4ce0] sm:$0xff]  ;;  %v2570_v3 = vld [vmem:[%s7620_s29 + $0x48c8] sm:$0xff] }
 0x295   : > { %5004 = vmatpush1.msra.mxu1 %v2725_v8  ;;  %4934 = vmatprep.subr.mxu0 %v2594_v13  ;;  %v2698_v5 = vld [vmem:[%s7620_s29 + $0x4cc8] sm:$0xff]  ;;  %v2569_v8 = vld [vmem:[%s7620_s29 + $0x48c0] sm:$0xff] }
 0x296   : > { %5005 = vmatprep.subr.mxu1 %v2722_v14  ;;  %4935 = vmatpush1.msra.mxu0 %v2593_v17  ;;  %v2697_v13 = vld [vmem:[%s7620_s29 + $0x4cc0] sm:$0xff]  ;;  %v2566_v14 = vld [vmem:[%s7620_s29 + $0x48a8] sm:$0xff] }
 0x297   : > { %5006 = vmatpush1.msra.mxu1 %v2721_v22  ;;  %4936 = vmatprep.subr.mxu0 %v2590_v26  ;;  %v2694_v17 = vld [vmem:[%s7620_s29 + $0x4ca8] sm:$0xff]  ;;  %v2565_v22 = vld [vmem:[%s7620_s29 + $0x48a0] sm:$0xff] }
 0x298   : > { %5007 = vmatprep.subr.mxu1 %v2718_v30  ;;  %4937 = vmatpush1.msra.mxu0 %v2589_v33  ;;  %v2693_v26 = vld [vmem:[%s7620_s29 + $0x4ca0] sm:$0xff]  ;;  %v2562_v30 = vld [vmem:[%s7620_s29 + $0x4888] sm:$0xff] }
 0x299   : > { %5008 = vmatpush1.msra.mxu1 %v2717_v34  ;;  %4938 = vmatprep.subr.mxu0 %v2586_v37  ;;  %v2690_v33 = vld [vmem:[%s7620_s29 + $0x4c88] sm:$0xff]  ;;  %v2561_v34 = vld [vmem:[%s7620_s29 + $0x4880] sm:$0xff] }
 0x29a   : > { %5009 = vmatprep.subr.mxu1 %v2714_v40  ;;  %4939 = vmatpush1.msra.mxu0 %v2585_v41  ;;  %v2689_v37 = vld [vmem:[%s7620_s29 + $0x4c80] sm:$0xff]  ;;  %v2558_v40 = vld [vmem:[%s7620_s29 + $0x4868] sm:$0xff] }
 0x29b   : > { %5010 = vmatpush1.msra.mxu1 %v2713_v43  ;;  %4940 = vmatprep.subr.mxu0 %v2582_v45  ;;  %v2686_v41 = vld [vmem:[%s7620_s29 + $0x4c68] sm:$0xff]  ;;  %v2557_v43 = vld [vmem:[%s7620_s29 + $0x4860] sm:$0xff] }
 0x29c   : > { %5011 = vmatprep.subr.mxu1 %v2710_v48  ;;  %4941 = vmatpush1.msra.mxu0 %v2581_v50  ;;  %v2685_v45 = vld [vmem:[%s7620_s29 + $0x4c60] sm:$0xff]  ;;  %v2554_v48 = vld [vmem:[%s7620_s29 + $0x4848] sm:$0xff] }
 0x29d   : > { %5012 = vmatpush1.msra.mxu1 %v2709_v54  ;;  %4942 = vmatprep.subr.mxu0 %v2578_v55  ;;  %v2682_v50 = vld [vmem:[%s7620_s29 + $0x4c48] sm:$0xff]  ;;  %v2553_v54 = vld [vmem:[%s7620_s29 + $0x4840] sm:$0xff] }
 0x29e   : > { %5013 = vmatprep.subr.mxu1 %v2706_v56  ;;  %4943 = vmatpush1.msra.mxu0 %v2577_v57  ;;  %v2681_v55 = vld [vmem:[%s7620_s29 + $0x4c40] sm:$0xff]  ;;  %v2550_v56 = vld [vmem:[%s7620_s29 + $0x4828] sm:$0xff] }
 0x29f   : > { %5014 = vmatpush1.msra.mxu1 %v2705_v58  ;;  %4944 = vmatprep.subr.mxu0 %v2574_v59  ;;  %v2678_v57 = vld [vmem:[%s7620_s29 + $0x4c28] sm:$0xff]  ;;  %v2549_v58 = vld [vmem:[%s7620_s29 + $0x4820] sm:$0xff] }
 0x2a0   : > { %5015 = vmatprep.subr.mxu1 %v2702_v60  ;;  %4945 = vmatpush1.msra.mxu0 %v2573_v62  ;;  %v2677_v59 = vld [vmem:[%s7620_s29 + $0x4c20] sm:$0xff]  ;;  %v2546_v60 = vld [vmem:[%s7620_s29 + $0x4808] sm:$0xff] }
 0x2a1   : > { %5016 = vmatpush1.msra.mxu1 %v2701_v1  ;;  %4946 = vmatprep.subr.mxu0 %v2570_v3  ;;  %v2674_v62 = vld [vmem:[%s7620_s29 + $0x4c08] sm:$0xff]  ;;  %v2545_v1 = vld [vmem:[%s7620_s29 + $0x4800] sm:$0xff] }
 0x2a2   : > { %5017 = vmatprep.subr.mxu1 %v2698_v5  ;;  %4947 = vmatpush1.msra.mxu0 %v2569_v8  ;;  %v2673_v3 = vld [vmem:[%s7620_s29 + $0x4c00] sm:$0xff]  ;;  %v2670_v5 = vld [vmem:[%s7620_s29 + $0x4be8] sm:$0xff] }
 0x2a3   : > { %5018 = vmatpush1.msra.mxu1 %v2697_v13  ;;  %4948 = vmatprep.subr.mxu0 %v2566_v14  ;;  %v2798_v8 = vld [vmem:[%s7620_s29 + $0x4fe8] sm:$0xff]  ;;  %v2669_v13 = vld [vmem:[%s7620_s29 + $0x4be0] sm:$0xff] }
 0x2a4   : > { %5019 = vmatprep.subr.mxu1 %v2694_v17  ;;  %4949 = vmatpush1.msra.mxu0 %v2565_v22  ;;  %v2797_v14 = vld [vmem:[%s7620_s29 + $0x4fe0] sm:$0xff]  ;;  %v2666_v17 = vld [vmem:[%s7620_s29 + $0x4bc8] sm:$0xff] }
 0x2a5   : > { %5020 = vmatpush1.msra.mxu1 %v2693_v26  ;;  %4950 = vmatprep.subr.mxu0 %v2562_v30  ;;  %v2794_v22 = vld [vmem:[%s7620_s29 + $0x4fc8] sm:$0xff]  ;;  %v2665_v26 = vld [vmem:[%s7620_s29 + $0x4bc0] sm:$0xff] }
 0x2a6   : > { %5021 = vmatprep.subr.mxu1 %v2690_v33  ;;  %4951 = vmatpush1.msra.mxu0 %v2561_v34  ;;  %v2793_v30 = vld [vmem:[%s7620_s29 + $0x4fc0] sm:$0xff]  ;;  %v2662_v33 = vld [vmem:[%s7620_s29 + $0x4ba8] sm:$0xff] }
 0x2a7   : > { %5022 = vmatpush1.msra.mxu1 %v2689_v37  ;;  %4952 = vmatprep.subr.mxu0 %v2558_v40  ;;  %v2790_v34 = vld [vmem:[%s7620_s29 + $0x4fa8] sm:$0xff]  ;;  %v2661_v37 = vld [vmem:[%s7620_s29 + $0x4ba0] sm:$0xff] }
 0x2a8   : > { %5023 = vmatprep.subr.mxu1 %v2686_v41  ;;  %4953 = vmatpush1.msra.mxu0 %v2557_v43  ;;  %v2789_v40 = vld [vmem:[%s7620_s29 + $0x4fa0] sm:$0xff]  ;;  %v2658_v41 = vld [vmem:[%s7620_s29 + $0x4b88] sm:$0xff] }
 0x2a9   : > { %5024 = vmatpush1.msra.mxu1 %v2685_v45  ;;  %4954 = vmatprep.subr.mxu0 %v2554_v48  ;;  %v2786_v43 = vld [vmem:[%s7620_s29 + $0x4f88] sm:$0xff]  ;;  %v2657_v45 = vld [vmem:[%s7620_s29 + $0x4b80] sm:$0xff] }
 0x2aa   : > { %5025 = vmatprep.subr.mxu1 %v2682_v50  ;;  %4955 = vmatpush1.msra.mxu0 %v2553_v54  ;;  %v2785_v48 = vld [vmem:[%s7620_s29 + $0x4f80] sm:$0xff]  ;;  %v2654_v50 = vld [vmem:[%s7620_s29 + $0x4b68] sm:$0xff] }
 0x2ab   : > { %5026 = vmatpush1.msra.mxu1 %v2681_v55  ;;  %4956 = vmatprep.subr.mxu0 %v2550_v56  ;;  %v2782_v54 = vld [vmem:[%s7620_s29 + $0x4f68] sm:$0xff]  ;;  %v2653_v55 = vld [vmem:[%s7620_s29 + $0x4b60] sm:$0xff] }
 0x2ac   : > { %5027 = vmatprep.subr.mxu1 %v2678_v57  ;;  %4957 = vmatpush1.msra.mxu0 %v2549_v58  ;;  %v2781_v56 = vld [vmem:[%s7620_s29 + $0x4f60] sm:$0xff]  ;;  %v2650_v57 = vld [vmem:[%s7620_s29 + $0x4b48] sm:$0xff] }
 0x2ad   : > { %5028 = vmatpush1.msra.mxu1 %v2677_v59  ;;  %4958 = vmatprep.subr.mxu0 %v2546_v60  ;;  %v2778_v58 = vld [vmem:[%s7620_s29 + $0x4f48] sm:$0xff]  ;;  %v2649_v59 = vld [vmem:[%s7620_s29 + $0x4b40] sm:$0xff] }
 0x2ae   : > { %5029 = vmatprep.subr.mxu1 %v2674_v62  ;;  %4959 = vmatpush1.msra.mxu0 %v2545_v1  ;;  %v2777_v60 = vld [vmem:[%s7620_s29 + $0x4f40] sm:$0xff]  ;;  %v2646_v62 = vld [vmem:[%s7620_s29 + $0x4b28] sm:$0xff] }
 0x2af   : > { %5030 = vmatpush1.msra.mxu1 %v2673_v3  ;;  %4960 = vmatprep.subr.mxu0 %v2670_v5  ;;  %v2774_v1 = vld [vmem:[%s7620_s29 + $0x4f28] sm:$0xff]  ;;  %v2645_v3 = vld [vmem:[%s7620_s29 + $0x4b20] sm:$0xff] }
 0x2b0   : > { %5031 = vmatprep.subr.mxu1 %v2798_v8  ;;  %4961 = vmatpush2.msra.mxu0 %v2669_v13  ;;  %v2773_v5 = vld [vmem:[%s7620_s29 + $0x4f20] sm:$0xff]  ;;  %v2642_v8 = vld [vmem:[%s7620_s29 + $0x4b08] sm:$0xff] }
 0x2b1   : > { %5032 = vmatpush2.msra.mxu1 %v2797_v14  ;;  %4962 = vmatprep.subr.mxu0 %v2666_v17  ;;  %v2770_v13 = vld [vmem:[%s7620_s29 + $0x4f08] sm:$0xff]  ;;  %v2641_v14 = vld [vmem:[%s7620_s29 + $0x4b00] sm:$0xff] }
 0x2b2   : > { %5033 = vmatprep.subr.mxu1 %v2794_v22  ;;  %4963 = vmatpush2.msra.mxu0 %v2665_v26  ;;  %v2769_v17 = vld [vmem:[%s7620_s29 + $0x4f00] sm:$0xff]  ;;  %v2638_v22 = vld [vmem:[%s7620_s29 + $0x4ae8] sm:$0xff] }
 0x2b3   : > { %5034 = vmatpush2.msra.mxu1 %v2793_v30  ;;  %4964 = vmatprep.subr.mxu0 %v2662_v33  ;;  %v2766_v26 = vld [vmem:[%s7620_s29 + $0x4ee8] sm:$0xff]  ;;  %v2637_v30 = vld [vmem:[%s7620_s29 + $0x4ae0] sm:$0xff] }
 0x2b4   : > { %5035 = vmatprep.subr.mxu1 %v2790_v34  ;;  %4965 = vmatpush2.msra.mxu0 %v2661_v37  ;;  %v2765_v33 = vld [vmem:[%s7620_s29 + $0x4ee0] sm:$0xff]  ;;  %v2634_v34 = vld [vmem:[%s7620_s29 + $0x4ac8] sm:$0xff] }
 0x2b5   : > { %5036 = vmatpush2.msra.mxu1 %v2789_v40  ;;  %4966 = vmatprep.subr.mxu0 %v2658_v41  ;;  %v2762_v37 = vld [vmem:[%s7620_s29 + $0x4ec8] sm:$0xff]  ;;  %v2633_v40 = vld [vmem:[%s7620_s29 + $0x4ac0] sm:$0xff] }
 0x2b6   : > { %5037 = vmatprep.subr.mxu1 %v2786_v43  ;;  %4967 = vmatpush2.msra.mxu0 %v2657_v45  ;;  %v2761_v41 = vld [vmem:[%s7620_s29 + $0x4ec0] sm:$0xff]  ;;  %v2630_v43 = vld [vmem:[%s7620_s29 + $0x4aa8] sm:$0xff] }
 0x2b7   : > { %5038 = vmatpush2.msra.mxu1 %v2785_v48  ;;  %4968 = vmatprep.subr.mxu0 %v2654_v50  ;;  %v2758_v45 = vld [vmem:[%s7620_s29 + $0x4ea8] sm:$0xff]  ;;  %v2629_v48 = vld [vmem:[%s7620_s29 + $0x4aa0] sm:$0xff] }
 0x2b8   : > { %5039 = vmatprep.subr.mxu1 %v2782_v54  ;;  %4969 = vmatpush2.msra.mxu0 %v2653_v55  ;;  %v2757_v50 = vld [vmem:[%s7620_s29 + $0x4ea0] sm:$0xff]  ;;  %v237_v54 = vld [vmem:[%s7638_s22 + $0x48] sm:$0xff] }
 0x2b9   : > { %5040 = vmatpush2.msra.mxu1 %v2781_v56  ;;  %4970 = vmatprep.subr.mxu0 %v2650_v57  ;;  %v2626_v55 = vld [vmem:[%s7620_s29 + $0x4a88] sm:$0xff]  ;;  %v2625_v57 = vld [vmem:[%s7620_s29 + $0x4a80] sm:$0xff] }
 0x2ba   : > { %5041 = vmatprep.subr.mxu1 %v2778_v58  ;;  %4971 = vmatpush2.msra.mxu0 %v2649_v59  ;;  %v2754_v56 = vld [vmem:[%s7620_s29 + $0x4e88] sm:$0xff]  ;;  %v2753_v58 = vld [vmem:[%s7620_s29 + $0x4e80] sm:$0xff] }
 0x2bb   : > { %5042 = vmatpush2.msra.mxu1 %v2777_v60  ;;  %4972 = vmatprep.subr.mxu0 %v2646_v62  ;;  %v2622_v59 = vld [vmem:[%s7620_s29 + $0x4a68] sm:$0xff]  ;;  %v3543_v62 = vcombine.high %v237_v54, %v237_v54 }
 0x2bc   : > { %5043 = vmatprep.subr.mxu1 %v2774_v1  ;;  %4973 = vmatpush2.msra.mxu0 %v2645_v3  ;;  %v2750_v60 = vld [vmem:[%s7620_s29 + $0x4e68] sm:$0xff]  ;;  %v2621_v1 = vld [vmem:[%s7620_s29 + $0x4a60] sm:$0xff] }
 0x2bd   : > { %5044 = vmatpush2.msra.mxu1 %v2773_v5  ;;  %4974 = vmatprep.subr.mxu0 %v2642_v8  ;;  %v2749_v3 = vld [vmem:[%s7620_s29 + $0x4e60] sm:$0xff]  ;;  %v2618_v5 = vld [vmem:[%s7620_s29 + $0x4a48] sm:$0xff] }
 0x2be   : > { %5045 = vmatprep.subr.mxu1 %v2770_v13  ;;  %4975 = vmatpush2.msra.mxu0 %v2641_v14  ;;  %v2746_v8 = vld [vmem:[%s7620_s29 + $0x4e48] sm:$0xff]  ;;  %v9087_v13 = vrot.slane %v237_v54, %v7753_v53  ;;  %v2617_v14 = vld [vmem:[%s7620_s29 + $0x4a40] sm:$0xff] }
 0x2bf   : > { %5046 = vmatpush2.msra.mxu1 %v2769_v17  ;;  %4976 = vmatprep.subr.mxu0 %v2638_v22  ;;  %v2745_v17 = vld [vmem:[%s7620_s29 + $0x4e40] sm:$0xff]  ;;  %v2614_v22 = vld [vmem:[%s7620_s29 + $0x4a28] sm:$0xff] }
 0x2c0   : > { %5047 = vmatprep.subr.mxu1 %v2766_v26  ;;  %4977 = vmatpush2.msra.mxu0 %v2637_v30  ;;  %v2742_v26 = vld [vmem:[%s7620_s29 + $0x4e28] sm:$0xff]  ;;  %v9094_v30 = vrot.slane %v3543_v62, %v7753_v53 }
 0x2c1   : > { %5048 = vmatpush2.msra.mxu1 %v2765_v33  ;;  %4978 = vmatprep.subr.mxu0 %v2634_v34  ;;  %v2613_v33 = vld [vmem:[%s7620_s29 + $0x4a20] sm:$0xff]  ;;  %v2990_v54 = vld [vmem:[%s7620_s29 + $0x55e8] sm:$0xff] }
 0x2c2   : > { %5049 = vmatprep.subr.mxu1 %v2762_v37  ;;  %4979 = vmatpush2.msra.mxu0 %v2633_v40  ;;  %v2741_v34 = vld [vmem:[%s7620_s29 + $0x4e20] sm:$0xff]  ;;  %v2610_v37 = vld [vmem:[%s7620_s29 + $0x4a08] sm:$0xff] }
 0x2c3   : > { %5050 = vmatpush2.msra.mxu1 %v2761_v41  ;;  %4980 = vmatprep.subr.mxu0 %v2630_v43  ;;  %v2738_v40 = vld [vmem:[%s7620_s29 + $0x4e08] sm:$0xff]  ;;  %v9102_v41 = vcombine.high %v9087_v13, %v9087_v13  ;;  %v2609_v43 = vld [vmem:[%s7620_s29 + $0x4a00] sm:$0xff] }
 0x2c4   : > { %5051 = vmatprep.subr.mxu1 %v2758_v45  ;;  %4981 = vmatpush2.msra.mxu0 %v2629_v48  ;;  %v2737_v45 = vld [vmem:[%s7620_s29 + $0x4e00] sm:$0xff]  ;;  %v9108_v48 = vcombine.high %v9094_v30, %v9094_v30  ;;  %v2854_v62 = vld [vmem:[%s7620_s29 + $0x51a8] sm:$0xff] }
 0x2c5   : > { %5052 = vmatpush2.msra.mxu1 %v2757_v50  ;;  %4982 = vmatprep.subr.mxu0 %v2626_v55  ;;  %v2862_v50 = vld [vmem:[%s7620_s29 + $0x51e8] sm:$0xff]  ;;  %v2861_v55 = vld [vmem:[%s7620_s29 + $0x51e0] sm:$0xff] }
 0x2c6   : > { %5053 = vmatprep.subr.mxu1 %v2754_v56  ;;  %4983 = vmatpush2.msra.mxu0 %v2625_v57  ;;  %v2989_v56 = vld [vmem:[%s7620_s29 + $0x55e0] sm:$0xff]  ;;  %v2858_v57 = vld [vmem:[%s7620_s29 + $0x51c8] sm:$0xff] }
 0x2c7   : > { %5054 = vmatpush2.msra.mxu1 %v2753_v58  ;;  %4984 = vmatprep.subr.mxu0 %v2622_v59  ;;  %v2986_v58 = vld [vmem:[%s7620_s29 + $0x55c8] sm:$0xff]  ;;  %v2857_v59 = vld [vmem:[%s7620_s29 + $0x51c0] sm:$0xff] }
 0x2c8   : > { %5055 = vmatprep.subr.mxu1 %v2750_v60  ;;  %4985 = vmatpush2.msra.mxu0 %v2621_v1  ;;  %v2985_v60 = vld [vmem:[%s7620_s29 + $0x55c0] sm:$0xff]  ;;  %v2982_v1 = vld [vmem:[%s7620_s29 + $0x55a8] sm:$0xff] }
 0x2c9   : > { %5056 = vmatpush2.msra.mxu1 %v2749_v3  ;;  %4986 = vmatprep.subr.mxu0 %v2618_v5  ;;  %v2853_v3 = vld [vmem:[%s7620_s29 + $0x51a0] sm:$0xff] }
 0x2ca   : > { %5057 = vmatprep.subr.mxu1 %v2746_v8  ;;  %4987 = vmatpush2.msra.mxu0 %v2617_v14  ;;  %v2981_v5 = vld [vmem:[%s7620_s29 + $0x55a0] sm:$0xff]  ;;  %v2850_v8 = vld [vmem:[%s7620_s29 + $0x5188] sm:$0xff] }
 0x2cb   : > { %5058 = vmatpush2.msra.mxu1 %v2745_v17  ;;  %4988 = vmatprep.subr.mxu0 %v2614_v22  ;;  %v2978_v14 = vld [vmem:[%s7620_s29 + $0x5588] sm:$0xff]  ;;  %v2849_v17 = vld [vmem:[%s7620_s29 + $0x5180] sm:$0xff] }
 0x2cc   : > { %5059 = vmatprep.subr.mxu1 %v2742_v26  ;;  %4989 = vmatpush2.msra.mxu0 %v2613_v33  ;;  %v2977_v22 = vld [vmem:[%s7620_s29 + $0x5580] sm:$0xff]  ;;  %v2846_v26 = vld [vmem:[%s7620_s29 + $0x5168] sm:$0xff] }
 0x2cd   : > { %5060 = vmatpush2.msra.mxu1 %v2741_v34  ;;  %4990 = vmatprep.subr.mxu0 %v2610_v37  ;;  %v2974_v33 = vld [vmem:[%s7620_s29 + $0x5568] sm:$0xff]  ;;  %v2845_v34 = vld [vmem:[%s7620_s29 + $0x5160] sm:$0xff] }
 0x2ce   : > { %5061 = vmatprep.subr.mxu1 %v2738_v40  ;;  %4991 = vmatpush2.msra.mxu0 %v2609_v43  ;;  %v2973_v37 = vld [vmem:[%s7620_s29 + $0x5560] sm:$0xff]  ;;  %v2842_v40 = vld [vmem:[%s7620_s29 + $0x5148] sm:$0xff] }
 0x2cf   : > { %4992 = vmatprep.mubr.f32.mxu0 %v9102_v41  ;;  %5062 = vmatpush2.msra.mxu1 %v2737_v45  ;;  %v2970_v43 = vld [vmem:[%s7620_s29 + $0x5548] sm:$0xff]  ;;  %v2841_v45 = vld [vmem:[%s7620_s29 + $0x5140] sm:$0xff] }
 0x2d0   : > { %4993 = vmatmul.mubr.f32.vlgmr.msra.gmra.mxu0 %v9087_v13  ;;  %5063 = vmatprep.mubr.f32.mxu1 %v9108_v48 }
 0x2d1   : > { %5070 = vmatprep.subr.mxu0 %v2862_v50  ;;  %5141 = vmatprep.subr.mxu1 %v2990_v54  ;;  %v2969_v50 = vld [vmem:[%s7620_s29 + $0x5540] sm:$0xff]  ;;  %v2838_v54 = vld [vmem:[%s7620_s29 + $0x5128] sm:$0xff] }
 0x2d2   : > { %5064 = vmatmul.mubr.f32.vlgmr.msra.gmra.mxu1 %v9094_v30  ;;  %5071 = vmatpush1.msra.mxu0 %v2861_v55  ;;  %v2966_v55 = vld [vmem:[%s7620_s29 + $0x5528] sm:$0xff] }
 0x2d3   : > { %5142 = vmatpush1.msra.mxu1 %v2989_v56  ;;  %5072 = vmatprep.subr.mxu0 %v2858_v57  ;;  %v2837_v56 = vld [vmem:[%s7620_s29 + $0x5120] sm:$0xff] }
 0x2d4   : > { %5143 = vmatprep.subr.mxu1 %v2986_v58  ;;  %5073 = vmatpush1.msra.mxu0 %v2857_v59  ;;  %v2965_v57 = vld [vmem:[%s7620_s29 + $0x5520] sm:$0xff]  ;;  %v2834_v58 = vld [vmem:[%s7620_s29 + $0x5108] sm:$0xff] }
 0x2d5   : > { %5144 = vmatpush1.msra.mxu1 %v2985_v60  ;;  %5074 = vmatprep.subr.mxu0 %v2854_v62  ;;  %v2962_v59 = vld [vmem:[%s7620_s29 + $0x5508] sm:$0xff]  ;;  %v2833_v60 = vld [vmem:[%s7620_s29 + $0x5100] sm:$0xff] }
 0x2d6   : > { %5145 = vmatprep.subr.mxu1 %v2982_v1  ;;  %5075 = vmatpush1.msra.mxu0 %v2853_v3  ;;  %v2961_v62 = vld [vmem:[%s7620_s29 + $0x5500] sm:$0xff]  ;;  %v2830_v1 = vld [vmem:[%s7620_s29 + $0x50e8] sm:$0xff] }
 0x2d7   : > { %5146 = vmatpush1.msra.mxu1 %v2981_v5  ;;  %5076 = vmatprep.subr.mxu0 %v2850_v8  ;;  %v2958_v3 = vld [vmem:[%s7620_s29 + $0x54e8] sm:$0xff]  ;;  %v2829_v5 = vld [vmem:[%s7620_s29 + $0x50e0] sm:$0xff] }
 0x2d8   : > { %5147 = vmatprep.subr.mxu1 %v2978_v14  ;;  %5077 = vmatpush1.msra.mxu0 %v2849_v17  ;;  %v2957_v8 = vld [vmem:[%s7620_s29 + $0x54e0] sm:$0xff]  ;;  %v2826_v14 = vld [vmem:[%s7620_s29 + $0x50c8] sm:$0xff] }
 0x2d9   : > { %5148 = vmatpush1.msra.mxu1 %v2977_v22  ;;  %5078 = vmatprep.subr.mxu0 %v2846_v26  ;;  %v2954_v17 = vld [vmem:[%s7620_s29 + $0x54c8] sm:$0xff]  ;;  %v2825_v22 = vld [vmem:[%s7620_s29 + $0x50c0] sm:$0xff] }
 0x2da   : > { %5149 = vmatprep.subr.mxu1 %v2974_v33  ;;  %5079 = vmatpush1.msra.mxu0 %v2845_v34  ;;  %v2953_v26 = vld [vmem:[%s7620_s29 + $0x54c0] sm:$0xff]  ;;  %v2822_v33 = vld [vmem:[%s7620_s29 + $0x50a8] sm:$0xff] }
 0x2db   : > { %5150 = vmatpush1.msra.mxu1 %v2973_v37  ;;  %5080 = vmatprep.subr.mxu0 %v2842_v40  ;;  %v2950_v34 = vld [vmem:[%s7620_s29 + $0x54a8] sm:$0xff]  ;;  %v2821_v37 = vld [vmem:[%s7620_s29 + $0x50a0] sm:$0xff] }
 0x2dc   : > { %5151 = vmatprep.subr.mxu1 %v2970_v43  ;;  %5081 = vmatpush1.msra.mxu0 %v2841_v45  ;;  %v2949_v40 = vld [vmem:[%s7620_s29 + $0x54a0] sm:$0xff]  ;;  %v2818_v43 = vld [vmem:[%s7620_s29 + $0x5088] sm:$0xff] }
 0x2dd   : > { %5152 = vmatpush1.msra.mxu1 %v2969_v50  ;;  %5082 = vmatprep.subr.mxu0 %v2838_v54  ;;  %v2946_v45 = vld [vmem:[%s7620_s29 + $0x5488] sm:$0xff]  ;;  %v2817_v50 = vld [vmem:[%s7620_s29 + $0x5080] sm:$0xff] }
 0x2de   : > { %5153 = vmatprep.subr.mxu1 %v2966_v55  ;;  %5083 = vmatpush1.msra.mxu0 %v2837_v56  ;;  %v2945_v54 = vld [vmem:[%s7620_s29 + $0x5480] sm:$0xff]  ;;  %v2814_v55 = vld [vmem:[%s7620_s29 + $0x5068] sm:$0xff] }
 0x2df   : > { %5154 = vmatpush1.msra.mxu1 %v2965_v57  ;;  %5084 = vmatprep.subr.mxu0 %v2834_v58  ;;  %v2942_v56 = vld [vmem:[%s7620_s29 + $0x5468] sm:$0xff]  ;;  %v2813_v57 = vld [vmem:[%s7620_s29 + $0x5060] sm:$0xff] }
 0x2e0   : > { %5155 = vmatprep.subr.mxu1 %v2962_v59  ;;  %5085 = vmatpush1.msra.mxu0 %v2833_v60  ;;  %v2941_v58 = vld [vmem:[%s7620_s29 + $0x5460] sm:$0xff]  ;;  %v2810_v59 = vld [vmem:[%s7620_s29 + $0x5048] sm:$0xff] }
 0x2e1   : > { %5156 = vmatpush1.msra.mxu1 %v2961_v62  ;;  %5086 = vmatprep.subr.mxu0 %v2830_v1  ;;  %v2938_v60 = vld [vmem:[%s7620_s29 + $0x5448] sm:$0xff]  ;;  %v2809_v62 = vld [vmem:[%s7620_s29 + $0x5040] sm:$0xff] }
 0x2e2   : > { %5157 = vmatprep.subr.mxu1 %v2958_v3  ;;  %5087 = vmatpush1.msra.mxu0 %v2829_v5  ;;  %v2937_v1 = vld [vmem:[%s7620_s29 + $0x5440] sm:$0xff]  ;;  %v2806_v3 = vld [vmem:[%s7620_s29 + $0x5028] sm:$0xff] }
 0x2e3   : > { %5158 = vmatpush1.msra.mxu1 %v2957_v8  ;;  %5088 = vmatprep.subr.mxu0 %v2826_v14  ;;  %v2934_v5 = vld [vmem:[%s7620_s29 + $0x5428] sm:$0xff]  ;;  %v2805_v8 = vld [vmem:[%s7620_s29 + $0x5020] sm:$0xff] }
 0x2e4   : > { %5159 = vmatprep.subr.mxu1 %v2954_v17  ;;  %5089 = vmatpush1.msra.mxu0 %v2825_v22  ;;  %v2933_v14 = vld [vmem:[%s7620_s29 + $0x5420] sm:$0xff]  ;;  %v2802_v17 = vld [vmem:[%s7620_s29 + $0x5008] sm:$0xff] }
 0x2e5   : > { %5160 = vmatpush1.msra.mxu1 %v2953_v26  ;;  %5090 = vmatprep.subr.mxu0 %v2822_v33  ;;  %v2930_v22 = vld [vmem:[%s7620_s29 + $0x5408] sm:$0xff]  ;;  %v2801_v26 = vld [vmem:[%s7620_s29 + $0x5000] sm:$0xff] }
 0x2e6   : > { %5161 = vmatprep.subr.mxu1 %v2950_v34  ;;  %5091 = vmatpush1.msra.mxu0 %v2821_v37  ;;  %v2929_v33 = vld [vmem:[%s7620_s29 + $0x5400] sm:$0xff]  ;;  %v2926_v34 = vld [vmem:[%s7620_s29 + $0x53e8] sm:$0xff] }
 0x2e7   : > { %5162 = vmatpush1.msra.mxu1 %v2949_v40  ;;  %5092 = vmatprep.subr.mxu0 %v2818_v43  ;;  %v3054_v37 = vld [vmem:[%s7620_s29 + $0x57e8] sm:$0xff]  ;;  %v2925_v40 = vld [vmem:[%s7620_s29 + $0x53e0] sm:$0xff] }
 0x2e8   : > { %5163 = vmatprep.subr.mxu1 %v2946_v45  ;;  %5093 = vmatpush1.msra.mxu0 %v2817_v50  ;;  %v3053_v43 = vld [vmem:[%s7620_s29 + $0x57e0] sm:$0xff]  ;;  %v2922_v45 = vld [vmem:[%s7620_s29 + $0x53c8] sm:$0xff] }
 0x2e9   : > { %5164 = vmatpush1.msra.mxu1 %v2945_v54  ;;  %5094 = vmatprep.subr.mxu0 %v2814_v55  ;;  %v3050_v50 = vld [vmem:[%s7620_s29 + $0x57c8] sm:$0xff]  ;;  %v2921_v54 = vld [vmem:[%s7620_s29 + $0x53c0] sm:$0xff] }
 0x2ea   : > { %5165 = vmatprep.subr.mxu1 %v2942_v56  ;;  %5095 = vmatpush1.msra.mxu0 %v2813_v57  ;;  %v3049_v55 = vld [vmem:[%s7620_s29 + $0x57c0] sm:$0xff]  ;;  %v2918_v56 = vld [vmem:[%s7620_s29 + $0x53a8] sm:$0xff] }
 0x2eb   : > { %5166 = vmatpush1.msra.mxu1 %v2941_v58  ;;  %5096 = vmatprep.subr.mxu0 %v2810_v59  ;;  %v3046_v57 = vld [vmem:[%s7620_s29 + $0x57a8] sm:$0xff]  ;;  %v2917_v58 = vld [vmem:[%s7620_s29 + $0x53a0] sm:$0xff] }
 0x2ec   : > { %5167 = vmatprep.subr.mxu1 %v2938_v60  ;;  %5097 = vmatpush1.msra.mxu0 %v2809_v62  ;;  %v3045_v59 = vld [vmem:[%s7620_s29 + $0x57a0] sm:$0xff]  ;;  %v2914_v60 = vld [vmem:[%s7620_s29 + $0x5388] sm:$0xff] }
 0x2ed   : > { %5168 = vmatpush1.msra.mxu1 %v2937_v1  ;;  %5098 = vmatprep.subr.mxu0 %v2806_v3  ;;  %v3042_v62 = vld [vmem:[%s7620_s29 + $0x5788] sm:$0xff]  ;;  %v2913_v1 = vld [vmem:[%s7620_s29 + $0x5380] sm:$0xff] }
 0x2ee   : > { %5169 = vmatprep.subr.mxu1 %v2934_v5  ;;  %5099 = vmatpush1.msra.mxu0 %v2805_v8  ;;  %v3041_v3 = vld [vmem:[%s7620_s29 + $0x5780] sm:$0xff]  ;;  %v2910_v5 = vld [vmem:[%s7620_s29 + $0x5368] sm:$0xff] }
 0x2ef   : > { %5170 = vmatpush1.msra.mxu1 %v2933_v14  ;;  %5100 = vmatprep.subr.mxu0 %v2802_v17  ;;  %v3038_v8 = vld [vmem:[%s7620_s29 + $0x5768] sm:$0xff]  ;;  %v2909_v14 = vld [vmem:[%s7620_s29 + $0x5360] sm:$0xff] }
 0x2f0   : > { %5171 = vmatprep.subr.mxu1 %v2930_v22  ;;  %5101 = vmatpush1.msra.mxu0 %v2801_v26  ;;  %v3037_v17 = vld [vmem:[%s7620_s29 + $0x5760] sm:$0xff]  ;;  %v2906_v22 = vld [vmem:[%s7620_s29 + $0x5348] sm:$0xff] }
 0x2f1   : > { %5172 = vmatpush1.msra.mxu1 %v2929_v33  ;;  %5102 = vmatprep.subr.mxu0 %v2926_v34  ;;  %v3034_v26 = vld [vmem:[%s7620_s29 + $0x5748] sm:$0xff]  ;;  %v2905_v33 = vld [vmem:[%s7620_s29 + $0x5340] sm:$0xff] }
 0x2f2   : > { %5173 = vmatprep.subr.mxu1 %v3054_v37  ;;  %5103 = vmatpush2.msra.mxu0 %v2925_v40  ;;  %v3033_v34 = vld [vmem:[%s7620_s29 + $0x5740] sm:$0xff]  ;;  %v2902_v37 = vld [vmem:[%s7620_s29 + $0x5328] sm:$0xff] }
 0x2f3   : > { %5174 = vmatpush2.msra.mxu1 %v3053_v43  ;;  %5104 = vmatprep.subr.mxu0 %v2922_v45  ;;  %v3030_v40 = vld [vmem:[%s7620_s29 + $0x5728] sm:$0xff]  ;;  %v2901_v43 = vld [vmem:[%s7620_s29 + $0x5320] sm:$0xff] }
 0x2f4   : > { %5175 = vmatprep.subr.mxu1 %v3050_v50  ;;  %5105 = vmatpush2.msra.mxu0 %v2921_v54  ;;  %v3029_v45 = vld [vmem:[%s7620_s29 + $0x5720] sm:$0xff]  ;;  %v2898_v50 = vld [vmem:[%s7620_s29 + $0x5308] sm:$0xff] }
 0x2f5   : > { %5176 = vmatpush2.msra.mxu1 %v3049_v55  ;;  %5106 = vmatprep.subr.mxu0 %v2918_v56  ;;  %v3026_v54 = vld [vmem:[%s7620_s29 + $0x5708] sm:$0xff]  ;;  %v2897_v55 = vld [vmem:[%s7620_s29 + $0x5300] sm:$0xff] }
 0x2f6   : > { %5177 = vmatprep.subr.mxu1 %v3046_v57  ;;  %5107 = vmatpush2.msra.mxu0 %v2917_v58  ;;  %v3025_v56 = vld [vmem:[%s7620_s29 + $0x5700] sm:$0xff]  ;;  %v2894_v57 = vld [vmem:[%s7620_s29 + $0x52e8] sm:$0xff] }
 0x2f7   : > { %5178 = vmatpush2.msra.mxu1 %v3045_v59  ;;  %5108 = vmatprep.subr.mxu0 %v2914_v60  ;;  %v3022_v58 = vld [vmem:[%s7620_s29 + $0x56e8] sm:$0xff]  ;;  %v2893_v59 = vld [vmem:[%s7620_s29 + $0x52e0] sm:$0xff] }
 0x2f8   : > { %5179 = vmatprep.subr.mxu1 %v3042_v62  ;;  %5109 = vmatpush2.msra.mxu0 %v2913_v1  ;;  %v3021_v60 = vld [vmem:[%s7620_s29 + $0x56e0] sm:$0xff]  ;;  %v2890_v62 = vld [vmem:[%s7620_s29 + $0x52c8] sm:$0xff] }
 0x2f9   : > { %5180 = vmatpush2.msra.mxu1 %v3041_v3  ;;  %5110 = vmatprep.subr.mxu0 %v2910_v5  ;;  %v3018_v1 = vld [vmem:[%s7620_s29 + $0x56c8] sm:$0xff]  ;;  %v2889_v3 = vld [vmem:[%s7620_s29 + $0x52c0] sm:$0xff] }
 0x2fa   : > { %5181 = vmatprep.subr.mxu1 %v3038_v8  ;;  %5111 = vmatpush2.msra.mxu0 %v2909_v14  ;;  %v3017_v5 = vld [vmem:[%s7620_s29 + $0x56c0] sm:$0xff]  ;;  %v2886_v8 = vld [vmem:[%s7620_s29 + $0x52a8] sm:$0xff] }
 0x2fb   : > { %5182 = vmatpush2.msra.mxu1 %v3037_v17  ;;  %5112 = vmatprep.subr.mxu0 %v2906_v22  ;;  %v3014_v14 = vld [vmem:[%s7620_s29 + $0x56a8] sm:$0xff]  ;;  %v2885_v17 = vld [vmem:[%s7620_s29 + $0x52a0] sm:$0xff] }
 0x2fc   : > { %5183 = vmatprep.subr.mxu1 %v3034_v26  ;;  %5113 = vmatpush2.msra.mxu0 %v2905_v33  ;;  %v3013_v22 = vld [vmem:[%s7620_s29 + $0x56a0] sm:$0xff]  ;;  %v238_v26 = vld [vmem:[%s7638_s22 + $0x50] sm:$0xff]  ;;  %v2882_v33 = vld [vmem:[%s7620_s29 + $0x5288] sm:$0xff] }
 0x2fd   : > { %5184 = vmatpush2.msra.mxu1 %v3033_v34  ;;  %5114 = vmatprep.subr.mxu0 %v2902_v37  ;;  %v3010_v34 = vld [vmem:[%s7620_s29 + $0x5688] sm:$0xff]  ;;  %v2881_v37 = vld [vmem:[%s7620_s29 + $0x5280] sm:$0xff] }
 0x2fe   : > { %5185 = vmatprep.subr.mxu1 %v3030_v40  ;;  %5115 = vmatpush2.msra.mxu0 %v2901_v43  ;;  %v3009_v40 = vld [vmem:[%s7620_s29 + $0x5680] sm:$0xff]  ;;  %v2878_v43 = vld [vmem:[%s7620_s29 + $0x5268] sm:$0xff] }
 0x2ff   : > { %5186 = vmatpush2.msra.mxu1 %v3029_v45  ;;  %5116 = vmatprep.subr.mxu0 %v2898_v50  ;;  %v3006_v45 = vld [vmem:[%s7620_s29 + $0x5668] sm:$0xff]  ;;  %v3560_v50 = vcombine.high %v238_v26, %v238_v26 }
 0x300   : > { %5187 = vmatprep.subr.mxu1 %v3026_v54  ;;  %5117 = vmatpush2.msra.mxu0 %v2897_v55  ;;  %v2877_v54 = vld [vmem:[%s7620_s29 + $0x5260] sm:$0xff] }
 0x301   : > { %5188 = vmatpush2.msra.mxu1 %v3025_v56  ;;  %5118 = vmatprep.subr.mxu0 %v2894_v57  ;;  %v3005_v55 = vld [vmem:[%s7620_s29 + $0x5660] sm:$0xff]  ;;  %v2874_v56 = vld [vmem:[%s7620_s29 + $0x5248] sm:$0xff] }
 0x302   : > { %5189 = vmatprep.subr.mxu1 %v3022_v58  ;;  %5119 = vmatpush2.msra.mxu0 %v2893_v59  ;;  %v3002_v57 = vld [vmem:[%s7620_s29 + $0x5648] sm:$0xff]  ;;  %v9234_v58 = vrot.slane %v238_v26, %v7753_v53  ;;  %v2873_v59 = vld [vmem:[%s7620_s29 + $0x5240] sm:$0xff] }
 0x303   : > { %5190 = vmatpush2.msra.mxu1 %v3021_v60  ;;  %5120 = vmatprep.subr.mxu0 %v2890_v62  ;;  %v3001_v60 = vld [vmem:[%s7620_s29 + $0x5640] sm:$0xff]  ;;  %v2870_v62 = vld [vmem:[%s7620_s29 + $0x5228] sm:$0xff] }
 0x304   : > { %5191 = vmatprep.subr.mxu1 %v3018_v1  ;;  %5121 = vmatpush2.msra.mxu0 %v2889_v3  ;;  %v2998_v1 = vld [vmem:[%s7620_s29 + $0x5628] sm:$0xff]  ;;  %v9241_v3 = vrot.slane %v3560_v50, %v7753_v53  ;;  %v2865_v26 = vld [vmem:[%s7620_s29 + $0x5200] sm:$0xff] }
 0x305   : > { %5192 = vmatpush2.msra.mxu1 %v3017_v5  ;;  %5122 = vmatprep.subr.mxu0 %v2886_v8  ;;  %v2869_v5 = vld [vmem:[%s7620_s29 + $0x5220] sm:$0xff]  ;;  %v3114_v50 = vld [vmem:[%s7620_s29 + $0x59c8] sm:$0xff] }
 0x306   : > { %5193 = vmatprep.subr.mxu1 %v3014_v14  ;;  %5123 = vmatpush2.msra.mxu0 %v2885_v17  ;;  %v2997_v8 = vld [vmem:[%s7620_s29 + $0x5620] sm:$0xff]  ;;  %v2866_v14 = vld [vmem:[%s7620_s29 + $0x5208] sm:$0xff] }
 0x307   : > { %5194 = vmatpush2.msra.mxu1 %v3013_v22  ;;  %5124 = vmatprep.subr.mxu0 %v2882_v33  ;;  %v2994_v17 = vld [vmem:[%s7620_s29 + $0x5608] sm:$0xff]  ;;  %v9249_v22 = vcombine.high %v9234_v58, %v9234_v58  ;;  %v2993_v33 = vld [vmem:[%s7620_s29 + $0x5600] sm:$0xff] }
 0x308   : > { %5195 = vmatprep.subr.mxu1 %v3010_v34  ;;  %5125 = vmatpush2.msra.mxu0 %v2881_v37  ;;  %v9255_v34 = vcombine.high %v9241_v3, %v9241_v3  ;;  %v3118_v37 = vld [vmem:[%s7620_s29 + $0x59e8] sm:$0xff] }
 0x309   : > { %5196 = vmatpush2.msra.mxu1 %v3009_v40  ;;  %5126 = vmatprep.subr.mxu0 %v2878_v43  ;;  %v3246_v40 = vld [vmem:[%s7620_s29 + $0x5de8] sm:$0xff]  ;;  %v3117_v43 = vld [vmem:[%s7620_s29 + $0x59e0] sm:$0xff] }
 0x30a   : > { %5197 = vmatprep.subr.mxu1 %v3006_v45  ;;  %5127 = vmatpush2.msra.mxu0 %v2877_v54  ;;  %v3245_v45 = vld [vmem:[%s7620_s29 + $0x5de0] sm:$0xff]  ;;  %v3242_v54 = vld [vmem:[%s7620_s29 + $0x5dc8] sm:$0xff] }
 0x30b   : > { %5198 = vmatpush2.msra.mxu1 %v3005_v55  ;;  %5128 = vmatprep.subr.mxu0 %v2874_v56  ;;  %v3113_v55 = vld [vmem:[%s7620_s29 + $0x59c0] sm:$0xff] }
 0x30c   : > { %5199 = vmatprep.subr.mxu1 %v3002_v57  ;;  %5129 = vmatpush2.msra.mxu0 %v2873_v59  ;;  %v3241_v56 = vld [vmem:[%s7620_s29 + $0x5dc0] sm:$0xff]  ;;  %v3110_v57 = vld [vmem:[%s7620_s29 + $0x59a8] sm:$0xff] }
 0x30d   : > { %5200 = vmatpush2.msra.mxu1 %v3001_v60  ;;  %5130 = vmatprep.subr.mxu0 %v2870_v62  ;;  %v3238_v59 = vld [vmem:[%s7620_s29 + $0x5da8] sm:$0xff]  ;;  %v3109_v60 = vld [vmem:[%s7620_s29 + $0x59a0] sm:$0xff] }
 0x30e   : > { %5201 = vmatprep.subr.mxu1 %v2998_v1  ;;  %5131 = vmatpush2.msra.mxu0 %v2869_v5  ;;  %v3237_v62 = vld [vmem:[%s7620_s29 + $0x5da0] sm:$0xff]  ;;  %v3106_v1 = vld [vmem:[%s7620_s29 + $0x5988] sm:$0xff] }
 0x30f   : > { %5202 = vmatpush2.msra.mxu1 %v2997_v8  ;;  %5132 = vmatprep.subr.mxu0 %v2866_v14  ;;  %v3234_v5 = vld [vmem:[%s7620_s29 + $0x5d88] sm:$0xff]  ;;  %v3105_v8 = vld [vmem:[%s7620_s29 + $0x5980] sm:$0xff] }
 0x310   : > { %5203 = vmatprep.subr.mxu1 %v2994_v17  ;;  %5133 = vmatpush2.msra.mxu0 %v2865_v26  ;;  %v3233_v14 = vld [vmem:[%s7620_s29 + $0x5d80] sm:$0xff]  ;;  %v3102_v17 = vld [vmem:[%s7620_s29 + $0x5968] sm:$0xff] }
 0x311   : > { %5134 = vmatprep.mubr.f32.mxu0 %v9249_v22  ;;  %5204 = vmatpush2.msra.mxu1 %v2993_v33  ;;  %v3230_v26 = vld [vmem:[%s7620_s29 + $0x5d68] sm:$0xff]  ;;  %v3101_v33 = vld [vmem:[%s7620_s29 + $0x5960] sm:$0xff] }
 0x312   : > { %5135 = vmatmul.mubr.f32.vlgmr.msra.gmra.mxu0 %v9234_v58  ;;  %5205 = vmatprep.mubr.f32.mxu1 %v9255_v34 }
 0x313   : > { %5212 = vmatprep.subr.mxu0 %v3118_v37  ;;  %5283 = vmatprep.subr.mxu1 %v3246_v40  ;;  %v3229_v37 = vld [vmem:[%s7620_s29 + $0x5d60] sm:$0xff]  ;;  %v3098_v40 = vld [vmem:[%s7620_s29 + $0x5948] sm:$0xff] }
 0x314   : > { %5206 = vmatmul.mubr.f32.vlgmr.msra.gmra.mxu1 %v9241_v3  ;;  %5213 = vmatpush1.msra.mxu0 %v3117_v43  ;;  %v3226_v43 = vld [vmem:[%s7620_s29 + $0x5d48] sm:$0xff] }
 0x315   : > { %5284 = vmatpush1.msra.mxu1 %v3245_v45  ;;  %5214 = vmatprep.subr.mxu0 %v3114_v50  ;;  %v3097_v45 = vld [vmem:[%s7620_s29 + $0x5940] sm:$0xff] }
 0x316   : > { %5285 = vmatprep.subr.mxu1 %v3242_v54  ;;  %5215 = vmatpush1.msra.mxu0 %v3113_v55  ;;  %v3225_v50 = vld [vmem:[%s7620_s29 + $0x5d40] sm:$0xff]  ;;  %v3094_v54 = vld [vmem:[%s7620_s29 + $0x5928] sm:$0xff] }
 0x317   : > { %5286 = vmatpush1.msra.mxu1 %v3241_v56  ;;  %5216 = vmatprep.subr.mxu0 %v3110_v57  ;;  %v3222_v55 = vld [vmem:[%s7620_s29 + $0x5d28] sm:$0xff]  ;;  %v3093_v56 = vld [vmem:[%s7620_s29 + $0x5920] sm:$0xff] }
 0x318   : > { %5287 = vmatprep.subr.mxu1 %v3238_v59  ;;  %5217 = vmatpush1.msra.mxu0 %v3109_v60  ;;  %v3221_v57 = vld [vmem:[%s7620_s29 + $0x5d20] sm:$0xff]  ;;  %v3090_v59 = vld [vmem:[%s7620_s29 + $0x5908] sm:$0xff] }
 0x319   : > { %5288 = vmatpush1.msra.mxu1 %v3237_v62  ;;  %5218 = vmatprep.subr.mxu0 %v3106_v1  ;;  %v3218_v60 = vld [vmem:[%s7620_s29 + $0x5d08] sm:$0xff]  ;;  %v3089_v62 = vld [vmem:[%s7620_s29 + $0x5900] sm:$0xff] }
 0x31a   : > { %5289 = vmatprep.subr.mxu1 %v3234_v5  ;;  %5219 = vmatpush1.msra.mxu0 %v3105_v8  ;;  %v3217_v1 = vld [vmem:[%s7620_s29 + $0x5d00] sm:$0xff]  ;;  %v3086_v5 = vld [vmem:[%s7620_s29 + $0x58e8] sm:$0xff] }
 0x31b   : > { %5290 = vmatpush1.msra.mxu1 %v3233_v14  ;;  %5220 = vmatprep.subr.mxu0 %v3102_v17  ;;  %v3214_v8 = vld [vmem:[%s7620_s29 + $0x5ce8] sm:$0xff]  ;;  %v3085_v14 = vld [vmem:[%s7620_s29 + $0x58e0] sm:$0xff] }
 0x31c   : > { %5291 = vmatprep.subr.mxu1 %v3230_v26  ;;  %5221 = vmatpush1.msra.mxu0 %v3101_v33  ;;  %v3213_v17 = vld [vmem:[%s7620_s29 + $0x5ce0] sm:$0xff]  ;;  %v3082_v26 = vld [vmem:[%s7620_s29 + $0x58c8] sm:$0xff] }
 0x31d   : > { %5292 = vmatpush1.msra.mxu1 %v3229_v37  ;;  %5222 = vmatprep.subr.mxu0 %v3098_v40  ;;  %v3210_v33 = vld [vmem:[%s7620_s29 + $0x5cc8] sm:$0xff]  ;;  %v3081_v37 = vld [vmem:[%s7620_s29 + $0x58c0] sm:$0xff] }
 0x31e   : > { %5293 = vmatprep.subr.mxu1 %v3226_v43  ;;  %5223 = vmatpush1.msra.mxu0 %v3097_v45  ;;  %v3209_v40 = vld [vmem:[%s7620_s29 + $0x5cc0] sm:$0xff]  ;;  %v3078_v43 = vld [vmem:[%s7620_s29 + $0x58a8] sm:$0xff] }
 0x31f   : > { %5294 = vmatpush1.msra.mxu1 %v3225_v50  ;;  %5224 = vmatprep.subr.mxu0 %v3094_v54  ;;  %v3206_v45 = vld [vmem:[%s7620_s29 + $0x5ca8] sm:$0xff]  ;;  %v3077_v50 = vld [vmem:[%s7620_s29 + $0x58a0] sm:$0xff] }
 0x320   : > { %5295 = vmatprep.subr.mxu1 %v3222_v55  ;;  %5225 = vmatpush1.msra.mxu0 %v3093_v56  ;;  %v3205_v54 = vld [vmem:[%s7620_s29 + $0x5ca0] sm:$0xff]  ;;  %v3074_v55 = vld [vmem:[%s7620_s29 + $0x5888] sm:$0xff] }
 0x321   : > { %5296 = vmatpush1.msra.mxu1 %v3221_v57  ;;  %5226 = vmatprep.subr.mxu0 %v3090_v59  ;;  %v3202_v56 = vld [vmem:[%s7620_s29 + $0x5c88] sm:$0xff]  ;;  %v3073_v57 = vld [vmem:[%s7620_s29 + $0x5880] sm:$0xff] }
 0x322   : > { %5297 = vmatprep.subr.mxu1 %v3218_v60  ;;  %5227 = vmatpush1.msra.mxu0 %v3089_v62  ;;  %v3201_v59 = vld [vmem:[%s7620_s29 + $0x5c80] sm:$0xff]  ;;  %v3070_v60 = vld [vmem:[%s7620_s29 + $0x5868] sm:$0xff] }
 0x323   : > { %5298 = vmatpush1.msra.mxu1 %v3217_v1  ;;  %5228 = vmatprep.subr.mxu0 %v3086_v5  ;;  %v3198_v62 = vld [vmem:[%s7620_s29 + $0x5c68] sm:$0xff]  ;;  %v3069_v1 = vld [vmem:[%s7620_s29 + $0x5860] sm:$0xff] }
 0x324   : > { %5299 = vmatprep.subr.mxu1 %v3214_v8  ;;  %5229 = vmatpush1.msra.mxu0 %v3085_v14  ;;  %v3197_v5 = vld [vmem:[%s7620_s29 + $0x5c60] sm:$0xff]  ;;  %v3066_v8 = vld [vmem:[%s7620_s29 + $0x5848] sm:$0xff] }
 0x325   : > { %5300 = vmatpush1.msra.mxu1 %v3213_v17  ;;  %5230 = vmatprep.subr.mxu0 %v3082_v26  ;;  %v3194_v14 = vld [vmem:[%s7620_s29 + $0x5c48] sm:$0xff]  ;;  %v3065_v17 = vld [vmem:[%s7620_s29 + $0x5840] sm:$0xff] }
 0x326   : > { %5301 = vmatprep.subr.mxu1 %v3210_v33  ;;  %5231 = vmatpush1.msra.mxu0 %v3081_v37  ;;  %v3193_v26 = vld [vmem:[%s7620_s29 + $0x5c40] sm:$0xff]  ;;  %v3062_v33 = vld [vmem:[%s7620_s29 + $0x5828] sm:$0xff] }
 0x327   : > { %5302 = vmatpush1.msra.mxu1 %v3209_v40  ;;  %5232 = vmatprep.subr.mxu0 %v3078_v43  ;;  %v3190_v37 = vld [vmem:[%s7620_s29 + $0x5c28] sm:$0xff]  ;;  %v3061_v40 = vld [vmem:[%s7620_s29 + $0x5820] sm:$0xff] }
 0x328   : > { %5303 = vmatprep.subr.mxu1 %v3206_v45  ;;  %5233 = vmatpush1.msra.mxu0 %v3077_v50  ;;  %v3189_v43 = vld [vmem:[%s7620_s29 + $0x5c20] sm:$0xff]  ;;  %v3058_v45 = vld [vmem:[%s7620_s29 + $0x5808] sm:$0xff] }
 0x329   : > { %5304 = vmatpush1.msra.mxu1 %v3205_v54  ;;  %5234 = vmatprep.subr.mxu0 %v3074_v55  ;;  %v3186_v50 = vld [vmem:[%s7620_s29 + $0x5c08] sm:$0xff]  ;;  %v3057_v54 = vld [vmem:[%s7620_s29 + $0x5800] sm:$0xff] }
 0x32a   : > { %5305 = vmatprep.subr.mxu1 %v3202_v56  ;;  %5235 = vmatpush1.msra.mxu0 %v3073_v57  ;;  %v3185_v55 = vld [vmem:[%s7620_s29 + $0x5c00] sm:$0xff]  ;;  %v3182_v56 = vld [vmem:[%s7620_s29 + $0x5be8] sm:$0xff] }
 0x32b   : > { %5306 = vmatpush1.msra.mxu1 %v3201_v59  ;;  %5236 = vmatprep.subr.mxu0 %v3070_v60  ;;  %v3310_v57 = vld [vmem:[%s7620_s29 + $0x5fe8] sm:$0xff]  ;;  %v3181_v59 = vld [vmem:[%s7620_s29 + $0x5be0] sm:$0xff] }
 0x32c   : > { %5307 = vmatprep.subr.mxu1 %v3198_v62  ;;  %5237 = vmatpush1.msra.mxu0 %v3069_v1  ;;  %v3309_v60 = vld [vmem:[%s7620_s29 + $0x5fe0] sm:$0xff]  ;;  %v3178_v62 = vld [vmem:[%s7620_s29 + $0x5bc8] sm:$0xff] }
 0x32d   : > { %5308 = vmatpush1.msra.mxu1 %v3197_v5  ;;  %5238 = vmatprep.subr.mxu0 %v3066_v8  ;;  %v3306_v1 = vld [vmem:[%s7620_s29 + $0x5fc8] sm:$0xff]  ;;  %v3177_v5 = vld [vmem:[%s7620_s29 + $0x5bc0] sm:$0xff] }
 0x32e   : > { %5309 = vmatprep.subr.mxu1 %v3194_v14  ;;  %5239 = vmatpush1.msra.mxu0 %v3065_v17  ;;  %v3305_v8 = vld [vmem:[%s7620_s29 + $0x5fc0] sm:$0xff]  ;;  %v3174_v14 = vld [vmem:[%s7620_s29 + $0x5ba8] sm:$0xff] }
 0x32f   : > { %5310 = vmatpush1.msra.mxu1 %v3193_v26  ;;  %5240 = vmatprep.subr.mxu0 %v3062_v33  ;;  %v3302_v17 = vld [vmem:[%s7620_s29 + $0x5fa8] sm:$0xff]  ;;  %v3173_v26 = vld [vmem:[%s7620_s29 + $0x5ba0] sm:$0xff] }
 0x330   : > { %5311 = vmatprep.subr.mxu1 %v3190_v37  ;;  %5241 = vmatpush1.msra.mxu0 %v3061_v40  ;;  %v3301_v33 = vld [vmem:[%s7620_s29 + $0x5fa0] sm:$0xff]  ;;  %v3170_v37 = vld [vmem:[%s7620_s29 + $0x5b88] sm:$0xff] }
 0x331   : > { %5312 = vmatpush1.msra.mxu1 %v3189_v43  ;;  %5242 = vmatprep.subr.mxu0 %v3058_v45  ;;  %v3298_v40 = vld [vmem:[%s7620_s29 + $0x5f88] sm:$0xff]  ;;  %v3169_v43 = vld [vmem:[%s7620_s29 + $0x5b80] sm:$0xff] }
 0x332   : > { %5313 = vmatprep.subr.mxu1 %v3186_v50  ;;  %5243 = vmatpush1.msra.mxu0 %v3057_v54  ;;  %v3297_v45 = vld [vmem:[%s7620_s29 + $0x5f80] sm:$0xff]  ;;  %v3166_v50 = vld [vmem:[%s7620_s29 + $0x5b68] sm:$0xff] }
 0x333   : > { %5314 = vmatpush1.msra.mxu1 %v3185_v55  ;;  %5244 = vmatprep.subr.mxu0 %v3182_v56  ;;  %v3294_v54 = vld [vmem:[%s7620_s29 + $0x5f68] sm:$0xff]  ;;  %v3165_v55 = vld [vmem:[%s7620_s29 + $0x5b60] sm:$0xff] }
 0x334   : > { %5315 = vmatprep.subr.mxu1 %v3310_v57  ;;  %5245 = vmatpush2.msra.mxu0 %v3181_v59  ;;  %v3293_v56 = vld [vmem:[%s7620_s29 + $0x5f60] sm:$0xff]  ;;  %v3162_v57 = vld [vmem:[%s7620_s29 + $0x5b48] sm:$0xff] }
 0x335   : > { %5316 = vmatpush2.msra.mxu1 %v3309_v60  ;;  %5246 = vmatprep.subr.mxu0 %v3178_v62  ;;  %v3290_v59 = vld [vmem:[%s7620_s29 + $0x5f48] sm:$0xff]  ;;  %v3161_v60 = vld [vmem:[%s7620_s29 + $0x5b40] sm:$0xff] }
 0x336   : > { %5317 = vmatprep.subr.mxu1 %v3306_v1  ;;  %5247 = vmatpush2.msra.mxu0 %v3177_v5  ;;  %v3289_v62 = vld [vmem:[%s7620_s29 + $0x5f40] sm:$0xff]  ;;  %v3158_v1 = vld [vmem:[%s7620_s29 + $0x5b28] sm:$0xff] }
 0x337   : > { %5318 = vmatpush2.msra.mxu1 %v3305_v8  ;;  %5248 = vmatprep.subr.mxu0 %v3174_v14  ;;  %v3286_v5 = vld [vmem:[%s7620_s29 + $0x5f28] sm:$0xff]  ;;  %v3157_v8 = vld [vmem:[%s7620_s29 + $0x5b20] sm:$0xff] }
 0x338   : > { %5319 = vmatprep.subr.mxu1 %v3302_v17  ;;  %5249 = vmatpush2.msra.mxu0 %v3173_v26  ;;  %v3285_v14 = vld [vmem:[%s7620_s29 + $0x5f20] sm:$0xff]  ;;  %v3154_v17 = vld [vmem:[%s7620_s29 + $0x5b08] sm:$0xff] }
 0x339   : > { %5320 = vmatpush2.msra.mxu1 %v3301_v33  ;;  %5250 = vmatprep.subr.mxu0 %v3170_v37  ;;  %v3282_v26 = vld [vmem:[%s7620_s29 + $0x5f08] sm:$0xff]  ;;  %v3153_v33 = vld [vmem:[%s7620_s29 + $0x5b00] sm:$0xff] }
 0x33a   : > { %5321 = vmatprep.subr.mxu1 %v3298_v40  ;;  %5251 = vmatpush2.msra.mxu0 %v3169_v43  ;;  %v3281_v37 = vld [vmem:[%s7620_s29 + $0x5f00] sm:$0xff]  ;;  %v3150_v40 = vld [vmem:[%s7620_s29 + $0x5ae8] sm:$0xff] }
 0x33b   : > { %5322 = vmatpush2.msra.mxu1 %v3297_v45  ;;  %5252 = vmatprep.subr.mxu0 %v3166_v50  ;;  %v3278_v43 = vld [vmem:[%s7620_s29 + $0x5ee8] sm:$0xff]  ;;  %v3149_v45 = vld [vmem:[%s7620_s29 + $0x5ae0] sm:$0xff] }
 0x33c   : > { %5323 = vmatprep.subr.mxu1 %v3294_v54  ;;  %5253 = vmatpush2.msra.mxu0 %v3165_v55  ;;  %v3277_v50 = vld [vmem:[%s7620_s29 + $0x5ee0] sm:$0xff]  ;;  %v3146_v54 = vld [vmem:[%s7620_s29 + $0x5ac8] sm:$0xff] }
 0x33d   : > { %5324 = vmatpush2.msra.mxu1 %v3293_v56  ;;  %5254 = vmatprep.subr.mxu0 %v3162_v57  ;;  %v3274_v55 = vld [vmem:[%s7620_s29 + $0x5ec8] sm:$0xff]  ;;  %v3145_v56 = vld [vmem:[%s7620_s29 + $0x5ac0] sm:$0xff] }
 0x33e   : > { %5325 = vmatprep.subr.mxu1 %v3290_v59  ;;  %5255 = vmatpush2.msra.mxu0 %v3161_v60  ;;  %v3273_v57 = vld [vmem:[%s7620_s29 + $0x5ec0] sm:$0xff]  ;;  %v3142_v59 = vld [vmem:[%s7620_s29 + $0x5aa8] sm:$0xff] }
 0x33f   : > { %5326 = vmatpush2.msra.mxu1 %v3289_v62  ;;  %5256 = vmatprep.subr.mxu0 %v3158_v1  ;;  %v3270_v60 = vld [vmem:[%s7620_s29 + $0x5ea8] sm:$0xff]  ;;  %v3141_v62 = vld [vmem:[%s7620_s29 + $0x5aa0] sm:$0xff] }
 0x340   : > { %5327 = vmatprep.subr.mxu1 %v3286_v5  ;;  %5257 = vmatpush2.msra.mxu0 %v3157_v8  ;;  %v3269_v1 = vld [vmem:[%s7620_s29 + $0x5ea0] sm:$0xff]  ;;  %v239_v5 = vld [vmem:[%s7638_s22 + $0x58] sm:$0xff]  ;;  %v3138_v8 = vld [vmem:[%s7620_s29 + $0x5a88] sm:$0xff] }
 0x341   : > { %5328 = vmatpush2.msra.mxu1 %v3285_v14  ;;  %5258 = vmatprep.subr.mxu0 %v3154_v17  ;;  %v3266_v14 = vld [vmem:[%s7620_s29 + $0x5e88] sm:$0xff]  ;;  %v3137_v17 = vld [vmem:[%s7620_s29 + $0x5a80] sm:$0xff] }
 0x342   : > { %5329 = vmatprep.subr.mxu1 %v3282_v26  ;;  %5259 = vmatpush2.msra.mxu0 %v3153_v33  ;;  %v3265_v26 = vld [vmem:[%s7620_s29 + $0x5e80] sm:$0xff]  ;;  %v3134_v33 = vld [vmem:[%s7620_s29 + $0x5a68] sm:$0xff] }
 0x343   : > { %5330 = vmatpush2.msra.mxu1 %v3281_v37  ;;  %5260 = vmatprep.subr.mxu0 %v3150_v40  ;;  %v3262_v37 = vld [vmem:[%s7620_s29 + $0x5e68] sm:$0xff]  ;;  %v3577_v40 = vcombine.high %v239_v5, %v239_v5 }
 0x344   : > { %5331 = vmatprep.subr.mxu1 %v3278_v43  ;;  %5261 = vmatpush2.msra.mxu0 %v3149_v45  ;;  %v3133_v43 = vld [vmem:[%s7620_s29 + $0x5a60] sm:$0xff] }
 0x345   : > { %5332 = vmatpush2.msra.mxu1 %v3277_v50  ;;  %5262 = vmatprep.subr.mxu0 %v3146_v54  ;;  %v3261_v45 = vld [vmem:[%s7620_s29 + $0x5e60] sm:$0xff]  ;;  %v3130_v50 = vld [vmem:[%s7620_s29 + $0x5a48] sm:$0xff] }
 0x346   : > { %5333 = vmatprep.subr.mxu1 %v3274_v55  ;;  %5263 = vmatpush2.msra.mxu0 %v3145_v56  ;;  %v3258_v54 = vld [vmem:[%s7620_s29 + $0x5e48] sm:$0xff]  ;;  %v9381_v55 = vrot.slane %v239_v5, %v7753_v53  ;;  %v3129_v56 = vld [vmem:[%s7620_s29 + $0x5a40] sm:$0xff] }
 0x347   : > { %5334 = vmatpush2.msra.mxu1 %v3273_v57  ;;  %5264 = vmatprep.subr.mxu0 %v3142_v59  ;;  %v3257_v57 = vld [vmem:[%s7620_s29 + $0x5e40] sm:$0xff]  ;;  %v3126_v59 = vld [vmem:[%s7620_s29 + $0x5a28] sm:$0xff] }
 0x348   : > { %5335 = vmatprep.subr.mxu1 %v3270_v60  ;;  %5265 = vmatpush2.msra.mxu0 %v3141_v62  ;;  %v3254_v60 = vld [vmem:[%s7620_s29 + $0x5e28] sm:$0xff]  ;;  %v9388_v62 = vrot.slane %v3577_v40, %v7753_v53  ;;  %v3253_v5 = vld [vmem:[%s7620_s29 + $0x5e20] sm:$0xff] }
 0x349   : > { %5336 = vmatpush2.msra.mxu1 %v3269_v1  ;;  %5266 = vmatprep.subr.mxu0 %v3138_v8  ;;  %v3125_v1 = vld [vmem:[%s7620_s29 + $0x5a20] sm:$0xff]  ;;  %v3122_v8 = vld [vmem:[%s7620_s29 + $0x5a08] sm:$0xff] }
 0x34a   : > { %5337 = vmatprep.subr.mxu1 %v3266_v14  ;;  %5267 = vmatpush2.msra.mxu0 %v3137_v17  ;;  %v3250_v14 = vld [vmem:[%s7620_s29 + $0x5e08] sm:$0xff]  ;;  %v9396_v17 = vcombine.high %v9381_v55, %v9381_v55 }
 0x34b   : > { %5338 = vmatpush2.msra.mxu1 %v3265_v26  ;;  %5268 = vmatprep.subr.mxu0 %v3134_v33  ;;  %v3121_v26 = vld [vmem:[%s7620_s29 + $0x5a00] sm:$0xff]  ;;  %v3374_v40 = vld [vmem:[%s7620_s29 + $0x61e8] sm:$0xff] }
 0x34c   : > { %5339 = vmatprep.subr.mxu1 %v3262_v37  ;;  %5269 = vmatpush2.msra.mxu0 %v3133_v43  ;;  %v3249_v33 = vld [vmem:[%s7620_s29 + $0x5e00] sm:$0xff]  ;;  %v9402_v37 = vcombine.high %v9388_v62, %v9388_v62  ;;  %v304_v43 = vld [vmem:[%s7620_s29 + $0x1f8] sm:$0xff] }
 0x34d   : > { %5340 = vmatpush2.msra.mxu1 %v3261_v45  ;;  %5270 = vmatprep.subr.mxu0 %v3130_v50  ;;  %v3373_v45 = vld [vmem:[%s7620_s29 + $0x61e0] sm:$0xff]  ;;  %v303_v50 = vld [vmem:[%s7620_s29 + $0x1f0] sm:$0xff] }
 0x34e   : > { %5341 = vmatprep.subr.mxu1 %v3258_v54  ;;  %5271 = vmatpush2.msra.mxu0 %v3129_v56  ;;  %v3370_v54 = vld [vmem:[%s7620_s29 + $0x61c8] sm:$0xff]  ;;  %v300_v56 = vld [vmem:[%s7620_s29 + $0x1d8] sm:$0xff] }
 0x34f   : > { %5342 = vmatpush2.msra.mxu1 %v3257_v57  ;;  %5272 = vmatprep.subr.mxu0 %v3126_v59  ;;  %v3369_v57 = vld [vmem:[%s7620_s29 + $0x61c0] sm:$0xff]  ;;  %v299_v59 = vld [vmem:[%s7620_s29 + $0x1d0] sm:$0xff] }
 0x350   : > { %5343 = vmatprep.subr.mxu1 %v3254_v60  ;;  %5273 = vmatpush2.msra.mxu0 %v3125_v1  ;;  %v3366_v60 = vld [vmem:[%s7620_s29 + $0x61a8] sm:$0xff]  ;;  %v296_v1 = vld [vmem:[%s7620_s29 + $0x1b8] sm:$0xff] }
 0x351   : > { %5344 = vmatpush2.msra.mxu1 %v3253_v5  ;;  %5274 = vmatprep.subr.mxu0 %v3122_v8  ;;  %v3365_v5 = vld [vmem:[%s7620_s29 + $0x61a0] sm:$0xff]  ;;  %v295_v8 = vld [vmem:[%s7620_s29 + $0x1b0] sm:$0xff] }
 0x352   : > { %5345 = vmatprep.subr.mxu1 %v3250_v14  ;;  %5275 = vmatpush2.msra.mxu0 %v3121_v26  ;;  %v3362_v14 = vld [vmem:[%s7620_s29 + $0x6188] sm:$0xff]  ;;  %v292_v26 = vld [vmem:[%s7620_s29 + $0x198] sm:$0xff] }
 0x353   : > { %5276 = vmatprep.mubr.f32.mxu0 %v9396_v17  ;;  %5346 = vmatpush2.msra.mxu1 %v3249_v33  ;;  %v3361_v33 = vld [vmem:[%s7620_s29 + $0x6180] sm:$0xff] }
 0x354   : > { %5277 = vmatmul.mubr.f32.vlgmr.msra.gmra.mxu0 %v9381_v55  ;;  %5347 = vmatprep.mubr.f32.mxu1 %v9402_v37 }
 0x355   : > { %5354 = vmatprep.subr.mxu0 %v3374_v40  ;;  %5425 = vmatprep.subr.mxu1 %v304_v43  ;;  %v291_v40 = vld [vmem:[%s7620_s29 + $0x190] sm:$0xff]  ;;  %v3358_v43 = vld [vmem:[%s7620_s29 + $0x6168] sm:$0xff] }
 0x356   : > { %5348 = vmatmul.mubr.f32.vlgmr.msra.gmra.mxu1 %v9388_v62  ;;  %5355 = vmatpush1.msra.mxu0 %v3373_v45  ;;  %v288_v45 = vld [vmem:[%s7620_s29 + $0x178] sm:$0xff] }
 0x357   : > { %5426 = vmatpush1.msra.mxu1 %v303_v50  ;;  %5356 = vmatprep.subr.mxu0 %v3370_v54  ;;  %v3357_v50 = vld [vmem:[%s7620_s29 + $0x6160] sm:$0xff]  ;;  %v287_v54 = vld [vmem:[%s7620_s29 + $0x170] sm:$0xff] }
 0x358   : > { %5427 = vmatprep.subr.mxu1 %v300_v56  ;;  %5357 = vmatpush1.msra.mxu0 %v3369_v57  ;;  %v3354_v56 = vld [vmem:[%s7620_s29 + $0x6148] sm:$0xff]  ;;  %v284_v57 = vld [vmem:[%s7620_s29 + $0x158] sm:$0xff] }
 0x359   : > { %5428 = vmatpush1.msra.mxu1 %v299_v59  ;;  %5358 = vmatprep.subr.mxu0 %v3366_v60  ;;  %v3353_v59 = vld [vmem:[%s7620_s29 + $0x6140] sm:$0xff]  ;;  %v283_v60 = vld [vmem:[%s7620_s29 + $0x150] sm:$0xff] }
 0x35a   : > { %5429 = vmatprep.subr.mxu1 %v296_v1  ;;  %5359 = vmatpush1.msra.mxu0 %v3365_v5  ;;  %v3350_v1 = vld [vmem:[%s7620_s29 + $0x6128] sm:$0xff]  ;;  %v280_v5 = vld [vmem:[%s7620_s29 + $0x138] sm:$0xff] }
 0x35b   : > { %5430 = vmatpush1.msra.mxu1 %v295_v8  ;;  %5360 = vmatprep.subr.mxu0 %v3362_v14  ;;  %v3349_v8 = vld [vmem:[%s7620_s29 + $0x6120] sm:$0xff]  ;;  %v279_v14 = vld [vmem:[%s7620_s29 + $0x130] sm:$0xff] }
 0x35c   : > { %5431 = vmatprep.subr.mxu1 %v292_v26  ;;  %5361 = vmatpush1.msra.mxu0 %v3361_v33  ;;  %v3346_v26 = vld [vmem:[%s7620_s29 + $0x6108] sm:$0xff]  ;;  %v276_v33 = vld [vmem:[%s7620_s29 + $0x118] sm:$0xff] }
 0x35d   : > { %5432 = vmatpush1.msra.mxu1 %v291_v40  ;;  %5362 = vmatprep.subr.mxu0 %v3358_v43  ;;  %v3345_v40 = vld [vmem:[%s7620_s29 + $0x6100] sm:$0xff]  ;;  %v275_v43 = vld [vmem:[%s7620_s29 + $0x110] sm:$0xff] }
 0x35e   : > { %5433 = vmatprep.subr.mxu1 %v288_v45  ;;  %5363 = vmatpush1.msra.mxu0 %v3357_v50  ;;  %v3342_v45 = vld [vmem:[%s7620_s29 + $0x60e8] sm:$0xff]  ;;  %v272_v50 = vld [vmem:[%s7620_s29 + $0xf8] sm:$0xff] }
 0x35f   : > { %5434 = vmatpush1.msra.mxu1 %v287_v54  ;;  %5364 = vmatprep.subr.mxu0 %v3354_v56  ;;  %v3341_v54 = vld [vmem:[%s7620_s29 + $0x60e0] sm:$0xff]  ;;  %v271_v56 = vld [vmem:[%s7620_s29 + $0xf0] sm:$0xff] }
 0x360   : > { %5435 = vmatprep.subr.mxu1 %v284_v57  ;;  %5365 = vmatpush1.msra.mxu0 %v3353_v59  ;;  %v3338_v57 = vld [vmem:[%s7620_s29 + $0x60c8] sm:$0xff]  ;;  %v268_v59 = vld [vmem:[%s7620_s29 + $0xd8] sm:$0xff] }
 0x361   : > { %5436 = vmatpush1.msra.mxu1 %v283_v60  ;;  %5366 = vmatprep.subr.mxu0 %v3350_v1  ;;  %v3337_v60 = vld [vmem:[%s7620_s29 + $0x60c0] sm:$0xff]  ;;  %v267_v1 = vld [vmem:[%s7620_s29 + $0xd0] sm:$0xff] }
 0x362   : > { %5437 = vmatprep.subr.mxu1 %v280_v5  ;;  %5367 = vmatpush1.msra.mxu0 %v3349_v8  ;;  %v3334_v5 = vld [vmem:[%s7620_s29 + $0x60a8] sm:$0xff]  ;;  %v264_v8 = vld [vmem:[%s7620_s29 + $0xb8] sm:$0xff] }
 0x363   : > { %5438 = vmatpush1.msra.mxu1 %v279_v14  ;;  %5368 = vmatprep.subr.mxu0 %v3346_v26  ;;  %v3333_v14 = vld [vmem:[%s7620_s29 + $0x60a0] sm:$0xff]  ;;  %v263_v26 = vld [vmem:[%s7620_s29 + $0xb0] sm:$0xff] }
 0x364   : > { %5439 = vmatprep.subr.mxu1 %v276_v33  ;;  %5369 = vmatpush1.msra.mxu0 %v3345_v40  ;;  %v3330_v33 = vld [vmem:[%s7620_s29 + $0x6088] sm:$0xff]  ;;  %v260_v40 = vld [vmem:[%s7620_s29 + $0x98] sm:$0xff] }
 0x365   : > { %5440 = vmatpush1.msra.mxu1 %v275_v43  ;;  %5370 = vmatprep.subr.mxu0 %v3342_v45  ;;  %v3329_v43 = vld [vmem:[%s7620_s29 + $0x6080] sm:$0xff]  ;;  %v259_v45 = vld [vmem:[%s7620_s29 + $0x90] sm:$0xff] }
 0x366   : > { %5441 = vmatprep.subr.mxu1 %v272_v50  ;;  %5371 = vmatpush1.msra.mxu0 %v3341_v54  ;;  %v3326_v50 = vld [vmem:[%s7620_s29 + $0x6068] sm:$0xff]  ;;  %v256_v54 = vld [vmem:[%s7620_s29 + $0x78] sm:$0xff] }
 0x367   : > { %5442 = vmatpush1.msra.mxu1 %v271_v56  ;;  %5372 = vmatprep.subr.mxu0 %v3338_v57  ;;  %v3325_v56 = vld [vmem:[%s7620_s29 + $0x6060] sm:$0xff]  ;;  %v255_v57 = vld [vmem:[%s7620_s29 + $0x70] sm:$0xff] }
 0x368   : > { %5443 = vmatprep.subr.mxu1 %v268_v59  ;;  %5373 = vmatpush1.msra.mxu0 %v3337_v60  ;;  %v3322_v59 = vld [vmem:[%s7620_s29 + $0x6048] sm:$0xff]  ;;  %v252_v60 = vld [vmem:[%s7620_s29 + $0x58] sm:$0xff] }
 0x369   : > { %5444 = vmatpush1.msra.mxu1 %v267_v1  ;;  %5374 = vmatprep.subr.mxu0 %v3334_v5  ;;  %v3321_v1 = vld [vmem:[%s7620_s29 + $0x6040] sm:$0xff]  ;;  %v251_v5 = vld [vmem:[%s7620_s29 + $0x50] sm:$0xff] }
 0x36a   : > { %5445 = vmatprep.subr.mxu1 %v264_v8  ;;  %5375 = vmatpush1.msra.mxu0 %v3333_v14  ;;  %v3318_v8 = vld [vmem:[%s7620_s29 + $0x6028] sm:$0xff]  ;;  %v248_v14 = vld [vmem:[%s7620_s29 + $0x38] sm:$0xff] }
 0x36b   : > { %5446 = vmatpush1.msra.mxu1 %v263_v26  ;;  %5376 = vmatprep.subr.mxu0 %v3330_v33  ;;  %v3317_v26 = vld [vmem:[%s7620_s29 + $0x6020] sm:$0xff]  ;;  %v247_v33 = vld [vmem:[%s7620_s29 + $0x30] sm:$0xff] }
 0x36c   : > { %5447 = vmatprep.subr.mxu1 %v260_v40  ;;  %5377 = vmatpush1.msra.mxu0 %v3329_v43  ;;  %v3314_v40 = vld [vmem:[%s7620_s29 + $0x6008] sm:$0xff]  ;;  %v244_v43 = vld [vmem:[%s7620_s29 + $0x18] sm:$0xff] }
 0x36d   : > { %5448 = vmatpush1.msra.mxu1 %v259_v45  ;;  %5378 = vmatprep.subr.mxu0 %v3326_v50  ;;  %v3313_v45 = vld [vmem:[%s7620_s29 + $0x6000] sm:$0xff]  ;;  %v243_v50 = vld [vmem:[%s7620_s29 + $0x10] sm:$0xff] }
 0x36e   : > { %5449 = vmatprep.subr.mxu1 %v256_v54  ;;  %5379 = vmatpush1.msra.mxu0 %v3325_v56  ;;  %v7327_v54 = vld.sshfl [vmem:[%s7638_s22 + $0x60] sm:$0x3 pattern:$0x76325410]  ;;  %v368_v56 = vld [vmem:[%s7620_s29 + $0x3f8] sm:$0xff] }
 0x36f   : > { %5450 = vmatpush1.msra.mxu1 %v255_v57  ;;  %5380 = vmatprep.subr.mxu0 %v3322_v59  ;;  %v432_v57 = vld [vmem:[%s7620_s29 + $0x5f8] sm:$0xff]  ;;  %v7526_v59 = vmov 0.0  }
 0x370   : > { %5451 = vmatprep.subr.mxu1 %v252_v60  ;;  %5381 = vmatpush1.msra.mxu0 %v3321_v1  ;;  %v367_v60 = vld [vmem:[%s7620_s29 + $0x3f0] sm:$0xff] }
 0x371   : > { %5452 = vmatpush1.msra.mxu1 %v251_v5  ;;  %5382 = vmatprep.subr.mxu0 %v3318_v8  ;;  %v431_v1 = vld [vmem:[%s7620_s29 + $0x5f0] sm:$0xff]  ;;  %v364_v5 = vld [vmem:[%s7620_s29 + $0x3d8] sm:$0xff] }
 0x372   : > { %5453 = vmatprep.subr.mxu1 %v248_v14  ;;  %5383 = vmatpush1.msra.mxu0 %v3317_v26  ;;  %v428_v8 = vld [vmem:[%s7620_s29 + $0x5d8] sm:$0xff]  ;;  %v363_v14 = vld [vmem:[%s7620_s29 + $0x3d0] sm:$0xff] }
 0x373   : > { %5454 = vmatpush1.msra.mxu1 %v247_v33  ;;  %5384 = vmatprep.subr.mxu0 %v3314_v40  ;;  %v427_v26 = vld [vmem:[%s7620_s29 + $0x5d0] sm:$0xff]  ;;  %v360_v33 = vld [vmem:[%s7620_s29 + $0x3b8] sm:$0xff] }
 0x374   : > { %5455 = vmatprep.subr.mxu1 %v244_v43  ;;  %5385 = vmatpush1.msra.mxu0 %v3313_v45  ;;  %v424_v40 = vld [vmem:[%s7620_s29 + $0x5b8] sm:$0xff]  ;;  %v359_v43 = vld [vmem:[%s7620_s29 + $0x3b0] sm:$0xff] }
 0x375   : > { %5418 = vmatprep.mubr.f32.mxu0 %v7526_v59  ;;  %5456 = vmatpush1.msra.mxu1 %v243_v50  ;;  %v423_v45 = vld [vmem:[%s7620_s29 + $0x5b0] sm:$0xff]  ;;  %v356_v50 = vld [vmem:[%s7620_s29 + $0x398] sm:$0xff] }
 0x376   : > { %5419 = vmatmul.mubr.f32.vlgmr.msra.gmra.mxu0 %v7327_v54  ;;  %5457 = vmatprep.subr.mxu1 %v368_v56  ;;  %v420_v54 = vld [vmem:[%s7620_s29 + $0x598] sm:$0xff]  ;;  %v355_v56 = vld [vmem:[%s7620_s29 + $0x390] sm:$0xff] }
 0x377   : > { %5496 = vmatprep.subr.mxu0 %v432_v57  ;;  %5458 = vmatpush2.msra.mxu1 %v367_v60  ;;  %v419_v57 = vld [vmem:[%s7620_s29 + $0x590] sm:$0xff]  ;;  %v352_v60 = vld [vmem:[%s7620_s29 + $0x378] sm:$0xff] }
 0x378   : > { %5497 = vmatpush1.msra.mxu0 %v431_v1  ;;  %5459 = vmatprep.subr.mxu1 %v364_v5  ;;  %v416_v1 = vld [vmem:[%s7620_s29 + $0x578] sm:$0xff]  ;;  %v351_v5 = vld [vmem:[%s7620_s29 + $0x370] sm:$0xff] }
 0x379   : > { %5498 = vmatprep.subr.mxu0 %v428_v8  ;;  %5460 = vmatpush2.msra.mxu1 %v363_v14  ;;  %v415_v8 = vld [vmem:[%s7620_s29 + $0x570] sm:$0xff]  ;;  %v348_v14 = vld [vmem:[%s7620_s29 + $0x358] sm:$0xff] }
 0x37a   : > { %5499 = vmatpush1.msra.mxu0 %v427_v26  ;;  %5461 = vmatprep.subr.mxu1 %v360_v33  ;;  %v412_v26 = vld [vmem:[%s7620_s29 + $0x558] sm:$0xff]  ;;  %v347_v33 = vld [vmem:[%s7620_s29 + $0x350] sm:$0xff] }
 0x37b   : > { %5500 = vmatprep.subr.mxu0 %v424_v40  ;;  %5462 = vmatpush2.msra.mxu1 %v359_v43  ;;  %v411_v40 = vld [vmem:[%s7620_s29 + $0x550] sm:$0xff]  ;;  %v344_v43 = vld [vmem:[%s7620_s29 + $0x338] sm:$0xff] }
 0x37c   : > { %5501 = vmatpush1.msra.mxu0 %v423_v45  ;;  %5463 = vmatprep.subr.mxu1 %v356_v50  ;;  %v408_v45 = vld [vmem:[%s7620_s29 + $0x538] sm:$0xff]  ;;  %v343_v50 = vld [vmem:[%s7620_s29 + $0x330] sm:$0xff] }
 0x37d   : > { %5502 = vmatprep.subr.mxu0 %v420_v54  ;;  %5464 = vmatpush2.msra.mxu1 %v355_v56  ;;  %v407_v54 = vld [vmem:[%s7620_s29 + $0x530] sm:$0xff]  ;;  %v340_v56 = vld [vmem:[%s7620_s29 + $0x318] sm:$0xff] }
 0x37e   : > { %5503 = vmatpush1.msra.mxu0 %v419_v57  ;;  %5465 = vmatprep.subr.mxu1 %v352_v60  ;;  %v404_v57 = vld [vmem:[%s7620_s29 + $0x518] sm:$0xff]  ;;  %v339_v60 = vld [vmem:[%s7620_s29 + $0x310] sm:$0xff] }
 0x37f   : > { %5504 = vmatprep.subr.mxu0 %v416_v1  ;;  %5466 = vmatpush2.msra.mxu1 %v351_v5  ;;  %v403_v1 = vld [vmem:[%s7620_s29 + $0x510] sm:$0xff]  ;;  %v336_v5 = vld [vmem:[%s7620_s29 + $0x2f8] sm:$0xff] }
 0x380   : > { %5505 = vmatpush1.msra.mxu0 %v415_v8  ;;  %5467 = vmatprep.subr.mxu1 %v348_v14  ;;  %v400_v8 = vld [vmem:[%s7620_s29 + $0x4f8] sm:$0xff]  ;;  %v335_v14 = vld [vmem:[%s7620_s29 + $0x2f0] sm:$0xff] }
 0x381   : > { %5506 = vmatprep.subr.mxu0 %v412_v26  ;;  %5468 = vmatpush2.msra.mxu1 %v347_v33  ;;  %v399_v26 = vld [vmem:[%s7620_s29 + $0x4f0] sm:$0xff]  ;;  %v332_v33 = vld [vmem:[%s7620_s29 + $0x2d8] sm:$0xff] }
 0x382   : > { %5507 = vmatpush1.msra.mxu0 %v411_v40  ;;  %5469 = vmatprep.subr.mxu1 %v344_v43  ;;  %v396_v40 = vld [vmem:[%s7620_s29 + $0x4d8] sm:$0xff]  ;;  %v331_v43 = vld [vmem:[%s7620_s29 + $0x2d0] sm:$0xff] }
 0x383   : > { %5508 = vmatprep.subr.mxu0 %v408_v45  ;;  %5470 = vmatpush2.msra.mxu1 %v343_v50  ;;  %v395_v45 = vld [vmem:[%s7620_s29 + $0x4d0] sm:$0xff]  ;;  %v328_v50 = vld [vmem:[%s7620_s29 + $0x2b8] sm:$0xff] }
 0x384   : > { %5509 = vmatpush1.msra.mxu0 %v407_v54  ;;  %5471 = vmatprep.subr.mxu1 %v340_v56  ;;  %v392_v54 = vld [vmem:[%s7620_s29 + $0x4b8] sm:$0xff]  ;;  %v327_v56 = vld [vmem:[%s7620_s29 + $0x2b0] sm:$0xff] }
 0x385   : > { %5510 = vmatprep.subr.mxu0 %v404_v57  ;;  %5472 = vmatpush2.msra.mxu1 %v339_v60  ;;  %v391_v57 = vld [vmem:[%s7620_s29 + $0x4b0] sm:$0xff]  ;;  %v324_v60 = vld [vmem:[%s7620_s29 + $0x298] sm:$0xff] }
 0x386   : > { %5511 = vmatpush1.msra.mxu0 %v403_v1  ;;  %5473 = vmatprep.subr.mxu1 %v336_v5  ;;  %v388_v1 = vld [vmem:[%s7620_s29 + $0x498] sm:$0xff]  ;;  %v323_v5 = vld [vmem:[%s7620_s29 + $0x290] sm:$0xff] }
 0x387   : > { %5512 = vmatprep.subr.mxu0 %v400_v8  ;;  %5474 = vmatpush2.msra.mxu1 %v335_v14  ;;  %v387_v8 = vld [vmem:[%s7620_s29 + $0x490] sm:$0xff]  ;;  %v320_v14 = vld [vmem:[%s7620_s29 + $0x278] sm:$0xff] }
 0x388   : > { %5513 = vmatpush1.msra.mxu0 %v399_v26  ;;  %5475 = vmatprep.subr.mxu1 %v332_v33  ;;  %v384_v26 = vld [vmem:[%s7620_s29 + $0x478] sm:$0xff]  ;;  %v319_v33 = vld [vmem:[%s7620_s29 + $0x270] sm:$0xff] }
 0x389   : > { %5514 = vmatprep.subr.mxu0 %v396_v40  ;;  %5476 = vmatpush2.msra.mxu1 %v331_v43  ;;  %v383_v40 = vld [vmem:[%s7620_s29 + $0x470] sm:$0xff]  ;;  %v316_v43 = vld [vmem:[%s7620_s29 + $0x258] sm:$0xff] }
 0x38a   : > { %5515 = vmatpush1.msra.mxu0 %v395_v45  ;;  %5477 = vmatprep.subr.mxu1 %v328_v50  ;;  %v380_v45 = vld [vmem:[%s7620_s29 + $0x458] sm:$0xff]  ;;  %v315_v50 = vld [vmem:[%s7620_s29 + $0x250] sm:$0xff] }
 0x38b   : > { %5516 = vmatprep.subr.mxu0 %v392_v54  ;;  %5478 = vmatpush2.msra.mxu1 %v327_v56  ;;  %v379_v54 = vld [vmem:[%s7620_s29 + $0x450] sm:$0xff]  ;;  %v312_v56 = vld [vmem:[%s7620_s29 + $0x238] sm:$0xff] }
 0x38c   : > { %5517 = vmatpush1.msra.mxu0 %v391_v57  ;;  %5479 = vmatprep.subr.mxu1 %v324_v60  ;;  %v376_v57 = vld [vmem:[%s7620_s29 + $0x438] sm:$0xff]  ;;  %v311_v60 = vld [vmem:[%s7620_s29 + $0x230] sm:$0xff] }
 0x38d   : > { %5518 = vmatprep.subr.mxu0 %v388_v1  ;;  %5480 = vmatpush2.msra.mxu1 %v323_v5  ;;  %v375_v1 = vld [vmem:[%s7620_s29 + $0x430] sm:$0xff]  ;;  %v308_v5 = vld [vmem:[%s7620_s29 + $0x218] sm:$0xff] }
 0x38e   : > { %5519 = vmatpush1.msra.mxu0 %v387_v8  ;;  %5481 = vmatprep.subr.mxu1 %v320_v14  ;;  %v372_v8 = vld [vmem:[%s7620_s29 + $0x418] sm:$0xff]  ;;  %v307_v14 = vld [vmem:[%s7620_s29 + $0x210] sm:$0xff] }
 0x38f   : > { %5520 = vmatprep.subr.mxu0 %v384_v26  ;;  %5482 = vmatpush2.msra.mxu1 %v319_v33  ;;  %v371_v26 = vld [vmem:[%s7620_s29 + $0x410] sm:$0xff]  ;;  %v496_v33 = vld [vmem:[%s7620_s29 + $0x7f8] sm:$0xff] }
 0x390   : > { %5521 = vmatpush1.msra.mxu0 %v383_v40  ;;  %5483 = vmatprep.subr.mxu1 %v316_v43  ;;  %v560_v40 = vld [vmem:[%s7620_s29 + $0x9f8] sm:$0xff]  ;;  %v495_v43 = vld [vmem:[%s7620_s29 + $0x7f0] sm:$0xff] }
 0x391   : > { %5522 = vmatprep.subr.mxu0 %v380_v45  ;;  %5484 = vmatpush2.msra.mxu1 %v315_v50  ;;  %v559_v45 = vld [vmem:[%s7620_s29 + $0x9f0] sm:$0xff]  ;;  %v492_v50 = vld [vmem:[%s7620_s29 + $0x7d8] sm:$0xff] }
 0x392   : > { %5523 = vmatpush1.msra.mxu0 %v379_v54  ;;  %5485 = vmatprep.subr.mxu1 %v312_v56  ;;  %v556_v54 = vld [vmem:[%s7620_s29 + $0x9d8] sm:$0xff]  ;;  %v491_v56 = vld [vmem:[%s7620_s29 + $0x7d0] sm:$0xff] }
 0x393   : > { %5524 = vmatprep.subr.mxu0 %v376_v57  ;;  %5486 = vmatpush2.msra.mxu1 %v311_v60  ;;  %v555_v57 = vld [vmem:[%s7620_s29 + $0x9d0] sm:$0xff]  ;;  %v488_v60 = vld [vmem:[%s7620_s29 + $0x7b8] sm:$0xff] }
 0x394   : > { %5525 = vmatpush1.msra.mxu0 %v375_v1  ;;  %5487 = vmatprep.subr.mxu1 %v308_v5  ;;  %v552_v1 = vld [vmem:[%s7620_s29 + $0x9b8] sm:$0xff]  ;;  %v551_v5 = vld [vmem:[%s7620_s29 + $0x9b0] sm:$0xff] }
 0x395   : > { %5526 = vmatprep.subr.mxu0 %v372_v8  ;;  %5488 = vmatpush2.msra.mxu1 %v307_v14  ;;  %v484_v8 = vld [vmem:[%s7620_s29 + $0x798] sm:$0xff]  ;;  %v483_v14 = vld [vmem:[%s7620_s29 + $0x790] sm:$0xff] }
 0x396   : > { %5527 = vmatpush1.msra.mxu0 %v371_v26  ;;  %5489 = vmatprep.mubr.f32.mxu1 %v7779_v9  ;;  %v487_v9 = vld [vmem:[%s7620_s29 + $0x7b0] sm:$0xff] }
 0x397   : > { %5528 = vmatprep.subr.mxu0 %v496_v33  ;;  %5567 = vmatprep.subr.mxu1 %v560_v40  ;;  %v547_v26 = vld [vmem:[%s7620_s29 + $0x990] sm:$0xff]  ;;  %v480_v33 = vld [vmem:[%s7620_s29 + $0x778] sm:$0xff] }
 0x398   : > { %5490 = vmatmul.mubr.f32.vlgmr.msra.gmra.mxu1 %v7764_v63  ;;  %5529 = vmatpush2.msra.mxu0 %v495_v43  ;;  %v548_v63 = vld [vmem:[%s7620_s29 + $0x998] sm:$0xff]  ;;  %v479_v43 = vld [vmem:[%s7620_s29 + $0x770] sm:$0xff] }
 0x399   : > { %5568 = vmatpush1.msra.mxu1 %v559_v45  ;;  %5530 = vmatprep.subr.mxu0 %v492_v50  ;;  %v544_v40 = vld [vmem:[%s7620_s29 + $0x978] sm:$0xff]  ;;  %v543_v45 = vld [vmem:[%s7620_s29 + $0x970] sm:$0xff] }
 0x39a   : > { %5569 = vmatprep.subr.mxu1 %v556_v54  ;;  %5531 = vmatpush2.msra.mxu0 %v491_v56  ;;  %v476_v50 = vld [vmem:[%s7620_s29 + $0x758] sm:$0xff]  ;;  %v475_v56 = vld [vmem:[%s7620_s29 + $0x750] sm:$0xff] }
 0x39b   : > { %5570 = vmatpush1.msra.mxu1 %v555_v57  ;;  %5532 = vmatprep.subr.mxu0 %v488_v60  ;;  %v540_v54 = vld [vmem:[%s7620_s29 + $0x958] sm:$0xff]  ;;  %v539_v57 = vld [vmem:[%s7620_s29 + $0x950] sm:$0xff] }
 0x39c   : > { %5571 = vmatprep.subr.mxu1 %v552_v1  ;;  %5533 = vmatpush2.msra.mxu0 %v487_v9  ;;  %v472_v60 = vld [vmem:[%s7620_s29 + $0x738] sm:$0xff]  ;;  %v471_v9 = vld [vmem:[%s7620_s29 + $0x730] sm:$0xff] }
 0x39d   : > { %5572 = vmatpush1.msra.mxu1 %v551_v5  ;;  %5534 = vmatprep.subr.mxu0 %v484_v8  ;;  %v536_v1 = vld [vmem:[%s7620_s29 + $0x938] sm:$0xff]  ;;  %v535_v5 = vld [vmem:[%s7620_s29 + $0x930] sm:$0xff] }
 0x39e   : > { %5573 = vmatprep.subr.mxu1 %v548_v63  ;;  %5535 = vmatpush2.msra.mxu0 %v483_v14  ;;  %v468_v8 = vld [vmem:[%s7620_s29 + $0x718] sm:$0xff]  ;;  %v467_v14 = vld [vmem:[%s7620_s29 + $0x710] sm:$0xff] }
 0x39f   : > { %5574 = vmatpush1.msra.mxu1 %v547_v26  ;;  %5536 = vmatprep.subr.mxu0 %v480_v33  ;;  %v532_v63 = vld [vmem:[%s7620_s29 + $0x918] sm:$0xff]  ;;  %v531_v26 = vld [vmem:[%s7620_s29 + $0x910] sm:$0xff] }
 0x3a0   : > { %5575 = vmatprep.subr.mxu1 %v544_v40  ;;  %5537 = vmatpush2.msra.mxu0 %v479_v43  ;;  %v464_v33 = vld [vmem:[%s7620_s29 + $0x6f8] sm:$0xff]  ;;  %v463_v43 = vld [vmem:[%s7620_s29 + $0x6f0] sm:$0xff] }
 0x3a1   : > { %5576 = vmatpush1.msra.mxu1 %v543_v45  ;;  %5538 = vmatprep.subr.mxu0 %v476_v50  ;;  %v528_v40 = vld [vmem:[%s7620_s29 + $0x8f8] sm:$0xff]  ;;  %v527_v45 = vld [vmem:[%s7620_s29 + $0x8f0] sm:$0xff] }
 0x3a2   : > { %5577 = vmatprep.subr.mxu1 %v540_v54  ;;  %5539 = vmatpush2.msra.mxu0 %v475_v56  ;;  %v460_v50 = vld [vmem:[%s7620_s29 + $0x6d8] sm:$0xff]  ;;  %v459_v56 = vld [vmem:[%s7620_s29 + $0x6d0] sm:$0xff] }
 0x3a3   : > { %5578 = vmatpush1.msra.mxu1 %v539_v57  ;;  %5540 = vmatprep.subr.mxu0 %v472_v60  ;;  %v524_v54 = vld [vmem:[%s7620_s29 + $0x8d8] sm:$0xff]  ;;  %v523_v57 = vld [vmem:[%s7620_s29 + $0x8d0] sm:$0xff] }
 0x3a4   : > { %5579 = vmatprep.subr.mxu1 %v536_v1  ;;  %5541 = vmatpush2.msra.mxu0 %v471_v9  ;;  %v456_v60 = vld [vmem:[%s7620_s29 + $0x6b8] sm:$0xff]  ;;  %v455_v9 = vld [vmem:[%s7620_s29 + $0x6b0] sm:$0xff] }
 0x3a5   : > { %5580 = vmatpush1.msra.mxu1 %v535_v5  ;;  %5542 = vmatprep.subr.mxu0 %v468_v8  ;;  %v520_v1 = vld [vmem:[%s7620_s29 + $0x8b8] sm:$0xff]  ;;  %v519_v5 = vld [vmem:[%s7620_s29 + $0x8b0] sm:$0xff] }
 0x3a6   : > { %5581 = vmatprep.subr.mxu1 %v532_v63  ;;  %5543 = vmatpush2.msra.mxu0 %v467_v14  ;;  %v452_v8 = vld [vmem:[%s7620_s29 + $0x698] sm:$0xff]  ;;  %v451_v14 = vld [vmem:[%s7620_s29 + $0x690] sm:$0xff] }
 0x3a7   : > { %5582 = vmatpush1.msra.mxu1 %v531_v26  ;;  %5544 = vmatprep.subr.mxu0 %v464_v33  ;;  %v516_v63 = vld [vmem:[%s7620_s29 + $0x898] sm:$0xff]  ;;  %v515_v26 = vld [vmem:[%s7620_s29 + $0x890] sm:$0xff] }
 0x3a8   : > { %5583 = vmatprep.subr.mxu1 %v528_v40  ;;  %5545 = vmatpush2.msra.mxu0 %v463_v43  ;;  %v448_v33 = vld [vmem:[%s7620_s29 + $0x678] sm:$0xff]  ;;  %v447_v43 = vld [vmem:[%s7620_s29 + $0x670] sm:$0xff] }
 0x3a9   : > { %5584 = vmatpush1.msra.mxu1 %v527_v45  ;;  %5546 = vmatprep.subr.mxu0 %v460_v50  ;;  %v512_v40 = vld [vmem:[%s7620_s29 + $0x878] sm:$0xff]  ;;  %v511_v45 = vld [vmem:[%s7620_s29 + $0x870] sm:$0xff] }
 0x3aa   : > { %5585 = vmatprep.subr.mxu1 %v524_v54  ;;  %5547 = vmatpush2.msra.mxu0 %v459_v56  ;;  %v444_v50 = vld [vmem:[%s7620_s29 + $0x658] sm:$0xff]  ;;  %v443_v56 = vld [vmem:[%s7620_s29 + $0x650] sm:$0xff] }
 0x3ab   : > { %5586 = vmatpush1.msra.mxu1 %v523_v57  ;;  %5548 = vmatprep.subr.mxu0 %v456_v60  ;;  %v508_v54 = vld [vmem:[%s7620_s29 + $0x858] sm:$0xff]  ;;  %v507_v57 = vld [vmem:[%s7620_s29 + $0x850] sm:$0xff] }
 0x3ac   : > { %5587 = vmatprep.subr.mxu1 %v520_v1  ;;  %5549 = vmatpush2.msra.mxu0 %v455_v9  ;;  %v440_v60 = vld [vmem:[%s7620_s29 + $0x638] sm:$0xff]  ;;  %v439_v9 = vld [vmem:[%s7620_s29 + $0x630] sm:$0xff] }
 0x3ad   : > { %5588 = vmatpush1.msra.mxu1 %v519_v5  ;;  %5550 = vmatprep.subr.mxu0 %v452_v8  ;;  %v504_v1 = vld [vmem:[%s7620_s29 + $0x838] sm:$0xff]  ;;  %v503_v5 = vld [vmem:[%s7620_s29 + $0x830] sm:$0xff] }
 0x3ae   : > { %5589 = vmatprep.subr.mxu1 %v516_v63  ;;  %5551 = vmatpush2.msra.mxu0 %v451_v14  ;;  %v436_v8 = vld [vmem:[%s7620_s29 + $0x618] sm:$0xff]  ;;  %v435_v14 = vld [vmem:[%s7620_s29 + $0x610] sm:$0xff] }
 0x3af   : > { %5590 = vmatpush1.msra.mxu1 %v515_v26  ;;  %5552 = vmatprep.subr.mxu0 %v448_v33  ;;  %v500_v63 = vld [vmem:[%s7620_s29 + $0x818] sm:$0xff]  ;;  %v499_v26 = vld [vmem:[%s7620_s29 + $0x810] sm:$0xff] }
 0x3b0   : > { %5591 = vmatprep.subr.mxu1 %v512_v40  ;;  %5553 = vmatpush2.msra.mxu0 %v447_v43  ;;  %v624_v33 = vld [vmem:[%s7620_s29 + $0xbf8] sm:$0xff]  ;;  %v623_v43 = vld [vmem:[%s7620_s29 + $0xbf0] sm:$0xff] }
 0x3b1   : > { %5592 = vmatpush1.msra.mxu1 %v511_v45  ;;  %5554 = vmatprep.subr.mxu0 %v444_v50  ;;  %v688_v40 = vld [vmem:[%s7620_s29 + $0xdf8] sm:$0xff]  ;;  %v687_v45 = vld [vmem:[%s7620_s29 + $0xdf0] sm:$0xff] }
 0x3b2   : > { %5593 = vmatprep.subr.mxu1 %v508_v54  ;;  %5555 = vmatpush2.msra.mxu0 %v443_v56  ;;  %v620_v50 = vld [vmem:[%s7620_s29 + $0xbd8] sm:$0xff]  ;;  %v619_v56 = vld [vmem:[%s7620_s29 + $0xbd0] sm:$0xff] }
 0x3b3   : > { %5594 = vmatpush1.msra.mxu1 %v507_v57  ;;  %5556 = vmatprep.subr.mxu0 %v440_v60  ;;  %v684_v54 = vld [vmem:[%s7620_s29 + $0xdd8] sm:$0xff]  ;;  %v683_v57 = vld [vmem:[%s7620_s29 + $0xdd0] sm:$0xff] }
 0x3b4   : > { %5595 = vmatprep.subr.mxu1 %v504_v1  ;;  %5557 = vmatpush2.msra.mxu0 %v439_v9  ;;  %v680_v60 = vld [vmem:[%s7620_s29 + $0xdb8] sm:$0xff]  ;;  %v615_v1 = vld [vmem:[%s7620_s29 + $0xbb0] sm:$0xff] }
 0x3b5   : > { %5596 = vmatpush1.msra.mxu1 %v503_v5  ;;  %5558 = vmatprep.subr.mxu0 %v436_v8  ;;  %v612_v9 = vld [vmem:[%s7620_s29 + $0xb98] sm:$0xff]  ;;  %v611_v8 = vld [vmem:[%s7620_s29 + $0xb90] sm:$0xff] }
 0x3b6   : > { %5597 = vmatprep.subr.mxu1 %v500_v63  ;;  %5559 = vmatpush2.msra.mxu0 %v435_v14  ;;  %v676_v5 = vld [vmem:[%s7620_s29 + $0xd98] sm:$0xff]  ;;  %v675_v63 = vld [vmem:[%s7620_s29 + $0xd90] sm:$0xff] }
 0x3b7   : > { %5560 = vmatprep.mubr.f32.mxu0 %v7784_v11  ;;  %5598 = vmatpush1.msra.mxu1 %v499_v26  ;;  %v616_v11 = vld [vmem:[%s7620_s29 + $0xbb8] sm:$0xff] }
 0x3b8   : > { %5561 = vmatmul.mubr.f32.vlgmr.msra.gmra.mxu0 %v7769_v2  ;;  %5599 = vmatprep.subr.mxu1 %v624_v33  ;;  %v679_v2 = vld [vmem:[%s7620_s29 + $0xdb0] sm:$0xff]  ;;  %v608_v14 = vld [vmem:[%s7620_s29 + $0xb78] sm:$0xff] }
 0x3b9   : > { %5638 = vmatprep.subr.mxu0 %v688_v40  ;;  %5600 = vmatpush2.msra.mxu1 %v623_v43  ;;  %v672_v26 = vld [vmem:[%s7620_s29 + $0xd78] sm:$0xff]  ;;  %v607_v33 = vld [vmem:[%s7620_s29 + $0xb70] sm:$0xff] }
 0x3ba   : > { %5639 = vmatpush1.msra.mxu0 %v687_v45  ;;  %5601 = vmatprep.subr.mxu1 %v620_v50  ;;  %v671_v40 = vld [vmem:[%s7620_s29 + $0xd70] sm:$0xff]  ;;  %v604_v43 = vld [vmem:[%s7620_s29 + $0xb58] sm:$0xff] }
 0x3bb   : > { %5640 = vmatprep.subr.mxu0 %v684_v54  ;;  %5602 = vmatpush2.msra.mxu1 %v619_v56  ;;  %v668_v45 = vld [vmem:[%s7620_s29 + $0xd58] sm:$0xff]  ;;  %v603_v50 = vld [vmem:[%s7620_s29 + $0xb50] sm:$0xff] }
 0x3bc   : > { %5641 = vmatpush1.msra.mxu0 %v683_v57  ;;  %5603 = vmatprep.subr.mxu1 %v616_v11  ;;  %v667_v54 = vld [vmem:[%s7620_s29 + $0xd50] sm:$0xff]  ;;  %v600_v56 = vld [vmem:[%s7620_s29 + $0xb38] sm:$0xff] }
 0x3bd   : > { %5642 = vmatprep.subr.mxu0 %v680_v60  ;;  %5604 = vmatpush2.msra.mxu1 %v615_v1  ;;  %v664_v57 = vld [vmem:[%s7620_s29 + $0xd38] sm:$0xff]  ;;  %v599_v11 = vld [vmem:[%s7620_s29 + $0xb30] sm:$0xff] }
 0x3be   : > { %5643 = vmatpush1.msra.mxu0 %v679_v2  ;;  %5605 = vmatprep.subr.mxu1 %v612_v9  ;;  %v663_v60 = vld [vmem:[%s7620_s29 + $0xd30] sm:$0xff]  ;;  %v596_v1 = vld [vmem:[%s7620_s29 + $0xb18] sm:$0xff] }
 0x3bf   : > { %5644 = vmatprep.subr.mxu0 %v676_v5  ;;  %5606 = vmatpush2.msra.mxu1 %v611_v8  ;;  %v660_v2 = vld [vmem:[%s7620_s29 + $0xd18] sm:$0xff]  ;;  %v595_v9 = vld [vmem:[%s7620_s29 + $0xb10] sm:$0xff] }
 0x3c0   : > { %5645 = vmatpush1.msra.mxu0 %v675_v63  ;;  %5607 = vmatprep.subr.mxu1 %v608_v14  ;;  %v659_v5 = vld [vmem:[%s7620_s29 + $0xd10] sm:$0xff]  ;;  %v592_v8 = vld [vmem:[%s7620_s29 + $0xaf8] sm:$0xff] }
 0x3c1   : > { %5646 = vmatprep.subr.mxu0 %v672_v26  ;;  %5608 = vmatpush2.msra.mxu1 %v607_v33  ;;  %v656_v63 = vld [vmem:[%s7620_s29 + $0xcf8] sm:$0xff]  ;;  %v591_v14 = vld [vmem:[%s7620_s29 + $0xaf0] sm:$0xff] }
 0x3c2   : > { %5647 = vmatpush1.msra.mxu0 %v671_v40  ;;  %5609 = vmatprep.subr.mxu1 %v604_v43  ;;  %v655_v26 = vld [vmem:[%s7620_s29 + $0xcf0] sm:$0xff]  ;;  %v588_v33 = vld [vmem:[%s7620_s29 + $0xad8] sm:$0xff] }
 0x3c3   : > { %5648 = vmatprep.subr.mxu0 %v668_v45  ;;  %5610 = vmatpush2.msra.mxu1 %v603_v50  ;;  %v652_v40 = vld [vmem:[%s7620_s29 + $0xcd8] sm:$0xff]  ;;  %v587_v43 = vld [vmem:[%s7620_s29 + $0xad0] sm:$0xff] }
 0x3c4   : > { %5649 = vmatpush1.msra.mxu0 %v667_v54  ;;  %5611 = vmatprep.subr.mxu1 %v600_v56  ;;  %v651_v45 = vld [vmem:[%s7620_s29 + $0xcd0] sm:$0xff]  ;;  %v584_v50 = vld [vmem:[%s7620_s29 + $0xab8] sm:$0xff] }
 0x3c5   : > { %5650 = vmatprep.subr.mxu0 %v664_v57  ;;  %5612 = vmatpush2.msra.mxu1 %v599_v11  ;;  %v648_v54 = vld [vmem:[%s7620_s29 + $0xcb8] sm:$0xff]  ;;  %v583_v56 = vld [vmem:[%s7620_s29 + $0xab0] sm:$0xff] }
 0x3c6   : > { %5651 = vmatpush1.msra.mxu0 %v663_v60  ;;  %5613 = vmatprep.subr.mxu1 %v596_v1  ;;  %v647_v57 = vld [vmem:[%s7620_s29 + $0xcb0] sm:$0xff]  ;;  %v580_v11 = vld [vmem:[%s7620_s29 + $0xa98] sm:$0xff] }
 0x3c7   : > { %5652 = vmatprep.subr.mxu0 %v660_v2  ;;  %5614 = vmatpush2.msra.mxu1 %v595_v9  ;;  %v644_v60 = vld [vmem:[%s7620_s29 + $0xc98] sm:$0xff]  ;;  %v579_v1 = vld [vmem:[%s7620_s29 + $0xa90] sm:$0xff] }
 0x3c8   : > { %5653 = vmatpush1.msra.mxu0 %v659_v5  ;;  %5615 = vmatprep.subr.mxu1 %v592_v8  ;;  %v643_v2 = vld [vmem:[%s7620_s29 + $0xc90] sm:$0xff]  ;;  %v576_v9 = vld [vmem:[%s7620_s29 + $0xa78] sm:$0xff] }
 0x3c9   : > { %5654 = vmatprep.subr.mxu0 %v656_v63  ;;  %5616 = vmatpush2.msra.mxu1 %v591_v14  ;;  %v640_v5 = vld [vmem:[%s7620_s29 + $0xc78] sm:$0xff]  ;;  %v575_v8 = vld [vmem:[%s7620_s29 + $0xa70] sm:$0xff] }
 0x3ca   : > { %5655 = vmatpush1.msra.mxu0 %v655_v26  ;;  %5617 = vmatprep.subr.mxu1 %v588_v33  ;;  %v639_v63 = vld [vmem:[%s7620_s29 + $0xc70] sm:$0xff]  ;;  %v572_v14 = vld [vmem:[%s7620_s29 + $0xa58] sm:$0xff] }
 0x3cb   : > { %5656 = vmatprep.subr.mxu0 %v652_v40  ;;  %5618 = vmatpush2.msra.mxu1 %v587_v43  ;;  %v636_v26 = vld [vmem:[%s7620_s29 + $0xc58] sm:$0xff]  ;;  %v571_v33 = vld [vmem:[%s7620_s29 + $0xa50] sm:$0xff] }
 0x3cc   : > { %5657 = vmatpush1.msra.mxu0 %v651_v45  ;;  %5619 = vmatprep.subr.mxu1 %v584_v50  ;;  %v635_v40 = vld [vmem:[%s7620_s29 + $0xc50] sm:$0xff]  ;;  %v568_v43 = vld [vmem:[%s7620_s29 + $0xa38] sm:$0xff] }
 0x3cd   : > { %5658 = vmatprep.subr.mxu0 %v648_v54  ;;  %5620 = vmatpush2.msra.mxu1 %v583_v56  ;;  %v632_v45 = vld [vmem:[%s7620_s29 + $0xc38] sm:$0xff]  ;;  %v567_v50 = vld [vmem:[%s7620_s29 + $0xa30] sm:$0xff] }
 0x3ce   : > { %5659 = vmatpush1.msra.mxu0 %v647_v57  ;;  %5621 = vmatprep.subr.mxu1 %v580_v11  ;;  %v631_v54 = vld [vmem:[%s7620_s29 + $0xc30] sm:$0xff]  ;;  %v564_v56 = vld [vmem:[%s7620_s29 + $0xa18] sm:$0xff] }
 0x3cf   : > { %5660 = vmatprep.subr.mxu0 %v644_v60  ;;  %5622 = vmatpush2.msra.mxu1 %v579_v1  ;;  %v628_v57 = vld [vmem:[%s7620_s29 + $0xc18] sm:$0xff]  ;;  %v563_v11 = vld [vmem:[%s7620_s29 + $0xa10] sm:$0xff] }
 0x3d0   : > { %5661 = vmatpush1.msra.mxu0 %v643_v2  ;;  %5623 = vmatprep.subr.mxu1 %v576_v9  ;;  %v627_v60 = vld [vmem:[%s7620_s29 + $0xc10] sm:$0xff]  ;;  %v752_v1 = vld [vmem:[%s7620_s29 + $0xff8] sm:$0xff] }
 0x3d1   : > { %5662 = vmatprep.subr.mxu0 %v640_v5  ;;  %5624 = vmatpush2.msra.mxu1 %v575_v8  ;;  %v816_v2 = vld [vmem:[%s7620_s29 + $0x11f8] sm:$0xff]  ;;  %v751_v9 = vld [vmem:[%s7620_s29 + $0xff0] sm:$0xff] }
 0x3d2   : > { %5663 = vmatpush1.msra.mxu0 %v639_v63  ;;  %5625 = vmatprep.subr.mxu1 %v572_v14  ;;  %v815_v5 = vld [vmem:[%s7620_s29 + $0x11f0] sm:$0xff]  ;;  %v748_v8 = vld [vmem:[%s7620_s29 + $0xfd8] sm:$0xff] }
 0x3d3   : > { %5664 = vmatprep.subr.mxu0 %v636_v26  ;;  %5626 = vmatpush2.msra.mxu1 %v571_v33  ;;  %v812_v63 = vld [vmem:[%s7620_s29 + $0x11d8] sm:$0xff]  ;;  %v747_v14 = vld [vmem:[%s7620_s29 + $0xfd0] sm:$0xff] }
 0x3d4   : > { %5665 = vmatpush1.msra.mxu0 %v635_v40  ;;  %5627 = vmatprep.subr.mxu1 %v568_v43  ;;  %v811_v26 = vld [vmem:[%s7620_s29 + $0x11d0] sm:$0xff]  ;;  %v808_v33 = vld [vmem:[%s7620_s29 + $0x11b8] sm:$0xff] }
 0x3d5   : > { %5666 = vmatprep.subr.mxu0 %v632_v45  ;;  %5628 = vmatpush2.msra.mxu1 %v567_v50  ;;  %v743_v40 = vld [vmem:[%s7620_s29 + $0xfb0] sm:$0xff]  ;;  %v740_v43 = vld [vmem:[%s7620_s29 + $0xf98] sm:$0xff] }
 0x3d6   : > { %5667 = vmatpush1.msra.mxu0 %v631_v54  ;;  %5629 = vmatprep.subr.mxu1 %v564_v56  ;;  %v804_v45 = vld [vmem:[%s7620_s29 + $0x1198] sm:$0xff]  ;;  %v739_v50 = vld [vmem:[%s7620_s29 + $0xf90] sm:$0xff] }
 0x3d7   : > { %5668 = vmatprep.subr.mxu0 %v628_v57  ;;  %5630 = vmatpush2.msra.mxu1 %v563_v11  ;;  %v803_v54 = vld [vmem:[%s7620_s29 + $0x1190] sm:$0xff]  ;;  %v736_v56 = vld [vmem:[%s7620_s29 + $0xf78] sm:$0xff] }
 0x3d8   : > { %5631 = vmatprep.mubr.f32.mxu1 %v7926_v25  ;;  %5669 = vmatpush1.msra.mxu0 %v627_v60  ;;  %v744_v25 = vld [vmem:[%s7620_s29 + $0xfb8] sm:$0xff]  ;;  %v735_v11 = vld [vmem:[%s7620_s29 + $0xf70] sm:$0xff] }
 0x3d9   : > { %5632 = vmatmul.mubr.f32.vlgmr.msra.gmra.mxu1 %v7911_v15  ;;  %5670 = vmatprep.subr.mxu0 %v752_v1  ;;  %v807_v15 = vld [vmem:[%s7620_s29 + $0x11b0] sm:$0xff]  ;;  %v800_v57 = vld [vmem:[%s7620_s29 + $0x1178] sm:$0xff] }
 0x3da   : > { %5709 = vmatprep.subr.mxu1 %v816_v2  ;;  %5671 = vmatpush2.msra.mxu0 %v751_v9  ;;  %v799_v60 = vld [vmem:[%s7620_s29 + $0x1170] sm:$0xff]  ;;  %v732_v1 = vld [vmem:[%s7620_s29 + $0xf58] sm:$0xff] }
 0x3db   : > { %5710 = vmatpush1.msra.mxu1 %v815_v5  ;;  %5672 = vmatprep.subr.mxu0 %v748_v8  ;;  %v796_v2 = vld [vmem:[%s7620_s29 + $0x1158] sm:$0xff]  ;;  %v731_v9 = vld [vmem:[%s7620_s29 + $0xf50] sm:$0xff] }
 0x3dc   : > { %5711 = vmatprep.subr.mxu1 %v812_v63  ;;  %5673 = vmatpush2.msra.mxu0 %v747_v14  ;;  %v795_v5 = vld [vmem:[%s7620_s29 + $0x1150] sm:$0xff]  ;;  %v728_v8 = vld [vmem:[%s7620_s29 + $0xf38] sm:$0xff] }
 0x3dd   : > { %5712 = vmatpush1.msra.mxu1 %v811_v26  ;;  %5674 = vmatprep.subr.mxu0 %v744_v25  ;;  %v792_v63 = vld [vmem:[%s7620_s29 + $0x1138] sm:$0xff]  ;;  %v727_v14 = vld [vmem:[%s7620_s29 + $0xf30] sm:$0xff] }
 0x3de   : > { %5713 = vmatprep.subr.mxu1 %v808_v33  ;;  %5675 = vmatpush2.msra.mxu0 %v743_v40  ;;  %v791_v26 = vld [vmem:[%s7620_s29 + $0x1130] sm:$0xff]  ;;  %v724_v25 = vld [vmem:[%s7620_s29 + $0xf18] sm:$0xff] }
 0x3df   : > { %5714 = vmatpush1.msra.mxu1 %v807_v15  ;;  %5676 = vmatprep.subr.mxu0 %v740_v43  ;;  %v788_v33 = vld [vmem:[%s7620_s29 + $0x1118] sm:$0xff]  ;;  %v723_v40 = vld [vmem:[%s7620_s29 + $0xf10] sm:$0xff] }
 0x3e0   : > { %5715 = vmatprep.subr.mxu1 %v804_v45  ;;  %5677 = vmatpush2.msra.mxu0 %v739_v50  ;;  %v787_v15 = vld [vmem:[%s7620_s29 + $0x1110] sm:$0xff]  ;;  %v720_v43 = vld [vmem:[%s7620_s29 + $0xef8] sm:$0xff] }
 0x3e1   : > { %5716 = vmatpush1.msra.mxu1 %v803_v54  ;;  %5678 = vmatprep.subr.mxu0 %v736_v56  ;;  %v784_v45 = vld [vmem:[%s7620_s29 + $0x10f8] sm:$0xff]  ;;  %v719_v50 = vld [vmem:[%s7620_s29 + $0xef0] sm:$0xff] }
 0x3e2   : > { %5717 = vmatprep.subr.mxu1 %v800_v57  ;;  %5679 = vmatpush2.msra.mxu0 %v735_v11  ;;  %v783_v54 = vld [vmem:[%s7620_s29 + $0x10f0] sm:$0xff]  ;;  %v716_v56 = vld [vmem:[%s7620_s29 + $0xed8] sm:$0xff] }
 0x3e3   : > { %5718 = vmatpush1.msra.mxu1 %v799_v60  ;;  %5680 = vmatprep.subr.mxu0 %v732_v1  ;;  %v780_v57 = vld [vmem:[%s7620_s29 + $0x10d8] sm:$0xff]  ;;  %v715_v11 = vld [vmem:[%s7620_s29 + $0xed0] sm:$0xff] }
 0x3e4   : > { %5719 = vmatprep.subr.mxu1 %v796_v2  ;;  %5681 = vmatpush2.msra.mxu0 %v731_v9  ;;  %v779_v60 = vld [vmem:[%s7620_s29 + $0x10d0] sm:$0xff]  ;;  %v712_v1 = vld [vmem:[%s7620_s29 + $0xeb8] sm:$0xff] }
 0x3e5   : > { %5720 = vmatpush1.msra.mxu1 %v795_v5  ;;  %5682 = vmatprep.subr.mxu0 %v728_v8  ;;  %v776_v2 = vld [vmem:[%s7620_s29 + $0x10b8] sm:$0xff]  ;;  %v711_v9 = vld [vmem:[%s7620_s29 + $0xeb0] sm:$0xff] }
 0x3e6   : > { %5721 = vmatprep.subr.mxu1 %v792_v63  ;;  %5683 = vmatpush2.msra.mxu0 %v727_v14  ;;  %v775_v5 = vld [vmem:[%s7620_s29 + $0x10b0] sm:$0xff]  ;;  %v708_v8 = vld [vmem:[%s7620_s29 + $0xe98] sm:$0xff] }
 0x3e7   : > { %5722 = vmatpush1.msra.mxu1 %v791_v26  ;;  %5684 = vmatprep.subr.mxu0 %v724_v25  ;;  %v772_v63 = vld [vmem:[%s7620_s29 + $0x1098] sm:$0xff]  ;;  %v707_v14 = vld [vmem:[%s7620_s29 + $0xe90] sm:$0xff] }
 0x3e8   : > { %5723 = vmatprep.subr.mxu1 %v788_v33  ;;  %5685 = vmatpush2.msra.mxu0 %v723_v40  ;;  %v771_v26 = vld [vmem:[%s7620_s29 + $0x1090] sm:$0xff]  ;;  %v704_v25 = vld [vmem:[%s7620_s29 + $0xe78] sm:$0xff] }
 0x3e9   : > { %5724 = vmatpush1.msra.mxu1 %v787_v15  ;;  %5686 = vmatprep.subr.mxu0 %v720_v43  ;;  %v768_v33 = vld [vmem:[%s7620_s29 + $0x1078] sm:$0xff]  ;;  %v703_v40 = vld [vmem:[%s7620_s29 + $0xe70] sm:$0xff] }
 0x3ea   : > { %5725 = vmatprep.subr.mxu1 %v784_v45  ;;  %5687 = vmatpush2.msra.mxu0 %v719_v50  ;;  %v767_v15 = vld [vmem:[%s7620_s29 + $0x1070] sm:$0xff]  ;;  %v700_v43 = vld [vmem:[%s7620_s29 + $0xe58] sm:$0xff] }
 0x3eb   : > { %5726 = vmatpush1.msra.mxu1 %v783_v54  ;;  %5688 = vmatprep.subr.mxu0 %v716_v56  ;;  %v764_v45 = vld [vmem:[%s7620_s29 + $0x1058] sm:$0xff]  ;;  %v699_v50 = vld [vmem:[%s7620_s29 + $0xe50] sm:$0xff] }
 0x3ec   : > { %5727 = vmatprep.subr.mxu1 %v780_v57  ;;  %5689 = vmatpush2.msra.mxu0 %v715_v11  ;;  %v763_v54 = vld [vmem:[%s7620_s29 + $0x1050] sm:$0xff]  ;;  %v696_v56 = vld [vmem:[%s7620_s29 + $0xe38] sm:$0xff] }
 0x3ed   : > { %5728 = vmatpush1.msra.mxu1 %v779_v60  ;;  %5690 = vmatprep.subr.mxu0 %v712_v1  ;;  %v760_v57 = vld [vmem:[%s7620_s29 + $0x1038] sm:$0xff]  ;;  %v695_v11 = vld [vmem:[%s7620_s29 + $0xe30] sm:$0xff] }
 0x3ee   : > { %5729 = vmatprep.subr.mxu1 %v776_v2  ;;  %5691 = vmatpush2.msra.mxu0 %v711_v9  ;;  %v759_v60 = vld [vmem:[%s7620_s29 + $0x1030] sm:$0xff]  ;;  %v692_v1 = vld [vmem:[%s7620_s29 + $0xe18] sm:$0xff] }
 0x3ef   : > { %5730 = vmatpush1.msra.mxu1 %v775_v5  ;;  %5692 = vmatprep.subr.mxu0 %v708_v8  ;;  %v756_v2 = vld [vmem:[%s7620_s29 + $0x1018] sm:$0xff]  ;;  %v691_v9 = vld [vmem:[%s7620_s29 + $0xe10] sm:$0xff] }
 0x3f0   : > { %5731 = vmatprep.subr.mxu1 %v772_v63  ;;  %5693 = vmatpush2.msra.mxu0 %v707_v14  ;;  %v755_v5 = vld [vmem:[%s7620_s29 + $0x1010] sm:$0xff]  ;;  %v880_v8 = vld [vmem:[%s7620_s29 + $0x13f8] sm:$0xff] }
 0x3f1   : > { %5732 = vmatpush1.msra.mxu1 %v771_v26  ;;  %5694 = vmatprep.subr.mxu0 %v704_v25  ;;  %v944_v63 = vld [vmem:[%s7620_s29 + $0x15f8] sm:$0xff]  ;;  %v879_v14 = vld [vmem:[%s7620_s29 + $0x13f0] sm:$0xff] }
 0x3f2   : > { %5733 = vmatprep.subr.mxu1 %v768_v33  ;;  %5695 = vmatpush2.msra.mxu0 %v703_v40  ;;  %v943_v26 = vld [vmem:[%s7620_s29 + $0x15f0] sm:$0xff]  ;;  %v876_v25 = vld [vmem:[%s7620_s29 + $0x13d8] sm:$0xff] }
 0x3f3   : > { %5734 = vmatpush1.msra.mxu1 %v767_v15  ;;  %5696 = vmatprep.subr.mxu0 %v700_v43  ;;  %v940_v33 = vld [vmem:[%s7620_s29 + $0x15d8] sm:$0xff]  ;;  %v875_v40 = vld [vmem:[%s7620_s29 + $0x13d0] sm:$0xff] }
 0x3f4   : > { %5735 = vmatprep.subr.mxu1 %v764_v45  ;;  %5697 = vmatpush2.msra.mxu0 %v699_v50  ;;  %v939_v15 = vld [vmem:[%s7620_s29 + $0x15d0] sm:$0xff]  ;;  %v936_v43 = vld [vmem:[%s7620_s29 + $0x15b8] sm:$0xff] }
 0x3f5   : > { %5736 = vmatpush1.msra.mxu1 %v763_v54  ;;  %5698 = vmatprep.subr.mxu0 %v696_v56  ;;  %v871_v45 = vld [vmem:[%s7620_s29 + $0x13b0] sm:$0xff]  ;;  %v868_v50 = vld [vmem:[%s7620_s29 + $0x1398] sm:$0xff] }
 0x3f6   : > { %5737 = vmatprep.subr.mxu1 %v760_v57  ;;  %5699 = vmatpush2.msra.mxu0 %v695_v11  ;;  %v932_v54 = vld [vmem:[%s7620_s29 + $0x1598] sm:$0xff]  ;;  %v867_v56 = vld [vmem:[%s7620_s29 + $0x1390] sm:$0xff] }
 0x3f7   : > { %5738 = vmatpush1.msra.mxu1 %v759_v60  ;;  %5700 = vmatprep.subr.mxu0 %v692_v1  ;;  %v931_v57 = vld [vmem:[%s7620_s29 + $0x1590] sm:$0xff]  ;;  %v864_v11 = vld [vmem:[%s7620_s29 + $0x1378] sm:$0xff] }
 0x3f8   : > { %5739 = vmatprep.subr.mxu1 %v756_v2  ;;  %5701 = vmatpush2.msra.mxu0 %v691_v9  ;;  %v928_v60 = vld [vmem:[%s7620_s29 + $0x1578] sm:$0xff]  ;;  %v863_v1 = vld [vmem:[%s7620_s29 + $0x1370] sm:$0xff] }
 0x3f9   : > { %5702 = vmatprep.mubr.f32.mxu0 %v7932_v28  ;;  %5740 = vmatpush1.msra.mxu1 %v755_v5  ;;  %v872_v28 = vld [vmem:[%s7620_s29 + $0x13b8] sm:$0xff]  ;;  %v927_v2 = vld [vmem:[%s7620_s29 + $0x1570] sm:$0xff] }
 0x3fa   : > { %5703 = vmatmul.mubr.f32.vlgmr.msra.gmra.mxu0 %v7918_v20  ;;  %5741 = vmatprep.subr.mxu1 %v880_v8  ;;  %v935_v20 = vld [vmem:[%s7620_s29 + $0x15b0] sm:$0xff]  ;;  %v860_v9 = vld [vmem:[%s7620_s29 + $0x1358] sm:$0xff] }
 0x3fb   : > { %5780 = vmatprep.subr.mxu0 %v944_v63  ;;  %5742 = vmatpush2.msra.mxu1 %v879_v14  ;;  %v924_v5 = vld [vmem:[%s7620_s29 + $0x1558] sm:$0xff]  ;;  %v859_v8 = vld [vmem:[%s7620_s29 + $0x1350] sm:$0xff] }
 0x3fc   : > { %5781 = vmatpush1.msra.mxu0 %v943_v26  ;;  %5743 = vmatprep.subr.mxu1 %v876_v25  ;;  %v923_v63 = vld [vmem:[%s7620_s29 + $0x1550] sm:$0xff]  ;;  %v856_v14 = vld [vmem:[%s7620_s29 + $0x1338] sm:$0xff] }
 0x3fd   : > { %5782 = vmatprep.subr.mxu0 %v940_v33  ;;  %5744 = vmatpush2.msra.mxu1 %v875_v40  ;;  %v920_v26 = vld [vmem:[%s7620_s29 + $0x1538] sm:$0xff]  ;;  %v855_v25 = vld [vmem:[%s7620_s29 + $0x1330] sm:$0xff] }
 0x3fe   : > { %5783 = vmatpush1.msra.mxu0 %v939_v15  ;;  %5745 = vmatprep.subr.mxu1 %v872_v28  ;;  %v919_v33 = vld [vmem:[%s7620_s29 + $0x1530] sm:$0xff]  ;;  %v852_v40 = vld [vmem:[%s7620_s29 + $0x1318] sm:$0xff] }
 0x3ff   : > { %5784 = vmatprep.subr.mxu0 %v936_v43  ;;  %5746 = vmatpush2.msra.mxu1 %v871_v45  ;;  %v916_v15 = vld [vmem:[%s7620_s29 + $0x1518] sm:$0xff]  ;;  %v851_v28 = vld [vmem:[%s7620_s29 + $0x1310] sm:$0xff] }
 0x400   : > { %5785 = vmatpush1.msra.mxu0 %v935_v20  ;;  %5747 = vmatprep.subr.mxu1 %v868_v50  ;;  %v915_v43 = vld [vmem:[%s7620_s29 + $0x1510] sm:$0xff]  ;;  %v848_v45 = vld [vmem:[%s7620_s29 + $0x12f8] sm:$0xff] }
 0x401   : > { %5786 = vmatprep.subr.mxu0 %v932_v54  ;;  %5748 = vmatpush2.msra.mxu1 %v867_v56  ;;  %v912_v20 = vld [vmem:[%s7620_s29 + $0x14f8] sm:$0xff]  ;;  %v847_v50 = vld [vmem:[%s7620_s29 + $0x12f0] sm:$0xff] }
 0x402   : > { %5787 = vmatpush1.msra.mxu0 %v931_v57  ;;  %5749 = vmatprep.subr.mxu1 %v864_v11  ;;  %v911_v54 = vld [vmem:[%s7620_s29 + $0x14f0] sm:$0xff]  ;;  %v844_v56 = vld [vmem:[%s7620_s29 + $0x12d8] sm:$0xff] }
 0x403   : > { %5788 = vmatprep.subr.mxu0 %v928_v60  ;;  %5750 = vmatpush2.msra.mxu1 %v863_v1  ;;  %v908_v57 = vld [vmem:[%s7620_s29 + $0x14d8] sm:$0xff]  ;;  %v843_v11 = vld [vmem:[%s7620_s29 + $0x12d0] sm:$0xff] }
 0x404   : > { %5789 = vmatpush1.msra.mxu0 %v927_v2  ;;  %5751 = vmatprep.subr.mxu1 %v860_v9  ;;  %v907_v60 = vld [vmem:[%s7620_s29 + $0x14d0] sm:$0xff]  ;;  %v840_v1 = vld [vmem:[%s7620_s29 + $0x12b8] sm:$0xff] }
 0x405   : > { %5790 = vmatprep.subr.mxu0 %v924_v5  ;;  %5752 = vmatpush2.msra.mxu1 %v859_v8  ;;  %v904_v2 = vld [vmem:[%s7620_s29 + $0x14b8] sm:$0xff]  ;;  %v839_v9 = vld [vmem:[%s7620_s29 + $0x12b0] sm:$0xff] }
 0x406   : > { %5791 = vmatpush1.msra.mxu0 %v923_v63  ;;  %5753 = vmatprep.subr.mxu1 %v856_v14  ;;  %v903_v5 = vld [vmem:[%s7620_s29 + $0x14b0] sm:$0xff]  ;;  %v836_v8 = vld [vmem:[%s7620_s29 + $0x1298] sm:$0xff] }
 0x407   : > { %5792 = vmatprep.subr.mxu0 %v920_v26  ;;  %5754 = vmatpush2.msra.mxu1 %v855_v25  ;;  %v900_v63 = vld [vmem:[%s7620_s29 + $0x1498] sm:$0xff]  ;;  %v835_v14 = vld [vmem:[%s7620_s29 + $0x1290] sm:$0xff] }
 0x408   : > { %5793 = vmatpush1.msra.mxu0 %v919_v33  ;;  %5755 = vmatprep.subr.mxu1 %v852_v40  ;;  %v899_v26 = vld [vmem:[%s7620_s29 + $0x1490] sm:$0xff]  ;;  %v832_v25 = vld [vmem:[%s7620_s29 + $0x1278] sm:$0xff] }
 0x409   : > { %5794 = vmatprep.subr.mxu0 %v916_v15  ;;  %5756 = vmatpush2.msra.mxu1 %v851_v28  ;;  %v896_v33 = vld [vmem:[%s7620_s29 + $0x1478] sm:$0xff]  ;;  %v831_v40 = vld [vmem:[%s7620_s29 + $0x1270] sm:$0xff] }
 0x40a   : > { %5795 = vmatpush1.msra.mxu0 %v915_v43  ;;  %5757 = vmatprep.subr.mxu1 %v848_v45  ;;  %v895_v15 = vld [vmem:[%s7620_s29 + $0x1470] sm:$0xff]  ;;  %v828_v28 = vld [vmem:[%s7620_s29 + $0x1258] sm:$0xff] }
 0x40b   : > { %5796 = vmatprep.subr.mxu0 %v912_v20  ;;  %5758 = vmatpush2.msra.mxu1 %v847_v50  ;;  %v892_v43 = vld [vmem:[%s7620_s29 + $0x1458] sm:$0xff]  ;;  %v827_v45 = vld [vmem:[%s7620_s29 + $0x1250] sm:$0xff] }
 0x40c   : > { %5797 = vmatpush1.msra.mxu0 %v911_v54  ;;  %5759 = vmatprep.subr.mxu1 %v844_v56  ;;  %v891_v20 = vld [vmem:[%s7620_s29 + $0x1450] sm:$0xff]  ;;  %v824_v50 = vld [vmem:[%s7620_s29 + $0x1238] sm:$0xff] }
 0x40d   : > { %5798 = vmatprep.subr.mxu0 %v908_v57  ;;  %5760 = vmatpush2.msra.mxu1 %v843_v11  ;;  %v888_v54 = vld [vmem:[%s7620_s29 + $0x1438] sm:$0xff]  ;;  %v823_v56 = vld [vmem:[%s7620_s29 + $0x1230] sm:$0xff] }
 0x40e   : > { %5799 = vmatpush1.msra.mxu0 %v907_v60  ;;  %5761 = vmatprep.subr.mxu1 %v840_v1  ;;  %v887_v57 = vld [vmem:[%s7620_s29 + $0x1430] sm:$0xff]  ;;  %v820_v11 = vld [vmem:[%s7620_s29 + $0x1218] sm:$0xff] }
 0x40f   : > { %5800 = vmatprep.subr.mxu0 %v904_v2  ;;  %5762 = vmatpush2.msra.mxu1 %v839_v9  ;;  %v884_v60 = vld [vmem:[%s7620_s29 + $0x1418] sm:$0xff]  ;;  %v819_v1 = vld [vmem:[%s7620_s29 + $0x1210] sm:$0xff] }
 0x410   : > { %5801 = vmatpush1.msra.mxu0 %v903_v5  ;;  %5763 = vmatprep.subr.mxu1 %v836_v8  ;;  %v883_v2 = vld [vmem:[%s7620_s29 + $0x1410] sm:$0xff]  ;;  %v1008_v9 = vld [vmem:[%s7620_s29 + $0x17f8] sm:$0xff] }
 0x411   : > { %5802 = vmatprep.subr.mxu0 %v900_v63  ;;  %5764 = vmatpush2.msra.mxu1 %v835_v14  ;;  %v1072_v5 = vld [vmem:[%s7620_s29 + $0x19f8] sm:$0xff]  ;;  %v1007_v8 = vld [vmem:[%s7620_s29 + $0x17f0] sm:$0xff] }
 0x412   : > { %5803 = vmatpush1.msra.mxu0 %v899_v26  ;;  %5765 = vmatprep.subr.mxu1 %v832_v25  ;;  %v1071_v63 = vld [vmem:[%s7620_s29 + $0x19f0] sm:$0xff]  ;;  %v1004_v14 = vld [vmem:[%s7620_s29 + $0x17d8] sm:$0xff] }
 0x413   : > { %5804 = vmatprep.subr.mxu0 %v896_v33  ;;  %5766 = vmatpush2.msra.mxu1 %v831_v40  ;;  %v1068_v26 = vld [vmem:[%s7620_s29 + $0x19d8] sm:$0xff]  ;;  %v1003_v25 = vld [vmem:[%s7620_s29 + $0x17d0] sm:$0xff] }
 0x414   : > { %5805 = vmatpush1.msra.mxu0 %v895_v15  ;;  %5767 = vmatprep.subr.mxu1 %v828_v28  ;;  %v1067_v33 = vld [vmem:[%s7620_s29 + $0x19d0] sm:$0xff]  ;;  %v1064_v40 = vld [vmem:[%s7620_s29 + $0x19b8] sm:$0xff] }
 0x415   : > { %5806 = vmatprep.subr.mxu0 %v892_v43  ;;  %5768 = vmatpush2.msra.mxu1 %v827_v45  ;;  %v999_v15 = vld [vmem:[%s7620_s29 + $0x17b0] sm:$0xff]  ;;  %v996_v28 = vld [vmem:[%s7620_s29 + $0x1798] sm:$0xff] }
 0x416   : > { %5807 = vmatpush1.msra.mxu0 %v891_v20  ;;  %5769 = vmatprep.subr.mxu1 %v824_v50  ;;  %v1060_v43 = vld [vmem:[%s7620_s29 + $0x1998] sm:$0xff]  ;;  %v995_v45 = vld [vmem:[%s7620_s29 + $0x1790] sm:$0xff] }
 0x417   : > { %5808 = vmatprep.subr.mxu0 %v888_v54  ;;  %5770 = vmatpush2.msra.mxu1 %v823_v56  ;;  %v1059_v20 = vld [vmem:[%s7620_s29 + $0x1990] sm:$0xff]  ;;  %v992_v50 = vld [vmem:[%s7620_s29 + $0x1778] sm:$0xff] }
 0x418   : > { %5809 = vmatpush1.msra.mxu0 %v887_v57  ;;  %5771 = vmatprep.subr.mxu1 %v820_v11  ;;  %v1056_v54 = vld [vmem:[%s7620_s29 + $0x1978] sm:$0xff]  ;;  %v991_v56 = vld [vmem:[%s7620_s29 + $0x1770] sm:$0xff] }
 0x419   : > { %5810 = vmatprep.subr.mxu0 %v884_v60  ;;  %5772 = vmatpush2.msra.mxu1 %v819_v1  ;;  %v1055_v57 = vld [vmem:[%s7620_s29 + $0x1970] sm:$0xff]  ;;  %v988_v11 = vld [vmem:[%s7620_s29 + $0x1758] sm:$0xff] }
 0x41a   : > { %5773 = vmatprep.mubr.f32.mxu1 %v8073_v49  ;;  %5811 = vmatpush1.msra.mxu0 %v883_v2  ;;  %v1000_v49 = vld [vmem:[%s7620_s29 + $0x17b8] sm:$0xff]  ;;  %v987_v1 = vld [vmem:[%s7620_s29 + $0x1750] sm:$0xff] }
 0x41b   : > { %5774 = vmatmul.mubr.f32.vlgmr.msra.gmra.mxu1 %v8058_v39  ;;  %5812 = vmatprep.subr.mxu0 %v1008_v9  ;;  %v1063_v39 = vld [vmem:[%s7620_s29 + $0x19b0] sm:$0xff]  ;;  %v1052_v60 = vld [vmem:[%s7620_s29 + $0x1958] sm:$0xff] }
 0x41c   : > { %5851 = vmatprep.subr.mxu1 %v1072_v5  ;;  %5813 = vmatpush2.msra.mxu0 %v1007_v8  ;;  %v1051_v2 = vld [vmem:[%s7620_s29 + $0x1950] sm:$0xff]  ;;  %v984_v9 = vld [vmem:[%s7620_s29 + $0x1738] sm:$0xff] }
 0x41d   : > { %5852 = vmatpush1.msra.mxu1 %v1071_v63  ;;  %5814 = vmatprep.subr.mxu0 %v1004_v14  ;;  %v1048_v5 = vld [vmem:[%s7620_s29 + $0x1938] sm:$0xff]  ;;  %v983_v8 = vld [vmem:[%s7620_s29 + $0x1730] sm:$0xff] }
 0x41e   : > { %5853 = vmatprep.subr.mxu1 %v1068_v26  ;;  %5815 = vmatpush2.msra.mxu0 %v1003_v25  ;;  %v1047_v63 = vld [vmem:[%s7620_s29 + $0x1930] sm:$0xff]  ;;  %v980_v14 = vld [vmem:[%s7620_s29 + $0x1718] sm:$0xff] }
 0x41f   : > { %5854 = vmatpush1.msra.mxu1 %v1067_v33  ;;  %5816 = vmatprep.subr.mxu0 %v1000_v49  ;;  %v1044_v26 = vld [vmem:[%s7620_s29 + $0x1918] sm:$0xff]  ;;  %v979_v25 = vld [vmem:[%s7620_s29 + $0x1710] sm:$0xff] }
 0x420   : > { %5855 = vmatprep.subr.mxu1 %v1064_v40  ;;  %5817 = vmatpush2.msra.mxu0 %v999_v15  ;;  %v1043_v33 = vld [vmem:[%s7620_s29 + $0x1910] sm:$0xff]  ;;  %v976_v49 = vld [vmem:[%s7620_s29 + $0x16f8] sm:$0xff] }
 0x421   : > { %5856 = vmatpush1.msra.mxu1 %v1063_v39  ;;  %5818 = vmatprep.subr.mxu0 %v996_v28  ;;  %v1040_v40 = vld [vmem:[%s7620_s29 + $0x18f8] sm:$0xff]  ;;  %v975_v15 = vld [vmem:[%s7620_s29 + $0x16f0] sm:$0xff] }
 0x422   : > { %5857 = vmatprep.subr.mxu1 %v1060_v43  ;;  %5819 = vmatpush2.msra.mxu0 %v995_v45  ;;  %v1039_v39 = vld [vmem:[%s7620_s29 + $0x18f0] sm:$0xff]  ;;  %v972_v28 = vld [vmem:[%s7620_s29 + $0x16d8] sm:$0xff] }
 0x423   : > { %5858 = vmatpush1.msra.mxu1 %v1059_v20  ;;  %5820 = vmatprep.subr.mxu0 %v992_v50  ;;  %v1036_v43 = vld [vmem:[%s7620_s29 + $0x18d8] sm:$0xff]  ;;  %v971_v45 = vld [vmem:[%s7620_s29 + $0x16d0] sm:$0xff] }
 0x424   : > { %5859 = vmatprep.subr.mxu1 %v1056_v54  ;;  %5821 = vmatpush2.msra.mxu0 %v991_v56  ;;  %v1035_v20 = vld [vmem:[%s7620_s29 + $0x18d0] sm:$0xff]  ;;  %v968_v50 = vld [vmem:[%s7620_s29 + $0x16b8] sm:$0xff] }
 0x425   : > { %5860 = vmatpush1.msra.mxu1 %v1055_v57  ;;  %5822 = vmatprep.subr.mxu0 %v988_v11  ;;  %v1032_v54 = vld [vmem:[%s7620_s29 + $0x18b8] sm:$0xff]  ;;  %v967_v56 = vld [vmem:[%s7620_s29 + $0x16b0] sm:$0xff] }
 0x426   : > { %5861 = vmatprep.subr.mxu1 %v1052_v60  ;;  %5823 = vmatpush2.msra.mxu0 %v987_v1  ;;  %v1031_v57 = vld [vmem:[%s7620_s29 + $0x18b0] sm:$0xff]  ;;  %v964_v11 = vld [vmem:[%s7620_s29 + $0x1698] sm:$0xff] }
 0x427   : > { %5862 = vmatpush1.msra.mxu1 %v1051_v2  ;;  %5824 = vmatprep.subr.mxu0 %v984_v9  ;;  %v1028_v60 = vld [vmem:[%s7620_s29 + $0x1898] sm:$0xff]  ;;  %v963_v1 = vld [vmem:[%s7620_s29 + $0x1690] sm:$0xff] }
 0x428   : > { %5863 = vmatprep.subr.mxu1 %v1048_v5  ;;  %5825 = vmatpush2.msra.mxu0 %v983_v8  ;;  %v1027_v2 = vld [vmem:[%s7620_s29 + $0x1890] sm:$0xff]  ;;  %v960_v9 = vld [vmem:[%s7620_s29 + $0x1678] sm:$0xff] }
 0x429   : > { %5864 = vmatpush1.msra.mxu1 %v1047_v63  ;;  %5826 = vmatprep.subr.mxu0 %v980_v14  ;;  %v1024_v5 = vld [vmem:[%s7620_s29 + $0x1878] sm:$0xff]  ;;  %v959_v8 = vld [vmem:[%s7620_s29 + $0x1670] sm:$0xff] }
 0x42a   : > { %5865 = vmatprep.subr.mxu1 %v1044_v26  ;;  %5827 = vmatpush2.msra.mxu0 %v979_v25  ;;  %v1023_v63 = vld [vmem:[%s7620_s29 + $0x1870] sm:$0xff]  ;;  %v956_v14 = vld [vmem:[%s7620_s29 + $0x1658] sm:$0xff] }
 0x42b   : > { %5866 = vmatpush1.msra.mxu1 %v1043_v33  ;;  %5828 = vmatprep.subr.mxu0 %v976_v49  ;;  %v1020_v26 = vld [vmem:[%s7620_s29 + $0x1858] sm:$0xff]  ;;  %v955_v25 = vld [vmem:[%s7620_s29 + $0x1650] sm:$0xff] }
 0x42c   : > { %5867 = vmatprep.subr.mxu1 %v1040_v40  ;;  %5829 = vmatpush2.msra.mxu0 %v975_v15  ;;  %v1019_v33 = vld [vmem:[%s7620_s29 + $0x1850] sm:$0xff]  ;;  %v952_v49 = vld [vmem:[%s7620_s29 + $0x1638] sm:$0xff] }
 0x42d   : > { %5868 = vmatpush1.msra.mxu1 %v1039_v39  ;;  %5830 = vmatprep.subr.mxu0 %v972_v28  ;;  %v1016_v40 = vld [vmem:[%s7620_s29 + $0x1838] sm:$0xff]  ;;  %v951_v15 = vld [vmem:[%s7620_s29 + $0x1630] sm:$0xff] }
 0x42e   : > { %5869 = vmatprep.subr.mxu1 %v1036_v43  ;;  %5831 = vmatpush2.msra.mxu0 %v971_v45  ;;  %v1015_v39 = vld [vmem:[%s7620_s29 + $0x1830] sm:$0xff]  ;;  %v948_v28 = vld [vmem:[%s7620_s29 + $0x1618] sm:$0xff] }
 0x42f   : > { %5870 = vmatpush1.msra.mxu1 %v1035_v20  ;;  %5832 = vmatprep.subr.mxu0 %v968_v50  ;;  %v1012_v43 = vld [vmem:[%s7620_s29 + $0x1818] sm:$0xff]  ;;  %v947_v45 = vld [vmem:[%s7620_s29 + $0x1610] sm:$0xff] }
 0x430   : > { %5871 = vmatprep.subr.mxu1 %v1032_v54  ;;  %5833 = vmatpush2.msra.mxu0 %v967_v56  ;;  %v1011_v20 = vld [vmem:[%s7620_s29 + $0x1810] sm:$0xff]  ;;  %v1136_v50 = vld [vmem:[%s7620_s29 + $0x1bf8] sm:$0xff] }
 0x431   : > { %5872 = vmatpush1.msra.mxu1 %v1031_v57  ;;  %5834 = vmatprep.subr.mxu0 %v964_v11  ;;  %v1200_v54 = vld [vmem:[%s7620_s29 + $0x1df8] sm:$0xff]  ;;  %v1135_v56 = vld [vmem:[%s7620_s29 + $0x1bf0] sm:$0xff] }
 0x432   : > { %5873 = vmatprep.subr.mxu1 %v1028_v60  ;;  %5835 = vmatpush2.msra.mxu0 %v963_v1  ;;  %v1199_v57 = vld [vmem:[%s7620_s29 + $0x1df0] sm:$0xff]  ;;  %v1132_v11 = vld [vmem:[%s7620_s29 + $0x1bd8] sm:$0xff] }
 0x433   : > { %5874 = vmatpush1.msra.mxu1 %v1027_v2  ;;  %5836 = vmatprep.subr.mxu0 %v960_v9  ;;  %v1196_v60 = vld [vmem:[%s7620_s29 + $0x1dd8] sm:$0xff]  ;;  %v1131_v1 = vld [vmem:[%s7620_s29 + $0x1bd0] sm:$0xff] }
 0x434   : > { %5875 = vmatprep.subr.mxu1 %v1024_v5  ;;  %5837 = vmatpush2.msra.mxu0 %v959_v8  ;;  %v1195_v2 = vld [vmem:[%s7620_s29 + $0x1dd0] sm:$0xff]  ;;  %v1192_v9 = vld [vmem:[%s7620_s29 + $0x1db8] sm:$0xff] }
 0x435   : > { %5876 = vmatpush1.msra.mxu1 %v1023_v63  ;;  %5838 = vmatprep.subr.mxu0 %v956_v14  ;;  %v1127_v5 = vld [vmem:[%s7620_s29 + $0x1bb0] sm:$0xff]  ;;  %v1124_v8 = vld [vmem:[%s7620_s29 + $0x1b98] sm:$0xff] }
 0x436   : > { %5877 = vmatprep.subr.mxu1 %v1020_v26  ;;  %5839 = vmatpush2.msra.mxu0 %v955_v25  ;;  %v1188_v63 = vld [vmem:[%s7620_s29 + $0x1d98] sm:$0xff]  ;;  %v1123_v14 = vld [vmem:[%s7620_s29 + $0x1b90] sm:$0xff] }
 0x437   : > { %5878 = vmatpush1.msra.mxu1 %v1019_v33  ;;  %5840 = vmatprep.subr.mxu0 %v952_v49  ;;  %v1187_v26 = vld [vmem:[%s7620_s29 + $0x1d90] sm:$0xff]  ;;  %v1120_v25 = vld [vmem:[%s7620_s29 + $0x1b78] sm:$0xff] }
 0x438   : > { %5879 = vmatprep.subr.mxu1 %v1016_v40  ;;  %5841 = vmatpush2.msra.mxu0 %v951_v15  ;;  %v1184_v33 = vld [vmem:[%s7620_s29 + $0x1d78] sm:$0xff]  ;;  %v1119_v49 = vld [vmem:[%s7620_s29 + $0x1b70] sm:$0xff] }
 0x439   : > { %5880 = vmatpush1.msra.mxu1 %v1015_v39  ;;  %5842 = vmatprep.subr.mxu0 %v948_v28  ;;  %v1183_v40 = vld [vmem:[%s7620_s29 + $0x1d70] sm:$0xff]  ;;  %v1116_v15 = vld [vmem:[%s7620_s29 + $0x1b58] sm:$0xff] }
 0x43a   : > { %5881 = vmatprep.subr.mxu1 %v1012_v43  ;;  %5843 = vmatpush2.msra.mxu0 %v947_v45  ;;  %v1180_v39 = vld [vmem:[%s7620_s29 + $0x1d58] sm:$0xff]  ;;  %v1115_v28 = vld [vmem:[%s7620_s29 + $0x1b50] sm:$0xff] }
 0x43b   : > { %5844 = vmatprep.mubr.f32.mxu0 %v8079_v52  ;;  %5882 = vmatpush1.msra.mxu1 %v1011_v20  ;;  %v1128_v52 = vld [vmem:[%s7620_s29 + $0x1bb8] sm:$0xff]  ;;  %v1179_v43 = vld [vmem:[%s7620_s29 + $0x1d50] sm:$0xff] }
 0x43c   : > { %5845 = vmatmul.mubr.f32.vlgmr.msra.gmra.mxu0 %v8065_v44  ;;  %5883 = vmatprep.subr.mxu1 %v1136_v50  ;;  %v1191_v44 = vld [vmem:[%s7620_s29 + $0x1db0] sm:$0xff]  ;;  %v1112_v45 = vld [vmem:[%s7620_s29 + $0x1b38] sm:$0xff] }
 0x43d   : > { %5922 = vmatprep.subr.mxu0 %v1200_v54  ;;  %5884 = vmatpush2.msra.mxu1 %v1135_v56  ;;  %v1176_v20 = vld [vmem:[%s7620_s29 + $0x1d38] sm:$0xff]  ;;  %v1111_v50 = vld [vmem:[%s7620_s29 + $0x1b30] sm:$0xff] }
 0x43e   : > { %5923 = vmatpush1.msra.mxu0 %v1199_v57  ;;  %5885 = vmatprep.subr.mxu1 %v1132_v11  ;;  %v1175_v54 = vld [vmem:[%s7620_s29 + $0x1d30] sm:$0xff]  ;;  %v1108_v56 = vld [vmem:[%s7620_s29 + $0x1b18] sm:$0xff] }
 0x43f   : > { %5924 = vmatprep.subr.mxu0 %v1196_v60  ;;  %5886 = vmatpush2.msra.mxu1 %v1131_v1  ;;  %v1172_v57 = vld [vmem:[%s7620_s29 + $0x1d18] sm:$0xff]  ;;  %v1107_v11 = vld [vmem:[%s7620_s29 + $0x1b10] sm:$0xff] }
 0x440   : > { %5925 = vmatpush1.msra.mxu0 %v1195_v2  ;;  %5887 = vmatprep.subr.mxu1 %v1128_v52  ;;  %v1171_v60 = vld [vmem:[%s7620_s29 + $0x1d10] sm:$0xff]  ;;  %v1104_v1 = vld [vmem:[%s7620_s29 + $0x1af8] sm:$0xff] }
 0x441   : > { %5926 = vmatprep.subr.mxu0 %v1192_v9  ;;  %5888 = vmatpush2.msra.mxu1 %v1127_v5  ;;  %v1168_v2 = vld [vmem:[%s7620_s29 + $0x1cf8] sm:$0xff]  ;;  %v1103_v52 = vld [vmem:[%s7620_s29 + $0x1af0] sm:$0xff] }
 0x442   : > { %5927 = vmatpush1.msra.mxu0 %v1191_v44  ;;  %5889 = vmatprep.subr.mxu1 %v1124_v8  ;;  %v1167_v9 = vld [vmem:[%s7620_s29 + $0x1cf0] sm:$0xff]  ;;  %v1100_v5 = vld [vmem:[%s7620_s29 + $0x1ad8] sm:$0xff] }
 0x443   : > { %5928 = vmatprep.subr.mxu0 %v1188_v63  ;;  %5890 = vmatpush2.msra.mxu1 %v1123_v14  ;;  %v1164_v44 = vld [vmem:[%s7620_s29 + $0x1cd8] sm:$0xff]  ;;  %v1099_v8 = vld [vmem:[%s7620_s29 + $0x1ad0] sm:$0xff] }
 0x444   : > { %5929 = vmatpush1.msra.mxu0 %v1187_v26  ;;  %5891 = vmatprep.subr.mxu1 %v1120_v25  ;;  %v1163_v63 = vld [vmem:[%s7620_s29 + $0x1cd0] sm:$0xff]  ;;  %v1096_v14 = vld [vmem:[%s7620_s29 + $0x1ab8] sm:$0xff] }
 0x445   : > { %5930 = vmatprep.subr.mxu0 %v1184_v33  ;;  %5892 = vmatpush2.msra.mxu1 %v1119_v49  ;;  %v1160_v26 = vld [vmem:[%s7620_s29 + $0x1cb8] sm:$0xff]  ;;  %v1095_v25 = vld [vmem:[%s7620_s29 + $0x1ab0] sm:$0xff] }
 0x446   : > { %5931 = vmatpush1.msra.mxu0 %v1183_v40  ;;  %5893 = vmatprep.subr.mxu1 %v1116_v15  ;;  %v1159_v33 = vld [vmem:[%s7620_s29 + $0x1cb0] sm:$0xff]  ;;  %v1092_v49 = vld [vmem:[%s7620_s29 + $0x1a98] sm:$0xff] }
 0x447   : > { %5932 = vmatprep.subr.mxu0 %v1180_v39  ;;  %5894 = vmatpush2.msra.mxu1 %v1115_v28  ;;  %v1156_v40 = vld [vmem:[%s7620_s29 + $0x1c98] sm:$0xff]  ;;  %v1091_v15 = vld [vmem:[%s7620_s29 + $0x1a90] sm:$0xff] }
 0x448   : > { %5933 = vmatpush1.msra.mxu0 %v1179_v43  ;;  %5895 = vmatprep.subr.mxu1 %v1112_v45  ;;  %v1155_v39 = vld [vmem:[%s7620_s29 + $0x1c90] sm:$0xff]  ;;  %v1088_v28 = vld [vmem:[%s7620_s29 + $0x1a78] sm:$0xff] }
 0x449   : > { %5934 = vmatprep.subr.mxu0 %v1176_v20  ;;  %5896 = vmatpush2.msra.mxu1 %v1111_v50  ;;  %v1152_v43 = vld [vmem:[%s7620_s29 + $0x1c78] sm:$0xff]  ;;  %v1087_v45 = vld [vmem:[%s7620_s29 + $0x1a70] sm:$0xff] }
 0x44a   : > { %5935 = vmatpush1.msra.mxu0 %v1175_v54  ;;  %5897 = vmatprep.subr.mxu1 %v1108_v56  ;;  %v1151_v20 = vld [vmem:[%s7620_s29 + $0x1c70] sm:$0xff]  ;;  %v1084_v50 = vld [vmem:[%s7620_s29 + $0x1a58] sm:$0xff] }
 0x44b   : > { %5936 = vmatprep.subr.mxu0 %v1172_v57  ;;  %5898 = vmatpush2.msra.mxu1 %v1107_v11  ;;  %v1148_v54 = vld [vmem:[%s7620_s29 + $0x1c58] sm:$0xff]  ;;  %v1083_v56 = vld [vmem:[%s7620_s29 + $0x1a50] sm:$0xff] }
 0x44c   : > { %5937 = vmatpush1.msra.mxu0 %v1171_v60  ;;  %5899 = vmatprep.subr.mxu1 %v1104_v1  ;;  %v1147_v57 = vld [vmem:[%s7620_s29 + $0x1c50] sm:$0xff]  ;;  %v1080_v11 = vld [vmem:[%s7620_s29 + $0x1a38] sm:$0xff] }
 0x44d   : > { %5938 = vmatprep.subr.mxu0 %v1168_v2  ;;  %5900 = vmatpush2.msra.mxu1 %v1103_v52  ;;  %v1144_v60 = vld [vmem:[%s7620_s29 + $0x1c38] sm:$0xff]  ;;  %v1079_v1 = vld [vmem:[%s7620_s29 + $0x1a30] sm:$0xff] }
 0x44e   : > { %5939 = vmatpush1.msra.mxu0 %v1167_v9  ;;  %5901 = vmatprep.subr.mxu1 %v1100_v5  ;;  %v1143_v2 = vld [vmem:[%s7620_s29 + $0x1c30] sm:$0xff]  ;;  %v1076_v52 = vld [vmem:[%s7620_s29 + $0x1a18] sm:$0xff] }
 0x44f   : > { %5940 = vmatprep.subr.mxu0 %v1164_v44  ;;  %5902 = vmatpush2.msra.mxu1 %v1099_v8  ;;  %v1140_v9 = vld [vmem:[%s7620_s29 + $0x1c18] sm:$0xff]  ;;  %v1075_v5 = vld [vmem:[%s7620_s29 + $0x1a10] sm:$0xff] }
 0x450   : > { %5941 = vmatpush1.msra.mxu0 %v1163_v63  ;;  %5903 = vmatprep.subr.mxu1 %v1096_v14  ;;  %v1139_v44 = vld [vmem:[%s7620_s29 + $0x1c10] sm:$0xff]  ;;  %v1264_v8 = vld [vmem:[%s7620_s29 + $0x1ff8] sm:$0xff] }
 0x451   : > { %5942 = vmatprep.subr.mxu0 %v1160_v26  ;;  %5904 = vmatpush2.msra.mxu1 %v1095_v25  ;;  %v1328_v63 = vld [vmem:[%s7620_s29 + $0x21f8] sm:$0xff]  ;;  %v1263_v14 = vld [vmem:[%s7620_s29 + $0x1ff0] sm:$0xff] }
 0x452   : > { %5943 = vmatpush1.msra.mxu0 %v1159_v33  ;;  %5905 = vmatprep.subr.mxu1 %v1092_v49  ;;  %v1327_v26 = vld [vmem:[%s7620_s29 + $0x21f0] sm:$0xff]  ;;  %v1260_v25 = vld [vmem:[%s7620_s29 + $0x1fd8] sm:$0xff] }
 0x453   : > { %5944 = vmatprep.subr.mxu0 %v1156_v40  ;;  %5906 = vmatpush2.msra.mxu1 %v1091_v15  ;;  %v1324_v33 = vld [vmem:[%s7620_s29 + $0x21d8] sm:$0xff]  ;;  %v1259_v49 = vld [vmem:[%s7620_s29 + $0x1fd0] sm:$0xff] }
 0x454   : > { %5945 = vmatpush1.msra.mxu0 %v1155_v39  ;;  %5907 = vmatprep.subr.mxu1 %v1088_v28  ;;  %v1323_v40 = vld [vmem:[%s7620_s29 + $0x21d0] sm:$0xff]  ;;  %v1320_v15 = vld [vmem:[%s7620_s29 + $0x21b8] sm:$0xff] }
 0x455   : > { %5946 = vmatprep.subr.mxu0 %v1152_v43  ;;  %5908 = vmatpush2.msra.mxu1 %v1087_v45  ;;  %v1255_v39 = vld [vmem:[%s7620_s29 + $0x1fb0] sm:$0xff]  ;;  %v1252_v28 = vld [vmem:[%s7620_s29 + $0x1f98] sm:$0xff] }
 0x456   : > { %5947 = vmatpush1.msra.mxu0 %v1151_v20  ;;  %5909 = vmatprep.subr.mxu1 %v1084_v50  ;;  %v1316_v43 = vld [vmem:[%s7620_s29 + $0x2198] sm:$0xff]  ;;  %v1251_v45 = vld [vmem:[%s7620_s29 + $0x1f90] sm:$0xff] }
 0x457   : > { %5948 = vmatprep.subr.mxu0 %v1148_v54  ;;  %5910 = vmatpush2.msra.mxu1 %v1083_v56  ;;  %v1315_v20 = vld [vmem:[%s7620_s29 + $0x2190] sm:$0xff]  ;;  %v1248_v50 = vld [vmem:[%s7620_s29 + $0x1f78] sm:$0xff] }
 0x458   : > { %5949 = vmatpush1.msra.mxu0 %v1147_v57  ;;  %5911 = vmatprep.subr.mxu1 %v1080_v11  ;;  %v1312_v54 = vld [vmem:[%s7620_s29 + $0x2178] sm:$0xff]  ;;  %v1247_v56 = vld [vmem:[%s7620_s29 + $0x1f70] sm:$0xff] }
 0x459   : > { %5950 = vmatprep.subr.mxu0 %v1144_v60  ;;  %5912 = vmatpush2.msra.mxu1 %v1079_v1  ;;  %v1311_v57 = vld [vmem:[%s7620_s29 + $0x2170] sm:$0xff]  ;;  %v1244_v11 = vld [vmem:[%s7620_s29 + $0x1f58] sm:$0xff] }
 0x45a   : > { %5951 = vmatpush1.msra.mxu0 %v1143_v2  ;;  %5913 = vmatprep.subr.mxu1 %v1076_v52  ;;  %v1308_v60 = vld [vmem:[%s7620_s29 + $0x2158] sm:$0xff]  ;;  %v1243_v1 = vld [vmem:[%s7620_s29 + $0x1f50] sm:$0xff] }
 0x45b   : > { %5952 = vmatprep.subr.mxu0 %v1140_v9  ;;  %5914 = vmatpush2.msra.mxu1 %v1075_v5  ;;  %v1307_v2 = vld [vmem:[%s7620_s29 + $0x2150] sm:$0xff]  ;;  %v1240_v52 = vld [vmem:[%s7620_s29 + $0x1f38] sm:$0xff] }
 0x45c   : > { %5915 = vmatprep.mubr.f32.mxu1 %v8220_v24  ;;  %5953 = vmatpush1.msra.mxu0 %v1139_v44  ;;  %v1256_v24 = vld [vmem:[%s7620_s29 + $0x1fb8] sm:$0xff]  ;;  %v1239_v5 = vld [vmem:[%s7620_s29 + $0x1f30] sm:$0xff] }
 0x45d   : > { %5916 = vmatmul.mubr.f32.vlgmr.msra.gmra.mxu1 %v8205_v12  ;;  %5954 = vmatprep.subr.mxu0 %v1264_v8  ;;  %v1319_v12 = vld [vmem:[%s7620_s29 + $0x21b0] sm:$0xff]  ;;  %v1304_v9 = vld [vmem:[%s7620_s29 + $0x2138] sm:$0xff] }
 0x45e   : > { %5993 = vmatprep.subr.mxu1 %v1328_v63  ;;  %5955 = vmatpush2.msra.mxu0 %v1263_v14  ;;  %v1303_v44 = vld [vmem:[%s7620_s29 + $0x2130] sm:$0xff]  ;;  %v1236_v8 = vld [vmem:[%s7620_s29 + $0x1f18] sm:$0xff] }
 0x45f   : > { %5994 = vmatpush1.msra.mxu1 %v1327_v26  ;;  %5956 = vmatprep.subr.mxu0 %v1260_v25  ;;  %v1300_v63 = vld [vmem:[%s7620_s29 + $0x2118] sm:$0xff]  ;;  %v1235_v14 = vld [vmem:[%s7620_s29 + $0x1f10] sm:$0xff] }
 0x460   : > { %5995 = vmatprep.subr.mxu1 %v1324_v33  ;;  %5957 = vmatpush2.msra.mxu0 %v1259_v49  ;;  %v1299_v26 = vld [vmem:[%s7620_s29 + $0x2110] sm:$0xff]  ;;  %v1232_v25 = vld [vmem:[%s7620_s29 + $0x1ef8] sm:$0xff] }
 0x461   : > { %5996 = vmatpush1.msra.mxu1 %v1323_v40  ;;  %5958 = vmatprep.subr.mxu0 %v1256_v24  ;;  %v1296_v33 = vld [vmem:[%s7620_s29 + $0x20f8] sm:$0xff]  ;;  %v1231_v49 = vld [vmem:[%s7620_s29 + $0x1ef0] sm:$0xff] }
 0x462   : > { %5997 = vmatprep.subr.mxu1 %v1320_v15  ;;  %5959 = vmatpush2.msra.mxu0 %v1255_v39  ;;  %v1295_v40 = vld [vmem:[%s7620_s29 + $0x20f0] sm:$0xff]  ;;  %v1228_v24 = vld [vmem:[%s7620_s29 + $0x1ed8] sm:$0xff] }
 0x463   : > { %5998 = vmatpush1.msra.mxu1 %v1319_v12  ;;  %5960 = vmatprep.subr.mxu0 %v1252_v28  ;;  %v1292_v15 = vld [vmem:[%s7620_s29 + $0x20d8] sm:$0xff]  ;;  %v1227_v39 = vld [vmem:[%s7620_s29 + $0x1ed0] sm:$0xff] }
 0x464   : > { %5999 = vmatprep.subr.mxu1 %v1316_v43  ;;  %5961 = vmatpush2.msra.mxu0 %v1251_v45  ;;  %v1291_v12 = vld [vmem:[%s7620_s29 + $0x20d0] sm:$0xff]  ;;  %v1224_v28 = vld [vmem:[%s7620_s29 + $0x1eb8] sm:$0xff] }
 0x465   : > { %6000 = vmatpush1.msra.mxu1 %v1315_v20  ;;  %5962 = vmatprep.subr.mxu0 %v1248_v50  ;;  %v1288_v43 = vld [vmem:[%s7620_s29 + $0x20b8] sm:$0xff]  ;;  %v1223_v45 = vld [vmem:[%s7620_s29 + $0x1eb0] sm:$0xff] }
 0x466   : > { %6001 = vmatprep.subr.mxu1 %v1312_v54  ;;  %5963 = vmatpush2.msra.mxu0 %v1247_v56  ;;  %v1287_v20 = vld [vmem:[%s7620_s29 + $0x20b0] sm:$0xff]  ;;  %v1220_v50 = vld [vmem:[%s7620_s29 + $0x1e98] sm:$0xff] }
 0x467   : > { %6002 = vmatpush1.msra.mxu1 %v1311_v57  ;;  %5964 = vmatprep.subr.mxu0 %v1244_v11  ;;  %v1284_v54 = vld [vmem:[%s7620_s29 + $0x2098] sm:$0xff]  ;;  %v1219_v56 = vld [vmem:[%s7620_s29 + $0x1e90] sm:$0xff] }
 0x468   : > { %6003 = vmatprep.subr.mxu1 %v1308_v60  ;;  %5965 = vmatpush2.msra.mxu0 %v1243_v1  ;;  %v1283_v57 = vld [vmem:[%s7620_s29 + $0x2090] sm:$0xff]  ;;  %v1216_v11 = vld [vmem:[%s7620_s29 + $0x1e78] sm:$0xff] }
 0x469   : > { %6004 = vmatpush1.msra.mxu1 %v1307_v2  ;;  %5966 = vmatprep.subr.mxu0 %v1240_v52  ;;  %v1280_v60 = vld [vmem:[%s7620_s29 + $0x2078] sm:$0xff]  ;;  %v1215_v1 = vld [vmem:[%s7620_s29 + $0x1e70] sm:$0xff] }
 0x46a   : > { %6005 = vmatprep.subr.mxu1 %v1304_v9  ;;  %5967 = vmatpush2.msra.mxu0 %v1239_v5  ;;  %v1279_v2 = vld [vmem:[%s7620_s29 + $0x2070] sm:$0xff]  ;;  %v1212_v52 = vld [vmem:[%s7620_s29 + $0x1e58] sm:$0xff] }
 0x46b   : > { %6006 = vmatpush1.msra.mxu1 %v1303_v44  ;;  %5968 = vmatprep.subr.mxu0 %v1236_v8  ;;  %v1276_v9 = vld [vmem:[%s7620_s29 + $0x2058] sm:$0xff]  ;;  %v1211_v5 = vld [vmem:[%s7620_s29 + $0x1e50] sm:$0xff] }
 0x46c   : > { %6007 = vmatprep.subr.mxu1 %v1300_v63  ;;  %5969 = vmatpush2.msra.mxu0 %v1235_v14  ;;  %v1275_v44 = vld [vmem:[%s7620_s29 + $0x2050] sm:$0xff]  ;;  %v1208_v8 = vld [vmem:[%s7620_s29 + $0x1e38] sm:$0xff] }
 0x46d   : > { %6008 = vmatpush1.msra.mxu1 %v1299_v26  ;;  %5970 = vmatprep.subr.mxu0 %v1232_v25  ;;  %v1272_v63 = vld [vmem:[%s7620_s29 + $0x2038] sm:$0xff]  ;;  %v1207_v14 = vld [vmem:[%s7620_s29 + $0x1e30] sm:$0xff] }
 0x46e   : > { %6009 = vmatprep.subr.mxu1 %v1296_v33  ;;  %5971 = vmatpush2.msra.mxu0 %v1231_v49  ;;  %v1271_v26 = vld [vmem:[%s7620_s29 + $0x2030] sm:$0xff]  ;;  %v1204_v25 = vld [vmem:[%s7620_s29 + $0x1e18] sm:$0xff] }
 0x46f   : > { %6010 = vmatpush1.msra.mxu1 %v1295_v40  ;;  %5972 = vmatprep.subr.mxu0 %v1228_v24  ;;  %v1268_v33 = vld [vmem:[%s7620_s29 + $0x2018] sm:$0xff]  ;;  %v1203_v49 = vld [vmem:[%s7620_s29 + $0x1e10] sm:$0xff] }
 0x470   : > { %6011 = vmatprep.subr.mxu1 %v1292_v15  ;;  %5973 = vmatpush2.msra.mxu0 %v1227_v39  ;;  %v1267_v40 = vld [vmem:[%s7620_s29 + $0x2010] sm:$0xff]  ;;  %v1392_v24 = vld [vmem:[%s7620_s29 + $0x23f8] sm:$0xff] }
 0x471   : > { %6012 = vmatpush1.msra.mxu1 %v1291_v12  ;;  %5974 = vmatprep.subr.mxu0 %v1224_v28  ;;  %v1456_v15 = vld [vmem:[%s7620_s29 + $0x25f8] sm:$0xff]  ;;  %v1391_v39 = vld [vmem:[%s7620_s29 + $0x23f0] sm:$0xff] }
 0x472   : > { %6013 = vmatprep.subr.mxu1 %v1288_v43  ;;  %5975 = vmatpush2.msra.mxu0 %v1223_v45  ;;  %v1455_v12 = vld [vmem:[%s7620_s29 + $0x25f0] sm:$0xff]  ;;  %v1388_v28 = vld [vmem:[%s7620_s29 + $0x23d8] sm:$0xff] }
 0x473   : > { %6014 = vmatpush1.msra.mxu1 %v1287_v20  ;;  %5976 = vmatprep.subr.mxu0 %v1220_v50  ;;  %v1452_v43 = vld [vmem:[%s7620_s29 + $0x25d8] sm:$0xff]  ;;  %v1387_v45 = vld [vmem:[%s7620_s29 + $0x23d0] sm:$0xff] }
 0x474   : > { %6015 = vmatprep.subr.mxu1 %v1284_v54  ;;  %5977 = vmatpush2.msra.mxu0 %v1219_v56  ;;  %v1451_v20 = vld [vmem:[%s7620_s29 + $0x25d0] sm:$0xff]  ;;  %v1448_v50 = vld [vmem:[%s7620_s29 + $0x25b8] sm:$0xff] }
 0x475   : > { %6016 = vmatpush1.msra.mxu1 %v1283_v57  ;;  %5978 = vmatprep.subr.mxu0 %v1216_v11  ;;  %v1383_v54 = vld [vmem:[%s7620_s29 + $0x23b0] sm:$0xff]  ;;  %v1380_v56 = vld [vmem:[%s7620_s29 + $0x2398] sm:$0xff] }
 0x476   : > { %6017 = vmatprep.subr.mxu1 %v1280_v60  ;;  %5979 = vmatpush2.msra.mxu0 %v1215_v1  ;;  %v1444_v57 = vld [vmem:[%s7620_s29 + $0x2598] sm:$0xff]  ;;  %v1379_v11 = vld [vmem:[%s7620_s29 + $0x2390] sm:$0xff] }
 0x477   : > { %6018 = vmatpush1.msra.mxu1 %v1279_v2  ;;  %5980 = vmatprep.subr.mxu0 %v1212_v52  ;;  %v1443_v60 = vld [vmem:[%s7620_s29 + $0x2590] sm:$0xff]  ;;  %v1376_v1 = vld [vmem:[%s7620_s29 + $0x2378] sm:$0xff] }
 0x478   : > { %6019 = vmatprep.subr.mxu1 %v1276_v9  ;;  %5981 = vmatpush2.msra.mxu0 %v1211_v5  ;;  %v1440_v2 = vld [vmem:[%s7620_s29 + $0x2578] sm:$0xff]  ;;  %v1375_v52 = vld [vmem:[%s7620_s29 + $0x2370] sm:$0xff] }
 0x479   : > { %6020 = vmatpush1.msra.mxu1 %v1275_v44  ;;  %5982 = vmatprep.subr.mxu0 %v1208_v8  ;;  %v1439_v9 = vld [vmem:[%s7620_s29 + $0x2570] sm:$0xff]  ;;  %v1372_v5 = vld [vmem:[%s7620_s29 + $0x2358] sm:$0xff] }
 0x47a   : > { %6021 = vmatprep.subr.mxu1 %v1272_v63  ;;  %5983 = vmatpush2.msra.mxu0 %v1207_v14  ;;  %v1436_v44 = vld [vmem:[%s7620_s29 + $0x2558] sm:$0xff]  ;;  %v1371_v8 = vld [vmem:[%s7620_s29 + $0x2350] sm:$0xff] }
 0x47b   : > { %6022 = vmatpush1.msra.mxu1 %v1271_v26  ;;  %5984 = vmatprep.subr.mxu0 %v1204_v25  ;;  %v1435_v63 = vld [vmem:[%s7620_s29 + $0x2550] sm:$0xff]  ;;  %v1368_v14 = vld [vmem:[%s7620_s29 + $0x2338] sm:$0xff] }
 0x47c   : > { %6023 = vmatprep.subr.mxu1 %v1268_v33  ;;  %5985 = vmatpush2.msra.mxu0 %v1203_v49  ;;  %v1432_v26 = vld [vmem:[%s7620_s29 + $0x2538] sm:$0xff]  ;;  %v1367_v25 = vld [vmem:[%s7620_s29 + $0x2330] sm:$0xff] }
 0x47d   : > { %5986 = vmatprep.mubr.f32.mxu0 %v8226_v29  ;;  %6024 = vmatpush1.msra.mxu1 %v1267_v40  ;;  %v1384_v29 = vld [vmem:[%s7620_s29 + $0x23b8] sm:$0xff]  ;;  %v1431_v33 = vld [vmem:[%s7620_s29 + $0x2530] sm:$0xff] }
 0x47e   : > { %5987 = vmatmul.mubr.f32.vlgmr.msra.gmra.mxu0 %v8212_v18  ;;  %6025 = vmatprep.subr.mxu1 %v1392_v24  ;;  %v1447_v18 = vld [vmem:[%s7620_s29 + $0x25b0] sm:$0xff]  ;;  %v1364_v49 = vld [vmem:[%s7620_s29 + $0x2318] sm:$0xff] }
 0x47f   : > { %6064 = vmatprep.subr.mxu0 %v1456_v15  ;;  %6026 = vmatpush2.msra.mxu1 %v1391_v39  ;;  %v1428_v40 = vld [vmem:[%s7620_s29 + $0x2518] sm:$0xff]  ;;  %v1363_v24 = vld [vmem:[%s7620_s29 + $0x2310] sm:$0xff] }
 0x480   : > { %6065 = vmatpush1.msra.mxu0 %v1455_v12  ;;  %6027 = vmatprep.subr.mxu1 %v1388_v28  ;;  %v1427_v15 = vld [vmem:[%s7620_s29 + $0x2510] sm:$0xff]  ;;  %v1360_v39 = vld [vmem:[%s7620_s29 + $0x22f8] sm:$0xff] }
 0x481   : > { %6066 = vmatprep.subr.mxu0 %v1452_v43  ;;  %6028 = vmatpush2.msra.mxu1 %v1387_v45  ;;  %v1424_v12 = vld [vmem:[%s7620_s29 + $0x24f8] sm:$0xff]  ;;  %v1359_v28 = vld [vmem:[%s7620_s29 + $0x22f0] sm:$0xff] }
 0x482   : > { %6067 = vmatpush1.msra.mxu0 %v1451_v20  ;;  %6029 = vmatprep.subr.mxu1 %v1384_v29  ;;  %v1423_v43 = vld [vmem:[%s7620_s29 + $0x24f0] sm:$0xff]  ;;  %v1356_v45 = vld [vmem:[%s7620_s29 + $0x22d8] sm:$0xff] }
 0x483   : > { %6068 = vmatprep.subr.mxu0 %v1448_v50  ;;  %6030 = vmatpush2.msra.mxu1 %v1383_v54  ;;  %v1420_v20 = vld [vmem:[%s7620_s29 + $0x24d8] sm:$0xff]  ;;  %v1355_v29 = vld [vmem:[%s7620_s29 + $0x22d0] sm:$0xff] }
 0x484   : > { %6069 = vmatpush1.msra.mxu0 %v1447_v18  ;;  %6031 = vmatprep.subr.mxu1 %v1380_v56  ;;  %v1419_v50 = vld [vmem:[%s7620_s29 + $0x24d0] sm:$0xff]  ;;  %v1352_v54 = vld [vmem:[%s7620_s29 + $0x22b8] sm:$0xff] }
 0x485   : > { %6070 = vmatprep.subr.mxu0 %v1444_v57  ;;  %6032 = vmatpush2.msra.mxu1 %v1379_v11  ;;  %v1416_v18 = vld [vmem:[%s7620_s29 + $0x24b8] sm:$0xff]  ;;  %v1351_v56 = vld [vmem:[%s7620_s29 + $0x22b0] sm:$0xff] }
 0x486   : > { %6071 = vmatpush1.msra.mxu0 %v1443_v60  ;;  %6033 = vmatprep.subr.mxu1 %v1376_v1  ;;  %v1415_v57 = vld [vmem:[%s7620_s29 + $0x24b0] sm:$0xff]  ;;  %v1348_v11 = vld [vmem:[%s7620_s29 + $0x2298] sm:$0xff] }
 0x487   : > { %6072 = vmatprep.subr.mxu0 %v1440_v2  ;;  %6034 = vmatpush2.msra.mxu1 %v1375_v52  ;;  %v1412_v60 = vld [vmem:[%s7620_s29 + $0x2498] sm:$0xff]  ;;  %v1347_v1 = vld [vmem:[%s7620_s29 + $0x2290] sm:$0xff] }
 0x488   : > { %6073 = vmatpush1.msra.mxu0 %v1439_v9  ;;  %6035 = vmatprep.subr.mxu1 %v1372_v5  ;;  %v1411_v2 = vld [vmem:[%s7620_s29 + $0x2490] sm:$0xff]  ;;  %v1344_v52 = vld [vmem:[%s7620_s29 + $0x2278] sm:$0xff] }
 0x489   : > { %6074 = vmatprep.subr.mxu0 %v1436_v44  ;;  %6036 = vmatpush2.msra.mxu1 %v1371_v8  ;;  %v1408_v9 = vld [vmem:[%s7620_s29 + $0x2478] sm:$0xff]  ;;  %v1343_v5 = vld [vmem:[%s7620_s29 + $0x2270] sm:$0xff] }
 0x48a   : > { %6075 = vmatpush1.msra.mxu0 %v1435_v63  ;;  %6037 = vmatprep.subr.mxu1 %v1368_v14  ;;  %v1407_v44 = vld [vmem:[%s7620_s29 + $0x2470] sm:$0xff]  ;;  %v1340_v8 = vld [vmem:[%s7620_s29 + $0x2258] sm:$0xff] }
 0x48b   : > { %6076 = vmatprep.subr.mxu0 %v1432_v26  ;;  %6038 = vmatpush2.msra.mxu1 %v1367_v25  ;;  %v1404_v63 = vld [vmem:[%s7620_s29 + $0x2458] sm:$0xff]  ;;  %v1339_v14 = vld [vmem:[%s7620_s29 + $0x2250] sm:$0xff] }
 0x48c   : > { %6077 = vmatpush1.msra.mxu0 %v1431_v33  ;;  %6039 = vmatprep.subr.mxu1 %v1364_v49  ;;  %v1403_v26 = vld [vmem:[%s7620_s29 + $0x2450] sm:$0xff]  ;;  %v1336_v25 = vld [vmem:[%s7620_s29 + $0x2238] sm:$0xff] }
 0x48d   : > { %6078 = vmatprep.subr.mxu0 %v1428_v40  ;;  %6040 = vmatpush2.msra.mxu1 %v1363_v24  ;;  %v1400_v33 = vld [vmem:[%s7620_s29 + $0x2438] sm:$0xff]  ;;  %v1335_v49 = vld [vmem:[%s7620_s29 + $0x2230] sm:$0xff] }
 0x48e   : > { %6079 = vmatpush1.msra.mxu0 %v1427_v15  ;;  %6041 = vmatprep.subr.mxu1 %v1360_v39  ;;  %v1399_v40 = vld [vmem:[%s7620_s29 + $0x2430] sm:$0xff]  ;;  %v1332_v24 = vld [vmem:[%s7620_s29 + $0x2218] sm:$0xff] }
 0x48f   : > { %6080 = vmatprep.subr.mxu0 %v1424_v12  ;;  %6042 = vmatpush2.msra.mxu1 %v1359_v28  ;;  %v1396_v15 = vld [vmem:[%s7620_s29 + $0x2418] sm:$0xff]  ;;  %v1331_v39 = vld [vmem:[%s7620_s29 + $0x2210] sm:$0xff] }
 0x490   : > { %6081 = vmatpush1.msra.mxu0 %v1423_v43  ;;  %6043 = vmatprep.subr.mxu1 %v1356_v45  ;;  %v1395_v12 = vld [vmem:[%s7620_s29 + $0x2410] sm:$0xff]  ;;  %v1520_v28 = vld [vmem:[%s7620_s29 + $0x27f8] sm:$0xff] }
 0x491   : > { %6082 = vmatprep.subr.mxu0 %v1420_v20  ;;  %6044 = vmatpush2.msra.mxu1 %v1355_v29  ;;  %v1584_v43 = vld [vmem:[%s7620_s29 + $0x29f8] sm:$0xff]  ;;  %v1519_v45 = vld [vmem:[%s7620_s29 + $0x27f0] sm:$0xff] }
 0x492   : > { %6083 = vmatpush1.msra.mxu0 %v1419_v50  ;;  %6045 = vmatprep.subr.mxu1 %v1352_v54  ;;  %v1583_v20 = vld [vmem:[%s7620_s29 + $0x29f0] sm:$0xff]  ;;  %v1516_v29 = vld [vmem:[%s7620_s29 + $0x27d8] sm:$0xff] }
 0x493   : > { %6084 = vmatprep.subr.mxu0 %v1416_v18  ;;  %6046 = vmatpush2.msra.mxu1 %v1351_v56  ;;  %v1580_v50 = vld [vmem:[%s7620_s29 + $0x29d8] sm:$0xff]  ;;  %v1515_v54 = vld [vmem:[%s7620_s29 + $0x27d0] sm:$0xff] }
 0x494   : > { %6085 = vmatpush1.msra.mxu0 %v1415_v57  ;;  %6047 = vmatprep.subr.mxu1 %v1348_v11  ;;  %v1579_v18 = vld [vmem:[%s7620_s29 + $0x29d0] sm:$0xff]  ;;  %v1576_v56 = vld [vmem:[%s7620_s29 + $0x29b8] sm:$0xff] }
 0x495   : > { %6086 = vmatprep.subr.mxu0 %v1412_v60  ;;  %6048 = vmatpush2.msra.mxu1 %v1347_v1  ;;  %v1511_v57 = vld [vmem:[%s7620_s29 + $0x27b0] sm:$0xff]  ;;  %v1508_v11 = vld [vmem:[%s7620_s29 + $0x2798] sm:$0xff] }
 0x496   : > { %6087 = vmatpush1.msra.mxu0 %v1411_v2  ;;  %6049 = vmatprep.subr.mxu1 %v1344_v52  ;;  %v1572_v60 = vld [vmem:[%s7620_s29 + $0x2998] sm:$0xff]  ;;  %v1507_v1 = vld [vmem:[%s7620_s29 + $0x2790] sm:$0xff] }
 0x497   : > { %6088 = vmatprep.subr.mxu0 %v1408_v9  ;;  %6050 = vmatpush2.msra.mxu1 %v1343_v5  ;;  %v1571_v2 = vld [vmem:[%s7620_s29 + $0x2990] sm:$0xff]  ;;  %v1504_v52 = vld [vmem:[%s7620_s29 + $0x2778] sm:$0xff] }
 0x498   : > { %6089 = vmatpush1.msra.mxu0 %v1407_v44  ;;  %6051 = vmatprep.subr.mxu1 %v1340_v8  ;;  %v1568_v9 = vld [vmem:[%s7620_s29 + $0x2978] sm:$0xff]  ;;  %v1503_v5 = vld [vmem:[%s7620_s29 + $0x2770] sm:$0xff] }
 0x499   : > { %6090 = vmatprep.subr.mxu0 %v1404_v63  ;;  %6052 = vmatpush2.msra.mxu1 %v1339_v14  ;;  %v1567_v44 = vld [vmem:[%s7620_s29 + $0x2970] sm:$0xff]  ;;  %v1500_v8 = vld [vmem:[%s7620_s29 + $0x2758] sm:$0xff] }
 0x49a   : > { %6091 = vmatpush1.msra.mxu0 %v1403_v26  ;;  %6053 = vmatprep.subr.mxu1 %v1336_v25  ;;  %v1564_v63 = vld [vmem:[%s7620_s29 + $0x2958] sm:$0xff]  ;;  %v1499_v14 = vld [vmem:[%s7620_s29 + $0x2750] sm:$0xff] }
 0x49b   : > { %6092 = vmatprep.subr.mxu0 %v1400_v33  ;;  %6054 = vmatpush2.msra.mxu1 %v1335_v49  ;;  %v1563_v26 = vld [vmem:[%s7620_s29 + $0x2950] sm:$0xff]  ;;  %v1496_v25 = vld [vmem:[%s7620_s29 + $0x2738] sm:$0xff] }
 0x49c   : > { %6093 = vmatpush1.msra.mxu0 %v1399_v40  ;;  %6055 = vmatprep.subr.mxu1 %v1332_v24  ;;  %v1560_v33 = vld [vmem:[%s7620_s29 + $0x2938] sm:$0xff]  ;;  %v1495_v49 = vld [vmem:[%s7620_s29 + $0x2730] sm:$0xff] }
 0x49d   : > { %6094 = vmatprep.subr.mxu0 %v1396_v15  ;;  %6056 = vmatpush2.msra.mxu1 %v1331_v39  ;;  %v1559_v40 = vld [vmem:[%s7620_s29 + $0x2930] sm:$0xff]  ;;  %v1492_v24 = vld [vmem:[%s7620_s29 + $0x2718] sm:$0xff] }
 0x49e   : > { %6057 = vmatprep.mubr.f32.mxu1 %v8367_v10  ;;  %6095 = vmatpush1.msra.mxu0 %v1395_v12  ;;  %v1512_v10 = vld [vmem:[%s7620_s29 + $0x27b8] sm:$0xff]  ;;  %v1491_v39 = vld [vmem:[%s7620_s29 + $0x2710] sm:$0xff] }
 0x49f   : > { %6058 = vmatmul.mubr.f32.vlgmr.msra.gmra.mxu1 %v8352_v61  ;;  %6096 = vmatprep.subr.mxu0 %v1520_v28  ;;  %v1575_v61 = vld [vmem:[%s7620_s29 + $0x29b0] sm:$0xff]  ;;  %v1556_v15 = vld [vmem:[%s7620_s29 + $0x2918] sm:$0xff] }
 0x4a0   : > { %6135 = vmatprep.subr.mxu1 %v1584_v43  ;;  %6097 = vmatpush2.msra.mxu0 %v1519_v45  ;;  %v1555_v12 = vld [vmem:[%s7620_s29 + $0x2910] sm:$0xff]  ;;  %v1488_v28 = vld [vmem:[%s7620_s29 + $0x26f8] sm:$0xff] }
 0x4a1   : > { %6136 = vmatpush1.msra.mxu1 %v1583_v20  ;;  %6098 = vmatprep.subr.mxu0 %v1516_v29  ;;  %v1552_v43 = vld [vmem:[%s7620_s29 + $0x28f8] sm:$0xff]  ;;  %v1487_v45 = vld [vmem:[%s7620_s29 + $0x26f0] sm:$0xff] }
 0x4a2   : > { %6137 = vmatprep.subr.mxu1 %v1580_v50  ;;  %6099 = vmatpush2.msra.mxu0 %v1515_v54  ;;  %v1551_v20 = vld [vmem:[%s7620_s29 + $0x28f0] sm:$0xff]  ;;  %v1484_v29 = vld [vmem:[%s7620_s29 + $0x26d8] sm:$0xff] }
 0x4a3   : > { %6138 = vmatpush1.msra.mxu1 %v1579_v18  ;;  %6100 = vmatprep.subr.mxu0 %v1512_v10  ;;  %v1548_v50 = vld [vmem:[%s7620_s29 + $0x28d8] sm:$0xff]  ;;  %v1483_v54 = vld [vmem:[%s7620_s29 + $0x26d0] sm:$0xff] }
 0x4a4   : > { %6139 = vmatprep.subr.mxu1 %v1576_v56  ;;  %6101 = vmatpush2.msra.mxu0 %v1511_v57  ;;  %v1547_v18 = vld [vmem:[%s7620_s29 + $0x28d0] sm:$0xff]  ;;  %v1480_v10 = vld [vmem:[%s7620_s29 + $0x26b8] sm:$0xff] }
 0x4a5   : > { %6140 = vmatpush1.msra.mxu1 %v1575_v61  ;;  %6102 = vmatprep.subr.mxu0 %v1508_v11  ;;  %v1544_v56 = vld [vmem:[%s7620_s29 + $0x28b8] sm:$0xff]  ;;  %v1479_v57 = vld [vmem:[%s7620_s29 + $0x26b0] sm:$0xff] }
 0x4a6   : > { %6141 = vmatprep.subr.mxu1 %v1572_v60  ;;  %6103 = vmatpush2.msra.mxu0 %v1507_v1  ;;  %v1543_v61 = vld [vmem:[%s7620_s29 + $0x28b0] sm:$0xff]  ;;  %v1476_v11 = vld [vmem:[%s7620_s29 + $0x2698] sm:$0xff] }
 0x4a7   : > { %6142 = vmatpush1.msra.mxu1 %v1571_v2  ;;  %6104 = vmatprep.subr.mxu0 %v1504_v52  ;;  %v1540_v60 = vld [vmem:[%s7620_s29 + $0x2898] sm:$0xff]  ;;  %v1475_v1 = vld [vmem:[%s7620_s29 + $0x2690] sm:$0xff] }
 0x4a8   : > { %6143 = vmatprep.subr.mxu1 %v1568_v9  ;;  %6105 = vmatpush2.msra.mxu0 %v1503_v5  ;;  %v1539_v2 = vld [vmem:[%s7620_s29 + $0x2890] sm:$0xff]  ;;  %v1472_v52 = vld [vmem:[%s7620_s29 + $0x2678] sm:$0xff] }
 0x4a9   : > { %6144 = vmatpush1.msra.mxu1 %v1567_v44  ;;  %6106 = vmatprep.subr.mxu0 %v1500_v8  ;;  %v1536_v9 = vld [vmem:[%s7620_s29 + $0x2878] sm:$0xff]  ;;  %v1471_v5 = vld [vmem:[%s7620_s29 + $0x2670] sm:$0xff] }
 0x4aa   : > { %6145 = vmatprep.subr.mxu1 %v1564_v63  ;;  %6107 = vmatpush2.msra.mxu0 %v1499_v14  ;;  %v1535_v44 = vld [vmem:[%s7620_s29 + $0x2870] sm:$0xff]  ;;  %v1468_v8 = vld [vmem:[%s7620_s29 + $0x2658] sm:$0xff] }
 0x4ab   : > { %6146 = vmatpush1.msra.mxu1 %v1563_v26  ;;  %6108 = vmatprep.subr.mxu0 %v1496_v25  ;;  %v1532_v63 = vld [vmem:[%s7620_s29 + $0x2858] sm:$0xff]  ;;  %v1467_v14 = vld [vmem:[%s7620_s29 + $0x2650] sm:$0xff] }
 0x4ac   : > { %6147 = vmatprep.subr.mxu1 %v1560_v33  ;;  %6109 = vmatpush2.msra.mxu0 %v1495_v49  ;;  %v1531_v26 = vld [vmem:[%s7620_s29 + $0x2850] sm:$0xff]  ;;  %v1464_v25 = vld [vmem:[%s7620_s29 + $0x2638] sm:$0xff] }
 0x4ad   : > { %6148 = vmatpush1.msra.mxu1 %v1559_v40  ;;  %6110 = vmatprep.subr.mxu0 %v1492_v24  ;;  %v1528_v33 = vld [vmem:[%s7620_s29 + $0x2838] sm:$0xff]  ;;  %v1463_v49 = vld [vmem:[%s7620_s29 + $0x2630] sm:$0xff] }
 0x4ae   : > { %6149 = vmatprep.subr.mxu1 %v1556_v15  ;;  %6111 = vmatpush2.msra.mxu0 %v1491_v39  ;;  %v1527_v40 = vld [vmem:[%s7620_s29 + $0x2830] sm:$0xff]  ;;  %v1460_v24 = vld [vmem:[%s7620_s29 + $0x2618] sm:$0xff] }
 0x4af   : > { %6150 = vmatpush1.msra.mxu1 %v1555_v12  ;;  %6112 = vmatprep.subr.mxu0 %v1488_v28  ;;  %v1524_v15 = vld [vmem:[%s7620_s29 + $0x2818] sm:$0xff]  ;;  %v1459_v39 = vld [vmem:[%s7620_s29 + $0x2610] sm:$0xff] }
 0x4b0   : > { %6151 = vmatprep.subr.mxu1 %v1552_v43  ;;  %6113 = vmatpush2.msra.mxu0 %v1487_v45  ;;  %v1523_v12 = vld [vmem:[%s7620_s29 + $0x2810] sm:$0xff]  ;;  %v1648_v28 = vld [vmem:[%s7620_s29 + $0x2bf8] sm:$0xff] }
 0x4b1   : > { %6152 = vmatpush1.msra.mxu1 %v1551_v20  ;;  %6114 = vmatprep.subr.mxu0 %v1484_v29  ;;  %v1712_v43 = vld [vmem:[%s7620_s29 + $0x2df8] sm:$0xff]  ;;  %v1647_v45 = vld [vmem:[%s7620_s29 + $0x2bf0] sm:$0xff] }
 0x4b2   : > { %6153 = vmatprep.subr.mxu1 %v1548_v50  ;;  %6115 = vmatpush2.msra.mxu0 %v1483_v54  ;;  %v1711_v20 = vld [vmem:[%s7620_s29 + $0x2df0] sm:$0xff]  ;;  %v1644_v29 = vld [vmem:[%s7620_s29 + $0x2bd8] sm:$0xff] }
 0x4b3   : > { %6154 = vmatpush1.msra.mxu1 %v1547_v18  ;;  %6116 = vmatprep.subr.mxu0 %v1480_v10  ;;  %v1708_v50 = vld [vmem:[%s7620_s29 + $0x2dd8] sm:$0xff]  ;;  %v1643_v54 = vld [vmem:[%s7620_s29 + $0x2bd0] sm:$0xff] }
 0x4b4   : > { %6155 = vmatprep.subr.mxu1 %v1544_v56  ;;  %6117 = vmatpush2.msra.mxu0 %v1479_v57  ;;  %v1707_v18 = vld [vmem:[%s7620_s29 + $0x2dd0] sm:$0xff]  ;;  %v1704_v10 = vld [vmem:[%s7620_s29 + $0x2db8] sm:$0xff] }
 0x4b5   : > { %6156 = vmatpush1.msra.mxu1 %v1543_v61  ;;  %6118 = vmatprep.subr.mxu0 %v1476_v11  ;;  %v1639_v56 = vld [vmem:[%s7620_s29 + $0x2bb0] sm:$0xff]  ;;  %v1636_v57 = vld [vmem:[%s7620_s29 + $0x2b98] sm:$0xff] }
 0x4b6   : > { %6157 = vmatprep.subr.mxu1 %v1540_v60  ;;  %6119 = vmatpush2.msra.mxu0 %v1475_v1  ;;  %v1700_v61 = vld [vmem:[%s7620_s29 + $0x2d98] sm:$0xff]  ;;  %v1635_v11 = vld [vmem:[%s7620_s29 + $0x2b90] sm:$0xff] }
 0x4b7   : > { %6158 = vmatpush1.msra.mxu1 %v1539_v2  ;;  %6120 = vmatprep.subr.mxu0 %v1472_v52  ;;  %v1699_v60 = vld [vmem:[%s7620_s29 + $0x2d90] sm:$0xff]  ;;  %v1632_v1 = vld [vmem:[%s7620_s29 + $0x2b78] sm:$0xff] }
 0x4b8   : > { %6159 = vmatprep.subr.mxu1 %v1536_v9  ;;  %6121 = vmatpush2.msra.mxu0 %v1471_v5  ;;  %v1696_v2 = vld [vmem:[%s7620_s29 + $0x2d78] sm:$0xff]  ;;  %v1631_v52 = vld [vmem:[%s7620_s29 + $0x2b70] sm:$0xff] }
 0x4b9   : > { %6160 = vmatpush1.msra.mxu1 %v1535_v44  ;;  %6122 = vmatprep.subr.mxu0 %v1468_v8  ;;  %v1695_v9 = vld [vmem:[%s7620_s29 + $0x2d70] sm:$0xff]  ;;  %v1628_v5 = vld [vmem:[%s7620_s29 + $0x2b58] sm:$0xff] }
 0x4ba   : > { %6161 = vmatprep.subr.mxu1 %v1532_v63  ;;  %6123 = vmatpush2.msra.mxu0 %v1467_v14  ;;  %v1692_v44 = vld [vmem:[%s7620_s29 + $0x2d58] sm:$0xff]  ;;  %v1627_v8 = vld [vmem:[%s7620_s29 + $0x2b50] sm:$0xff] }
 0x4bb   : > { %6162 = vmatpush1.msra.mxu1 %v1531_v26  ;;  %6124 = vmatprep.subr.mxu0 %v1464_v25  ;;  %v1691_v63 = vld [vmem:[%s7620_s29 + $0x2d50] sm:$0xff]  ;;  %v1624_v14 = vld [vmem:[%s7620_s29 + $0x2b38] sm:$0xff] }
 0x4bc   : > { %6163 = vmatprep.subr.mxu1 %v1528_v33  ;;  %6125 = vmatpush2.msra.mxu0 %v1463_v49  ;;  %v1688_v26 = vld [vmem:[%s7620_s29 + $0x2d38] sm:$0xff]  ;;  %v1623_v25 = vld [vmem:[%s7620_s29 + $0x2b30] sm:$0xff] }
 0x4bd   : > { %6164 = vmatpush1.msra.mxu1 %v1527_v40  ;;  %6126 = vmatprep.subr.mxu0 %v1460_v24  ;;  %v1687_v33 = vld [vmem:[%s7620_s29 + $0x2d30] sm:$0xff]  ;;  %v1620_v49 = vld [vmem:[%s7620_s29 + $0x2b18] sm:$0xff] }
 0x4be   : > { %6165 = vmatprep.subr.mxu1 %v1524_v15  ;;  %6127 = vmatpush2.msra.mxu0 %v1459_v39  ;;  %v1684_v40 = vld [vmem:[%s7620_s29 + $0x2d18] sm:$0xff]  ;;  %v1619_v24 = vld [vmem:[%s7620_s29 + $0x2b10] sm:$0xff] }
 0x4bf   : > { %6128 = vmatprep.mubr.f32.mxu0 %v8373_v16  ;;  %6166 = vmatpush1.msra.mxu1 %v1523_v12  ;;  %v1640_v16 = vld [vmem:[%s7620_s29 + $0x2bb8] sm:$0xff]  ;;  %v1683_v15 = vld [vmem:[%s7620_s29 + $0x2d10] sm:$0xff] }
 0x4c0   : > { %6129 = vmatmul.mubr.f32.vlgmr.msra.gmra.mxu0 %v8359_v4  ;;  %6167 = vmatprep.subr.mxu1 %v1648_v28  ;;  %v1703_v4 = vld [vmem:[%s7620_s29 + $0x2db0] sm:$0xff]  ;;  %v1616_v39 = vld [vmem:[%s7620_s29 + $0x2af8] sm:$0xff] }
 0x4c1   : > { %6206 = vmatprep.subr.mxu0 %v1712_v43  ;;  %6168 = vmatpush2.msra.mxu1 %v1647_v45  ;;  %v1680_v12 = vld [vmem:[%s7620_s29 + $0x2cf8] sm:$0xff]  ;;  %v1615_v28 = vld [vmem:[%s7620_s29 + $0x2af0] sm:$0xff] }
 0x4c2   : > { %6207 = vmatpush1.msra.mxu0 %v1711_v20  ;;  %6169 = vmatprep.subr.mxu1 %v1644_v29  ;;  %v1679_v43 = vld [vmem:[%s7620_s29 + $0x2cf0] sm:$0xff]  ;;  %v1612_v45 = vld [vmem:[%s7620_s29 + $0x2ad8] sm:$0xff] }
 0x4c3   : > { %6208 = vmatprep.subr.mxu0 %v1708_v50  ;;  %6170 = vmatpush2.msra.mxu1 %v1643_v54  ;;  %v1676_v20 = vld [vmem:[%s7620_s29 + $0x2cd8] sm:$0xff]  ;;  %v1611_v29 = vld [vmem:[%s7620_s29 + $0x2ad0] sm:$0xff] }
 0x4c4   : > { %6209 = vmatpush1.msra.mxu0 %v1707_v18  ;;  %6171 = vmatprep.subr.mxu1 %v1640_v16  ;;  %v1675_v50 = vld [vmem:[%s7620_s29 + $0x2cd0] sm:$0xff]  ;;  %v1608_v54 = vld [vmem:[%s7620_s29 + $0x2ab8] sm:$0xff] }
 0x4c5   : > { %6210 = vmatprep.subr.mxu0 %v1704_v10  ;;  %6172 = vmatpush2.msra.mxu1 %v1639_v56  ;;  %v1672_v18 = vld [vmem:[%s7620_s29 + $0x2cb8] sm:$0xff]  ;;  %v1607_v16 = vld [vmem:[%s7620_s29 + $0x2ab0] sm:$0xff] }
 0x4c6   : > { %6211 = vmatpush1.msra.mxu0 %v1703_v4  ;;  %6173 = vmatprep.subr.mxu1 %v1636_v57  ;;  %v1671_v10 = vld [vmem:[%s7620_s29 + $0x2cb0] sm:$0xff]  ;;  %v1604_v56 = vld [vmem:[%s7620_s29 + $0x2a98] sm:$0xff] }
 0x4c7   : > { %6212 = vmatprep.subr.mxu0 %v1700_v61  ;;  %6174 = vmatpush2.msra.mxu1 %v1635_v11  ;;  %v1668_v4 = vld [vmem:[%s7620_s29 + $0x2c98] sm:$0xff]  ;;  %v1603_v57 = vld [vmem:[%s7620_s29 + $0x2a90] sm:$0xff] }
 0x4c8   : > { %6213 = vmatpush1.msra.mxu0 %v1699_v60  ;;  %6175 = vmatprep.subr.mxu1 %v1632_v1  ;;  %v1667_v61 = vld [vmem:[%s7620_s29 + $0x2c90] sm:$0xff]  ;;  %v1600_v11 = vld [vmem:[%s7620_s29 + $0x2a78] sm:$0xff] }
 0x4c9   : > { %6214 = vmatprep.subr.mxu0 %v1696_v2  ;;  %6176 = vmatpush2.msra.mxu1 %v1631_v52  ;;  %v1664_v60 = vld [vmem:[%s7620_s29 + $0x2c78] sm:$0xff]  ;;  %v1599_v1 = vld [vmem:[%s7620_s29 + $0x2a70] sm:$0xff] }
 0x4ca   : > { %6215 = vmatpush1.msra.mxu0 %v1695_v9  ;;  %6177 = vmatprep.subr.mxu1 %v1628_v5  ;;  %v1663_v2 = vld [vmem:[%s7620_s29 + $0x2c70] sm:$0xff]  ;;  %v1596_v52 = vld [vmem:[%s7620_s29 + $0x2a58] sm:$0xff] }
 0x4cb   : > { %6216 = vmatprep.subr.mxu0 %v1692_v44  ;;  %6178 = vmatpush2.msra.mxu1 %v1627_v8  ;;  %v1660_v9 = vld [vmem:[%s7620_s29 + $0x2c58] sm:$0xff]  ;;  %v1595_v5 = vld [vmem:[%s7620_s29 + $0x2a50] sm:$0xff] }
 0x4cc   : > { %6217 = vmatpush1.msra.mxu0 %v1691_v63  ;;  %6179 = vmatprep.subr.mxu1 %v1624_v14  ;;  %v1659_v44 = vld [vmem:[%s7620_s29 + $0x2c50] sm:$0xff]  ;;  %v1592_v8 = vld [vmem:[%s7620_s29 + $0x2a38] sm:$0xff] }
 0x4cd   : > { %6218 = vmatprep.subr.mxu0 %v1688_v26  ;;  %6180 = vmatpush2.msra.mxu1 %v1623_v25  ;;  %v1656_v63 = vld [vmem:[%s7620_s29 + $0x2c38] sm:$0xff]  ;;  %v1591_v14 = vld [vmem:[%s7620_s29 + $0x2a30] sm:$0xff] }
 0x4ce   : > { %6219 = vmatpush1.msra.mxu0 %v1687_v33  ;;  %6181 = vmatprep.subr.mxu1 %v1620_v49  ;;  %v1655_v26 = vld [vmem:[%s7620_s29 + $0x2c30] sm:$0xff]  ;;  %v1588_v25 = vld [vmem:[%s7620_s29 + $0x2a18] sm:$0xff] }
 0x4cf   : > { %6220 = vmatprep.subr.mxu0 %v1684_v40  ;;  %6182 = vmatpush2.msra.mxu1 %v1619_v24  ;;  %v1652_v33 = vld [vmem:[%s7620_s29 + $0x2c18] sm:$0xff]  ;;  %v1587_v49 = vld [vmem:[%s7620_s29 + $0x2a10] sm:$0xff] }
 0x4d0   : > { %6221 = vmatpush1.msra.mxu0 %v1683_v15  ;;  %6183 = vmatprep.subr.mxu1 %v1616_v39  ;;  %v1651_v40 = vld [vmem:[%s7620_s29 + $0x2c10] sm:$0xff]  ;;  %v1776_v24 = vld [vmem:[%s7620_s29 + $0x2ff8] sm:$0xff] }
 0x4d1   : > { %6222 = vmatprep.subr.mxu0 %v1680_v12  ;;  %6184 = vmatpush2.msra.mxu1 %v1615_v28  ;;  %v1840_v15 = vld [vmem:[%s7620_s29 + $0x31f8] sm:$0xff]  ;;  %v1775_v39 = vld [vmem:[%s7620_s29 + $0x2ff0] sm:$0xff] }
 0x4d2   : > { %6223 = vmatpush1.msra.mxu0 %v1679_v43  ;;  %6185 = vmatprep.subr.mxu1 %v1612_v45  ;;  %v1839_v12 = vld [vmem:[%s7620_s29 + $0x31f0] sm:$0xff]  ;;  %v1772_v28 = vld [vmem:[%s7620_s29 + $0x2fd8] sm:$0xff] }
 0x4d3   : > { %6224 = vmatprep.subr.mxu0 %v1676_v20  ;;  %6186 = vmatpush2.msra.mxu1 %v1611_v29  ;;  %v1836_v43 = vld [vmem:[%s7620_s29 + $0x31d8] sm:$0xff]  ;;  %v1771_v45 = vld [vmem:[%s7620_s29 + $0x2fd0] sm:$0xff] }
 0x4d4   : > { %6225 = vmatpush1.msra.mxu0 %v1675_v50  ;;  %6187 = vmatprep.subr.mxu1 %v1608_v54  ;;  %v1835_v20 = vld [vmem:[%s7620_s29 + $0x31d0] sm:$0xff]  ;;  %v1832_v29 = vld [vmem:[%s7620_s29 + $0x31b8] sm:$0xff] }
 0x4d5   : > { %6226 = vmatprep.subr.mxu0 %v1672_v18  ;;  %6188 = vmatpush2.msra.mxu1 %v1607_v16  ;;  %v1767_v50 = vld [vmem:[%s7620_s29 + $0x2fb0] sm:$0xff]  ;;  %v1764_v54 = vld [vmem:[%s7620_s29 + $0x2f98] sm:$0xff] }
 0x4d6   : > { %6227 = vmatpush1.msra.mxu0 %v1671_v10  ;;  %6189 = vmatprep.subr.mxu1 %v1604_v56  ;;  %v1828_v18 = vld [vmem:[%s7620_s29 + $0x3198] sm:$0xff]  ;;  %v1763_v16 = vld [vmem:[%s7620_s29 + $0x2f90] sm:$0xff] }
 0x4d7   : > { %6228 = vmatprep.subr.mxu0 %v1668_v4  ;;  %6190 = vmatpush2.msra.mxu1 %v1603_v57  ;;  %v1827_v10 = vld [vmem:[%s7620_s29 + $0x3190] sm:$0xff]  ;;  %v1760_v56 = vld [vmem:[%s7620_s29 + $0x2f78] sm:$0xff] }
 0x4d8   : > { %6229 = vmatpush1.msra.mxu0 %v1667_v61  ;;  %6191 = vmatprep.subr.mxu1 %v1600_v11  ;;  %v1824_v4 = vld [vmem:[%s7620_s29 + $0x3178] sm:$0xff]  ;;  %v1759_v57 = vld [vmem:[%s7620_s29 + $0x2f70] sm:$0xff] }
 0x4d9   : > { %6230 = vmatprep.subr.mxu0 %v1664_v60  ;;  %6192 = vmatpush2.msra.mxu1 %v1599_v1  ;;  %v1823_v61 = vld [vmem:[%s7620_s29 + $0x3170] sm:$0xff]  ;;  %v1756_v11 = vld [vmem:[%s7620_s29 + $0x2f58] sm:$0xff] }
 0x4da   : > { %6231 = vmatpush1.msra.mxu0 %v1663_v2  ;;  %6193 = vmatprep.subr.mxu1 %v1596_v52  ;;  %v1820_v60 = vld [vmem:[%s7620_s29 + $0x3158] sm:$0xff]  ;;  %v1755_v1 = vld [vmem:[%s7620_s29 + $0x2f50] sm:$0xff] }
 0x4db   : > { %6232 = vmatprep.subr.mxu0 %v1660_v9  ;;  %6194 = vmatpush2.msra.mxu1 %v1595_v5  ;;  %v1819_v2 = vld [vmem:[%s7620_s29 + $0x3150] sm:$0xff]  ;;  %v1752_v52 = vld [vmem:[%s7620_s29 + $0x2f38] sm:$0xff] }
 0x4dc   : > { %6233 = vmatpush1.msra.mxu0 %v1659_v44  ;;  %6195 = vmatprep.subr.mxu1 %v1592_v8  ;;  %v1816_v9 = vld [vmem:[%s7620_s29 + $0x3138] sm:$0xff]  ;;  %v1751_v5 = vld [vmem:[%s7620_s29 + $0x2f30] sm:$0xff] }
 0x4dd   : > { %6234 = vmatprep.subr.mxu0 %v1656_v63  ;;  %6196 = vmatpush2.msra.mxu1 %v1591_v14  ;;  %v1815_v44 = vld [vmem:[%s7620_s29 + $0x3130] sm:$0xff]  ;;  %v1748_v8 = vld [vmem:[%s7620_s29 + $0x2f18] sm:$0xff] }
 0x4de   : > { %6235 = vmatpush1.msra.mxu0 %v1655_v26  ;;  %6197 = vmatprep.subr.mxu1 %v1588_v25  ;;  %v1812_v63 = vld [vmem:[%s7620_s29 + $0x3118] sm:$0xff]  ;;  %v1747_v14 = vld [vmem:[%s7620_s29 + $0x2f10] sm:$0xff] }
 0x4df   : > { %6236 = vmatprep.subr.mxu0 %v1652_v33  ;;  %6198 = vmatpush2.msra.mxu1 %v1587_v49  ;;  %v1811_v26 = vld [vmem:[%s7620_s29 + $0x3110] sm:$0xff]  ;;  %v1744_v25 = vld [vmem:[%s7620_s29 + $0x2ef8] sm:$0xff] }
 0x4e0   : > { %6199 = vmatprep.mubr.f32.mxu1 %v8514_v19  ;;  %6237 = vmatpush1.msra.mxu0 %v1651_v40  ;;  %v1768_v19 = vld [vmem:[%s7620_s29 + $0x2fb8] sm:$0xff]  ;;  %v1743_v49 = vld [vmem:[%s7620_s29 + $0x2ef0] sm:$0xff] }
 0x4e1   : > { %6200 = vmatmul.mubr.f32.vlgmr.msra.gmra.mxu1 %v8499_v0  ;;  %6238 = vmatprep.subr.mxu0 %v1776_v24  ;;  %v1831_v0 = vld [vmem:[%s7620_s29 + $0x31b0] sm:$0xff]  ;;  %v1808_v33 = vld [vmem:[%s7620_s29 + $0x30f8] sm:$0xff] }
 0x4e2   : > { %6277 = vmatprep.subr.mxu1 %v1840_v15  ;;  %6239 = vmatpush2.msra.mxu0 %v1775_v39  ;;  %v1807_v40 = vld [vmem:[%s7620_s29 + $0x30f0] sm:$0xff]  ;;  %v1740_v24 = vld [vmem:[%s7620_s29 + $0x2ed8] sm:$0xff] }
 0x4e3   : > { %6278 = vmatpush1.msra.mxu1 %v1839_v12  ;;  %6240 = vmatprep.subr.mxu0 %v1772_v28  ;;  %v1804_v15 = vld [vmem:[%s7620_s29 + $0x30d8] sm:$0xff]  ;;  %v1739_v39 = vld [vmem:[%s7620_s29 + $0x2ed0] sm:$0xff] }
 0x4e4   : > { %6279 = vmatprep.subr.mxu1 %v1836_v43  ;;  %6241 = vmatpush2.msra.mxu0 %v1771_v45  ;;  %v1803_v12 = vld [vmem:[%s7620_s29 + $0x30d0] sm:$0xff]  ;;  %v1736_v28 = vld [vmem:[%s7620_s29 + $0x2eb8] sm:$0xff] }
 0x4e5   : > { %6280 = vmatpush1.msra.mxu1 %v1835_v20  ;;  %6242 = vmatprep.subr.mxu0 %v1768_v19  ;;  %v1800_v43 = vld [vmem:[%s7620_s29 + $0x30b8] sm:$0xff]  ;;  %v1735_v45 = vld [vmem:[%s7620_s29 + $0x2eb0] sm:$0xff] }
 0x4e6   : > { %6281 = vmatprep.subr.mxu1 %v1832_v29  ;;  %6243 = vmatpush2.msra.mxu0 %v1767_v50  ;;  %v1799_v20 = vld [vmem:[%s7620_s29 + $0x30b0] sm:$0xff]  ;;  %v1732_v19 = vld [vmem:[%s7620_s29 + $0x2e98] sm:$0xff] }
 0x4e7   : > { %6282 = vmatpush1.msra.mxu1 %v1831_v0  ;;  %6244 = vmatprep.subr.mxu0 %v1764_v54  ;;  %v1796_v29 = vld [vmem:[%s7620_s29 + $0x3098] sm:$0xff]  ;;  %v1731_v50 = vld [vmem:[%s7620_s29 + $0x2e90] sm:$0xff] }
 0x4e8   : > { %6283 = vmatprep.subr.mxu1 %v1828_v18  ;;  %6245 = vmatpush2.msra.mxu0 %v1763_v16  ;;  %v1795_v0 = vld [vmem:[%s7620_s29 + $0x3090] sm:$0xff]  ;;  %v1728_v54 = vld [vmem:[%s7620_s29 + $0x2e78] sm:$0xff] }
 0x4e9   : > { %6284 = vmatpush1.msra.mxu1 %v1827_v10  ;;  %6246 = vmatprep.subr.mxu0 %v1760_v56  ;;  %v1792_v18 = vld [vmem:[%s7620_s29 + $0x3078] sm:$0xff]  ;;  %v1727_v16 = vld [vmem:[%s7620_s29 + $0x2e70] sm:$0xff] }
 0x4ea   : > { %6285 = vmatprep.subr.mxu1 %v1824_v4  ;;  %6247 = vmatpush2.msra.mxu0 %v1759_v57  ;;  %v1791_v10 = vld [vmem:[%s7620_s29 + $0x3070] sm:$0xff]  ;;  %v1724_v56 = vld [vmem:[%s7620_s29 + $0x2e58] sm:$0xff] }
 0x4eb   : > { %6286 = vmatpush1.msra.mxu1 %v1823_v61  ;;  %6248 = vmatprep.subr.mxu0 %v1756_v11  ;;  %v1788_v4 = vld [vmem:[%s7620_s29 + $0x3058] sm:$0xff]  ;;  %v1723_v57 = vld [vmem:[%s7620_s29 + $0x2e50] sm:$0xff] }
 0x4ec   : > { %6287 = vmatprep.subr.mxu1 %v1820_v60  ;;  %6249 = vmatpush2.msra.mxu0 %v1755_v1  ;;  %v1787_v61 = vld [vmem:[%s7620_s29 + $0x3050] sm:$0xff]  ;;  %v1720_v11 = vld [vmem:[%s7620_s29 + $0x2e38] sm:$0xff] }
 0x4ed   : > { %6288 = vmatpush1.msra.mxu1 %v1819_v2  ;;  %6250 = vmatprep.subr.mxu0 %v1752_v52  ;;  %v1784_v60 = vld [vmem:[%s7620_s29 + $0x3038] sm:$0xff]  ;;  %v1719_v1 = vld [vmem:[%s7620_s29 + $0x2e30] sm:$0xff] }
 0x4ee   : > { %6289 = vmatprep.subr.mxu1 %v1816_v9  ;;  %6251 = vmatpush2.msra.mxu0 %v1751_v5  ;;  %v1783_v2 = vld [vmem:[%s7620_s29 + $0x3030] sm:$0xff]  ;;  %v1716_v52 = vld [vmem:[%s7620_s29 + $0x2e18] sm:$0xff] }
 0x4ef   : > { %6290 = vmatpush1.msra.mxu1 %v1815_v44  ;;  %6252 = vmatprep.subr.mxu0 %v1748_v8  ;;  %v1780_v9 = vld [vmem:[%s7620_s29 + $0x3018] sm:$0xff]  ;;  %v1715_v5 = vld [vmem:[%s7620_s29 + $0x2e10] sm:$0xff] }
 0x4f0   : > { %6291 = vmatprep.subr.mxu1 %v1812_v63  ;;  %6253 = vmatpush2.msra.mxu0 %v1747_v14  ;;  %v1779_v44 = vld [vmem:[%s7620_s29 + $0x3010] sm:$0xff]  ;;  %v1904_v8 = vld [vmem:[%s7620_s29 + $0x33f8] sm:$0xff] }
 0x4f1   : > { %6292 = vmatpush1.msra.mxu1 %v1811_v26  ;;  %6254 = vmatprep.subr.mxu0 %v1744_v25  ;;  %v1968_v63 = vld [vmem:[%s7620_s29 + $0x35f8] sm:$0xff]  ;;  %v1903_v14 = vld [vmem:[%s7620_s29 + $0x33f0] sm:$0xff] }
 0x4f2   : > { %6293 = vmatprep.subr.mxu1 %v1808_v33  ;;  %6255 = vmatpush2.msra.mxu0 %v1743_v49  ;;  %v1967_v26 = vld [vmem:[%s7620_s29 + $0x35f0] sm:$0xff]  ;;  %v1900_v25 = vld [vmem:[%s7620_s29 + $0x33d8] sm:$0xff] }
 0x4f3   : > { %6294 = vmatpush1.msra.mxu1 %v1807_v40  ;;  %6256 = vmatprep.subr.mxu0 %v1740_v24  ;;  %v1964_v33 = vld [vmem:[%s7620_s29 + $0x35d8] sm:$0xff]  ;;  %v1899_v49 = vld [vmem:[%s7620_s29 + $0x33d0] sm:$0xff] }
 0x4f4   : > { %6295 = vmatprep.subr.mxu1 %v1804_v15  ;;  %6257 = vmatpush2.msra.mxu0 %v1739_v39  ;;  %v1963_v40 = vld [vmem:[%s7620_s29 + $0x35d0] sm:$0xff]  ;;  %v1960_v24 = vld [vmem:[%s7620_s29 + $0x35b8] sm:$0xff] }
 0x4f5   : > { %6296 = vmatpush1.msra.mxu1 %v1803_v12  ;;  %6258 = vmatprep.subr.mxu0 %v1736_v28  ;;  %v1895_v15 = vld [vmem:[%s7620_s29 + $0x33b0] sm:$0xff]  ;;  %v1892_v39 = vld [vmem:[%s7620_s29 + $0x3398] sm:$0xff] }
 0x4f6   : > { %6297 = vmatprep.subr.mxu1 %v1800_v43  ;;  %6259 = vmatpush2.msra.mxu0 %v1735_v45  ;;  %v1956_v12 = vld [vmem:[%s7620_s29 + $0x3598] sm:$0xff]  ;;  %v1891_v28 = vld [vmem:[%s7620_s29 + $0x3390] sm:$0xff] }
 0x4f7   : > { %6298 = vmatpush1.msra.mxu1 %v1799_v20  ;;  %6260 = vmatprep.subr.mxu0 %v1732_v19  ;;  %v1955_v43 = vld [vmem:[%s7620_s29 + $0x3590] sm:$0xff]  ;;  %v1888_v45 = vld [vmem:[%s7620_s29 + $0x3378] sm:$0xff] }
 0x4f8   : > { %6299 = vmatprep.subr.mxu1 %v1796_v29  ;;  %6261 = vmatpush2.msra.mxu0 %v1731_v50  ;;  %v1952_v20 = vld [vmem:[%s7620_s29 + $0x3578] sm:$0xff]  ;;  %v1887_v19 = vld [vmem:[%s7620_s29 + $0x3370] sm:$0xff] }
 0x4f9   : > { %6300 = vmatpush1.msra.mxu1 %v1795_v0  ;;  %6262 = vmatprep.subr.mxu0 %v1728_v54  ;;  %v1951_v29 = vld [vmem:[%s7620_s29 + $0x3570] sm:$0xff]  ;;  %v1884_v50 = vld [vmem:[%s7620_s29 + $0x3358] sm:$0xff] }
 0x4fa   : > { %6301 = vmatprep.subr.mxu1 %v1792_v18  ;;  %6263 = vmatpush2.msra.mxu0 %v1727_v16  ;;  %v1948_v0 = vld [vmem:[%s7620_s29 + $0x3558] sm:$0xff]  ;;  %v1883_v54 = vld [vmem:[%s7620_s29 + $0x3350] sm:$0xff] }
 0x4fb   : > { %6302 = vmatpush1.msra.mxu1 %v1791_v10  ;;  %6264 = vmatprep.subr.mxu0 %v1724_v56  ;;  %v1947_v18 = vld [vmem:[%s7620_s29 + $0x3550] sm:$0xff]  ;;  %v1880_v16 = vld [vmem:[%s7620_s29 + $0x3338] sm:$0xff] }
 0x4fc   : > { %6303 = vmatprep.subr.mxu1 %v1788_v4  ;;  %6265 = vmatpush2.msra.mxu0 %v1723_v57  ;;  %v1944_v10 = vld [vmem:[%s7620_s29 + $0x3538] sm:$0xff]  ;;  %v1879_v56 = vld [vmem:[%s7620_s29 + $0x3330] sm:$0xff] }
 0x4fd   : > { %6304 = vmatpush1.msra.mxu1 %v1787_v61  ;;  %6266 = vmatprep.subr.mxu0 %v1720_v11  ;;  %v1943_v4 = vld [vmem:[%s7620_s29 + $0x3530] sm:$0xff]  ;;  %v1876_v57 = vld [vmem:[%s7620_s29 + $0x3318] sm:$0xff] }
 0x4fe   : > { %6305 = vmatprep.subr.mxu1 %v1784_v60  ;;  %6267 = vmatpush2.msra.mxu0 %v1719_v1  ;;  %v1940_v61 = vld [vmem:[%s7620_s29 + $0x3518] sm:$0xff]  ;;  %v1875_v11 = vld [vmem:[%s7620_s29 + $0x3310] sm:$0xff] }
 0x4ff   : > { %6306 = vmatpush1.msra.mxu1 %v1783_v2  ;;  %6268 = vmatprep.subr.mxu0 %v1716_v52  ;;  %v1939_v60 = vld [vmem:[%s7620_s29 + $0x3510] sm:$0xff]  ;;  %v1872_v1 = vld [vmem:[%s7620_s29 + $0x32f8] sm:$0xff] }
 0x500   : > { %6307 = vmatprep.subr.mxu1 %v1780_v9  ;;  %6269 = vmatpush2.msra.mxu0 %v1715_v5  ;;  %v1936_v2 = vld [vmem:[%s7620_s29 + $0x34f8] sm:$0xff]  ;;  %v1871_v52 = vld [vmem:[%s7620_s29 + $0x32f0] sm:$0xff] }
 0x501   : > { %6270 = vmatprep.mubr.f32.mxu0 %v8520_v23  ;;  %6308 = vmatpush1.msra.mxu1 %v1779_v44  ;;  %v1896_v23 = vld [vmem:[%s7620_s29 + $0x33b8] sm:$0xff]  ;;  %v1935_v9 = vld [vmem:[%s7620_s29 + $0x34f0] sm:$0xff] }
 0x502   : > { %6271 = vmatmul.mubr.f32.vlgmr.msra.gmra.mxu0 %v8506_v7  ;;  %6309 = vmatprep.subr.mxu1 %v1904_v8  ;;  %v1959_v7 = vld [vmem:[%s7620_s29 + $0x35b0] sm:$0xff]  ;;  %v1868_v5 = vld [vmem:[%s7620_s29 + $0x32d8] sm:$0xff] }
 0x503   : > { %6348 = vmatprep.subr.mxu0 %v1968_v63  ;;  %6310 = vmatpush2.msra.mxu1 %v1903_v14  ;;  %v1932_v44 = vld [vmem:[%s7620_s29 + $0x34d8] sm:$0xff]  ;;  %v1867_v8 = vld [vmem:[%s7620_s29 + $0x32d0] sm:$0xff] }
 0x504   : > { %6349 = vmatpush1.msra.mxu0 %v1967_v26  ;;  %6311 = vmatprep.subr.mxu1 %v1900_v25  ;;  %v1931_v63 = vld [vmem:[%s7620_s29 + $0x34d0] sm:$0xff]  ;;  %v1864_v14 = vld [vmem:[%s7620_s29 + $0x32b8] sm:$0xff] }
 0x505   : > { %6350 = vmatprep.subr.mxu0 %v1964_v33  ;;  %6312 = vmatpush2.msra.mxu1 %v1899_v49  ;;  %v1928_v26 = vld [vmem:[%s7620_s29 + $0x34b8] sm:$0xff]  ;;  %v1863_v25 = vld [vmem:[%s7620_s29 + $0x32b0] sm:$0xff] }
 0x506   : > { %6351 = vmatpush1.msra.mxu0 %v1963_v40  ;;  %6313 = vmatprep.subr.mxu1 %v1896_v23  ;;  %v1927_v33 = vld [vmem:[%s7620_s29 + $0x34b0] sm:$0xff]  ;;  %v1860_v49 = vld [vmem:[%s7620_s29 + $0x3298] sm:$0xff] }
 0x507   : > { %6352 = vmatprep.subr.mxu0 %v1960_v24  ;;  %6314 = vmatpush2.msra.mxu1 %v1895_v15  ;;  %v1924_v40 = vld [vmem:[%s7620_s29 + $0x3498] sm:$0xff]  ;;  %v1859_v23 = vld [vmem:[%s7620_s29 + $0x3290] sm:$0xff] }
 0x508   : > { %6353 = vmatpush1.msra.mxu0 %v1959_v7  ;;  %6315 = vmatprep.subr.mxu1 %v1892_v39  ;;  %v1923_v24 = vld [vmem:[%s7620_s29 + $0x3490] sm:$0xff]  ;;  %v1856_v15 = vld [vmem:[%s7620_s29 + $0x3278] sm:$0xff] }
 0x509   : > { %6354 = vmatprep.subr.mxu0 %v1956_v12  ;;  %6316 = vmatpush2.msra.mxu1 %v1891_v28  ;;  %v1920_v7 = vld [vmem:[%s7620_s29 + $0x3478] sm:$0xff]  ;;  %v1855_v39 = vld [vmem:[%s7620_s29 + $0x3270] sm:$0xff] }
 0x50a   : > { %6355 = vmatpush1.msra.mxu0 %v1955_v43  ;;  %6317 = vmatprep.subr.mxu1 %v1888_v45  ;;  %v1919_v12 = vld [vmem:[%s7620_s29 + $0x3470] sm:$0xff]  ;;  %v1852_v28 = vld [vmem:[%s7620_s29 + $0x3258] sm:$0xff] }
 0x50b   : > { %6356 = vmatprep.subr.mxu0 %v1952_v20  ;;  %6318 = vmatpush2.msra.mxu1 %v1887_v19  ;;  %v1916_v43 = vld [vmem:[%s7620_s29 + $0x3458] sm:$0xff]  ;;  %v1851_v45 = vld [vmem:[%s7620_s29 + $0x3250] sm:$0xff] }
 0x50c   : > { %6357 = vmatpush1.msra.mxu0 %v1951_v29  ;;  %6319 = vmatprep.subr.mxu1 %v1884_v50  ;;  %v1915_v20 = vld [vmem:[%s7620_s29 + $0x3450] sm:$0xff]  ;;  %v1848_v19 = vld [vmem:[%s7620_s29 + $0x3238] sm:$0xff] }
 0x50d   : > { %6358 = vmatprep.subr.mxu0 %v1948_v0  ;;  %6320 = vmatpush2.msra.mxu1 %v1883_v54  ;;  %v1912_v29 = vld [vmem:[%s7620_s29 + $0x3438] sm:$0xff]  ;;  %v1847_v50 = vld [vmem:[%s7620_s29 + $0x3230] sm:$0xff] }
 0x50e   : > { %6359 = vmatpush1.msra.mxu0 %v1947_v18  ;;  %6321 = vmatprep.subr.mxu1 %v1880_v16  ;;  %v1911_v0 = vld [vmem:[%s7620_s29 + $0x3430] sm:$0xff]  ;;  %v1844_v54 = vld [vmem:[%s7620_s29 + $0x3218] sm:$0xff] }
 0x50f   : > { %6360 = vmatprep.subr.mxu0 %v1944_v10  ;;  %6322 = vmatpush2.msra.mxu1 %v1879_v56  ;;  %v1908_v18 = vld [vmem:[%s7620_s29 + $0x3418] sm:$0xff]  ;;  %v1843_v16 = vld [vmem:[%s7620_s29 + $0x3210] sm:$0xff] }
 0x510   : > { %6361 = vmatpush1.msra.mxu0 %v1943_v4  ;;  %6323 = vmatprep.subr.mxu1 %v1876_v57  ;;  %v1907_v10 = vld [vmem:[%s7620_s29 + $0x3410] sm:$0xff]  ;;  %v2032_v56 = vld [vmem:[%s7620_s29 + $0x37f8] sm:$0xff] }
 0x511   : > { %6362 = vmatprep.subr.mxu0 %v1940_v61  ;;  %6324 = vmatpush2.msra.mxu1 %v1875_v11  ;;  %v2096_v4 = vld [vmem:[%s7620_s29 + $0x39f8] sm:$0xff]  ;;  %v2031_v57 = vld [vmem:[%s7620_s29 + $0x37f0] sm:$0xff] }
 0x512   : > { %6363 = vmatpush1.msra.mxu0 %v1939_v60  ;;  %6325 = vmatprep.subr.mxu1 %v1872_v1  ;;  %v2095_v61 = vld [vmem:[%s7620_s29 + $0x39f0] sm:$0xff]  ;;  %v2028_v11 = vld [vmem:[%s7620_s29 + $0x37d8] sm:$0xff] }
 0x513   : > { %6364 = vmatprep.subr.mxu0 %v1936_v2  ;;  %6326 = vmatpush2.msra.mxu1 %v1871_v52  ;;  %v2092_v60 = vld [vmem:[%s7620_s29 + $0x39d8] sm:$0xff]  ;;  %v2027_v1 = vld [vmem:[%s7620_s29 + $0x37d0] sm:$0xff] }
 0x514   : > { %6365 = vmatpush1.msra.mxu0 %v1935_v9  ;;  %6327 = vmatprep.subr.mxu1 %v1868_v5  ;;  %v2091_v2 = vld [vmem:[%s7620_s29 + $0x39d0] sm:$0xff]  ;;  %v2088_v52 = vld [vmem:[%s7620_s29 + $0x39b8] sm:$0xff] }
 0x515   : > { %6366 = vmatprep.subr.mxu0 %v1932_v44  ;;  %6328 = vmatpush2.msra.mxu1 %v1867_v8  ;;  %v2023_v9 = vld [vmem:[%s7620_s29 + $0x37b0] sm:$0xff]  ;;  %v2020_v5 = vld [vmem:[%s7620_s29 + $0x3798] sm:$0xff] }
 0x516   : > { %6367 = vmatpush1.msra.mxu0 %v1931_v63  ;;  %6329 = vmatprep.subr.mxu1 %v1864_v14  ;;  %v2084_v44 = vld [vmem:[%s7620_s29 + $0x3998] sm:$0xff]  ;;  %v2019_v8 = vld [vmem:[%s7620_s29 + $0x3790] sm:$0xff] }
 0x517   : > { %6368 = vmatprep.subr.mxu0 %v1928_v26  ;;  %6330 = vmatpush2.msra.mxu1 %v1863_v25  ;;  %v2083_v63 = vld [vmem:[%s7620_s29 + $0x3990] sm:$0xff]  ;;  %v2016_v14 = vld [vmem:[%s7620_s29 + $0x3778] sm:$0xff] }
 0x518   : > { %6369 = vmatpush1.msra.mxu0 %v1927_v33  ;;  %6331 = vmatprep.subr.mxu1 %v1860_v49  ;;  %v2080_v26 = vld [vmem:[%s7620_s29 + $0x3978] sm:$0xff]  ;;  %v2015_v25 = vld [vmem:[%s7620_s29 + $0x3770] sm:$0xff] }
 0x519   : > { %6370 = vmatprep.subr.mxu0 %v1924_v40  ;;  %6332 = vmatpush2.msra.mxu1 %v1859_v23  ;;  %v2079_v33 = vld [vmem:[%s7620_s29 + $0x3970] sm:$0xff]  ;;  %v2012_v49 = vld [vmem:[%s7620_s29 + $0x3758] sm:$0xff] }
 0x51a   : > { %6371 = vmatpush1.msra.mxu0 %v1923_v24  ;;  %6333 = vmatprep.subr.mxu1 %v1856_v15  ;;  %v2076_v40 = vld [vmem:[%s7620_s29 + $0x3958] sm:$0xff]  ;;  %v2011_v23 = vld [vmem:[%s7620_s29 + $0x3750] sm:$0xff] }
 0x51b   : > { %6372 = vmatprep.subr.mxu0 %v1920_v7  ;;  %6334 = vmatpush2.msra.mxu1 %v1855_v39  ;;  %v2075_v24 = vld [vmem:[%s7620_s29 + $0x3950] sm:$0xff]  ;;  %v2008_v15 = vld [vmem:[%s7620_s29 + $0x3738] sm:$0xff] }
 0x51c   : > { %6373 = vmatpush1.msra.mxu0 %v1919_v12  ;;  %6335 = vmatprep.subr.mxu1 %v1852_v28  ;;  %v2072_v7 = vld [vmem:[%s7620_s29 + $0x3938] sm:$0xff]  ;;  %v2007_v39 = vld [vmem:[%s7620_s29 + $0x3730] sm:$0xff] }
 0x51d   : > { %6374 = vmatprep.subr.mxu0 %v1916_v43  ;;  %6336 = vmatpush2.msra.mxu1 %v1851_v45  ;;  %v2071_v12 = vld [vmem:[%s7620_s29 + $0x3930] sm:$0xff]  ;;  %v2004_v28 = vld [vmem:[%s7620_s29 + $0x3718] sm:$0xff] }
 0x51e   : > { %6375 = vmatpush1.msra.mxu0 %v1915_v20  ;;  %6337 = vmatprep.subr.mxu1 %v1848_v19  ;;  %v2068_v43 = vld [vmem:[%s7620_s29 + $0x3918] sm:$0xff]  ;;  %v2003_v45 = vld [vmem:[%s7620_s29 + $0x3710] sm:$0xff] }
 0x51f   : > { %6376 = vmatprep.subr.mxu0 %v1912_v29  ;;  %6338 = vmatpush2.msra.mxu1 %v1847_v50  ;;  %v2067_v20 = vld [vmem:[%s7620_s29 + $0x3910] sm:$0xff]  ;;  %v2000_v19 = vld [vmem:[%s7620_s29 + $0x36f8] sm:$0xff] }
 0x520   : > { %6377 = vmatpush1.msra.mxu0 %v1911_v0  ;;  %6339 = vmatprep.subr.mxu1 %v1844_v54  ;;  %v2064_v29 = vld [vmem:[%s7620_s29 + $0x38f8] sm:$0xff]  ;;  %v1999_v50 = vld [vmem:[%s7620_s29 + $0x36f0] sm:$0xff] }
 0x521   : > { %6378 = vmatprep.subr.mxu0 %v1908_v18  ;;  %6340 = vmatpush2.msra.mxu1 %v1843_v16  ;;  %v2063_v0 = vld [vmem:[%s7620_s29 + $0x38f0] sm:$0xff]  ;;  %v1996_v54 = vld [vmem:[%s7620_s29 + $0x36d8] sm:$0xff] }
 0x522   : > { %6341 = vmatprep.mubr.f32.mxu1 %v8661_v42  ;;  %6379 = vmatpush1.msra.mxu0 %v1907_v10  ;;  %v2024_v42 = vld [vmem:[%s7620_s29 + $0x37b8] sm:$0xff]  ;;  %v1995_v16 = vld [vmem:[%s7620_s29 + $0x36d0] sm:$0xff] }
 0x523   : > { %6342 = vmatmul.mubr.f32.vlgmr.msra.gmra.mxu1 %v8646_v31  ;;  %6380 = vmatprep.subr.mxu0 %v2032_v56  ;;  %v2087_v31 = vld [vmem:[%s7620_s29 + $0x39b0] sm:$0xff]  ;;  %v2060_v18 = vld [vmem:[%s7620_s29 + $0x38d8] sm:$0xff] }
 0x524   : > { %6419 = vmatprep.subr.mxu1 %v2096_v4  ;;  %6381 = vmatpush2.msra.mxu0 %v2031_v57  ;;  %v2059_v10 = vld [vmem:[%s7620_s29 + $0x38d0] sm:$0xff]  ;;  %v1992_v56 = vld [vmem:[%s7620_s29 + $0x36b8] sm:$0xff] }
 0x525   : > { %6420 = vmatpush1.msra.mxu1 %v2095_v61  ;;  %6382 = vmatprep.subr.mxu0 %v2028_v11  ;;  %v2056_v4 = vld [vmem:[%s7620_s29 + $0x38b8] sm:$0xff]  ;;  %v1991_v57 = vld [vmem:[%s7620_s29 + $0x36b0] sm:$0xff] }
 0x526   : > { %6421 = vmatprep.subr.mxu1 %v2092_v60  ;;  %6383 = vmatpush2.msra.mxu0 %v2027_v1  ;;  %v2055_v61 = vld [vmem:[%s7620_s29 + $0x38b0] sm:$0xff]  ;;  %v1988_v11 = vld [vmem:[%s7620_s29 + $0x3698] sm:$0xff] }
 0x527   : > { %6422 = vmatpush1.msra.mxu1 %v2091_v2  ;;  %6384 = vmatprep.subr.mxu0 %v2024_v42  ;;  %v2052_v60 = vld [vmem:[%s7620_s29 + $0x3898] sm:$0xff]  ;;  %v1987_v1 = vld [vmem:[%s7620_s29 + $0x3690] sm:$0xff] }
 0x528   : > { %6423 = vmatprep.subr.mxu1 %v2088_v52  ;;  %6385 = vmatpush2.msra.mxu0 %v2023_v9  ;;  %v2051_v2 = vld [vmem:[%s7620_s29 + $0x3890] sm:$0xff]  ;;  %v1984_v42 = vld [vmem:[%s7620_s29 + $0x3678] sm:$0xff] }
 0x529   : > { %6424 = vmatpush1.msra.mxu1 %v2087_v31  ;;  %6386 = vmatprep.subr.mxu0 %v2020_v5  ;;  %v2048_v52 = vld [vmem:[%s7620_s29 + $0x3878] sm:$0xff]  ;;  %v1983_v9 = vld [vmem:[%s7620_s29 + $0x3670] sm:$0xff] }
 0x52a   : > { %6425 = vmatprep.subr.mxu1 %v2084_v44  ;;  %6387 = vmatpush2.msra.mxu0 %v2019_v8  ;;  %v2047_v31 = vld [vmem:[%s7620_s29 + $0x3870] sm:$0xff]  ;;  %v1980_v5 = vld [vmem:[%s7620_s29 + $0x3658] sm:$0xff] }
 0x52b   : > { %6426 = vmatpush1.msra.mxu1 %v2083_v63  ;;  %6388 = vmatprep.subr.mxu0 %v2016_v14  ;;  %v2044_v44 = vld [vmem:[%s7620_s29 + $0x3858] sm:$0xff]  ;;  %v1979_v8 = vld [vmem:[%s7620_s29 + $0x3650] sm:$0xff] }
 0x52c   : > { %6427 = vmatprep.subr.mxu1 %v2080_v26  ;;  %6389 = vmatpush2.msra.mxu0 %v2015_v25  ;;  %v2043_v63 = vld [vmem:[%s7620_s29 + $0x3850] sm:$0xff]  ;;  %v1976_v14 = vld [vmem:[%s7620_s29 + $0x3638] sm:$0xff] }
 0x52d   : > { %6428 = vmatpush1.msra.mxu1 %v2079_v33  ;;  %6390 = vmatprep.subr.mxu0 %v2012_v49  ;;  %v2040_v26 = vld [vmem:[%s7620_s29 + $0x3838] sm:$0xff]  ;;  %v1975_v25 = vld [vmem:[%s7620_s29 + $0x3630] sm:$0xff] }
 0x52e   : > { %6429 = vmatprep.subr.mxu1 %v2076_v40  ;;  %6391 = vmatpush2.msra.mxu0 %v2011_v23  ;;  %v2039_v33 = vld [vmem:[%s7620_s29 + $0x3830] sm:$0xff]  ;;  %v1972_v49 = vld [vmem:[%s7620_s29 + $0x3618] sm:$0xff] }
 0x52f   : > { %6430 = vmatpush1.msra.mxu1 %v2075_v24  ;;  %6392 = vmatprep.subr.mxu0 %v2008_v15  ;;  %v2036_v40 = vld [vmem:[%s7620_s29 + $0x3818] sm:$0xff]  ;;  %v1971_v23 = vld [vmem:[%s7620_s29 + $0x3610] sm:$0xff] }
 0x530   : > { %6431 = vmatprep.subr.mxu1 %v2072_v7  ;;  %6393 = vmatpush2.msra.mxu0 %v2007_v39  ;;  %v2035_v24 = vld [vmem:[%s7620_s29 + $0x3810] sm:$0xff]  ;;  %v2160_v15 = vld [vmem:[%s7620_s29 + $0x3bf8] sm:$0xff] }
 0x531   : > { %6432 = vmatpush1.msra.mxu1 %v2071_v12  ;;  %6394 = vmatprep.subr.mxu0 %v2004_v28  ;;  %v2224_v7 = vld [vmem:[%s7620_s29 + $0x3df8] sm:$0xff]  ;;  %v2159_v39 = vld [vmem:[%s7620_s29 + $0x3bf0] sm:$0xff] }
 0x532   : > { %6433 = vmatprep.subr.mxu1 %v2068_v43  ;;  %6395 = vmatpush2.msra.mxu0 %v2003_v45  ;;  %v2223_v12 = vld [vmem:[%s7620_s29 + $0x3df0] sm:$0xff]  ;;  %v2156_v28 = vld [vmem:[%s7620_s29 + $0x3bd8] sm:$0xff] }
 0x533   : > { %6434 = vmatpush1.msra.mxu1 %v2067_v20  ;;  %6396 = vmatprep.subr.mxu0 %v2000_v19  ;;  %v2220_v43 = vld [vmem:[%s7620_s29 + $0x3dd8] sm:$0xff]  ;;  %v2155_v45 = vld [vmem:[%s7620_s29 + $0x3bd0] sm:$0xff] }
 0x534   : > { %6435 = vmatprep.subr.mxu1 %v2064_v29  ;;  %6397 = vmatpush2.msra.mxu0 %v1999_v50  ;;  %v2219_v20 = vld [vmem:[%s7620_s29 + $0x3dd0] sm:$0xff]  ;;  %v2216_v19 = vld [vmem:[%s7620_s29 + $0x3db8] sm:$0xff] }
 0x535   : > { %6436 = vmatpush1.msra.mxu1 %v2063_v0  ;;  %6398 = vmatprep.subr.mxu0 %v1996_v54  ;;  %v2151_v29 = vld [vmem:[%s7620_s29 + $0x3bb0] sm:$0xff]  ;;  %v2148_v50 = vld [vmem:[%s7620_s29 + $0x3b98] sm:$0xff] }
 0x536   : > { %6437 = vmatprep.subr.mxu1 %v2060_v18  ;;  %6399 = vmatpush2.msra.mxu0 %v1995_v16  ;;  %v2212_v0 = vld [vmem:[%s7620_s29 + $0x3d98] sm:$0xff]  ;;  %v2147_v54 = vld [vmem:[%s7620_s29 + $0x3b90] sm:$0xff] }
 0x537   : > { %6438 = vmatpush1.msra.mxu1 %v2059_v10  ;;  %6400 = vmatprep.subr.mxu0 %v1992_v56  ;;  %v2211_v18 = vld [vmem:[%s7620_s29 + $0x3d90] sm:$0xff]  ;;  %v2144_v16 = vld [vmem:[%s7620_s29 + $0x3b78] sm:$0xff] }
 0x538   : > { %6439 = vmatprep.subr.mxu1 %v2056_v4  ;;  %6401 = vmatpush2.msra.mxu0 %v1991_v57  ;;  %v2208_v10 = vld [vmem:[%s7620_s29 + $0x3d78] sm:$0xff]  ;;  %v2143_v56 = vld [vmem:[%s7620_s29 + $0x3b70] sm:$0xff] }
 0x539   : > { %6440 = vmatpush1.msra.mxu1 %v2055_v61  ;;  %6402 = vmatprep.subr.mxu0 %v1988_v11  ;;  %v2207_v4 = vld [vmem:[%s7620_s29 + $0x3d70] sm:$0xff]  ;;  %v2140_v57 = vld [vmem:[%s7620_s29 + $0x3b58] sm:$0xff] }
 0x53a   : > { %6441 = vmatprep.subr.mxu1 %v2052_v60  ;;  %6403 = vmatpush2.msra.mxu0 %v1987_v1  ;;  %v2204_v61 = vld [vmem:[%s7620_s29 + $0x3d58] sm:$0xff]  ;;  %v2139_v11 = vld [vmem:[%s7620_s29 + $0x3b50] sm:$0xff] }
 0x53b   : > { %6442 = vmatpush1.msra.mxu1 %v2051_v2  ;;  %6404 = vmatprep.subr.mxu0 %v1984_v42  ;;  %v2203_v60 = vld [vmem:[%s7620_s29 + $0x3d50] sm:$0xff]  ;;  %v2136_v1 = vld [vmem:[%s7620_s29 + $0x3b38] sm:$0xff] }
 0x53c   : > { %6443 = vmatprep.subr.mxu1 %v2048_v52  ;;  %6405 = vmatpush2.msra.mxu0 %v1983_v9  ;;  %v2200_v2 = vld [vmem:[%s7620_s29 + $0x3d38] sm:$0xff]  ;;  %v2135_v42 = vld [vmem:[%s7620_s29 + $0x3b30] sm:$0xff] }
 0x53d   : > { %6444 = vmatpush1.msra.mxu1 %v2047_v31  ;;  %6406 = vmatprep.subr.mxu0 %v1980_v5  ;;  %v2199_v52 = vld [vmem:[%s7620_s29 + $0x3d30] sm:$0xff]  ;;  %v2132_v9 = vld [vmem:[%s7620_s29 + $0x3b18] sm:$0xff] }
 0x53e   : > { %6445 = vmatprep.subr.mxu1 %v2044_v44  ;;  %6407 = vmatpush2.msra.mxu0 %v1979_v8  ;;  %v2196_v31 = vld [vmem:[%s7620_s29 + $0x3d18] sm:$0xff]  ;;  %v2131_v5 = vld [vmem:[%s7620_s29 + $0x3b10] sm:$0xff] }
 0x53f   : > { %6446 = vmatpush1.msra.mxu1 %v2043_v63  ;;  %6408 = vmatprep.subr.mxu0 %v1976_v14  ;;  %v2195_v44 = vld [vmem:[%s7620_s29 + $0x3d10] sm:$0xff]  ;;  %v2128_v8 = vld [vmem:[%s7620_s29 + $0x3af8] sm:$0xff] }
 0x540   : > { %6447 = vmatprep.subr.mxu1 %v2040_v26  ;;  %6409 = vmatpush2.msra.mxu0 %v1975_v25  ;;  %v2192_v63 = vld [vmem:[%s7620_s29 + $0x3cf8] sm:$0xff]  ;;  %v2127_v14 = vld [vmem:[%s7620_s29 + $0x3af0] sm:$0xff] }
 0x541   : > { %6448 = vmatpush1.msra.mxu1 %v2039_v33  ;;  %6410 = vmatprep.subr.mxu0 %v1972_v49  ;;  %v2191_v26 = vld [vmem:[%s7620_s29 + $0x3cf0] sm:$0xff]  ;;  %v2124_v25 = vld [vmem:[%s7620_s29 + $0x3ad8] sm:$0xff] }
 0x542   : > { %6449 = vmatprep.subr.mxu1 %v2036_v40  ;;  %6411 = vmatpush2.msra.mxu0 %v1971_v23  ;;  %v2188_v33 = vld [vmem:[%s7620_s29 + $0x3cd8] sm:$0xff]  ;;  %v2123_v49 = vld [vmem:[%s7620_s29 + $0x3ad0] sm:$0xff] }
 0x543   : > { %6412 = vmatprep.mubr.f32.mxu0 %v8667_v46  ;;  %6450 = vmatpush1.msra.mxu1 %v2035_v24  ;;  %v2152_v46 = vld [vmem:[%s7620_s29 + $0x3bb8] sm:$0xff]  ;;  %v2187_v40 = vld [vmem:[%s7620_s29 + $0x3cd0] sm:$0xff] }
 0x544   : > { %6413 = vmatmul.mubr.f32.vlgmr.msra.gmra.mxu0 %v8653_v36  ;;  %6451 = vmatprep.subr.mxu1 %v2160_v15  ;;  %v2215_v36 = vld [vmem:[%s7620_s29 + $0x3db0] sm:$0xff]  ;;  %v2120_v23 = vld [vmem:[%s7620_s29 + $0x3ab8] sm:$0xff] }
 0x545   : > { %6490 = vmatprep.subr.mxu0 %v2224_v7  ;;  %6452 = vmatpush2.msra.mxu1 %v2159_v39  ;;  %v2184_v24 = vld [vmem:[%s7620_s29 + $0x3cb8] sm:$0xff]  ;;  %v2119_v15 = vld [vmem:[%s7620_s29 + $0x3ab0] sm:$0xff] }
 0x546   : > { %6491 = vmatpush1.msra.mxu0 %v2223_v12  ;;  %6453 = vmatprep.subr.mxu1 %v2156_v28  ;;  %v2183_v7 = vld [vmem:[%s7620_s29 + $0x3cb0] sm:$0xff]  ;;  %v2116_v39 = vld [vmem:[%s7620_s29 + $0x3a98] sm:$0xff] }
 0x547   : > { %6492 = vmatprep.subr.mxu0 %v2220_v43  ;;  %6454 = vmatpush2.msra.mxu1 %v2155_v45  ;;  %v2180_v12 = vld [vmem:[%s7620_s29 + $0x3c98] sm:$0xff]  ;;  %v2115_v28 = vld [vmem:[%s7620_s29 + $0x3a90] sm:$0xff] }
 0x548   : > { %6493 = vmatpush1.msra.mxu0 %v2219_v20  ;;  %6455 = vmatprep.subr.mxu1 %v2152_v46  ;;  %v2179_v43 = vld [vmem:[%s7620_s29 + $0x3c90] sm:$0xff]  ;;  %v2112_v45 = vld [vmem:[%s7620_s29 + $0x3a78] sm:$0xff] }
 0x549   : > { %6494 = vmatprep.subr.mxu0 %v2216_v19  ;;  %6456 = vmatpush2.msra.mxu1 %v2151_v29  ;;  %v2176_v20 = vld [vmem:[%s7620_s29 + $0x3c78] sm:$0xff]  ;;  %v2111_v46 = vld [vmem:[%s7620_s29 + $0x3a70] sm:$0xff] }
 0x54a   : > { %6495 = vmatpush1.msra.mxu0 %v2215_v36  ;;  %6457 = vmatprep.subr.mxu1 %v2148_v50  ;;  %v2175_v19 = vld [vmem:[%s7620_s29 + $0x3c70] sm:$0xff]  ;;  %v2108_v29 = vld [vmem:[%s7620_s29 + $0x3a58] sm:$0xff] }
 0x54b   : > { %6496 = vmatprep.subr.mxu0 %v2212_v0  ;;  %6458 = vmatpush2.msra.mxu1 %v2147_v54  ;;  %v2172_v36 = vld [vmem:[%s7620_s29 + $0x3c58] sm:$0xff]  ;;  %v2107_v50 = vld [vmem:[%s7620_s29 + $0x3a50] sm:$0xff] }
 0x54c   : > { %6497 = vmatpush1.msra.mxu0 %v2211_v18  ;;  %6459 = vmatprep.subr.mxu1 %v2144_v16  ;;  %v2171_v0 = vld [vmem:[%s7620_s29 + $0x3c50] sm:$0xff]  ;;  %v2104_v54 = vld [vmem:[%s7620_s29 + $0x3a38] sm:$0xff] }
 0x54d   : > { %6498 = vmatprep.subr.mxu0 %v2208_v10  ;;  %6460 = vmatpush2.msra.mxu1 %v2143_v56  ;;  %v2168_v18 = vld [vmem:[%s7620_s29 + $0x3c38] sm:$0xff]  ;;  %v2103_v16 = vld [vmem:[%s7620_s29 + $0x3a30] sm:$0xff] }
 0x54e   : > { %6499 = vmatpush1.msra.mxu0 %v2207_v4  ;;  %6461 = vmatprep.subr.mxu1 %v2140_v57  ;;  %v2167_v10 = vld [vmem:[%s7620_s29 + $0x3c30] sm:$0xff]  ;;  %v2100_v56 = vld [vmem:[%s7620_s29 + $0x3a18] sm:$0xff] }
 0x54f   : > { %6500 = vmatprep.subr.mxu0 %v2204_v61  ;;  %6462 = vmatpush2.msra.mxu1 %v2139_v11  ;;  %v2164_v4 = vld [vmem:[%s7620_s29 + $0x3c18] sm:$0xff]  ;;  %v2099_v57 = vld [vmem:[%s7620_s29 + $0x3a10] sm:$0xff] }
 0x550   : > { %6501 = vmatpush1.msra.mxu0 %v2203_v60  ;;  %6463 = vmatprep.subr.mxu1 %v2136_v1  ;;  %v2163_v61 = vld [vmem:[%s7620_s29 + $0x3c10] sm:$0xff]  ;;  %v2288_v11 = vld [vmem:[%s7620_s29 + $0x3ff8] sm:$0xff] }
 0x551   : > { %6502 = vmatprep.subr.mxu0 %v2200_v2  ;;  %6464 = vmatpush2.msra.mxu1 %v2135_v42  ;;  %v2352_v60 = vld [vmem:[%s7620_s29 + $0x41f8] sm:$0xff]  ;;  %v2287_v1 = vld [vmem:[%s7620_s29 + $0x3ff0] sm:$0xff] }
 0x552   : > { %6503 = vmatpush1.msra.mxu0 %v2199_v52  ;;  %6465 = vmatprep.subr.mxu1 %v2132_v9  ;;  %v2351_v2 = vld [vmem:[%s7620_s29 + $0x41f0] sm:$0xff]  ;;  %v2284_v42 = vld [vmem:[%s7620_s29 + $0x3fd8] sm:$0xff] }
 0x553   : > { %6504 = vmatprep.subr.mxu0 %v2196_v31  ;;  %6466 = vmatpush2.msra.mxu1 %v2131_v5  ;;  %v2348_v52 = vld [vmem:[%s7620_s29 + $0x41d8] sm:$0xff]  ;;  %v2283_v9 = vld [vmem:[%s7620_s29 + $0x3fd0] sm:$0xff] }
 0x554   : > { %6505 = vmatpush1.msra.mxu0 %v2195_v44  ;;  %6467 = vmatprep.subr.mxu1 %v2128_v8  ;;  %v2347_v31 = vld [vmem:[%s7620_s29 + $0x41d0] sm:$0xff]  ;;  %v2344_v5 = vld [vmem:[%s7620_s29 + $0x41b8] sm:$0xff] }
 0x555   : > { %6506 = vmatprep.subr.mxu0 %v2192_v63  ;;  %6468 = vmatpush2.msra.mxu1 %v2127_v14  ;;  %v2279_v44 = vld [vmem:[%s7620_s29 + $0x3fb0] sm:$0xff]  ;;  %v2276_v8 = vld [vmem:[%s7620_s29 + $0x3f98] sm:$0xff] }
 0x556   : > { %6507 = vmatpush1.msra.mxu0 %v2191_v26  ;;  %6469 = vmatprep.subr.mxu1 %v2124_v25  ;;  %v2340_v63 = vld [vmem:[%s7620_s29 + $0x4198] sm:$0xff]  ;;  %v2275_v14 = vld [vmem:[%s7620_s29 + $0x3f90] sm:$0xff] }
 0x557   : > { %6508 = vmatprep.subr.mxu0 %v2188_v33  ;;  %6470 = vmatpush2.msra.mxu1 %v2123_v49  ;;  %v2339_v26 = vld [vmem:[%s7620_s29 + $0x4190] sm:$0xff]  ;;  %v2272_v25 = vld [vmem:[%s7620_s29 + $0x3f78] sm:$0xff] }
 0x558   : > { %6509 = vmatpush1.msra.mxu0 %v2187_v40  ;;  %6471 = vmatprep.subr.mxu1 %v2120_v23  ;;  %v2336_v33 = vld [vmem:[%s7620_s29 + $0x4178] sm:$0xff]  ;;  %v2271_v49 = vld [vmem:[%s7620_s29 + $0x3f70] sm:$0xff] }
 0x559   : > { %6510 = vmatprep.subr.mxu0 %v2184_v24  ;;  %6472 = vmatpush2.msra.mxu1 %v2119_v15  ;;  %v2335_v40 = vld [vmem:[%s7620_s29 + $0x4170] sm:$0xff]  ;;  %v2268_v23 = vld [vmem:[%s7620_s29 + $0x3f58] sm:$0xff] }
 0x55a   : > { %6511 = vmatpush1.msra.mxu0 %v2183_v7  ;;  %6473 = vmatprep.subr.mxu1 %v2116_v39  ;;  %v2332_v24 = vld [vmem:[%s7620_s29 + $0x4158] sm:$0xff]  ;;  %v2267_v15 = vld [vmem:[%s7620_s29 + $0x3f50] sm:$0xff] }
 0x55b   : > { %6512 = vmatprep.subr.mxu0 %v2180_v12  ;;  %6474 = vmatpush2.msra.mxu1 %v2115_v28  ;;  %v2331_v7 = vld [vmem:[%s7620_s29 + $0x4150] sm:$0xff]  ;;  %v2264_v39 = vld [vmem:[%s7620_s29 + $0x3f38] sm:$0xff] }
 0x55c   : > { %6513 = vmatpush1.msra.mxu0 %v2179_v43  ;;  %6475 = vmatprep.subr.mxu1 %v2112_v45  ;;  %v2328_v12 = vld [vmem:[%s7620_s29 + $0x4138] sm:$0xff]  ;;  %v2263_v28 = vld [vmem:[%s7620_s29 + $0x3f30] sm:$0xff] }
 0x55d   : > { %6514 = vmatprep.subr.mxu0 %v2176_v20  ;;  %6476 = vmatpush2.msra.mxu1 %v2111_v46  ;;  %v2327_v43 = vld [vmem:[%s7620_s29 + $0x4130] sm:$0xff]  ;;  %v2260_v45 = vld [vmem:[%s7620_s29 + $0x3f18] sm:$0xff] }
 0x55e   : > { %6515 = vmatpush1.msra.mxu0 %v2175_v19  ;;  %6477 = vmatprep.subr.mxu1 %v2108_v29  ;;  %v2324_v20 = vld [vmem:[%s7620_s29 + $0x4118] sm:$0xff]  ;;  %v2259_v46 = vld [vmem:[%s7620_s29 + $0x3f10] sm:$0xff] }
 0x55f   : > { %6516 = vmatprep.subr.mxu0 %v2172_v36  ;;  %6478 = vmatpush2.msra.mxu1 %v2107_v50  ;;  %v2323_v19 = vld [vmem:[%s7620_s29 + $0x4110] sm:$0xff]  ;;  %v2256_v29 = vld [vmem:[%s7620_s29 + $0x3ef8] sm:$0xff] }
 0x560   : > { %6517 = vmatpush1.msra.mxu0 %v2171_v0  ;;  %6479 = vmatprep.subr.mxu1 %v2104_v54  ;;  %v2320_v36 = vld [vmem:[%s7620_s29 + $0x40f8] sm:$0xff]  ;;  %v2255_v50 = vld [vmem:[%s7620_s29 + $0x3ef0] sm:$0xff] }
 0x561   : > { %6518 = vmatprep.subr.mxu0 %v2168_v18  ;;  %6480 = vmatpush2.msra.mxu1 %v2103_v16  ;;  %v2319_v0 = vld [vmem:[%s7620_s29 + $0x40f0] sm:$0xff]  ;;  %v2252_v54 = vld [vmem:[%s7620_s29 + $0x3ed8] sm:$0xff] }
 0x562   : > { %6519 = vmatpush1.msra.mxu0 %v2167_v10  ;;  %6481 = vmatprep.subr.mxu1 %v2100_v56  ;;  %v2316_v18 = vld [vmem:[%s7620_s29 + $0x40d8] sm:$0xff]  ;;  %v2251_v16 = vld [vmem:[%s7620_s29 + $0x3ed0] sm:$0xff] }
 0x563   : > { %6520 = vmatprep.subr.mxu0 %v2164_v4  ;;  %6482 = vmatpush2.msra.mxu1 %v2099_v57  ;;  %v2315_v10 = vld [vmem:[%s7620_s29 + $0x40d0] sm:$0xff]  ;;  %v2248_v56 = vld [vmem:[%s7620_s29 + $0x3eb8] sm:$0xff] }
 0x564   : > { %6483 = vmatprep.mubr.f32.mxu1 %v8808_v32  ;;  %6521 = vmatpush1.msra.mxu0 %v2163_v61  ;;  %v2280_v32 = vld [vmem:[%s7620_s29 + $0x3fb8] sm:$0xff]  ;;  %v2247_v57 = vld [vmem:[%s7620_s29 + $0x3eb0] sm:$0xff] }
 0x565   : > { %6484 = vmatmul.mubr.f32.vlgmr.msra.gmra.mxu1 %v8793_v6  ;;  %6522 = vmatprep.subr.mxu0 %v2288_v11  ;;  %v2343_v6 = vld [vmem:[%s7620_s29 + $0x41b0] sm:$0xff]  ;;  %v2312_v4 = vld [vmem:[%s7620_s29 + $0x40b8] sm:$0xff] }
 0x566   : > { %6561 = vmatprep.subr.mxu1 %v2352_v60  ;;  %6523 = vmatpush2.msra.mxu0 %v2287_v1  ;;  %v2311_v61 = vld [vmem:[%s7620_s29 + $0x40b0] sm:$0xff]  ;;  %v2244_v11 = vld [vmem:[%s7620_s29 + $0x3e98] sm:$0xff] }
 0x567   : > { %6562 = vmatpush1.msra.mxu1 %v2351_v2  ;;  %6524 = vmatprep.subr.mxu0 %v2284_v42  ;;  %v2308_v60 = vld [vmem:[%s7620_s29 + $0x4098] sm:$0xff]  ;;  %v2243_v1 = vld [vmem:[%s7620_s29 + $0x3e90] sm:$0xff] }
 0x568   : > { %6563 = vmatprep.subr.mxu1 %v2348_v52  ;;  %6525 = vmatpush2.msra.mxu0 %v2283_v9  ;;  %v2307_v2 = vld [vmem:[%s7620_s29 + $0x4090] sm:$0xff]  ;;  %v2240_v42 = vld [vmem:[%s7620_s29 + $0x3e78] sm:$0xff] }
 0x569   : > { %6564 = vmatpush1.msra.mxu1 %v2347_v31  ;;  %6526 = vmatprep.subr.mxu0 %v2280_v32  ;;  %v2304_v52 = vld [vmem:[%s7620_s29 + $0x4078] sm:$0xff]  ;;  %v2239_v9 = vld [vmem:[%s7620_s29 + $0x3e70] sm:$0xff] }
 0x56a   : > { %6565 = vmatprep.subr.mxu1 %v2344_v5  ;;  %6527 = vmatpush2.msra.mxu0 %v2279_v44  ;;  %v2303_v31 = vld [vmem:[%s7620_s29 + $0x4070] sm:$0xff]  ;;  %v2236_v32 = vld [vmem:[%s7620_s29 + $0x3e58] sm:$0xff] }
 0x56b   : > { %6566 = vmatpush1.msra.mxu1 %v2343_v6  ;;  %6528 = vmatprep.subr.mxu0 %v2276_v8  ;;  %v2300_v5 = vld [vmem:[%s7620_s29 + $0x4058] sm:$0xff]  ;;  %v2235_v44 = vld [vmem:[%s7620_s29 + $0x3e50] sm:$0xff] }
 0x56c   : > { %6567 = vmatprep.subr.mxu1 %v2340_v63  ;;  %6529 = vmatpush2.msra.mxu0 %v2275_v14  ;;  %v2299_v6 = vld [vmem:[%s7620_s29 + $0x4050] sm:$0xff]  ;;  %v2232_v8 = vld [vmem:[%s7620_s29 + $0x3e38] sm:$0xff] }
 0x56d   : > { %6568 = vmatpush1.msra.mxu1 %v2339_v26  ;;  %6530 = vmatprep.subr.mxu0 %v2272_v25  ;;  %v2296_v63 = vld [vmem:[%s7620_s29 + $0x4038] sm:$0xff]  ;;  %v2231_v14 = vld [vmem:[%s7620_s29 + $0x3e30] sm:$0xff] }
 0x56e   : > { %6569 = vmatprep.subr.mxu1 %v2336_v33  ;;  %6531 = vmatpush2.msra.mxu0 %v2271_v49  ;;  %v2295_v26 = vld [vmem:[%s7620_s29 + $0x4030] sm:$0xff]  ;;  %v2228_v25 = vld [vmem:[%s7620_s29 + $0x3e18] sm:$0xff] }
 0x56f   : > { %6570 = vmatpush1.msra.mxu1 %v2335_v40  ;;  %6532 = vmatprep.subr.mxu0 %v2268_v23  ;;  %v2292_v33 = vld [vmem:[%s7620_s29 + $0x4018] sm:$0xff]  ;;  %v2227_v49 = vld [vmem:[%s7620_s29 + $0x3e10] sm:$0xff] }
 0x570   : > { %6571 = vmatprep.subr.mxu1 %v2332_v24  ;;  %6533 = vmatpush2.msra.mxu0 %v2267_v15  ;;  %v2291_v40 = vld [vmem:[%s7620_s29 + $0x4010] sm:$0xff]  ;;  %v2416_v23 = vld [vmem:[%s7620_s29 + $0x43f8] sm:$0xff] }
 0x571   : > { %6572 = vmatpush1.msra.mxu1 %v2331_v7  ;;  %6534 = vmatprep.subr.mxu0 %v2264_v39  ;;  %v2480_v24 = vld [vmem:[%s7620_s29 + $0x45f8] sm:$0xff]  ;;  %v2415_v15 = vld [vmem:[%s7620_s29 + $0x43f0] sm:$0xff] }
 0x572   : > { %6573 = vmatprep.subr.mxu1 %v2328_v12  ;;  %6535 = vmatpush2.msra.mxu0 %v2263_v28  ;;  %v2479_v7 = vld [vmem:[%s7620_s29 + $0x45f0] sm:$0xff]  ;;  %v2412_v39 = vld [vmem:[%s7620_s29 + $0x43d8] sm:$0xff] }
 0x573   : > { %6574 = vmatpush1.msra.mxu1 %v2327_v43  ;;  %6536 = vmatprep.subr.mxu0 %v2260_v45  ;;  %v2476_v12 = vld [vmem:[%s7620_s29 + $0x45d8] sm:$0xff]  ;;  %v2411_v28 = vld [vmem:[%s7620_s29 + $0x43d0] sm:$0xff] }
 0x574   : > { %6575 = vmatprep.subr.mxu1 %v2324_v20  ;;  %6537 = vmatpush2.msra.mxu0 %v2259_v46  ;;  %v2475_v43 = vld [vmem:[%s7620_s29 + $0x45d0] sm:$0xff]  ;;  %v2472_v45 = vld [vmem:[%s7620_s29 + $0x45b8] sm:$0xff] }
 0x575   : > { %6576 = vmatpush1.msra.mxu1 %v2323_v19  ;;  %6538 = vmatprep.subr.mxu0 %v2256_v29  ;;  %v2407_v20 = vld [vmem:[%s7620_s29 + $0x43b0] sm:$0xff]  ;;  %v2404_v46 = vld [vmem:[%s7620_s29 + $0x4398] sm:$0xff] }
 0x576   : > { %6577 = vmatprep.subr.mxu1 %v2320_v36  ;;  %6539 = vmatpush2.msra.mxu0 %v2255_v50  ;;  %v2468_v19 = vld [vmem:[%s7620_s29 + $0x4598] sm:$0xff]  ;;  %v2403_v29 = vld [vmem:[%s7620_s29 + $0x4390] sm:$0xff] }
 0x577   : > { %6578 = vmatpush1.msra.mxu1 %v2319_v0  ;;  %6540 = vmatprep.subr.mxu0 %v2252_v54  ;;  %v2467_v36 = vld [vmem:[%s7620_s29 + $0x4590] sm:$0xff]  ;;  %v2400_v50 = vld [vmem:[%s7620_s29 + $0x4378] sm:$0xff] }
 0x578   : > { %6579 = vmatprep.subr.mxu1 %v2316_v18  ;;  %6541 = vmatpush2.msra.mxu0 %v2251_v16  ;;  %v2464_v0 = vld [vmem:[%s7620_s29 + $0x4578] sm:$0xff]  ;;  %v2399_v54 = vld [vmem:[%s7620_s29 + $0x4370] sm:$0xff] }
 0x579   : > { %6580 = vmatpush1.msra.mxu1 %v2315_v10  ;;  %6542 = vmatprep.subr.mxu0 %v2248_v56  ;;  %v2463_v18 = vld [vmem:[%s7620_s29 + $0x4570] sm:$0xff]  ;;  %v2396_v16 = vld [vmem:[%s7620_s29 + $0x4358] sm:$0xff] }
 0x57a   : > { %6581 = vmatprep.subr.mxu1 %v2312_v4  ;;  %6543 = vmatpush2.msra.mxu0 %v2247_v57  ;;  %v2460_v10 = vld [vmem:[%s7620_s29 + $0x4558] sm:$0xff]  ;;  %v2395_v56 = vld [vmem:[%s7620_s29 + $0x4350] sm:$0xff] }
 0x57b   : > { %6582 = vmatpush1.msra.mxu1 %v2311_v61  ;;  %6544 = vmatprep.subr.mxu0 %v2244_v11  ;;  %v2459_v4 = vld [vmem:[%s7620_s29 + $0x4550] sm:$0xff]  ;;  %v2392_v57 = vld [vmem:[%s7620_s29 + $0x4338] sm:$0xff] }
 0x57c   : > { %6583 = vmatprep.subr.mxu1 %v2308_v60  ;;  %6545 = vmatpush2.msra.mxu0 %v2243_v1  ;;  %v2456_v61 = vld [vmem:[%s7620_s29 + $0x4538] sm:$0xff]  ;;  %v2391_v11 = vld [vmem:[%s7620_s29 + $0x4330] sm:$0xff] }
 0x57d   : > { %6584 = vmatpush1.msra.mxu1 %v2307_v2  ;;  %6546 = vmatprep.subr.mxu0 %v2240_v42  ;;  %v2455_v60 = vld [vmem:[%s7620_s29 + $0x4530] sm:$0xff]  ;;  %v2388_v1 = vld [vmem:[%s7620_s29 + $0x4318] sm:$0xff] }
 0x57e   : > { %6585 = vmatprep.subr.mxu1 %v2304_v52  ;;  %6547 = vmatpush2.msra.mxu0 %v2239_v9  ;;  %v2452_v2 = vld [vmem:[%s7620_s29 + $0x4518] sm:$0xff]  ;;  %v2387_v42 = vld [vmem:[%s7620_s29 + $0x4310] sm:$0xff] }
 0x57f   : > { %6586 = vmatpush1.msra.mxu1 %v2303_v31  ;;  %6548 = vmatprep.subr.mxu0 %v2236_v32  ;;  %v2451_v52 = vld [vmem:[%s7620_s29 + $0x4510] sm:$0xff]  ;;  %v2384_v9 = vld [vmem:[%s7620_s29 + $0x42f8] sm:$0xff] }
 0x580   : > { %6587 = vmatprep.subr.mxu1 %v2300_v5  ;;  %6549 = vmatpush2.msra.mxu0 %v2235_v44  ;;  %v2448_v31 = vld [vmem:[%s7620_s29 + $0x44f8] sm:$0xff]  ;;  %v2383_v32 = vld [vmem:[%s7620_s29 + $0x42f0] sm:$0xff] }
 0x581   : > { %6588 = vmatpush1.msra.mxu1 %v2299_v6  ;;  %6550 = vmatprep.subr.mxu0 %v2232_v8  ;;  %v2447_v5 = vld [vmem:[%s7620_s29 + $0x44f0] sm:$0xff]  ;;  %v2380_v44 = vld [vmem:[%s7620_s29 + $0x42d8] sm:$0xff] }
 0x582   : > { %6589 = vmatprep.subr.mxu1 %v2296_v63  ;;  %6551 = vmatpush2.msra.mxu0 %v2231_v14  ;;  %v2444_v6 = vld [vmem:[%s7620_s29 + $0x44d8] sm:$0xff]  ;;  %v2379_v8 = vld [vmem:[%s7620_s29 + $0x42d0] sm:$0xff] }
 0x583   : > { %6590 = vmatpush1.msra.mxu1 %v2295_v26  ;;  %6552 = vmatprep.subr.mxu0 %v2228_v25  ;;  %v2443_v63 = vld [vmem:[%s7620_s29 + $0x44d0] sm:$0xff]  ;;  %v2376_v14 = vld [vmem:[%s7620_s29 + $0x42b8] sm:$0xff] }
 0x584   : > { %6591 = vmatprep.subr.mxu1 %v2292_v33  ;;  %6553 = vmatpush2.msra.mxu0 %v2227_v49  ;;  %v2440_v26 = vld [vmem:[%s7620_s29 + $0x44b8] sm:$0xff]  ;;  %v2375_v25 = vld [vmem:[%s7620_s29 + $0x42b0] sm:$0xff] }
 0x585   : > { %6554 = vmatprep.mubr.f32.mxu0 %v8814_v35  ;;  %6592 = vmatpush1.msra.mxu1 %v2291_v40  ;;  %v2408_v35 = vld [vmem:[%s7620_s29 + $0x43b8] sm:$0xff]  ;;  %v2439_v33 = vld [vmem:[%s7620_s29 + $0x44b0] sm:$0xff] }
 0x586   : > { %6555 = vmatmul.mubr.f32.vlgmr.msra.gmra.mxu0 %v8800_v21  ;;  %6593 = vmatprep.subr.mxu1 %v2416_v23  ;;  %v2471_v21 = vld [vmem:[%s7620_s29 + $0x45b0] sm:$0xff]  ;;  %v2372_v49 = vld [vmem:[%s7620_s29 + $0x4298] sm:$0xff] }
 0x587   : > { %6632 = vmatprep.subr.mxu0 %v2480_v24  ;;  %6594 = vmatpush2.msra.mxu1 %v2415_v15  ;;  %v2436_v40 = vld [vmem:[%s7620_s29 + $0x4498] sm:$0xff]  ;;  %v2371_v23 = vld [vmem:[%s7620_s29 + $0x4290] sm:$0xff] }
 0x588   : > { %6633 = vmatpush1.msra.mxu0 %v2479_v7  ;;  %6595 = vmatprep.subr.mxu1 %v2412_v39  ;;  %v2435_v24 = vld [vmem:[%s7620_s29 + $0x4490] sm:$0xff]  ;;  %v2368_v15 = vld [vmem:[%s7620_s29 + $0x4278] sm:$0xff] }
 0x589   : > { %6634 = vmatprep.subr.mxu0 %v2476_v12  ;;  %6596 = vmatpush2.msra.mxu1 %v2411_v28  ;;  %v2432_v7 = vld [vmem:[%s7620_s29 + $0x4478] sm:$0xff]  ;;  %v2367_v39 = vld [vmem:[%s7620_s29 + $0x4270] sm:$0xff] }
 0x58a   : > { %6635 = vmatpush1.msra.mxu0 %v2475_v43  ;;  %6597 = vmatprep.subr.mxu1 %v2408_v35  ;;  %v2431_v12 = vld [vmem:[%s7620_s29 + $0x4470] sm:$0xff]  ;;  %v2364_v28 = vld [vmem:[%s7620_s29 + $0x4258] sm:$0xff] }
 0x58b   : > { %6636 = vmatprep.subr.mxu0 %v2472_v45  ;;  %6598 = vmatpush2.msra.mxu1 %v2407_v20  ;;  %v2428_v43 = vld [vmem:[%s7620_s29 + $0x4458] sm:$0xff]  ;;  %v2363_v35 = vld [vmem:[%s7620_s29 + $0x4250] sm:$0xff] }
 0x58c   : > { %6637 = vmatpush1.msra.mxu0 %v2471_v21  ;;  %6599 = vmatprep.subr.mxu1 %v2404_v46  ;;  %v2427_v45 = vld [vmem:[%s7620_s29 + $0x4450] sm:$0xff]  ;;  %v2360_v20 = vld [vmem:[%s7620_s29 + $0x4238] sm:$0xff] }
 0x58d   : > { %6638 = vmatprep.subr.mxu0 %v2468_v19  ;;  %6600 = vmatpush2.msra.mxu1 %v2403_v29  ;;  %v2424_v21 = vld [vmem:[%s7620_s29 + $0x4438] sm:$0xff]  ;;  %v2359_v46 = vld [vmem:[%s7620_s29 + $0x4230] sm:$0xff] }
 0x58e   : > { %6639 = vmatpush1.msra.mxu0 %v2467_v36  ;;  %6601 = vmatprep.subr.mxu1 %v2400_v50  ;;  %v2423_v19 = vld [vmem:[%s7620_s29 + $0x4430] sm:$0xff]  ;;  %v2356_v29 = vld [vmem:[%s7620_s29 + $0x4218] sm:$0xff] }
 0x58f   : > { %6640 = vmatprep.subr.mxu0 %v2464_v0  ;;  %6602 = vmatpush2.msra.mxu1 %v2399_v54  ;;  %v2420_v36 = vld [vmem:[%s7620_s29 + $0x4418] sm:$0xff]  ;;  %v2355_v50 = vld [vmem:[%s7620_s29 + $0x4210] sm:$0xff] }
 0x590   : > { %6641 = vmatpush1.msra.mxu0 %v2463_v18  ;;  %6603 = vmatprep.subr.mxu1 %v2396_v16  ;;  %v2419_v0 = vld [vmem:[%s7620_s29 + $0x4410] sm:$0xff]  ;;  %v2544_v54 = vld [vmem:[%s7620_s29 + $0x47f8] sm:$0xff] }
 0x591   : > { %6642 = vmatprep.subr.mxu0 %v2460_v10  ;;  %6604 = vmatpush2.msra.mxu1 %v2395_v56  ;;  %v2608_v18 = vld [vmem:[%s7620_s29 + $0x49f8] sm:$0xff]  ;;  %v2543_v16 = vld [vmem:[%s7620_s29 + $0x47f0] sm:$0xff] }
 0x592   : > { %6643 = vmatpush1.msra.mxu0 %v2459_v4  ;;  %6605 = vmatprep.subr.mxu1 %v2392_v57  ;;  %v2607_v10 = vld [vmem:[%s7620_s29 + $0x49f0] sm:$0xff]  ;;  %v2540_v56 = vld [vmem:[%s7620_s29 + $0x47d8] sm:$0xff] }
 0x593   : > { %6644 = vmatprep.subr.mxu0 %v2456_v61  ;;  %6606 = vmatpush2.msra.mxu1 %v2391_v11  ;;  %v2604_v4 = vld [vmem:[%s7620_s29 + $0x49d8] sm:$0xff]  ;;  %v2539_v57 = vld [vmem:[%s7620_s29 + $0x47d0] sm:$0xff] }
 0x594   : > { %6645 = vmatpush1.msra.mxu0 %v2455_v60  ;;  %6607 = vmatprep.subr.mxu1 %v2388_v1  ;;  %v2603_v61 = vld [vmem:[%s7620_s29 + $0x49d0] sm:$0xff]  ;;  %v2600_v11 = vld [vmem:[%s7620_s29 + $0x49b8] sm:$0xff] }
 0x595   : > { %6646 = vmatprep.subr.mxu0 %v2452_v2  ;;  %6608 = vmatpush2.msra.mxu1 %v2387_v42  ;;  %v2535_v60 = vld [vmem:[%s7620_s29 + $0x47b0] sm:$0xff]  ;;  %v2532_v1 = vld [vmem:[%s7620_s29 + $0x4798] sm:$0xff] }
 0x596   : > { %6647 = vmatpush1.msra.mxu0 %v2451_v52  ;;  %6609 = vmatprep.subr.mxu1 %v2384_v9  ;;  %v2596_v2 = vld [vmem:[%s7620_s29 + $0x4998] sm:$0xff]  ;;  %v2531_v42 = vld [vmem:[%s7620_s29 + $0x4790] sm:$0xff] }
 0x597   : > { %6648 = vmatprep.subr.mxu0 %v2448_v31  ;;  %6610 = vmatpush2.msra.mxu1 %v2383_v32  ;;  %v2595_v52 = vld [vmem:[%s7620_s29 + $0x4990] sm:$0xff]  ;;  %v2528_v9 = vld [vmem:[%s7620_s29 + $0x4778] sm:$0xff] }
 0x598   : > { %6649 = vmatpush1.msra.mxu0 %v2447_v5  ;;  %6611 = vmatprep.subr.mxu1 %v2380_v44  ;;  %v2592_v31 = vld [vmem:[%s7620_s29 + $0x4978] sm:$0xff]  ;;  %v2527_v32 = vld [vmem:[%s7620_s29 + $0x4770] sm:$0xff] }
 0x599   : > { %6650 = vmatprep.subr.mxu0 %v2444_v6  ;;  %6612 = vmatpush2.msra.mxu1 %v2379_v8  ;;  %v2591_v5 = vld [vmem:[%s7620_s29 + $0x4970] sm:$0xff]  ;;  %v2524_v44 = vld [vmem:[%s7620_s29 + $0x4758] sm:$0xff] }
 0x59a   : > { %6651 = vmatpush1.msra.mxu0 %v2443_v63  ;;  %6613 = vmatprep.subr.mxu1 %v2376_v14  ;;  %v2588_v6 = vld [vmem:[%s7620_s29 + $0x4958] sm:$0xff]  ;;  %v2523_v8 = vld [vmem:[%s7620_s29 + $0x4750] sm:$0xff] }
 0x59b   : > { %6652 = vmatprep.subr.mxu0 %v2440_v26  ;;  %6614 = vmatpush2.msra.mxu1 %v2375_v25  ;;  %v2587_v63 = vld [vmem:[%s7620_s29 + $0x4950] sm:$0xff]  ;;  %v2520_v14 = vld [vmem:[%s7620_s29 + $0x4738] sm:$0xff] }
 0x59c   : > { %6653 = vmatpush1.msra.mxu0 %v2439_v33  ;;  %6615 = vmatprep.subr.mxu1 %v2372_v49  ;;  %v2584_v26 = vld [vmem:[%s7620_s29 + $0x4938] sm:$0xff]  ;;  %v2519_v25 = vld [vmem:[%s7620_s29 + $0x4730] sm:$0xff] }
 0x59d   : > { %6654 = vmatprep.subr.mxu0 %v2436_v40  ;;  %6616 = vmatpush2.msra.mxu1 %v2371_v23  ;;  %v2583_v33 = vld [vmem:[%s7620_s29 + $0x4930] sm:$0xff]  ;;  %v2516_v49 = vld [vmem:[%s7620_s29 + $0x4718] sm:$0xff] }
 0x59e   : > { %6655 = vmatpush1.msra.mxu0 %v2435_v24  ;;  %6617 = vmatprep.subr.mxu1 %v2368_v15  ;;  %v2580_v40 = vld [vmem:[%s7620_s29 + $0x4918] sm:$0xff]  ;;  %v2515_v23 = vld [vmem:[%s7620_s29 + $0x4710] sm:$0xff] }
 0x59f   : > { %6656 = vmatprep.subr.mxu0 %v2432_v7  ;;  %6618 = vmatpush2.msra.mxu1 %v2367_v39  ;;  %v2579_v24 = vld [vmem:[%s7620_s29 + $0x4910] sm:$0xff]  ;;  %v2512_v15 = vld [vmem:[%s7620_s29 + $0x46f8] sm:$0xff] }
 0x5a0   : > { %6657 = vmatpush1.msra.mxu0 %v2431_v12  ;;  %6619 = vmatprep.subr.mxu1 %v2364_v28  ;;  %v2576_v7 = vld [vmem:[%s7620_s29 + $0x48f8] sm:$0xff]  ;;  %v2511_v39 = vld [vmem:[%s7620_s29 + $0x46f0] sm:$0xff] }
 0x5a1   : > { %6658 = vmatprep.subr.mxu0 %v2428_v43  ;;  %6620 = vmatpush2.msra.mxu1 %v2363_v35  ;;  %v2575_v12 = vld [vmem:[%s7620_s29 + $0x48f0] sm:$0xff]  ;;  %v2508_v28 = vld [vmem:[%s7620_s29 + $0x46d8] sm:$0xff] }
 0x5a2   : > { %6659 = vmatpush1.msra.mxu0 %v2427_v45  ;;  %6621 = vmatprep.subr.mxu1 %v2360_v20  ;;  %v2572_v43 = vld [vmem:[%s7620_s29 + $0x48d8] sm:$0xff]  ;;  %v2507_v35 = vld [vmem:[%s7620_s29 + $0x46d0] sm:$0xff] }
 0x5a3   : > { %6660 = vmatprep.subr.mxu0 %v2424_v21  ;;  %6622 = vmatpush2.msra.mxu1 %v2359_v46  ;;  %v2571_v45 = vld [vmem:[%s7620_s29 + $0x48d0] sm:$0xff]  ;;  %v2504_v20 = vld [vmem:[%s7620_s29 + $0x46b8] sm:$0xff] }
 0x5a4   : > { %6661 = vmatpush1.msra.mxu0 %v2423_v19  ;;  %6623 = vmatprep.subr.mxu1 %v2356_v29  ;;  %v2568_v21 = vld [vmem:[%s7620_s29 + $0x48b8] sm:$0xff]  ;;  %v2503_v46 = vld [vmem:[%s7620_s29 + $0x46b0] sm:$0xff] }
 0x5a5   : > { %6662 = vmatprep.subr.mxu0 %v2420_v36  ;;  %6624 = vmatpush2.msra.mxu1 %v2355_v50  ;;  %v2567_v19 = vld [vmem:[%s7620_s29 + $0x48b0] sm:$0xff]  ;;  %v2500_v29 = vld [vmem:[%s7620_s29 + $0x4698] sm:$0xff] }
 0x5a6   : > { %6625 = vmatprep.mubr.f32.mxu1 %v8955_v47  ;;  %6663 = vmatpush1.msra.mxu0 %v2419_v0  ;;  %v2536_v47 = vld [vmem:[%s7620_s29 + $0x47b8] sm:$0xff]  ;;  %v2499_v50 = vld [vmem:[%s7620_s29 + $0x4690] sm:$0xff] }
 0x5a7   : > { %6626 = vmatmul.mubr.f32.vlgmr.msra.gmra.mxu1 %v8940_v27  ;;  %6664 = vmatprep.subr.mxu0 %v2544_v54  ;;  %v2599_v27 = vld [vmem:[%s7620_s29 + $0x49b0] sm:$0xff]  ;;  %v2564_v36 = vld [vmem:[%s7620_s29 + $0x4898] sm:$0xff] }
 0x5a8   : > { %6703 = vmatprep.subr.mxu1 %v2608_v18  ;;  %6665 = vmatpush2.msra.mxu0 %v2543_v16  ;;  %v2563_v0 = vld [vmem:[%s7620_s29 + $0x4890] sm:$0xff]  ;;  %v2496_v54 = vld [vmem:[%s7620_s29 + $0x4678] sm:$0xff] }
 0x5a9   : > { %6704 = vmatpush1.msra.mxu1 %v2607_v10  ;;  %6666 = vmatprep.subr.mxu0 %v2540_v56  ;;  %v2560_v18 = vld [vmem:[%s7620_s29 + $0x4878] sm:$0xff]  ;;  %v2495_v16 = vld [vmem:[%s7620_s29 + $0x4670] sm:$0xff] }
 0x5aa   : > { %6705 = vmatprep.subr.mxu1 %v2604_v4  ;;  %6667 = vmatpush2.msra.mxu0 %v2539_v57  ;;  %v2559_v10 = vld [vmem:[%s7620_s29 + $0x4870] sm:$0xff]  ;;  %v2492_v56 = vld [vmem:[%s7620_s29 + $0x4658] sm:$0xff] }
 0x5ab   : > { %6706 = vmatpush1.msra.mxu1 %v2603_v61  ;;  %6668 = vmatprep.subr.mxu0 %v2536_v47  ;;  %v2556_v4 = vld [vmem:[%s7620_s29 + $0x4858] sm:$0xff]  ;;  %v2491_v57 = vld [vmem:[%s7620_s29 + $0x4650] sm:$0xff] }
 0x5ac   : > { %6707 = vmatprep.subr.mxu1 %v2600_v11  ;;  %6669 = vmatpush2.msra.mxu0 %v2535_v60  ;;  %v2555_v61 = vld [vmem:[%s7620_s29 + $0x4850] sm:$0xff]  ;;  %v2488_v47 = vld [vmem:[%s7620_s29 + $0x4638] sm:$0xff] }
 0x5ad   : > { %6708 = vmatpush1.msra.mxu1 %v2599_v27  ;;  %6670 = vmatprep.subr.mxu0 %v2532_v1  ;;  %v2552_v11 = vld [vmem:[%s7620_s29 + $0x4838] sm:$0xff]  ;;  %v2487_v60 = vld [vmem:[%s7620_s29 + $0x4630] sm:$0xff] }
 0x5ae   : > { %6709 = vmatprep.subr.mxu1 %v2596_v2  ;;  %6671 = vmatpush2.msra.mxu0 %v2531_v42  ;;  %v2551_v27 = vld [vmem:[%s7620_s29 + $0x4830] sm:$0xff]  ;;  %v2484_v1 = vld [vmem:[%s7620_s29 + $0x4618] sm:$0xff] }
 0x5af   : > { %6710 = vmatpush1.msra.mxu1 %v2595_v52  ;;  %6672 = vmatprep.subr.mxu0 %v2528_v9  ;;  %v2548_v2 = vld [vmem:[%s7620_s29 + $0x4818] sm:$0xff]  ;;  %v2483_v42 = vld [vmem:[%s7620_s29 + $0x4610] sm:$0xff] }
 0x5b0   : > { %6711 = vmatprep.subr.mxu1 %v2592_v31  ;;  %6673 = vmatpush2.msra.mxu0 %v2527_v32  ;;  %v2547_v52 = vld [vmem:[%s7620_s29 + $0x4810] sm:$0xff]  ;;  %v2672_v9 = vld [vmem:[%s7620_s29 + $0x4bf8] sm:$0xff] }
 0x5b1   : > { %6712 = vmatpush1.msra.mxu1 %v2591_v5  ;;  %6674 = vmatprep.subr.mxu0 %v2524_v44  ;;  %v2736_v31 = vld [vmem:[%s7620_s29 + $0x4df8] sm:$0xff]  ;;  %v2671_v32 = vld [vmem:[%s7620_s29 + $0x4bf0] sm:$0xff] }
 0x5b2   : > { %6713 = vmatprep.subr.mxu1 %v2588_v6  ;;  %6675 = vmatpush2.msra.mxu0 %v2523_v8  ;;  %v2735_v5 = vld [vmem:[%s7620_s29 + $0x4df0] sm:$0xff]  ;;  %v2668_v44 = vld [vmem:[%s7620_s29 + $0x4bd8] sm:$0xff] }
 0x5b3   : > { %6714 = vmatpush1.msra.mxu1 %v2587_v63  ;;  %6676 = vmatprep.subr.mxu0 %v2520_v14  ;;  %v2732_v6 = vld [vmem:[%s7620_s29 + $0x4dd8] sm:$0xff]  ;;  %v2667_v8 = vld [vmem:[%s7620_s29 + $0x4bd0] sm:$0xff] }
 0x5b4   : > { %6715 = vmatprep.subr.mxu1 %v2584_v26  ;;  %6677 = vmatpush2.msra.mxu0 %v2519_v25  ;;  %v2731_v63 = vld [vmem:[%s7620_s29 + $0x4dd0] sm:$0xff]  ;;  %v2728_v14 = vld [vmem:[%s7620_s29 + $0x4db8] sm:$0xff] }
 0x5b5   : > { %6716 = vmatpush1.msra.mxu1 %v2583_v33  ;;  %6678 = vmatprep.subr.mxu0 %v2516_v49  ;;  %v2663_v26 = vld [vmem:[%s7620_s29 + $0x4bb0] sm:$0xff]  ;;  %v2660_v25 = vld [vmem:[%s7620_s29 + $0x4b98] sm:$0xff] }
 0x5b6   : > { %6717 = vmatprep.subr.mxu1 %v2580_v40  ;;  %6679 = vmatpush2.msra.mxu0 %v2515_v23  ;;  %v2724_v33 = vld [vmem:[%s7620_s29 + $0x4d98] sm:$0xff]  ;;  %v2659_v49 = vld [vmem:[%s7620_s29 + $0x4b90] sm:$0xff] }
 0x5b7   : > { %6718 = vmatpush1.msra.mxu1 %v2579_v24  ;;  %6680 = vmatprep.subr.mxu0 %v2512_v15  ;;  %v2723_v40 = vld [vmem:[%s7620_s29 + $0x4d90] sm:$0xff]  ;;  %v2656_v23 = vld [vmem:[%s7620_s29 + $0x4b78] sm:$0xff] }
 0x5b8   : > { %6719 = vmatprep.subr.mxu1 %v2576_v7  ;;  %6681 = vmatpush2.msra.mxu0 %v2511_v39  ;;  %v2720_v24 = vld [vmem:[%s7620_s29 + $0x4d78] sm:$0xff]  ;;  %v2655_v15 = vld [vmem:[%s7620_s29 + $0x4b70] sm:$0xff] }
 0x5b9   : > { %6720 = vmatpush1.msra.mxu1 %v2575_v12  ;;  %6682 = vmatprep.subr.mxu0 %v2508_v28  ;;  %v2719_v7 = vld [vmem:[%s7620_s29 + $0x4d70] sm:$0xff]  ;;  %v2652_v39 = vld [vmem:[%s7620_s29 + $0x4b58] sm:$0xff] }
 0x5ba   : > { %6721 = vmatprep.subr.mxu1 %v2572_v43  ;;  %6683 = vmatpush2.msra.mxu0 %v2507_v35  ;;  %v2716_v12 = vld [vmem:[%s7620_s29 + $0x4d58] sm:$0xff]  ;;  %v2651_v28 = vld [vmem:[%s7620_s29 + $0x4b50] sm:$0xff] }
 0x5bb   : > { %6722 = vmatpush1.msra.mxu1 %v2571_v45  ;;  %6684 = vmatprep.subr.mxu0 %v2504_v20  ;;  %v2715_v43 = vld [vmem:[%s7620_s29 + $0x4d50] sm:$0xff]  ;;  %v2648_v35 = vld [vmem:[%s7620_s29 + $0x4b38] sm:$0xff] }
 0x5bc   : > { %6723 = vmatprep.subr.mxu1 %v2568_v21  ;;  %6685 = vmatpush2.msra.mxu0 %v2503_v46  ;;  %v2712_v45 = vld [vmem:[%s7620_s29 + $0x4d38] sm:$0xff]  ;;  %v2647_v20 = vld [vmem:[%s7620_s29 + $0x4b30] sm:$0xff] }
 0x5bd   : > { %6724 = vmatpush1.msra.mxu1 %v2567_v19  ;;  %6686 = vmatprep.subr.mxu0 %v2500_v29  ;;  %v2711_v21 = vld [vmem:[%s7620_s29 + $0x4d30] sm:$0xff]  ;;  %v2644_v46 = vld [vmem:[%s7620_s29 + $0x4b18] sm:$0xff] }
 0x5be   : > { %6725 = vmatprep.subr.mxu1 %v2564_v36  ;;  %6687 = vmatpush2.msra.mxu0 %v2499_v50  ;;  %v2708_v19 = vld [vmem:[%s7620_s29 + $0x4d18] sm:$0xff]  ;;  %v2643_v29 = vld [vmem:[%s7620_s29 + $0x4b10] sm:$0xff] }
 0x5bf   : > { %6726 = vmatpush1.msra.mxu1 %v2563_v0  ;;  %6688 = vmatprep.subr.mxu0 %v2496_v54  ;;  %v2707_v36 = vld [vmem:[%s7620_s29 + $0x4d10] sm:$0xff]  ;;  %v2640_v50 = vld [vmem:[%s7620_s29 + $0x4af8] sm:$0xff] }
 0x5c0   : > { %6727 = vmatprep.subr.mxu1 %v2560_v18  ;;  %6689 = vmatpush2.msra.mxu0 %v2495_v16  ;;  %v2704_v0 = vld [vmem:[%s7620_s29 + $0x4cf8] sm:$0xff]  ;;  %v2639_v54 = vld [vmem:[%s7620_s29 + $0x4af0] sm:$0xff] }
 0x5c1   : > { %6728 = vmatpush1.msra.mxu1 %v2559_v10  ;;  %6690 = vmatprep.subr.mxu0 %v2492_v56  ;;  %v2703_v18 = vld [vmem:[%s7620_s29 + $0x4cf0] sm:$0xff]  ;;  %v2636_v16 = vld [vmem:[%s7620_s29 + $0x4ad8] sm:$0xff] }
 0x5c2   : > { %6729 = vmatprep.subr.mxu1 %v2556_v4  ;;  %6691 = vmatpush2.msra.mxu0 %v2491_v57  ;;  %v2700_v10 = vld [vmem:[%s7620_s29 + $0x4cd8] sm:$0xff]  ;;  %v2635_v56 = vld [vmem:[%s7620_s29 + $0x4ad0] sm:$0xff] }
 0x5c3   : > { %6730 = vmatpush1.msra.mxu1 %v2555_v61  ;;  %6692 = vmatprep.subr.mxu0 %v2488_v47  ;;  %v2699_v4 = vld [vmem:[%s7620_s29 + $0x4cd0] sm:$0xff]  ;;  %v2632_v57 = vld [vmem:[%s7620_s29 + $0x4ab8] sm:$0xff] }
 0x5c4   : > { %6731 = vmatprep.subr.mxu1 %v2552_v11  ;;  %6693 = vmatpush2.msra.mxu0 %v2487_v60  ;;  %v2696_v61 = vld [vmem:[%s7620_s29 + $0x4cb8] sm:$0xff]  ;;  %v2631_v47 = vld [vmem:[%s7620_s29 + $0x4ab0] sm:$0xff] }
 0x5c5   : > { %6732 = vmatpush1.msra.mxu1 %v2551_v27  ;;  %6694 = vmatprep.subr.mxu0 %v2484_v1  ;;  %v2695_v11 = vld [vmem:[%s7620_s29 + $0x4cb0] sm:$0xff]  ;;  %v2628_v60 = vld [vmem:[%s7620_s29 + $0x4a98] sm:$0xff] }
 0x5c6   : > { %6733 = vmatprep.subr.mxu1 %v2548_v2  ;;  %6695 = vmatpush2.msra.mxu0 %v2483_v42  ;;  %v2692_v27 = vld [vmem:[%s7620_s29 + $0x4c98] sm:$0xff]  ;;  %v2627_v1 = vld [vmem:[%s7620_s29 + $0x4a90] sm:$0xff] }
 0x5c7   : > { %6696 = vmatprep.mubr.f32.mxu0 %v8961_v51  ;;  %6734 = vmatpush1.msra.mxu1 %v2547_v52  ;;  %v2664_v51 = vld [vmem:[%s7620_s29 + $0x4bb8] sm:$0xff]  ;;  %v2691_v2 = vld [vmem:[%s7620_s29 + $0x4c90] sm:$0xff] }
 0x5c8   : > { %6697 = vmatmul.mubr.f32.vlgmr.msra.gmra.mxu0 %v8947_v38  ;;  %6735 = vmatprep.subr.mxu1 %v2672_v9  ;;  %v2727_v38 = vld [vmem:[%s7620_s29 + $0x4db0] sm:$0xff]  ;;  %v2624_v42 = vld [vmem:[%s7620_s29 + $0x4a78] sm:$0xff] }
 0x5c9   : > { %6774 = vmatprep.subr.mxu0 %v2736_v31  ;;  %6736 = vmatpush2.msra.mxu1 %v2671_v32  ;;  %v2688_v52 = vld [vmem:[%s7620_s29 + $0x4c78] sm:$0xff]  ;;  %v2623_v9 = vld [vmem:[%s7620_s29 + $0x4a70] sm:$0xff] }
 0x5ca   : > { %6775 = vmatpush1.msra.mxu0 %v2735_v5  ;;  %6737 = vmatprep.subr.mxu1 %v2668_v44  ;;  %v2687_v31 = vld [vmem:[%s7620_s29 + $0x4c70] sm:$0xff]  ;;  %v2620_v32 = vld [vmem:[%s7620_s29 + $0x4a58] sm:$0xff] }
 0x5cb   : > { %6776 = vmatprep.subr.mxu0 %v2732_v6  ;;  %6738 = vmatpush2.msra.mxu1 %v2667_v8  ;;  %v2684_v5 = vld [vmem:[%s7620_s29 + $0x4c58] sm:$0xff]  ;;  %v2619_v44 = vld [vmem:[%s7620_s29 + $0x4a50] sm:$0xff] }
 0x5cc   : > { %6777 = vmatpush1.msra.mxu0 %v2731_v63  ;;  %6739 = vmatprep.subr.mxu1 %v2664_v51  ;;  %v2683_v6 = vld [vmem:[%s7620_s29 + $0x4c50] sm:$0xff]  ;;  %v2616_v8 = vld [vmem:[%s7620_s29 + $0x4a38] sm:$0xff] }
 0x5cd   : > { %6778 = vmatprep.subr.mxu0 %v2728_v14  ;;  %6740 = vmatpush2.msra.mxu1 %v2663_v26  ;;  %v2680_v63 = vld [vmem:[%s7620_s29 + $0x4c38] sm:$0xff]  ;;  %v2615_v51 = vld [vmem:[%s7620_s29 + $0x4a30] sm:$0xff] }
 0x5ce   : > { %6779 = vmatpush1.msra.mxu0 %v2727_v38  ;;  %6741 = vmatprep.subr.mxu1 %v2660_v25  ;;  %v2679_v14 = vld [vmem:[%s7620_s29 + $0x4c30] sm:$0xff]  ;;  %v2612_v26 = vld [vmem:[%s7620_s29 + $0x4a18] sm:$0xff] }
 0x5cf   : > { %6780 = vmatprep.subr.mxu0 %v2724_v33  ;;  %6742 = vmatpush2.msra.mxu1 %v2659_v49  ;;  %v2676_v38 = vld [vmem:[%s7620_s29 + $0x4c18] sm:$0xff]  ;;  %v2611_v25 = vld [vmem:[%s7620_s29 + $0x4a10] sm:$0xff] }
 0x5d0   : > { %6781 = vmatpush1.msra.mxu0 %v2723_v40  ;;  %6743 = vmatprep.subr.mxu1 %v2656_v23  ;;  %v2675_v33 = vld [vmem:[%s7620_s29 + $0x4c10] sm:$0xff]  ;;  %v2800_v49 = vld [vmem:[%s7620_s29 + $0x4ff8] sm:$0xff] }
 0x5d1   : > { %6782 = vmatprep.subr.mxu0 %v2720_v24  ;;  %6744 = vmatpush2.msra.mxu1 %v2655_v15  ;;  %v2864_v40 = vld [vmem:[%s7620_s29 + $0x51f8] sm:$0xff]  ;;  %v2799_v23 = vld [vmem:[%s7620_s29 + $0x4ff0] sm:$0xff] }
 0x5d2   : > { %6783 = vmatpush1.msra.mxu0 %v2719_v7  ;;  %6745 = vmatprep.subr.mxu1 %v2652_v39  ;;  %v2863_v24 = vld [vmem:[%s7620_s29 + $0x51f0] sm:$0xff]  ;;  %v2796_v15 = vld [vmem:[%s7620_s29 + $0x4fd8] sm:$0xff] }
 0x5d3   : > { %6784 = vmatprep.subr.mxu0 %v2716_v12  ;;  %6746 = vmatpush2.msra.mxu1 %v2651_v28  ;;  %v2860_v7 = vld [vmem:[%s7620_s29 + $0x51d8] sm:$0xff]  ;;  %v2795_v39 = vld [vmem:[%s7620_s29 + $0x4fd0] sm:$0xff] }
 0x5d4   : > { %6785 = vmatpush1.msra.mxu0 %v2715_v43  ;;  %6747 = vmatprep.subr.mxu1 %v2648_v35  ;;  %v2859_v12 = vld [vmem:[%s7620_s29 + $0x51d0] sm:$0xff]  ;;  %v2856_v28 = vld [vmem:[%s7620_s29 + $0x51b8] sm:$0xff] }
 0x5d5   : > { %6786 = vmatprep.subr.mxu0 %v2712_v45  ;;  %6748 = vmatpush2.msra.mxu1 %v2647_v20  ;;  %v2791_v43 = vld [vmem:[%s7620_s29 + $0x4fb0] sm:$0xff]  ;;  %v2788_v35 = vld [vmem:[%s7620_s29 + $0x4f98] sm:$0xff] }
 0x5d6   : > { %6787 = vmatpush1.msra.mxu0 %v2711_v21  ;;  %6749 = vmatprep.subr.mxu1 %v2644_v46  ;;  %v2852_v45 = vld [vmem:[%s7620_s29 + $0x5198] sm:$0xff]  ;;  %v2787_v20 = vld [vmem:[%s7620_s29 + $0x4f90] sm:$0xff] }
 0x5d7   : > { %6788 = vmatprep.subr.mxu0 %v2708_v19  ;;  %6750 = vmatpush2.msra.mxu1 %v2643_v29  ;;  %v2851_v21 = vld [vmem:[%s7620_s29 + $0x5190] sm:$0xff]  ;;  %v2784_v46 = vld [vmem:[%s7620_s29 + $0x4f78] sm:$0xff] }
 0x5d8   : > { %6789 = vmatpush1.msra.mxu0 %v2707_v36  ;;  %6751 = vmatprep.subr.mxu1 %v2640_v50  ;;  %v2848_v19 = vld [vmem:[%s7620_s29 + $0x5178] sm:$0xff]  ;;  %v2783_v29 = vld [vmem:[%s7620_s29 + $0x4f70] sm:$0xff] }
 0x5d9   : > { %6790 = vmatprep.subr.mxu0 %v2704_v0  ;;  %6752 = vmatpush2.msra.mxu1 %v2639_v54  ;;  %v2847_v36 = vld [vmem:[%s7620_s29 + $0x5170] sm:$0xff]  ;;  %v2780_v50 = vld [vmem:[%s7620_s29 + $0x4f58] sm:$0xff] }
 0x5da   : > { %6791 = vmatpush1.msra.mxu0 %v2703_v18  ;;  %6753 = vmatprep.subr.mxu1 %v2636_v16  ;;  %v2844_v0 = vld [vmem:[%s7620_s29 + $0x5158] sm:$0xff]  ;;  %v2779_v54 = vld [vmem:[%s7620_s29 + $0x4f50] sm:$0xff] }
 0x5db   : > { %6792 = vmatprep.subr.mxu0 %v2700_v10  ;;  %6754 = vmatpush2.msra.mxu1 %v2635_v56  ;;  %v2843_v18 = vld [vmem:[%s7620_s29 + $0x5150] sm:$0xff]  ;;  %v2776_v16 = vld [vmem:[%s7620_s29 + $0x4f38] sm:$0xff] }
 0x5dc   : > { %6793 = vmatpush1.msra.mxu0 %v2699_v4  ;;  %6755 = vmatprep.subr.mxu1 %v2632_v57  ;;  %v2840_v10 = vld [vmem:[%s7620_s29 + $0x5138] sm:$0xff]  ;;  %v2775_v56 = vld [vmem:[%s7620_s29 + $0x4f30] sm:$0xff] }
 0x5dd   : > { %6794 = vmatprep.subr.mxu0 %v2696_v61  ;;  %6756 = vmatpush2.msra.mxu1 %v2631_v47  ;;  %v2839_v4 = vld [vmem:[%s7620_s29 + $0x5130] sm:$0xff]  ;;  %v2772_v57 = vld [vmem:[%s7620_s29 + $0x4f18] sm:$0xff] }
 0x5de   : > { %6795 = vmatpush1.msra.mxu0 %v2695_v11  ;;  %6757 = vmatprep.subr.mxu1 %v2628_v60  ;;  %v2836_v61 = vld [vmem:[%s7620_s29 + $0x5118] sm:$0xff]  ;;  %v2771_v47 = vld [vmem:[%s7620_s29 + $0x4f10] sm:$0xff] }
 0x5df   : > { %6796 = vmatprep.subr.mxu0 %v2692_v27  ;;  %6758 = vmatpush2.msra.mxu1 %v2627_v1  ;;  %v2835_v11 = vld [vmem:[%s7620_s29 + $0x5110] sm:$0xff]  ;;  %v2768_v60 = vld [vmem:[%s7620_s29 + $0x4ef8] sm:$0xff] }
 0x5e0   : > { %6797 = vmatpush1.msra.mxu0 %v2691_v2  ;;  %6759 = vmatprep.subr.mxu1 %v2624_v42  ;;  %v2832_v27 = vld [vmem:[%s7620_s29 + $0x50f8] sm:$0xff]  ;;  %v2767_v1 = vld [vmem:[%s7620_s29 + $0x4ef0] sm:$0xff] }
 0x5e1   : > { %6798 = vmatprep.subr.mxu0 %v2688_v52  ;;  %6760 = vmatpush2.msra.mxu1 %v2623_v9  ;;  %v2831_v2 = vld [vmem:[%s7620_s29 + $0x50f0] sm:$0xff]  ;;  %v2764_v42 = vld [vmem:[%s7620_s29 + $0x4ed8] sm:$0xff] }
 0x5e2   : > { %6799 = vmatpush1.msra.mxu0 %v2687_v31  ;;  %6761 = vmatprep.subr.mxu1 %v2620_v32  ;;  %v2828_v52 = vld [vmem:[%s7620_s29 + $0x50d8] sm:$0xff]  ;;  %v2763_v9 = vld [vmem:[%s7620_s29 + $0x4ed0] sm:$0xff] }
 0x5e3   : > { %6800 = vmatprep.subr.mxu0 %v2684_v5  ;;  %6762 = vmatpush2.msra.mxu1 %v2619_v44  ;;  %v2827_v31 = vld [vmem:[%s7620_s29 + $0x50d0] sm:$0xff]  ;;  %v2760_v32 = vld [vmem:[%s7620_s29 + $0x4eb8] sm:$0xff] }
 0x5e4   : > { %6801 = vmatpush1.msra.mxu0 %v2683_v6  ;;  %6763 = vmatprep.subr.mxu1 %v2616_v8  ;;  %v2824_v5 = vld [vmem:[%s7620_s29 + $0x50b8] sm:$0xff]  ;;  %v2759_v44 = vld [vmem:[%s7620_s29 + $0x4eb0] sm:$0xff] }
 0x5e5   : > { %6802 = vmatprep.subr.mxu0 %v2680_v63  ;;  %6764 = vmatpush2.msra.mxu1 %v2615_v51  ;;  %v2823_v6 = vld [vmem:[%s7620_s29 + $0x50b0] sm:$0xff]  ;;  %v2756_v8 = vld [vmem:[%s7620_s29 + $0x4e98] sm:$0xff] }
 0x5e6   : > { %6803 = vmatpush1.msra.mxu0 %v2679_v14  ;;  %6765 = vmatprep.subr.mxu1 %v2612_v26  ;;  %v2820_v63 = vld [vmem:[%s7620_s29 + $0x5098] sm:$0xff]  ;;  %v2755_v51 = vld [vmem:[%s7620_s29 + $0x4e90] sm:$0xff] }
 0x5e7   : > { %6804 = vmatprep.subr.mxu0 %v2676_v38  ;;  %6766 = vmatpush2.msra.mxu1 %v2611_v25  ;;  %v2819_v14 = vld [vmem:[%s7620_s29 + $0x5090] sm:$0xff]  ;;  %v2752_v26 = vld [vmem:[%s7620_s29 + $0x4e78] sm:$0xff] }
 0x5e8   : > { %6767 = vmatprep.mubr.f32.mxu1 %v9102_v41  ;;  %6805 = vmatpush1.msra.mxu0 %v2675_v33  ;;  %v2792_v41 = vld [vmem:[%s7620_s29 + $0x4fb8] sm:$0xff]  ;;  %v2751_v25 = vld [vmem:[%s7620_s29 + $0x4e70] sm:$0xff] }
 0x5e9   : > { %6768 = vmatmul.mubr.f32.vlgmr.msra.gmra.mxu1 %v9087_v13  ;;  %6806 = vmatprep.subr.mxu0 %v2800_v49  ;;  %v2855_v13 = vld [vmem:[%s7620_s29 + $0x51b0] sm:$0xff]  ;;  %v2816_v38 = vld [vmem:[%s7620_s29 + $0x5078] sm:$0xff] }
 0x5ea   : > { %6845 = vmatprep.subr.mxu1 %v2864_v40  ;;  %6807 = vmatpush2.msra.mxu0 %v2799_v23  ;;  %v2815_v33 = vld [vmem:[%s7620_s29 + $0x5070] sm:$0xff]  ;;  %v2748_v49 = vld [vmem:[%s7620_s29 + $0x4e58] sm:$0xff] }
 0x5eb   : > { %6846 = vmatpush1.msra.mxu1 %v2863_v24  ;;  %6808 = vmatprep.subr.mxu0 %v2796_v15  ;;  %v2812_v40 = vld [vmem:[%s7620_s29 + $0x5058] sm:$0xff]  ;;  %v2747_v23 = vld [vmem:[%s7620_s29 + $0x4e50] sm:$0xff] }
 0x5ec   : > { %6847 = vmatprep.subr.mxu1 %v2860_v7  ;;  %6809 = vmatpush2.msra.mxu0 %v2795_v39  ;;  %v2811_v24 = vld [vmem:[%s7620_s29 + $0x5050] sm:$0xff]  ;;  %v2744_v15 = vld [vmem:[%s7620_s29 + $0x4e38] sm:$0xff] }
 0x5ed   : > { %6848 = vmatpush1.msra.mxu1 %v2859_v12  ;;  %6810 = vmatprep.subr.mxu0 %v2792_v41  ;;  %v2808_v7 = vld [vmem:[%s7620_s29 + $0x5038] sm:$0xff]  ;;  %v2743_v39 = vld [vmem:[%s7620_s29 + $0x4e30] sm:$0xff] }
 0x5ee   : > { %6849 = vmatprep.subr.mxu1 %v2856_v28  ;;  %6811 = vmatpush2.msra.mxu0 %v2791_v43  ;;  %v2807_v12 = vld [vmem:[%s7620_s29 + $0x5030] sm:$0xff]  ;;  %v2740_v41 = vld [vmem:[%s7620_s29 + $0x4e18] sm:$0xff] }
 0x5ef   : > { %6850 = vmatpush1.msra.mxu1 %v2855_v13  ;;  %6812 = vmatprep.subr.mxu0 %v2788_v35  ;;  %v2804_v28 = vld [vmem:[%s7620_s29 + $0x5018] sm:$0xff]  ;;  %v2739_v43 = vld [vmem:[%s7620_s29 + $0x4e10] sm:$0xff] }
 0x5f0   : > { %6851 = vmatprep.subr.mxu1 %v2852_v45  ;;  %6813 = vmatpush2.msra.mxu0 %v2787_v20  ;;  %v2803_v13 = vld [vmem:[%s7620_s29 + $0x5010] sm:$0xff]  ;;  %v2928_v35 = vld [vmem:[%s7620_s29 + $0x53f8] sm:$0xff] }
 0x5f1   : > { %6852 = vmatpush1.msra.mxu1 %v2851_v21  ;;  %6814 = vmatprep.subr.mxu0 %v2784_v46  ;;  %v2992_v45 = vld [vmem:[%s7620_s29 + $0x55f8] sm:$0xff]  ;;  %v2927_v20 = vld [vmem:[%s7620_s29 + $0x53f0] sm:$0xff] }
 0x5f2   : > { %6853 = vmatprep.subr.mxu1 %v2848_v19  ;;  %6815 = vmatpush2.msra.mxu0 %v2783_v29  ;;  %v2991_v21 = vld [vmem:[%s7620_s29 + $0x55f0] sm:$0xff]  ;;  %v2924_v46 = vld [vmem:[%s7620_s29 + $0x53d8] sm:$0xff] }
 0x5f3   : > { %6854 = vmatpush1.msra.mxu1 %v2847_v36  ;;  %6816 = vmatprep.subr.mxu0 %v2780_v50  ;;  %v2988_v19 = vld [vmem:[%s7620_s29 + $0x55d8] sm:$0xff]  ;;  %v2923_v29 = vld [vmem:[%s7620_s29 + $0x53d0] sm:$0xff] }
 0x5f4   : > { %6855 = vmatprep.subr.mxu1 %v2844_v0  ;;  %6817 = vmatpush2.msra.mxu0 %v2779_v54  ;;  %v2987_v36 = vld [vmem:[%s7620_s29 + $0x55d0] sm:$0xff]  ;;  %v2984_v50 = vld [vmem:[%s7620_s29 + $0x55b8] sm:$0xff] }
 0x5f5   : > { %6856 = vmatpush1.msra.mxu1 %v2843_v18  ;;  %6818 = vmatprep.subr.mxu0 %v2776_v16  ;;  %v2919_v0 = vld [vmem:[%s7620_s29 + $0x53b0] sm:$0xff]  ;;  %v2916_v54 = vld [vmem:[%s7620_s29 + $0x5398] sm:$0xff] }
 0x5f6   : > { %6857 = vmatprep.subr.mxu1 %v2840_v10  ;;  %6819 = vmatpush2.msra.mxu0 %v2775_v56  ;;  %v2980_v18 = vld [vmem:[%s7620_s29 + $0x5598] sm:$0xff]  ;;  %v2915_v16 = vld [vmem:[%s7620_s29 + $0x5390] sm:$0xff] }
 0x5f7   : > { %6858 = vmatpush1.msra.mxu1 %v2839_v4  ;;  %6820 = vmatprep.subr.mxu0 %v2772_v57  ;;  %v2979_v10 = vld [vmem:[%s7620_s29 + $0x5590] sm:$0xff]  ;;  %v2912_v56 = vld [vmem:[%s7620_s29 + $0x5378] sm:$0xff] }
 0x5f8   : > { %6859 = vmatprep.subr.mxu1 %v2836_v61  ;;  %6821 = vmatpush2.msra.mxu0 %v2771_v47  ;;  %v2976_v4 = vld [vmem:[%s7620_s29 + $0x5578] sm:$0xff]  ;;  %v2911_v57 = vld [vmem:[%s7620_s29 + $0x5370] sm:$0xff] }
 0x5f9   : > { %6860 = vmatpush1.msra.mxu1 %v2835_v11  ;;  %6822 = vmatprep.subr.mxu0 %v2768_v60  ;;  %v2975_v61 = vld [vmem:[%s7620_s29 + $0x5570] sm:$0xff]  ;;  %v2908_v47 = vld [vmem:[%s7620_s29 + $0x5358] sm:$0xff] }
 0x5fa   : > { %6861 = vmatprep.subr.mxu1 %v2832_v27  ;;  %6823 = vmatpush2.msra.mxu0 %v2767_v1  ;;  %v2972_v11 = vld [vmem:[%s7620_s29 + $0x5558] sm:$0xff]  ;;  %v2907_v60 = vld [vmem:[%s7620_s29 + $0x5350] sm:$0xff] }
 0x5fb   : > { %6862 = vmatpush1.msra.mxu1 %v2831_v2  ;;  %6824 = vmatprep.subr.mxu0 %v2764_v42  ;;  %v2971_v27 = vld [vmem:[%s7620_s29 + $0x5550] sm:$0xff]  ;;  %v2904_v1 = vld [vmem:[%s7620_s29 + $0x5338] sm:$0xff] }
 0x5fc   : > { %6863 = vmatprep.subr.mxu1 %v2828_v52  ;;  %6825 = vmatpush2.msra.mxu0 %v2763_v9  ;;  %v2968_v2 = vld [vmem:[%s7620_s29 + $0x5538] sm:$0xff]  ;;  %v2903_v42 = vld [vmem:[%s7620_s29 + $0x5330] sm:$0xff] }
 0x5fd   : > { %6864 = vmatpush1.msra.mxu1 %v2827_v31  ;;  %6826 = vmatprep.subr.mxu0 %v2760_v32  ;;  %v2967_v52 = vld [vmem:[%s7620_s29 + $0x5530] sm:$0xff]  ;;  %v2900_v9 = vld [vmem:[%s7620_s29 + $0x5318] sm:$0xff] }
 0x5fe   : > { %6865 = vmatprep.subr.mxu1 %v2824_v5  ;;  %6827 = vmatpush2.msra.mxu0 %v2759_v44  ;;  %v2964_v31 = vld [vmem:[%s7620_s29 + $0x5518] sm:$0xff]  ;;  %v2899_v32 = vld [vmem:[%s7620_s29 + $0x5310] sm:$0xff] }
 0x5ff   : > { %6866 = vmatpush1.msra.mxu1 %v2823_v6  ;;  %6828 = vmatprep.subr.mxu0 %v2756_v8  ;;  %v2963_v5 = vld [vmem:[%s7620_s29 + $0x5510] sm:$0xff]  ;;  %v2896_v44 = vld [vmem:[%s7620_s29 + $0x52f8] sm:$0xff] }
 0x600   : > { %6867 = vmatprep.subr.mxu1 %v2820_v63  ;;  %6829 = vmatpush2.msra.mxu0 %v2755_v51  ;;  %v2960_v6 = vld [vmem:[%s7620_s29 + $0x54f8] sm:$0xff]  ;;  %v2895_v8 = vld [vmem:[%s7620_s29 + $0x52f0] sm:$0xff] }
 0x601   : > { %6868 = vmatpush1.msra.mxu1 %v2819_v14  ;;  %6830 = vmatprep.subr.mxu0 %v2752_v26  ;;  %v2959_v63 = vld [vmem:[%s7620_s29 + $0x54f0] sm:$0xff]  ;;  %v2892_v51 = vld [vmem:[%s7620_s29 + $0x52d8] sm:$0xff] }
 0x602   : > { %6869 = vmatprep.subr.mxu1 %v2816_v38  ;;  %6831 = vmatpush2.msra.mxu0 %v2751_v25  ;;  %v2956_v14 = vld [vmem:[%s7620_s29 + $0x54d8] sm:$0xff]  ;;  %v2891_v26 = vld [vmem:[%s7620_s29 + $0x52d0] sm:$0xff] }
 0x603   : > { %6870 = vmatpush1.msra.mxu1 %v2815_v33  ;;  %6832 = vmatprep.subr.mxu0 %v2748_v49  ;;  %v2955_v38 = vld [vmem:[%s7620_s29 + $0x54d0] sm:$0xff]  ;;  %v2888_v25 = vld [vmem:[%s7620_s29 + $0x52b8] sm:$0xff] }
 0x604   : > { %6871 = vmatprep.subr.mxu1 %v2812_v40  ;;  %6833 = vmatpush2.msra.mxu0 %v2747_v23  ;;  %v2952_v33 = vld [vmem:[%s7620_s29 + $0x54b8] sm:$0xff]  ;;  %v2887_v49 = vld [vmem:[%s7620_s29 + $0x52b0] sm:$0xff] }
 0x605   : > { %6872 = vmatpush1.msra.mxu1 %v2811_v24  ;;  %6834 = vmatprep.subr.mxu0 %v2744_v15  ;;  %v2951_v40 = vld [vmem:[%s7620_s29 + $0x54b0] sm:$0xff]  ;;  %v2884_v23 = vld [vmem:[%s7620_s29 + $0x5298] sm:$0xff] }
 0x606   : > { %6873 = vmatprep.subr.mxu1 %v2808_v7  ;;  %6835 = vmatpush2.msra.mxu0 %v2743_v39  ;;  %v2948_v24 = vld [vmem:[%s7620_s29 + $0x5498] sm:$0xff]  ;;  %v2883_v15 = vld [vmem:[%s7620_s29 + $0x5290] sm:$0xff] }
 0x607   : > { %6874 = vmatpush1.msra.mxu1 %v2807_v12  ;;  %6836 = vmatprep.subr.mxu0 %v2740_v41  ;;  %v2947_v7 = vld [vmem:[%s7620_s29 + $0x5490] sm:$0xff]  ;;  %v2880_v39 = vld [vmem:[%s7620_s29 + $0x5278] sm:$0xff] }
 0x608   : > { %6875 = vmatprep.subr.mxu1 %v2804_v28  ;;  %6837 = vmatpush2.msra.mxu0 %v2739_v43  ;;  %v2944_v12 = vld [vmem:[%s7620_s29 + $0x5478] sm:$0xff]  ;;  %v2879_v41 = vld [vmem:[%s7620_s29 + $0x5270] sm:$0xff] }
 0x609   : > { %6838 = vmatprep.mubr.f32.mxu0 %v9108_v48  ;;  %6876 = vmatpush1.msra.mxu1 %v2803_v13  ;;  %v2920_v48 = vld [vmem:[%s7620_s29 + $0x53b8] sm:$0xff]  ;;  %v2943_v28 = vld [vmem:[%s7620_s29 + $0x5470] sm:$0xff] }
 0x60a   : > { %6839 = vmatmul.mubr.f32.vlgmr.msra.gmra.mxu0 %v9094_v30  ;;  %6877 = vmatprep.subr.mxu1 %v2928_v35  ;;  %v2983_v30 = vld [vmem:[%s7620_s29 + $0x55b0] sm:$0xff]  ;;  %v2876_v43 = vld [vmem:[%s7620_s29 + $0x5258] sm:$0xff] }
 0x60b   : > { %6916 = vmatprep.subr.mxu0 %v2992_v45  ;;  %6878 = vmatpush2.msra.mxu1 %v2927_v20  ;;  %v2940_v13 = vld [vmem:[%s7620_s29 + $0x5458] sm:$0xff]  ;;  %v2875_v35 = vld [vmem:[%s7620_s29 + $0x5250] sm:$0xff] }
 0x60c   : > { %6917 = vmatpush1.msra.mxu0 %v2991_v21  ;;  %6879 = vmatprep.subr.mxu1 %v2924_v46  ;;  %v2939_v45 = vld [vmem:[%s7620_s29 + $0x5450] sm:$0xff]  ;;  %v2872_v20 = vld [vmem:[%s7620_s29 + $0x5238] sm:$0xff] }
 0x60d   : > { %6918 = vmatprep.subr.mxu0 %v2988_v19  ;;  %6880 = vmatpush2.msra.mxu1 %v2923_v29  ;;  %v2936_v21 = vld [vmem:[%s7620_s29 + $0x5438] sm:$0xff]  ;;  %v2871_v46 = vld [vmem:[%s7620_s29 + $0x5230] sm:$0xff] }
 0x60e   : > { %6919 = vmatpush1.msra.mxu0 %v2987_v36  ;;  %6881 = vmatprep.subr.mxu1 %v2920_v48  ;;  %v2935_v19 = vld [vmem:[%s7620_s29 + $0x5430] sm:$0xff]  ;;  %v2868_v29 = vld [vmem:[%s7620_s29 + $0x5218] sm:$0xff] }
 0x60f   : > { %6920 = vmatprep.subr.mxu0 %v2984_v50  ;;  %6882 = vmatpush2.msra.mxu1 %v2919_v0  ;;  %v2932_v36 = vld [vmem:[%s7620_s29 + $0x5418] sm:$0xff]  ;;  %v2867_v48 = vld [vmem:[%s7620_s29 + $0x5210] sm:$0xff] }
 0x610   : > { %6921 = vmatpush1.msra.mxu0 %v2983_v30  ;;  %6883 = vmatprep.subr.mxu1 %v2916_v54  ;;  %v2931_v50 = vld [vmem:[%s7620_s29 + $0x5410] sm:$0xff]  ;;  %v3056_v0 = vld [vmem:[%s7620_s29 + $0x57f8] sm:$0xff] }
 0x611   : > { %6922 = vmatprep.subr.mxu0 %v2980_v18  ;;  %6884 = vmatpush2.msra.mxu1 %v2915_v16  ;;  %v3120_v30 = vld [vmem:[%s7620_s29 + $0x59f8] sm:$0xff]  ;;  %v3055_v54 = vld [vmem:[%s7620_s29 + $0x57f0] sm:$0xff] }
 0x612   : > { %6923 = vmatpush1.msra.mxu0 %v2979_v10  ;;  %6885 = vmatprep.subr.mxu1 %v2912_v56  ;;  %v3119_v18 = vld [vmem:[%s7620_s29 + $0x59f0] sm:$0xff]  ;;  %v3052_v16 = vld [vmem:[%s7620_s29 + $0x57d8] sm:$0xff] }
 0x613   : > { %6924 = vmatprep.subr.mxu0 %v2976_v4  ;;  %6886 = vmatpush2.msra.mxu1 %v2911_v57  ;;  %v3116_v10 = vld [vmem:[%s7620_s29 + $0x59d8] sm:$0xff]  ;;  %v3051_v56 = vld [vmem:[%s7620_s29 + $0x57d0] sm:$0xff] }
 0x614   : > { %6925 = vmatpush1.msra.mxu0 %v2975_v61  ;;  %6887 = vmatprep.subr.mxu1 %v2908_v47  ;;  %v3115_v4 = vld [vmem:[%s7620_s29 + $0x59d0] sm:$0xff]  ;;  %v3112_v57 = vld [vmem:[%s7620_s29 + $0x59b8] sm:$0xff] }
 0x615   : > { %6926 = vmatprep.subr.mxu0 %v2972_v11  ;;  %6888 = vmatpush2.msra.mxu1 %v2907_v60  ;;  %v3047_v61 = vld [vmem:[%s7620_s29 + $0x57b0] sm:$0xff]  ;;  %v3044_v47 = vld [vmem:[%s7620_s29 + $0x5798] sm:$0xff] }
 0x616   : > { %6927 = vmatpush1.msra.mxu0 %v2971_v27  ;;  %6889 = vmatprep.subr.mxu1 %v2904_v1  ;;  %v3108_v11 = vld [vmem:[%s7620_s29 + $0x5998] sm:$0xff]  ;;  %v3043_v60 = vld [vmem:[%s7620_s29 + $0x5790] sm:$0xff] }
 0x617   : > { %6928 = vmatprep.subr.mxu0 %v2968_v2  ;;  %6890 = vmatpush2.msra.mxu1 %v2903_v42  ;;  %v3107_v27 = vld [vmem:[%s7620_s29 + $0x5990] sm:$0xff]  ;;  %v3040_v1 = vld [vmem:[%s7620_s29 + $0x5778] sm:$0xff] }
 0x618   : > { %6929 = vmatpush1.msra.mxu0 %v2967_v52  ;;  %6891 = vmatprep.subr.mxu1 %v2900_v9  ;;  %v3104_v2 = vld [vmem:[%s7620_s29 + $0x5978] sm:$0xff]  ;;  %v3039_v42 = vld [vmem:[%s7620_s29 + $0x5770] sm:$0xff] }
 0x619   : > { %6930 = vmatprep.subr.mxu0 %v2964_v31  ;;  %6892 = vmatpush2.msra.mxu1 %v2899_v32  ;;  %v3103_v52 = vld [vmem:[%s7620_s29 + $0x5970] sm:$0xff]  ;;  %v3036_v9 = vld [vmem:[%s7620_s29 + $0x5758] sm:$0xff] }
 0x61a   : > { %6931 = vmatpush1.msra.mxu0 %v2963_v5  ;;  %6893 = vmatprep.subr.mxu1 %v2896_v44  ;;  %v3100_v31 = vld [vmem:[%s7620_s29 + $0x5958] sm:$0xff]  ;;  %v3035_v32 = vld [vmem:[%s7620_s29 + $0x5750] sm:$0xff] }
 0x61b   : > { %6932 = vmatprep.subr.mxu0 %v2960_v6  ;;  %6894 = vmatpush2.msra.mxu1 %v2895_v8  ;;  %v3099_v5 = vld [vmem:[%s7620_s29 + $0x5950] sm:$0xff]  ;;  %v3032_v44 = vld [vmem:[%s7620_s29 + $0x5738] sm:$0xff] }
 0x61c   : > { %6933 = vmatpush1.msra.mxu0 %v2959_v63  ;;  %6895 = vmatprep.subr.mxu1 %v2892_v51  ;;  %v3096_v6 = vld [vmem:[%s7620_s29 + $0x5938] sm:$0xff]  ;;  %v3031_v8 = vld [vmem:[%s7620_s29 + $0x5730] sm:$0xff] }
 0x61d   : > { %6934 = vmatprep.subr.mxu0 %v2956_v14  ;;  %6896 = vmatpush2.msra.mxu1 %v2891_v26  ;;  %v3095_v63 = vld [vmem:[%s7620_s29 + $0x5930] sm:$0xff]  ;;  %v3028_v51 = vld [vmem:[%s7620_s29 + $0x5718] sm:$0xff] }
 0x61e   : > { %6935 = vmatpush1.msra.mxu0 %v2955_v38  ;;  %6897 = vmatprep.subr.mxu1 %v2888_v25  ;;  %v3092_v14 = vld [vmem:[%s7620_s29 + $0x5918] sm:$0xff]  ;;  %v3027_v26 = vld [vmem:[%s7620_s29 + $0x5710] sm:$0xff] }
 0x61f   : > { %6936 = vmatprep.subr.mxu0 %v2952_v33  ;;  %6898 = vmatpush2.msra.mxu1 %v2887_v49  ;;  %v3091_v38 = vld [vmem:[%s7620_s29 + $0x5910] sm:$0xff]  ;;  %v3024_v25 = vld [vmem:[%s7620_s29 + $0x56f8] sm:$0xff] }
 0x620   : > { %6937 = vmatpush1.msra.mxu0 %v2951_v40  ;;  %6899 = vmatprep.subr.mxu1 %v2884_v23  ;;  %v3088_v33 = vld [vmem:[%s7620_s29 + $0x58f8] sm:$0xff]  ;;  %v3023_v49 = vld [vmem:[%s7620_s29 + $0x56f0] sm:$0xff] }
 0x621   : > { %6938 = vmatprep.subr.mxu0 %v2948_v24  ;;  %6900 = vmatpush2.msra.mxu1 %v2883_v15  ;;  %v3087_v40 = vld [vmem:[%s7620_s29 + $0x58f0] sm:$0xff]  ;;  %v3020_v23 = vld [vmem:[%s7620_s29 + $0x56d8] sm:$0xff] }
 0x622   : > { %6939 = vmatpush1.msra.mxu0 %v2947_v7  ;;  %6901 = vmatprep.subr.mxu1 %v2880_v39  ;;  %v3084_v24 = vld [vmem:[%s7620_s29 + $0x58d8] sm:$0xff]  ;;  %v3019_v15 = vld [vmem:[%s7620_s29 + $0x56d0] sm:$0xff] }
 0x623   : > { %6940 = vmatprep.subr.mxu0 %v2944_v12  ;;  %6902 = vmatpush2.msra.mxu1 %v2879_v41  ;;  %v3083_v7 = vld [vmem:[%s7620_s29 + $0x58d0] sm:$0xff]  ;;  %v3016_v39 = vld [vmem:[%s7620_s29 + $0x56b8] sm:$0xff] }
 0x624   : > { %6941 = vmatpush1.msra.mxu0 %v2943_v28  ;;  %6903 = vmatprep.subr.mxu1 %v2876_v43  ;;  %v3080_v12 = vld [vmem:[%s7620_s29 + $0x58b8] sm:$0xff]  ;;  %v3015_v41 = vld [vmem:[%s7620_s29 + $0x56b0] sm:$0xff] }
 0x625   : > { %6942 = vmatprep.subr.mxu0 %v2940_v13  ;;  %6904 = vmatpush2.msra.mxu1 %v2875_v35  ;;  %v3079_v28 = vld [vmem:[%s7620_s29 + $0x58b0] sm:$0xff]  ;;  %v3012_v43 = vld [vmem:[%s7620_s29 + $0x5698] sm:$0xff] }
 0x626   : > { %6943 = vmatpush1.msra.mxu0 %v2939_v45  ;;  %6905 = vmatprep.subr.mxu1 %v2872_v20  ;;  %v3076_v13 = vld [vmem:[%s7620_s29 + $0x5898] sm:$0xff]  ;;  %v3011_v35 = vld [vmem:[%s7620_s29 + $0x5690] sm:$0xff] }
 0x627   : > { %6944 = vmatprep.subr.mxu0 %v2936_v21  ;;  %6906 = vmatpush2.msra.mxu1 %v2871_v46  ;;  %v3075_v45 = vld [vmem:[%s7620_s29 + $0x5890] sm:$0xff]  ;;  %v3008_v20 = vld [vmem:[%s7620_s29 + $0x5678] sm:$0xff] }
 0x628   : > { %6945 = vmatpush1.msra.mxu0 %v2935_v19  ;;  %6907 = vmatprep.subr.mxu1 %v2868_v29  ;;  %v3072_v21 = vld [vmem:[%s7620_s29 + $0x5878] sm:$0xff]  ;;  %v3007_v46 = vld [vmem:[%s7620_s29 + $0x5670] sm:$0xff] }
 0x629   : > { %6946 = vmatprep.subr.mxu0 %v2932_v36  ;;  %6908 = vmatpush2.msra.mxu1 %v2867_v48  ;;  %v3071_v19 = vld [vmem:[%s7620_s29 + $0x5870] sm:$0xff]  ;;  %v3004_v29 = vld [vmem:[%s7620_s29 + $0x5658] sm:$0xff] }
 0x62a   : > { %6909 = vmatprep.mubr.f32.mxu1 %v9249_v22  ;;  %6947 = vmatpush1.msra.mxu0 %v2931_v50  ;;  %v3048_v22 = vld [vmem:[%s7620_s29 + $0x57b8] sm:$0xff]  ;;  %v3003_v48 = vld [vmem:[%s7620_s29 + $0x5650] sm:$0xff] }
 0x62b   : > { %6910 = vmatmul.mubr.f32.vlgmr.msra.gmra.mxu1 %v9234_v58  ;;  %6948 = vmatprep.subr.mxu0 %v3056_v0  ;;  %v3111_v58 = vld [vmem:[%s7620_s29 + $0x59b0] sm:$0xff]  ;;  %v3068_v36 = vld [vmem:[%s7620_s29 + $0x5858] sm:$0xff] }
 0x62c   : > { %6987 = vmatprep.subr.mxu1 %v3120_v30  ;;  %6949 = vmatpush2.msra.mxu0 %v3055_v54  ;;  %v3067_v50 = vld [vmem:[%s7620_s29 + $0x5850] sm:$0xff]  ;;  %v3000_v0 = vld [vmem:[%s7620_s29 + $0x5638] sm:$0xff] }
 0x62d   : > { %6988 = vmatpush1.msra.mxu1 %v3119_v18  ;;  %6950 = vmatprep.subr.mxu0 %v3052_v16  ;;  %v3064_v30 = vld [vmem:[%s7620_s29 + $0x5838] sm:$0xff]  ;;  %v2999_v54 = vld [vmem:[%s7620_s29 + $0x5630] sm:$0xff] }
 0x62e   : > { %6989 = vmatprep.subr.mxu1 %v3116_v10  ;;  %6951 = vmatpush2.msra.mxu0 %v3051_v56  ;;  %v3063_v18 = vld [vmem:[%s7620_s29 + $0x5830] sm:$0xff]  ;;  %v2996_v16 = vld [vmem:[%s7620_s29 + $0x5618] sm:$0xff] }
 0x62f   : > { %6990 = vmatpush1.msra.mxu1 %v3115_v4  ;;  %6952 = vmatprep.subr.mxu0 %v3048_v22  ;;  %v3060_v10 = vld [vmem:[%s7620_s29 + $0x5818] sm:$0xff]  ;;  %v2995_v56 = vld [vmem:[%s7620_s29 + $0x5610] sm:$0xff] }
 0x630   : > { %6991 = vmatprep.subr.mxu1 %v3112_v57  ;;  %6953 = vmatpush2.msra.mxu0 %v3047_v61  ;;  %v3059_v4 = vld [vmem:[%s7620_s29 + $0x5810] sm:$0xff]  ;;  %v3184_v22 = vld [vmem:[%s7620_s29 + $0x5bf8] sm:$0xff] }
 0x631   : > { %6992 = vmatpush1.msra.mxu1 %v3111_v58  ;;  %6954 = vmatprep.subr.mxu0 %v3044_v47  ;;  %v3248_v57 = vld [vmem:[%s7620_s29 + $0x5df8] sm:$0xff]  ;;  %v3183_v61 = vld [vmem:[%s7620_s29 + $0x5bf0] sm:$0xff] }
 0x632   : > { %6993 = vmatprep.subr.mxu1 %v3108_v11  ;;  %6955 = vmatpush2.msra.mxu0 %v3043_v60  ;;  %v3247_v58 = vld [vmem:[%s7620_s29 + $0x5df0] sm:$0xff]  ;;  %v3180_v47 = vld [vmem:[%s7620_s29 + $0x5bd8] sm:$0xff] }
 0x633   : > { %6994 = vmatpush1.msra.mxu1 %v3107_v27  ;;  %6956 = vmatprep.subr.mxu0 %v3040_v1  ;;  %v3244_v11 = vld [vmem:[%s7620_s29 + $0x5dd8] sm:$0xff]  ;;  %v3179_v60 = vld [vmem:[%s7620_s29 + $0x5bd0] sm:$0xff] }
 0x634   : > { %6995 = vmatprep.subr.mxu1 %v3104_v2  ;;  %6957 = vmatpush2.msra.mxu0 %v3039_v42  ;;  %v3243_v27 = vld [vmem:[%s7620_s29 + $0x5dd0] sm:$0xff]  ;;  %v3240_v1 = vld [vmem:[%s7620_s29 + $0x5db8] sm:$0xff] }
 0x635   : > { %6996 = vmatpush1.msra.mxu1 %v3103_v52  ;;  %6958 = vmatprep.subr.mxu0 %v3036_v9  ;;  %v3175_v2 = vld [vmem:[%s7620_s29 + $0x5bb0] sm:$0xff]  ;;  %v3172_v42 = vld [vmem:[%s7620_s29 + $0x5b98] sm:$0xff] }
 0x636   : > { %6997 = vmatprep.subr.mxu1 %v3100_v31  ;;  %6959 = vmatpush2.msra.mxu0 %v3035_v32  ;;  %v3236_v52 = vld [vmem:[%s7620_s29 + $0x5d98] sm:$0xff]  ;;  %v3171_v9 = vld [vmem:[%s7620_s29 + $0x5b90] sm:$0xff] }
 0x637   : > { %6998 = vmatpush1.msra.mxu1 %v3099_v5  ;;  %6960 = vmatprep.subr.mxu0 %v3032_v44  ;;  %v3235_v31 = vld [vmem:[%s7620_s29 + $0x5d90] sm:$0xff]  ;;  %v3168_v32 = vld [vmem:[%s7620_s29 + $0x5b78] sm:$0xff] }
 0x638   : > { %6999 = vmatprep.subr.mxu1 %v3096_v6  ;;  %6961 = vmatpush2.msra.mxu0 %v3031_v8  ;;  %v3232_v5 = vld [vmem:[%s7620_s29 + $0x5d78] sm:$0xff]  ;;  %v3167_v44 = vld [vmem:[%s7620_s29 + $0x5b70] sm:$0xff] }
 0x639   : > { %7000 = vmatpush1.msra.mxu1 %v3095_v63  ;;  %6962 = vmatprep.subr.mxu0 %v3028_v51  ;;  %v3231_v6 = vld [vmem:[%s7620_s29 + $0x5d70] sm:$0xff]  ;;  %v3164_v8 = vld [vmem:[%s7620_s29 + $0x5b58] sm:$0xff] }
 0x63a   : > { %7001 = vmatprep.subr.mxu1 %v3092_v14  ;;  %6963 = vmatpush2.msra.mxu0 %v3027_v26  ;;  %v3228_v63 = vld [vmem:[%s7620_s29 + $0x5d58] sm:$0xff]  ;;  %v3163_v51 = vld [vmem:[%s7620_s29 + $0x5b50] sm:$0xff] }
 0x63b   : > { %7002 = vmatpush1.msra.mxu1 %v3091_v38  ;;  %6964 = vmatprep.subr.mxu0 %v3024_v25  ;;  %v3227_v14 = vld [vmem:[%s7620_s29 + $0x5d50] sm:$0xff]  ;;  %v3160_v26 = vld [vmem:[%s7620_s29 + $0x5b38] sm:$0xff] }
 0x63c   : > { %7003 = vmatprep.subr.mxu1 %v3088_v33  ;;  %6965 = vmatpush2.msra.mxu0 %v3023_v49  ;;  %v3224_v38 = vld [vmem:[%s7620_s29 + $0x5d38] sm:$0xff]  ;;  %v3159_v25 = vld [vmem:[%s7620_s29 + $0x5b30] sm:$0xff] }
 0x63d   : > { %7004 = vmatpush1.msra.mxu1 %v3087_v40  ;;  %6966 = vmatprep.subr.mxu0 %v3020_v23  ;;  %v3223_v33 = vld [vmem:[%s7620_s29 + $0x5d30] sm:$0xff]  ;;  %v3156_v49 = vld [vmem:[%s7620_s29 + $0x5b18] sm:$0xff] }
 0x63e   : > { %7005 = vmatprep.subr.mxu1 %v3084_v24  ;;  %6967 = vmatpush2.msra.mxu0 %v3019_v15  ;;  %v3220_v40 = vld [vmem:[%s7620_s29 + $0x5d18] sm:$0xff]  ;;  %v3155_v23 = vld [vmem:[%s7620_s29 + $0x5b10] sm:$0xff] }
 0x63f   : > { %7006 = vmatpush1.msra.mxu1 %v3083_v7  ;;  %6968 = vmatprep.subr.mxu0 %v3016_v39  ;;  %v3219_v24 = vld [vmem:[%s7620_s29 + $0x5d10] sm:$0xff]  ;;  %v3152_v15 = vld [vmem:[%s7620_s29 + $0x5af8] sm:$0xff] }
 0x640   : > { %7007 = vmatprep.subr.mxu1 %v3080_v12  ;;  %6969 = vmatpush2.msra.mxu0 %v3015_v41  ;;  %v3216_v7 = vld [vmem:[%s7620_s29 + $0x5cf8] sm:$0xff]  ;;  %v3151_v39 = vld [vmem:[%s7620_s29 + $0x5af0] sm:$0xff] }
 0x641   : > { %7008 = vmatpush1.msra.mxu1 %v3079_v28  ;;  %6970 = vmatprep.subr.mxu0 %v3012_v43  ;;  %v3215_v12 = vld [vmem:[%s7620_s29 + $0x5cf0] sm:$0xff]  ;;  %v3148_v41 = vld [vmem:[%s7620_s29 + $0x5ad8] sm:$0xff] }
 0x642   : > { %7009 = vmatprep.subr.mxu1 %v3076_v13  ;;  %6971 = vmatpush2.msra.mxu0 %v3011_v35  ;;  %v3212_v28 = vld [vmem:[%s7620_s29 + $0x5cd8] sm:$0xff]  ;;  %v3147_v43 = vld [vmem:[%s7620_s29 + $0x5ad0] sm:$0xff] }
 0x643   : > { %7010 = vmatpush1.msra.mxu1 %v3075_v45  ;;  %6972 = vmatprep.subr.mxu0 %v3008_v20  ;;  %v3211_v13 = vld [vmem:[%s7620_s29 + $0x5cd0] sm:$0xff]  ;;  %v3144_v35 = vld [vmem:[%s7620_s29 + $0x5ab8] sm:$0xff] }
 0x644   : > { %7011 = vmatprep.subr.mxu1 %v3072_v21  ;;  %6973 = vmatpush2.msra.mxu0 %v3007_v46  ;;  %v3208_v45 = vld [vmem:[%s7620_s29 + $0x5cb8] sm:$0xff]  ;;  %v3143_v20 = vld [vmem:[%s7620_s29 + $0x5ab0] sm:$0xff] }
 0x645   : > { %7012 = vmatpush1.msra.mxu1 %v3071_v19  ;;  %6974 = vmatprep.subr.mxu0 %v3004_v29  ;;  %v3207_v21 = vld [vmem:[%s7620_s29 + $0x5cb0] sm:$0xff]  ;;  %v3140_v46 = vld [vmem:[%s7620_s29 + $0x5a98] sm:$0xff] }
 0x646   : > { %7013 = vmatprep.subr.mxu1 %v3068_v36  ;;  %6975 = vmatpush2.msra.mxu0 %v3003_v48  ;;  %v3204_v19 = vld [vmem:[%s7620_s29 + $0x5c98] sm:$0xff]  ;;  %v3139_v29 = vld [vmem:[%s7620_s29 + $0x5a90] sm:$0xff] }
 0x647   : > { %7014 = vmatpush1.msra.mxu1 %v3067_v50  ;;  %6976 = vmatprep.subr.mxu0 %v3000_v0  ;;  %v3203_v36 = vld [vmem:[%s7620_s29 + $0x5c90] sm:$0xff]  ;;  %v3136_v48 = vld [vmem:[%s7620_s29 + $0x5a78] sm:$0xff] }
 0x648   : > { %7015 = vmatprep.subr.mxu1 %v3064_v30  ;;  %6977 = vmatpush2.msra.mxu0 %v2999_v54  ;;  %v3200_v50 = vld [vmem:[%s7620_s29 + $0x5c78] sm:$0xff]  ;;  %v3135_v0 = vld [vmem:[%s7620_s29 + $0x5a70] sm:$0xff] }
 0x649   : > { %7016 = vmatpush1.msra.mxu1 %v3063_v18  ;;  %6978 = vmatprep.subr.mxu0 %v2996_v16  ;;  %v3199_v30 = vld [vmem:[%s7620_s29 + $0x5c70] sm:$0xff]  ;;  %v3132_v54 = vld [vmem:[%s7620_s29 + $0x5a58] sm:$0xff] }
 0x64a   : > { %7017 = vmatprep.subr.mxu1 %v3060_v10  ;;  %6979 = vmatpush2.msra.mxu0 %v2995_v56  ;;  %v3196_v18 = vld [vmem:[%s7620_s29 + $0x5c58] sm:$0xff]  ;;  %v3131_v16 = vld [vmem:[%s7620_s29 + $0x5a50] sm:$0xff] }
 0x64b   : > { %6980 = vmatprep.mubr.f32.mxu0 %v9255_v34  ;;  %7018 = vmatpush1.msra.mxu1 %v3059_v4  ;;  %v3176_v34 = vld [vmem:[%s7620_s29 + $0x5bb8] sm:$0xff]  ;;  %v3195_v10 = vld [vmem:[%s7620_s29 + $0x5c50] sm:$0xff] }
 0x64c   : > { %6981 = vmatmul.mubr.f32.vlgmr.msra.gmra.mxu0 %v9241_v3  ;;  %7019 = vmatprep.subr.mxu1 %v3184_v22  ;;  %v3239_v3 = vld [vmem:[%s7620_s29 + $0x5db0] sm:$0xff]  ;;  %v3128_v56 = vld [vmem:[%s7620_s29 + $0x5a38] sm:$0xff] }
 0x64d   : > { %7058 = vmatprep.subr.mxu0 %v3248_v57  ;;  %7020 = vmatpush2.msra.mxu1 %v3183_v61  ;;  %v3192_v4 = vld [vmem:[%s7620_s29 + $0x5c38] sm:$0xff]  ;;  %v3127_v22 = vld [vmem:[%s7620_s29 + $0x5a30] sm:$0xff] }
 0x64e   : > { %7059 = vmatpush1.msra.mxu0 %v3247_v58  ;;  %7021 = vmatprep.subr.mxu1 %v3180_v47  ;;  %v3191_v57 = vld [vmem:[%s7620_s29 + $0x5c30] sm:$0xff]  ;;  %v3124_v61 = vld [vmem:[%s7620_s29 + $0x5a18] sm:$0xff] }
 0x64f   : > { %7060 = vmatprep.subr.mxu0 %v3244_v11  ;;  %7022 = vmatpush2.msra.mxu1 %v3179_v60  ;;  %v3188_v58 = vld [vmem:[%s7620_s29 + $0x5c18] sm:$0xff]  ;;  %v3123_v47 = vld [vmem:[%s7620_s29 + $0x5a10] sm:$0xff] }
 0x650   : > { %7061 = vmatpush1.msra.mxu0 %v3243_v27  ;;  %7023 = vmatprep.subr.mxu1 %v3176_v34  ;;  %v3187_v11 = vld [vmem:[%s7620_s29 + $0x5c10] sm:$0xff]  ;;  %v3312_v60 = vld [vmem:[%s7620_s29 + $0x5ff8] sm:$0xff] }
 0x651   : > { %7062 = vmatprep.subr.mxu0 %v3240_v1  ;;  %7024 = vmatpush2.msra.mxu1 %v3175_v2  ;;  %v3376_v27 = vld [vmem:[%s7620_s29 + $0x61f8] sm:$0xff]  ;;  %v3311_v34 = vld [vmem:[%s7620_s29 + $0x5ff0] sm:$0xff] }
 0x652   : > { %7063 = vmatpush1.msra.mxu0 %v3239_v3  ;;  %7025 = vmatprep.subr.mxu1 %v3172_v42  ;;  %v3375_v1 = vld [vmem:[%s7620_s29 + $0x61f0] sm:$0xff]  ;;  %v3308_v2 = vld [vmem:[%s7620_s29 + $0x5fd8] sm:$0xff] }
 0x653   : > { %7064 = vmatprep.subr.mxu0 %v3236_v52  ;;  %7026 = vmatpush2.msra.mxu1 %v3171_v9  ;;  %v3372_v3 = vld [vmem:[%s7620_s29 + $0x61d8] sm:$0xff]  ;;  %v3307_v42 = vld [vmem:[%s7620_s29 + $0x5fd0] sm:$0xff] }
 0x654   : > { %7065 = vmatpush1.msra.mxu0 %v3235_v31  ;;  %7027 = vmatprep.subr.mxu1 %v3168_v32  ;;  %v3371_v52 = vld [vmem:[%s7620_s29 + $0x61d0] sm:$0xff]  ;;  %v3368_v9 = vld [vmem:[%s7620_s29 + $0x61b8] sm:$0xff] }
 0x655   : > { %7066 = vmatprep.subr.mxu0 %v3232_v5  ;;  %7028 = vmatpush2.msra.mxu1 %v3167_v44  ;;  %v3303_v31 = vld [vmem:[%s7620_s29 + $0x5fb0] sm:$0xff]  ;;  %v3300_v32 = vld [vmem:[%s7620_s29 + $0x5f98] sm:$0xff] }
 0x656   : > { %7067 = vmatpush1.msra.mxu0 %v3231_v6  ;;  %7029 = vmatprep.subr.mxu1 %v3164_v8  ;;  %v3364_v5 = vld [vmem:[%s7620_s29 + $0x6198] sm:$0xff]  ;;  %v3299_v44 = vld [vmem:[%s7620_s29 + $0x5f90] sm:$0xff] }
 0x657   : > { %7068 = vmatprep.subr.mxu0 %v3228_v63  ;;  %7030 = vmatpush2.msra.mxu1 %v3163_v51  ;;  %v3363_v6 = vld [vmem:[%s7620_s29 + $0x6190] sm:$0xff]  ;;  %v3296_v8 = vld [vmem:[%s7620_s29 + $0x5f78] sm:$0xff] }
 0x658   : > { %7069 = vmatpush1.msra.mxu0 %v3227_v14  ;;  %7031 = vmatprep.subr.mxu1 %v3160_v26  ;;  %v3360_v63 = vld [vmem:[%s7620_s29 + $0x6178] sm:$0xff]  ;;  %v3295_v51 = vld [vmem:[%s7620_s29 + $0x5f70] sm:$0xff] }
 0x659   : > { %7070 = vmatprep.subr.mxu0 %v3224_v38  ;;  %7032 = vmatpush2.msra.mxu1 %v3159_v25  ;;  %v3359_v14 = vld [vmem:[%s7620_s29 + $0x6170] sm:$0xff]  ;;  %v3292_v26 = vld [vmem:[%s7620_s29 + $0x5f58] sm:$0xff] }
 0x65a   : > { %7071 = vmatpush1.msra.mxu0 %v3223_v33  ;;  %7033 = vmatprep.subr.mxu1 %v3156_v49  ;;  %v3356_v38 = vld [vmem:[%s7620_s29 + $0x6158] sm:$0xff]  ;;  %v3291_v25 = vld [vmem:[%s7620_s29 + $0x5f50] sm:$0xff] }
 0x65b   : > { %7072 = vmatprep.subr.mxu0 %v3220_v40  ;;  %7034 = vmatpush2.msra.mxu1 %v3155_v23  ;;  %v3355_v33 = vld [vmem:[%s7620_s29 + $0x6150] sm:$0xff]  ;;  %v3288_v49 = vld [vmem:[%s7620_s29 + $0x5f38] sm:$0xff] }
 0x65c   : > { %7073 = vmatpush1.msra.mxu0 %v3219_v24  ;;  %7035 = vmatprep.subr.mxu1 %v3152_v15  ;;  %v3352_v40 = vld [vmem:[%s7620_s29 + $0x6138] sm:$0xff]  ;;  %v3287_v23 = vld [vmem:[%s7620_s29 + $0x5f30] sm:$0xff] }
 0x65d   : > { %7074 = vmatprep.subr.mxu0 %v3216_v7  ;;  %7036 = vmatpush2.msra.mxu1 %v3151_v39  ;;  %v3351_v24 = vld [vmem:[%s7620_s29 + $0x6130] sm:$0xff]  ;;  %v3284_v15 = vld [vmem:[%s7620_s29 + $0x5f18] sm:$0xff] }
 0x65e   : > { %7075 = vmatpush1.msra.mxu0 %v3215_v12  ;;  %7037 = vmatprep.subr.mxu1 %v3148_v41  ;;  %v3348_v7 = vld [vmem:[%s7620_s29 + $0x6118] sm:$0xff]  ;;  %v3283_v39 = vld [vmem:[%s7620_s29 + $0x5f10] sm:$0xff] }
 0x65f   : > { %7076 = vmatprep.subr.mxu0 %v3212_v28  ;;  %7038 = vmatpush2.msra.mxu1 %v3147_v43  ;;  %v3347_v12 = vld [vmem:[%s7620_s29 + $0x6110] sm:$0xff]  ;;  %v3280_v41 = vld [vmem:[%s7620_s29 + $0x5ef8] sm:$0xff] }
 0x660   : > { %7077 = vmatpush1.msra.mxu0 %v3211_v13  ;;  %7039 = vmatprep.subr.mxu1 %v3144_v35  ;;  %v3344_v28 = vld [vmem:[%s7620_s29 + $0x60f8] sm:$0xff]  ;;  %v3279_v43 = vld [vmem:[%s7620_s29 + $0x5ef0] sm:$0xff] }
 0x661   : > { %7078 = vmatprep.subr.mxu0 %v3208_v45  ;;  %7040 = vmatpush2.msra.mxu1 %v3143_v20  ;;  %v3343_v13 = vld [vmem:[%s7620_s29 + $0x60f0] sm:$0xff]  ;;  %v3276_v35 = vld [vmem:[%s7620_s29 + $0x5ed8] sm:$0xff] }
 0x662   : > { %7079 = vmatpush1.msra.mxu0 %v3207_v21  ;;  %7041 = vmatprep.subr.mxu1 %v3140_v46  ;;  %v3340_v45 = vld [vmem:[%s7620_s29 + $0x60d8] sm:$0xff]  ;;  %v3275_v20 = vld [vmem:[%s7620_s29 + $0x5ed0] sm:$0xff] }
 0x663   : > { %7080 = vmatprep.subr.mxu0 %v3204_v19  ;;  %7042 = vmatpush2.msra.mxu1 %v3139_v29  ;;  %v3339_v21 = vld [vmem:[%s7620_s29 + $0x60d0] sm:$0xff]  ;;  %v3272_v46 = vld [vmem:[%s7620_s29 + $0x5eb8] sm:$0xff] }
 0x664   : > { %7081 = vmatpush1.msra.mxu0 %v3203_v36  ;;  %7043 = vmatprep.subr.mxu1 %v3136_v48  ;;  %v3336_v19 = vld [vmem:[%s7620_s29 + $0x60b8] sm:$0xff]  ;;  %v3271_v29 = vld [vmem:[%s7620_s29 + $0x5eb0] sm:$0xff] }
 0x665   : > { %7082 = vmatprep.subr.mxu0 %v3200_v50  ;;  %7044 = vmatpush2.msra.mxu1 %v3135_v0  ;;  %v3335_v36 = vld [vmem:[%s7620_s29 + $0x60b0] sm:$0xff]  ;;  %v3268_v48 = vld [vmem:[%s7620_s29 + $0x5e98] sm:$0xff] }
 0x666   : > { %7083 = vmatpush1.msra.mxu0 %v3199_v30  ;;  %7045 = vmatprep.subr.mxu1 %v3132_v54  ;;  %v3332_v50 = vld [vmem:[%s7620_s29 + $0x6098] sm:$0xff]  ;;  %v3267_v0 = vld [vmem:[%s7620_s29 + $0x5e90] sm:$0xff] }
 0x667   : > { %7084 = vmatprep.subr.mxu0 %v3196_v18  ;;  %7046 = vmatpush2.msra.mxu1 %v3131_v16  ;;  %v3331_v30 = vld [vmem:[%s7620_s29 + $0x6090] sm:$0xff]  ;;  %v3264_v54 = vld [vmem:[%s7620_s29 + $0x5e78] sm:$0xff] }
 0x668   : > { %7085 = vmatpush1.msra.mxu0 %v3195_v10  ;;  %7047 = vmatprep.subr.mxu1 %v3128_v56  ;;  %v3328_v18 = vld [vmem:[%s7620_s29 + $0x6078] sm:$0xff]  ;;  %v3263_v16 = vld [vmem:[%s7620_s29 + $0x5e70] sm:$0xff] }
 0x669   : > { %7086 = vmatprep.subr.mxu0 %v3192_v4  ;;  %7048 = vmatpush2.msra.mxu1 %v3127_v22  ;;  %v3327_v10 = vld [vmem:[%s7620_s29 + $0x6070] sm:$0xff]  ;;  %v3260_v56 = vld [vmem:[%s7620_s29 + $0x5e58] sm:$0xff] }
 0x66a   : > { %7087 = vmatpush1.msra.mxu0 %v3191_v57  ;;  %7049 = vmatprep.subr.mxu1 %v3124_v61  ;;  %v3324_v4 = vld [vmem:[%s7620_s29 + $0x6058] sm:$0xff]  ;;  %v3259_v22 = vld [vmem:[%s7620_s29 + $0x5e50] sm:$0xff] }
 0x66b   : > { %7088 = vmatprep.subr.mxu0 %v3188_v58  ;;  %7050 = vmatpush2.msra.mxu1 %v3123_v47  ;;  %v3323_v57 = vld [vmem:[%s7620_s29 + $0x6050] sm:$0xff]  ;;  %v3256_v61 = vld [vmem:[%s7620_s29 + $0x5e38] sm:$0xff] }
 0x66c   : > { %7051 = vmatprep.mubr.f32.mxu1 %v9396_v17  ;;  %7089 = vmatpush1.msra.mxu0 %v3187_v11  ;;  %v3304_v17 = vld [vmem:[%s7620_s29 + $0x5fb8] sm:$0xff]  ;;  %v3255_v47 = vld [vmem:[%s7620_s29 + $0x5e30] sm:$0xff] }
 0x66d   : > { %7052 = vmatmul.mubr.f32.vlgmr.msra.gmra.mxu1 %v9381_v55  ;;  %7090 = vmatprep.subr.mxu0 %v3312_v60  ;;  %v3367_v55 = vld [vmem:[%s7620_s29 + $0x61b0] sm:$0xff]  ;;  %v3320_v58 = vld [vmem:[%s7620_s29 + $0x6038] sm:$0xff] }
 0x66e   : > { %7129 = vmatprep.subr.mxu1 %v3376_v27  ;;  %7091 = vmatpush2.msra.mxu0 %v3311_v34  ;;  %v3319_v11 = vld [vmem:[%s7620_s29 + $0x6030] sm:$0xff]  ;;  %v3252_v60 = vld [vmem:[%s7620_s29 + $0x5e18] sm:$0xff] }
 0x66f   : > { %7130 = vmatpush1.msra.mxu1 %v3375_v1  ;;  %7092 = vmatprep.subr.mxu0 %v3308_v2  ;;  %v3316_v27 = vld [vmem:[%s7620_s29 + $0x6018] sm:$0xff]  ;;  %v3251_v34 = vld [vmem:[%s7620_s29 + $0x5e10] sm:$0xff]  ;;  %v7424_v2 = vld.sshfl [vmem:[%s7638_s22 + $0x60] sm:$0x3 pattern:$0x76325410] }
 0x670   : > { %7131 = vmatprep.subr.mxu1 %v3372_v3  ;;  %7093 = vmatpush2.msra.mxu0 %v3307_v42  ;;  %v3315_v1 = vld [vmem:[%s7620_s29 + $0x6010] sm:$0xff]  ;;  %v3716_v3 = vpop.f32.mrf.mxu0  ;;  %v3787_v42 = vpop.f32.mrf.mxu1 }
 0x671   : > { %7132 = vmatpush1.msra.mxu1 %v3371_v52  ;;  %7094 = vmatprep.subr.mxu0 %v3304_v17 }
 0x672   : > { %7133 = vmatprep.subr.mxu1 %v3368_v9  ;;  %7095 = vmatpush2.msra.mxu0 %v3303_v31  ;;  %v3718_v52 = vpop.f32.mrf.mxu0  ;;  %v3789_v17 = vpop.f32.mrf.mxu1 }
 0x673   : > { %7134 = vmatpush1.msra.mxu1 %v3367_v55  ;;  %7096 = vmatprep.subr.mxu0 %v3300_v32 }
 0x674   : > { %7135 = vmatprep.subr.mxu1 %v3364_v5  ;;  %7097 = vmatpush2.msra.mxu0 %v3299_v44  ;;  %v3858_v9 = vpop.f32.mrf.mxu0  ;;  %v3929_v31 = vpop.f32.mrf.mxu1 }
 0x675   : > { %7136 = vmatpush1.msra.mxu1 %v3363_v6  ;;  %7098 = vmatprep.subr.mxu0 %v3296_v8 }
 0x676   : > { %7137 = vmatprep.subr.mxu1 %v3360_v63  ;;  %7099 = vmatpush2.msra.mxu0 %v3295_v51  ;;  %v3860_v55 = vpop.f32.mrf.mxu0  ;;  %v3931_v32 = vpop.f32.mrf.mxu1 }
 0x677   : > { %7138 = vmatpush1.msra.mxu1 %v3359_v14  ;;  %7100 = vmatprep.subr.mxu0 %v3292_v26 }
 0x678   : > { %7139 = vmatprep.subr.mxu1 %v3356_v38  ;;  %7101 = vmatpush2.msra.mxu0 %v3291_v25  ;;  %v4000_v5 = vpop.f32.mrf.mxu0  ;;  %v4071_v44 = vpop.f32.mrf.mxu1 }
 0x679   : > { %7140 = vmatpush1.msra.mxu1 %v3355_v33  ;;  %7102 = vmatprep.subr.mxu0 %v3288_v49 }
 0x67a   : > { %7141 = vmatprep.subr.mxu1 %v3352_v40  ;;  %7103 = vmatpush2.msra.mxu0 %v3287_v23  ;;  %v4002_v6 = vpop.f32.mrf.mxu0  ;;  %v4073_v8 = vpop.f32.mrf.mxu1 }
 0x67b   : > { %7142 = vmatpush1.msra.mxu1 %v3351_v24  ;;  %7104 = vmatprep.subr.mxu0 %v3284_v15 }
 0x67c   : > { %7143 = vmatprep.subr.mxu1 %v3348_v7  ;;  %7105 = vmatpush2.msra.mxu0 %v3283_v39  ;;  %v11060_v63 = vpop.f32.mrf.mxu1 }
 0x67d   : > { %7144 = vmatpush1.msra.mxu1 %v3347_v12  ;;  %7106 = vmatprep.subr.mxu0 %v3280_v41 }
 0x67e   : > { %7145 = vmatprep.subr.mxu1 %v3344_v28  ;;  %7107 = vmatpush2.msra.mxu0 %v3279_v43  ;;  %v4215_v51 = vpop.f32.mrf.mxu1 }
 0x67f   : > { %7146 = vmatpush1.msra.mxu1 %v3343_v13  ;;  %7108 = vmatprep.subr.mxu0 %v3276_v35 }
 0x680   : > { %7147 = vmatprep.subr.mxu1 %v3340_v45  ;;  %7109 = vmatpush2.msra.mxu0 %v3275_v20  ;;  %v11064_v14 = vpop.f32.mrf.mxu1 }
 0x681   : > { %7148 = vmatpush1.msra.mxu1 %v3339_v21  ;;  %7110 = vmatprep.subr.mxu0 %v3272_v46 }
 0x682   : > { %7149 = vmatprep.subr.mxu1 %v3336_v19  ;;  %7111 = vmatpush2.msra.mxu0 %v3271_v29  ;;  %v11066_v38 = vpop.f32.mrf.mxu1 }
 0x683   : > { %7150 = vmatpush1.msra.mxu1 %v3335_v36  ;;  %7112 = vmatprep.subr.mxu0 %v3268_v48 }
 0x684   : > { %7151 = vmatprep.subr.mxu1 %v3332_v50  ;;  %7113 = vmatpush2.msra.mxu0 %v3267_v0  ;;  %v11070_v33 = vpop.f32.mrf.mxu1 }
 0x685   : > { %7152 = vmatpush1.msra.mxu1 %v3331_v30  ;;  %7114 = vmatprep.subr.mxu0 %v3264_v54 }
 0x686   : > { %7153 = vmatprep.subr.mxu1 %v3328_v18  ;;  %7115 = vmatpush2.msra.mxu0 %v3263_v16  ;;  %v11074_v40 = vpop.f32.mrf.mxu1 }
 0x687   : > { %7154 = vmatpush1.msra.mxu1 %v3327_v10  ;;  %7116 = vmatprep.subr.mxu0 %v3260_v56 }
 0x688   : > { %7155 = vmatprep.subr.mxu1 %v3324_v4  ;;  %7117 = vmatpush2.msra.mxu0 %v3259_v22  ;;  %v11078_v24 = vpop.f32.mrf.mxu1 }
 0x689   : > { %7156 = vmatpush1.msra.mxu1 %v3323_v57  ;;  %7118 = vmatprep.subr.mxu0 %v3256_v61  ;;  %v3790_v57 = vadd.f32 %v3789_v17, %v3718_v52 }
 0x68a   : > { %7157 = vmatprep.subr.mxu1 %v3320_v58  ;;  %7119 = vmatpush2.msra.mxu0 %v3255_v47  ;;  %v11082_v7 = vpop.f32.mrf.mxu1  ;;  %v3788_v58 = vadd.f32 %v3787_v42, %v3716_v3 }
 0x68b   : > { %7158 = vmatpush1.msra.mxu1 %v3319_v11  ;;  %7120 = vmatprep.subr.mxu0 %v3252_v60  ;;  %v3861_v47 = vadd.f32 %v3860_v55, %v3790_v57 }
 0x68c   : > { %7159 = vmatprep.subr.mxu1 %v3316_v27  ;;  %7121 = vmatpush2.msra.mxu0 %v3251_v34  ;;  %v11086_v12 = vpop.f32.mrf.mxu1  ;;  %v3859_v60 = vadd.f32 %v3858_v9, %v3788_v58 }
 0x68d   : > { %7122 = vmatprep.mubr.f32.mxu0 %v9402_v37  ;;  %7160 = vmatpush1.msra.mxu1 %v3315_v1  ;;  %v4142_v37 = vpop.f32.mrf.mxu0  ;;  %v3932_v1 = vadd.f32 %v3931_v32, %v3861_v47 }
 0x68e   : > { %7193 = vmatprep.mubr.f32.mxu1 %v7526_v59  ;;  %7123 = vmatmul.mubr.f32.vlgmr.msra.gmra.mxu0 %v9388_v62  ;;  %v11090_v28 = vpop.f32.mrf.mxu1  ;;  %v3930_v53 = vadd.f32 %v3929_v31, %v3859_v60 }
 0x68f   : > { %7194 = vmatmul.mubr.f32.vlgmr.msra.gmra.mxu1 %v7424_v2  ;;  %v4144_v59 = vpop.f32.mrf.mxu0 }
 0x690   : > { %v11094_v13 = vpop.f32.mrf.mxu1 }
 0x691   : > { %v11062_v62 = vpop.f32.mrf.mxu0 }
 0x692   : > { %v11098_v45 = vpop.f32.mrf.mxu1 }
 0x693   : > { %v4286_v26 = vpop.f32.mrf.mxu0 }
 0x694   : > { %v11102_v21 = vpop.f32.mrf.mxu1 }
 0x695   : > { %v11068_v25 = vpop.f32.mrf.mxu0 }
 0x696   : > { %v11106_v19 = vpop.f32.mrf.mxu1 }
 0x697   : > { %v11072_v49 = vpop.f32.mrf.mxu0 }
 0x698   : > { %v11110_v36 = vpop.f32.mrf.mxu1 }
 0x699   : > { %v11076_v23 = vpop.f32.mrf.mxu0  ;;  %11199 = vst [vmem:[#allocation7_spill] sm:$0xff] %v11110_v36 }
 0x69a   : > { %v11114_v50 = vpop.f32.mrf.mxu1 }
 0x69b   : > { %v11080_v15 = vpop.f32.mrf.mxu0  ;;  %11200 = vst [vmem:[#allocation8_spill] sm:$0xff] %v11114_v50 }
 0x69c   : > { %v11118_v30 = vpop.f32.mrf.mxu1 }
 0x69d   : > { %v11084_v39 = vpop.f32.mrf.mxu0  ;;  %11202 = vst [vmem:[#allocation10_spill] sm:$0xff] %v11118_v30  ;;  %v4003_v30 = vadd.f32 %v4002_v6, %v3932_v1 }
 0x69e   : > { %v11122_v18 = vpop.f32.mrf.mxu1 }
 0x69f   : > { %v11088_v41 = vpop.f32.mrf.mxu0  ;;  %11204 = vst [vmem:[#allocation12_spill] sm:$0xff] %v11122_v18  ;;  %v4074_v36 = vadd.f32 %v4073_v8, %v4003_v30 }
 0x6a0   : > { %v5491_v10 = vpop.f32.mrf.mxu1 }
 0x6a1   : > { %v11092_v43 = vpop.f32.mrf.mxu0 }
 0x6a2   : > { %v5493_v4 = vpop.f32.mrf.mxu1 }
 0x6a3   : > { %v11096_v35 = vpop.f32.mrf.mxu0 }
 0x6a4   : > { %v5633_v61 = vpop.f32.mrf.mxu1 }
 0x6a5   : > { %v11100_v20 = vpop.f32.mrf.mxu0 }
 0x6a6   : > { %v5635_v27 = vpop.f32.mrf.mxu1 }
 0x6a7   : > { %v11104_v46 = vpop.f32.mrf.mxu0 }
 0x6a8   : > { %v5775_v2 = vpop.f32.mrf.mxu1 }
 0x6a9   : > { %v11108_v29 = vpop.f32.mrf.mxu0 }
 0x6aa   : > { %11198 = vst [vmem:[#allocation6_spill] sm:$0xff] %v11108_v29  ;;  %v4145_v29 = vadd.f32 %v4144_v59, %v4074_v36 }
 0x6ab   : > { %v11112_v48 = vpop.f32.mrf.mxu0 }
 0x6ac   : > { %v4216_v55 = vadd.f32 %v4215_v51, %v4145_v29 }
 0x6ad   : > { %v11116_v0 = vpop.f32.mrf.mxu0 }
 0x6ae   : > { %11201 = vst [vmem:[#allocation9_spill] sm:$0xff] %v11116_v0  ;;  %v4001_v0 = vadd.f32 %v4000_v5, %v3930_v53  ;;  %v4287_v32 = vadd.f32 %v4286_v26, %v4216_v55 }
 0x6af   : > { %v11120_v54 = vpop.f32.mrf.mxu0 }
 0x6b0   : > { %11203 = vst [vmem:[#allocation11_spill] sm:$0xff] %v11120_v54  ;;  %v4072_v50 = vadd.f32 %v4071_v44, %v4001_v0  ;;  %v4358_v5 = vadd.f32 %v11066_v38, %v4287_v32 }
 0x6b1   : > { %v11124_v16 = vpop.f32.mrf.mxu0 }
 0x6b2   : > { %11205 = vst [vmem:[#allocation13_spill] sm:$0xff] %v11124_v16  ;;  %v5777_v16 = vpop.f32.mrf.mxu1  ;;  %v4143_v17 = vadd.f32 %v4142_v37, %v4072_v50  ;;  %v4429_v37 = vadd.f32 %v11072_v49, %v4358_v5 }
 0x6b3   : > { %v11126_v56 = vpop.f32.mrf.mxu0 }
 0x6b4   : > { %11206 = vst [vmem:[#allocation14_spill] sm:$0xff] %v11126_v56  ;;  %v5917_v56 = vpop.f32.mrf.mxu1  ;;  %v4214_v57 = vadd.f32 %v11060_v63, %v4143_v17 }
 0x6b5   : > { %v5562_v22 = vpop.f32.mrf.mxu0 }
 0x6b6   : > { %v5919_v3 = vpop.f32.mrf.mxu1  ;;  %v4285_v31 = vadd.f32 %v11062_v62, %v4214_v57  ;;  %v5563_v8 = vadd.f32 %v5562_v22, %v5491_v10  ;;  %v4500_v62 = vadd.f32 %v11074_v40, %v4429_v37 }
 0x6b7   : > { %v5564_v11 = vpop.f32.mrf.mxu0 }
 0x6b8   : > { %v6059_v9 = vpop.f32.mrf.mxu1  ;;  %v4356_v44 = vadd.f32 %v11064_v14, %v4285_v31  ;;  %v5565_v59 = vadd.f32 %v5564_v11, %v5493_v4  ;;  %v5634_v36 = vadd.f32 %v5633_v61, %v5563_v8  ;;  %v4571_v14 = vadd.f32 %v11080_v15, %v4500_v62 }
 0x6b9   : > { %v5704_v34 = vpop.f32.mrf.mxu0 }
 0x6ba   : > { %v6061_v6 = vpop.f32.mrf.mxu1  ;;  %v4427_v29 = vadd.f32 %v11068_v25, %v4356_v44  ;;  %v5636_v63 = vadd.f32 %v5635_v27, %v5565_v59  ;;  %v5705_v26 = vadd.f32 %v5704_v34, %v5634_v36  ;;  %v4642_v1 = vadd.f32 %v11082_v7, %v4571_v14  ;;  %v11207_v14 = vld [vmem:[#allocation6_spill] sm:$0xff] }
 0x6bb   : > { %v5706_v18 = vpop.f32.mrf.mxu0 }
 0x6bc   : > { %v6201_v30 = vpop.f32.mrf.mxu1  ;;  %v5707_v47 = vadd.f32 %v5706_v18, %v5636_v63  ;;  %v5776_v60 = vadd.f32 %v5775_v2, %v5705_v26  ;;  %v4498_v10 = vadd.f32 %v11070_v33, %v4427_v29  ;;  %v4713_v33 = vadd.f32 %v11088_v41, %v4642_v1  ;;  %v11209_v1 = vld [vmem:[#allocation7_spill] sm:$0xff] }
 0x6bd   : > { %v5846_v54 = vpop.f32.mrf.mxu0 }
 0x6be   : > { %v6203_v50 = vpop.f32.mrf.mxu1  ;;  %v5778_v22 = vadd.f32 %v5777_v16, %v5707_v47  ;;  %v5847_v49 = vadd.f32 %v5846_v54, %v5776_v60  ;;  %v4569_v61 = vadd.f32 %v11076_v23, %v4498_v10  ;;  %v4784_v32 = vadd.f32 %v11090_v28, %v4713_v33  ;;  %v11211_v33 = vld [vmem:[#allocation9_spill] sm:$0xff] }
 0x6bf   : > { %v5848_v52 = vpop.f32.mrf.mxu0 }
 0x6c0   : > { %v6343_v38 = vpop.f32.mrf.mxu1  ;;  %v5849_v11 = vadd.f32 %v5848_v52, %v5778_v22  ;;  %v5918_v25 = vadd.f32 %v5917_v56, %v5847_v49  ;;  %v4640_v2 = vadd.f32 %v11078_v24, %v4569_v61  ;;  %v4855_v24 = vadd.f32 %v11096_v35, %v4784_v32 }
 0x6c1   : > { %v5988_v42 = vpop.f32.mrf.mxu0 }
 0x6c2   : > { %v6345_v27 = vpop.f32.mrf.mxu1  ;;  %v5920_v17 = vadd.f32 %v5919_v3, %v5849_v11  ;;  %v5989_v40 = vadd.f32 %v5988_v42, %v5918_v25  ;;  %v4711_v54 = vadd.f32 %v11084_v39, %v4640_v2  ;;  %v4926_v44 = vadd.f32 %v11098_v45, %v4855_v24  ;;  %v11208_v11 = vld [vmem:[#allocation8_spill] sm:$0xff] }
 0x6c3   : > { %v5990_v58 = vpop.f32.mrf.mxu0 }
 0x6c4   : > { %v6485_v18 = vpop.f32.mrf.mxu1  ;;  %v5991_v55 = vadd.f32 %v5990_v58, %v5920_v17  ;;  %v6060_v15 = vadd.f32 %v6059_v9, %v5989_v40  ;;  %v4782_v42 = vadd.f32 %v11086_v12, %v4711_v54  ;;  %v4997_v12 = vadd.f32 %v11104_v46, %v4926_v44  ;;  %v11210_v40 = vld [vmem:[#allocation11_spill] sm:$0xff] }
 0x6c5   : > { %v6130_v53 = vpop.f32.mrf.mxu0 }
 0x6c6   : > { %v6062_v57 = vadd.f32 %v6061_v6, %v5991_v55  ;;  %v6131_v23 = vadd.f32 %v6130_v53, %v6060_v15  ;;  %v6487_v52 = vpop.f32.mrf.mxu1  ;;  %v4853_v9 = vadd.f32 %v11092_v43, %v4782_v42  ;;  %v11214_v42 = vld [vmem:[#allocation14_spill] sm:$0xff] }
 0x6c7   : > { %v6132_v51 = vpop.f32.mrf.mxu0 }
 0x6c8   : > { %v6133_v31 = vadd.f32 %v6132_v51, %v6062_v57  ;;  %v6202_v7 = vadd.f32 %v6201_v30, %v6131_v23  ;;  %v6627_v3 = vpop.f32.mrf.mxu1  ;;  %v4924_v30 = vadd.f32 %v11094_v13, %v4853_v9  ;;  %v11212_v57 = vld [vmem:[#allocation12_spill] sm:$0xff]  ;;  %v11215_v9 = vld [vmem:[#allocation13_spill] sm:$0xff] }
 0x6c9   : > { %v6272_v0 = vpop.f32.mrf.mxu0 }
 0x6ca   : > { %v6204_v5 = vadd.f32 %v6203_v50, %v6133_v31  ;;  %v6273_v41 = vadd.f32 %v6272_v0, %v6202_v7  ;;  %v6629_v6 = vpop.f32.mrf.mxu1  ;;  %v4995_v29 = vadd.f32 %v11100_v20, %v4924_v30  ;;  %v5068_v0 = vadd.f32 %v11106_v19, %v4997_v12  ;;  %v11213_v7 = vld [vmem:[#allocation10_spill] sm:$0xff] }
 0x6cb   : > { %v6274_v4 = vpop.f32.mrf.mxu0 }
 0x6cc   : > { %v6275_v8 = vadd.f32 %v6274_v4, %v6204_v5  ;;  %v6344_v39 = vadd.f32 %v6343_v38, %v6273_v41  ;;  %v6769_v59 = vpop.f32.mrf.mxu1  ;;  %v5066_v60 = vadd.f32 %v11102_v21, %v4995_v29  ;;  %v5139_v13 = vadd.f32 %v11112_v48, %v5068_v0 }
 0x6cd   : > { %v6414_v34 = vpop.f32.mrf.mxu0 }
 0x6ce   : > { %v6346_v37 = vadd.f32 %v6345_v27, %v6275_v8  ;;  %v6415_v28 = vadd.f32 %v6414_v34, %v6344_v39  ;;  %v6771_v26 = vpop.f32.mrf.mxu1  ;;  %v5137_v22 = vadd.f32 %v11207_v14, %v5066_v60  ;;  %v5210_v25 = vadd.f32 %v11208_v11, %v5139_v13 }
 0x6cf   : > { %v6416_v16 = vpop.f32.mrf.mxu0 }
 0x6d0   : > { %v6417_v36 = vadd.f32 %v6416_v16, %v6346_v37  ;;  %v6486_v35 = vadd.f32 %v6485_v18, %v6415_v28  ;;  %v5208_v17 = vadd.f32 %v11209_v1, %v5137_v22  ;;  %v5281_v21 = vadd.f32 %v11210_v40, %v5210_v25 }
 0x6d1   : > { %v6556_v56 = vpop.f32.mrf.mxu0 }
 0x6d2   : > { %v6488_v63 = vadd.f32 %v6487_v52, %v6417_v36  ;;  %v6557_v43 = vadd.f32 %v6556_v56, %v6486_v35  ;;  %v5279_v55 = vadd.f32 %v11211_v33, %v5208_v17  ;;  %v5352_v23 = vadd.f32 %v11212_v57, %v5281_v21  ;;  %v227_v36 = vld [vmem:[%s7633_s9] sm:$0xff] }
 0x6d3   : > { %v6558_v58 = vpop.f32.mrf.mxu0 }
 0x6d4   : > { %v6559_v62 = vadd.f32 %v6558_v58, %v6488_v63  ;;  %v6628_v45 = vadd.f32 %v6627_v3, %v6557_v43  ;;  %v5350_v3 = vadd.f32 %v11213_v7, %v5279_v55  ;;  %v5423_v24 = vadd.f32 %v11214_v42, %v5352_v23 }
 0x6d5   : > { %v6698_v53 = vpop.f32.mrf.mxu0 }
 0x6d6   : > { %v6630_v38 = vadd.f32 %v6629_v6, %v6559_v62  ;;  %v6699_v46 = vadd.f32 %v6698_v53, %v6628_v45  ;;  %v5421_v8 = vadd.f32 %v11215_v9, %v5350_v3 }
 0x6d7   : > { %v6700_v51 = vpop.f32.mrf.mxu0 }
 0x6d8   : > { %v6701_v49 = vadd.f32 %v6700_v51, %v6630_v38  ;;  %v6770_v20 = vadd.f32 %v6769_v59, %v6699_v46  ;;  %v7204_v53 = vcombine.low %v5421_v8, %v5423_v24  ;;  %v11216_v59 = vld [vmem:[#allocation5_spill] sm:$0xff] }
 0x6d9   : > { %v6840_v50 = vpop.f32.mrf.mxu0 }
 0x6da   : > { %v6772_v27 = vadd.f32 %v6771_v26, %v6701_v49  ;;  %v6841_v19 = vadd.f32 %v6840_v50, %v6770_v20  ;;  %v7212_v30 = vrot.slane %v7204_v53, %v11216_v59 }
 0x6db   : > { %v6842_v10 = vpop.f32.mrf.mxu0 }
 0x6dc   : > { %v6843_v18 = vadd.f32 %v6842_v10, %v6772_v27 }
 0x6eb   : > { %v6911_v47 = vpop.f32.mrf.mxu1 }
 0x6ec   : > { %v6912_v48 = vadd.f32 %v6911_v47, %v6841_v19 }
 0x6ed   : > { %v6913_v4 = vpop.f32.mrf.mxu1 }
 0x6ee   : > { %v6914_v15 = vadd.f32 %v6913_v4, %v6843_v18 }
 0x70c   : > { %v6982_v61 = vpop.f32.mrf.mxu0 }
 0x70d   : > { %v6983_v16 = vadd.f32 %v6982_v61, %v6912_v48 }
 0x70e   : > { %v6984_v2 = vpop.f32.mrf.mxu0 }
 0x70f   : > { %v6985_v52 = vadd.f32 %v6984_v2, %v6914_v15 }
 0x72d   : > { %v7053_v34 = vpop.f32.mrf.mxu1 }
 0x72e   : > { %v7054_v56 = vadd.f32 %v7053_v34, %v6983_v16 }
 0x72f   : > { %v7055_v54 = vpop.f32.mrf.mxu1 }
 0x730   : > { %v7056_v5 = vadd.f32 %v7055_v54, %v6985_v52 }
 0x74e   : > { %v7124_v32 = vpop.f32.mrf.mxu0 }
 0x74f   : > { %v7195_v31 = vpop.f32.mrf.mxu1  ;;  %v7125_v41 = vadd.f32 %v7124_v32, %v7054_v56 }
 0x750   : > { %v7126_v58 = vpop.f32.mrf.mxu0 }
 0x751   : > { %v7127_v39 = vadd.f32 %v7126_v58, %v7056_v5  ;;  %v7197_v6 = vpop.f32.mrf.mxu1  ;;  %v7196_v44 = vadd.f32 %v7195_v31, %v7125_v41 }
 0x753   : > { %v7198_v37 = vadd.f32 %v7197_v6, %v7127_v39 }
 0x755   : > { %v7205_v28 = vcombine.low %v7196_v44, %v7198_v37 }
 0x757   : > { %v7219_v12 = vrot.slane %v7205_v28, %v11216_v59 }
 0x759   : > { %v7220_v35 = vcombine.low %v7212_v30, %v7219_v12 }
 0x75b   : > { %v7222_v51 = vadd.f32 %v7220_v35, %v227_v36 }
 0x75d   : > { %7223 = vst [vmem:[%s7633_s9] sm:$0xff] %v7222_v51 }
 0x75e PF: > { %s15_s16 = sadd.s32 1, %s7519_s16   ;;  %s11217_s9 = smov %s7495_s10 }
 0x75f   : > { %p12_p11 = scmp.ge.s32.totalorder %s15_s16, 26   ;;  %s11218_s10 = smov %s7499_s11 }
 0x760   : > { %s11219_s11 = smov %s7608_s3  ;;  %s11220_s12 = smov %s7511_s14 }
 0x761   : > { %s11221_s13 = smov %s7515_s15  ;;  %s11222_s14 = smov %s11225_s18 }
 0x762   : > { %s11223_s15 = smov %s11229_s19  ;;  %14 = sbr.rel (!%p12_p11) target bundleno = 5 (0x5), region = 75 }
 0x767   :  { %7245 = vsyncpa [#allocation3], 1 }
 0x768   :  { %7247 = vsyncpa [#allocation3 + $0x1], 1 }

</bundles_post_ra>
